<compile_context>
chip_gen: v7x
topology: tpu7x:2x2x1
jax: 0.10.0
libtpu: 0.0.40
codegen_flags: <defaults>
</compile_context>

<pallas_src>
import numpy as np
import jax
import jax.numpy as jnp
from jax.experimental import pallas as pl
from jax.experimental.pallas import tpu as pltpu


N_FRAMES = 8          # input channels (stacked frames)
FEATURES_DIM = 64     # linear1 output features
# Spatial sizes implied by the module (64x64 input): conv1 -> 15x15, conv2 -> 6x6,
# conv3 -> 4x4, pool -> 2x2, flatten -> 512.


# ----------------------------------------------------------------------------
# Fused kernel: whole network for one sample per grid step.
# ----------------------------------------------------------------------------
def _fused_kernel(xb_ref, w1_ref, w2_ref, w3_ref, l1_ref, l2_ref, b_ref,
                  out_ref, a1, h1, a2, h2, a3):
    bf16 = jnp.bfloat16
    f32 = jnp.float32

    # ---- conv1: 8x8 stride 4 via 4x4-block decomposition -> one GEMM --------
    # xb_ref: (16, 16, 128) where lane dim packs a 4x4 input block x 8 channels.
    # A1[(ho*15+wo), (dh*2+dw)*128 + k] = xb[ho+dh, wo+dw, k]
    for dh in range(2):
        for dw in range(2):
            col = (dh * 2 + dw) * 128
            for ho in range(15):
                a1[ho * 15:(ho + 1) * 15, col:col + 128] = xb_ref[ho + dh, dw:dw + 15, :]
    a1[225:232, :] = jnp.zeros((7, 512), f32)            # pad rows (M 225 -> 232)
    acc = jnp.dot(a1[...].astype(bf16), w1_ref[...], preferred_element_type=f32)
    h1[...] = jnp.maximum(acc + b_ref[0:1, :], 0.0)      # (232, 128) f32, rows=(ho,wo)

    # ---- conv2: 4x4 stride 2, in-kernel im2col (static stride-2 slices) -----
    # A2[(ho2*6+wo2), (kh*4+kw)*128 + c] = h1[(2ho2+kh)*15 + 2wo2+kw, c]
    for kh in range(4):
        for kw in range(4):
            col = (kh * 4 + kw) * 128
            for ho2 in range(6):
                base = (2 * ho2 + kh) * 15 + kw
                a2[ho2 * 6:(ho2 + 1) * 6, col:col + 128] = h1[base:base + 12:2, :]
    a2[36:40, :] = jnp.zeros((4, 2048), f32)             # pad rows (M 36 -> 40)
    acc = jnp.dot(a2[...].astype(bf16), w2_ref[...], preferred_element_type=f32)
    h2[...] = jnp.maximum(acc + b_ref[1:2, :], 0.0)      # (40, 128) f32

    # ---- conv3: 3x3 stride 1, in-kernel im2col (contiguous slices) ----------
    # A3[(ho3*4+wo3), (kh*3+kw)*128 + c] = h2[(ho3+kh)*6 + wo3+kw, c]
    for kh in range(3):
        for kw in range(3):
            col = (kh * 3 + kw) * 128
            for ho3 in range(4):
                base = (ho3 + kh) * 6 + kw
                a3[ho3 * 4:(ho3 + 1) * 4, col:col + 128] = h2[base:base + 4, :]
    h3 = jnp.maximum(
        jnp.dot(a3[...].astype(bf16), w3_ref[...], preferred_element_type=f32)
        + b_ref[2:3, :], 0.0)                            # (16, 128) f32 value, rows=(ho3,wo3)

    # ---- AvgPool2d(2,2) over the 4x4 grid (pure VPU) -------------------------
    pooled = []
    for ph in range(2):
        for pw in range(2):
            r = 8 * ph + 2 * pw
            pooled.append(0.25 * (h3[r:r + 1, :] + h3[r + 1:r + 2, :]
                                  + h3[r + 4:r + 5, :] + h3[r + 5:r + 6, :]))
    # NCHW-flatten order is folded into the pre-permuted linear1 weights.
    feat = jnp.concatenate(pooled, axis=1)               # (1, 512) f32
    feat8 = jnp.broadcast_to(feat, (8, 512)).astype(bf16)  # sublane-aligned M

    # ---- linear1 + ReLU, linear2 (all VMEM-resident) -------------------------
    z1 = jnp.dot(feat8, l1_ref[...], preferred_element_type=f32)
    hl1 = jnp.maximum(z1 + b_ref[3:4, :], 0.0)           # padded cols stay exactly 0
    z2 = jnp.dot(hl1.astype(bf16), l2_ref[...], preferred_element_type=f32)
    out_ref[...] = z2 + b_ref[4:5, :]                    # (8, 128); row 0 / cols 0:3 are real


# ----------------------------------------------------------------------------
# One-time parameter preprocessing: (K, N) layouts, channel dims padded to 128.
# ----------------------------------------------------------------------------
def prepare_params(p):
    bf16 = jnp.bfloat16

    # conv1 (32, 8, 8, 8) -> block-im2col layout (512, 128)
    w1 = p["c1w"].reshape(32, 8, 2, 4, 2, 4)                     # o, c, dh, r, dw, s
    w1 = jnp.transpose(w1, (2, 4, 3, 5, 1, 0)).reshape(512, 32)  # (dh,dw,r,s,c), o
    w1 = jnp.pad(w1, ((0, 0), (0, 96)))

    # conv2 (64, 32, 4, 4) -> (2048, 128): rows = (kh, kw, cin[pad 128]), cols = cout[pad 128]
    w2 = jnp.transpose(p["c2w"], (2, 3, 1, 0))                   # (4, 4, 32, 64)
    w2 = jnp.pad(w2, ((0, 0), (0, 0), (0, 96), (0, 64))).reshape(2048, 128)

    # conv3 (128, 64, 3, 3) -> (1152, 128)
    w3 = jnp.transpose(p["c3w"], (2, 3, 1, 0))                   # (3, 3, 64, 128)
    w3 = jnp.pad(w3, ((0, 0), (0, 0), (0, 64), (0, 0))).reshape(1152, 128)

    # linear1 (64, 512): permute K to (spatial, channel) to match the kernel's
    # lane-major feature order (undoes PyTorch's NCHW flatten), pad N 64 -> 128.
    l1 = p["l1w"].reshape(FEATURES_DIM, 128, 4)                  # n, c, s
    l1 = jnp.transpose(l1, (2, 1, 0)).reshape(512, FEATURES_DIM)
    l1 = jnp.pad(l1, ((0, 0), (0, 128 - FEATURES_DIM)))

    # linear2 (3, 64) -> (128, 128)
    l2 = jnp.pad(p["l2w"].T, ((0, 128 - FEATURES_DIM), (0, 125)))

    # biases stacked (8, 128) f32, zero-padded
    bias = jnp.zeros((8, 128), jnp.float32)
    bias = bias.at[0, :32].set(p["c1b"])
    bias = bias.at[1, :64].set(p["c2b"])
    bias = bias.at[2, :128].set(p["c3b"])
    bias = bias.at[3, :FEATURES_DIM].set(p["l1b"])
    bias = bias.at[4, :3].set(p["l2b"])

    return {"w1": w1.astype(bf16), "w2": w2.astype(bf16), "w3": w3.astype(bf16),
            "l1": l1.astype(bf16), "l2": l2.astype(bf16), "bias": bias}


# ----------------------------------------------------------------------------
# Forward pass (matches ImageOnlyExtractor.forward)
# ----------------------------------------------------------------------------
@jax.jit
def image_only_extractor(x_nchw, pp):
    B = x_nchw.shape[0]
    # Re-layout input into 4x4 blocks x channels on the lane dim: (B, 16, 16, 128).
    xb = x_nchw.astype(jnp.float32).reshape(B, N_FRAMES, 16, 4, 16, 4)
    xb = jnp.transpose(xb, (0, 2, 4, 3, 5, 1)).reshape(B, 16, 16, 16 * N_FRAMES)

    out = pl.pallas_call(
        _fused_kernel,
        out_shape=jax.ShapeDtypeStruct((B, 8, 128), jnp.float32),
        grid=(B,),
        in_specs=[
            pl.BlockSpec((None, 16, 16, 128), lambda b: (b, 0, 0, 0)),   # xb
            pl.BlockSpec((512, 128), lambda b: (0, 0)),                  # conv1 W
            pl.BlockSpec((2048, 128), lambda b: (0, 0)),                 # conv2 W
            pl.BlockSpec((1152, 128), lambda b: (0, 0)),                 # conv3 W
            pl.BlockSpec((512, 128), lambda b: (0, 0)),                  # linear1 W
            pl.BlockSpec((128, 128), lambda b: (0, 0)),                  # linear2 W
            pl.BlockSpec((8, 128), lambda b: (0, 0)),                    # biases
        ],
        out_specs=pl.BlockSpec((None, 8, 128), lambda b: (b, 0, 0)),
        scratch_shapes=[
            pltpu.VMEM((232, 512), jnp.float32),    # conv1 im2col patches
            pltpu.VMEM((232, 128), jnp.float32),    # conv1 output
            pltpu.VMEM((40, 2048), jnp.float32),    # conv2 im2col patches
            pltpu.VMEM((40, 128), jnp.float32),     # conv2 output
            pltpu.VMEM((16, 1152), jnp.float32),    # conv3 im2col patches
        ],
        compiler_params=pltpu.CompilerParams(
            dimension_semantics=("parallel",)),     # both TCs on v7x
    )(xb, pp["w1"], pp["w2"], pp["w3"], pp["l1"], pp["l2"], pp["bias"])

    return out[:, 0, :3]


# ----------------------------------------------------------------------------
# Pure-JAX reference (XLA conv) for validation
# ----------------------------------------------------------------------------
def reference(x, p):
    def conv(h, w, b, s):
        dn = jax.lax.conv_dimension_numbers(h.shape, w.shape, ("NCHW", "OIHW", "NCHW"))
        h = jax.lax.conv_general_dilated(h, w, (s, s), "VALID", dimension_numbers=dn)
        return jnp.maximum(h + b[None, :, None, None], 0.0)

    h = conv(x, p["c1w"], p["c1b"], 4)
    h = conv(h, p["c2w"], p["c2b"], 2)
    h = conv(h, p["c3w"], p["c3b"], 1)
    B, C, H, W = h.shape
    h = h.reshape(B, C, H // 2, 2, W // 2, 2).mean(axis=(3, 5))    # AvgPool2d(2,2)
    h = h.reshape(B, -1)                                           # Flatten (NCHW order)
    h = jnp.maximum(h @ p["l1w"].T + p["l1b"], 0.0)
    return h @ p["l2w"].T + p["l2b"]


# ----------------------------------------------------------------------------
# Main
# ----------------------------------------------------------------------------
if __name__ == "__main__":
    B = 2
    key = jax.random.PRNGKey(0)
    ks = jax.random.split(key, 11)

    params = {
        "c1w": jax.random.normal(ks[0], (32, N_FRAMES, 8, 8), jnp.float32) * 0.05,
        "c1b": jax.random.normal(ks[1], (32,), jnp.float32) * 0.05,
        "c2w": jax.random.normal(ks[2], (64, 32, 4, 4), jnp.float32) * 0.05,
        "c2b": jax.random.normal(ks[3], (64,), jnp.float32) * 0.05,
        "c3w": jax.random.normal(ks[4], (128, 64, 3, 3), jnp.float32) * 0.05,
        "c3b": jax.random.normal(ks[5], (128,), jnp.float32) * 0.05,
        "l1w": jax.random.normal(ks[6], (FEATURES_DIM, 512), jnp.float32) * 0.05,
        "l1b": jax.random.normal(ks[7], (FEATURES_DIM,), jnp.float32) * 0.05,
        "l2w": jax.random.normal(ks[8], (3, FEATURES_DIM), jnp.float32) * 0.05,
        "l2b": jax.random.normal(ks[9], (3,), jnp.float32) * 0.05,
    }

    # One-time weight re-layout (hoisted out of the forward pass).
    pp = jax.tree_util.tree_map(jax.block_until_ready, prepare_params(params))

    # Spatial must be 64x64: the module's Flatten size (512) is derived from a 64x64 dummy.
    x = jax.random.normal(ks[10], (B, N_FRAMES, 64, 64), jnp.float32)

    out = jax.block_until_ready(image_only_extractor(x, pp))
    assert out.shape == (B, 3)

    ref = jax.block_until_ready(reference(x, params))
    np.testing.assert_allclose(np.asarray(out), np.asarray(ref), rtol=2e-2, atol=2e-2)

    print("KERNEL_OK")
</pallas_src>

<mosaic_0001>
module attributes {stable_mosaic.version = 11 : i64} {
  func.func @_fused_kernel(%arg0: i32, %arg1: memref<1x16x16x128xf32, #tpu.memory_space<vmem>>, %arg2: memref<512x128xbf16, #tpu.memory_space<vmem>>, %arg3: memref<2048x128xbf16, #tpu.memory_space<vmem>>, %arg4: memref<1152x128xbf16, #tpu.memory_space<vmem>>, %arg5: memref<512x128xbf16, #tpu.memory_space<vmem>>, %arg6: memref<128x128xbf16, #tpu.memory_space<vmem>>, %arg7: memref<8x128xf32, #tpu.memory_space<vmem>>, %arg8: memref<1x8x128xf32, #tpu.memory_space<vmem>>, %arg9: memref<232x512xf32, #tpu.memory_space<vmem>>, %arg10: memref<232x128xf32, #tpu.memory_space<vmem>>, %arg11: memref<40x2048xf32, #tpu.memory_space<vmem>>, %arg12: memref<40x128xf32, #tpu.memory_space<vmem>>, %arg13: memref<16x1152xf32, #tpu.memory_space<vmem>>) attributes {dimension_semantics = [#tpu.dimension_semantics<parallel>], iteration_bounds = array<i64: 2>, scalar_prefetch = 0 : i64, scratch_operands = 5 : i64, tpu.core_type = #tpu.core_type<tc>, window_params = [{transform_indices = @transform_0, window_bounds = array<i64: 1, 16, 16, 128>}, {pipeline_mode = #tpu.pipeline_mode<synchronous>, transform_indices = @transform_1, window_bounds = array<i64: 512, 128>}, {pipeline_mode = #tpu.pipeline_mode<synchronous>, transform_indices = @transform_2, window_bounds = array<i64: 2048, 128>}, {pipeline_mode = #tpu.pipeline_mode<synchronous>, transform_indices = @transform_3, window_bounds = array<i64: 1152, 128>}, {pipeline_mode = #tpu.pipeline_mode<synchronous>, transform_indices = @transform_4, window_bounds = array<i64: 512, 128>}, {pipeline_mode = #tpu.pipeline_mode<synchronous>, transform_indices = @transform_5, window_bounds = array<i64: 128, 128>}, {pipeline_mode = #tpu.pipeline_mode<synchronous>, transform_indices = @transform_6, window_bounds = array<i64: 8, 128>}, {transform_indices = @transform_7, window_bounds = array<i64: 1, 8, 128>}]} {
    %c0 = arith.constant 0 : index
    %c0_0 = arith.constant 0 : index
    %c0_1 = arith.constant 0 : index
    %c0_2 = arith.constant 0 : index
    %0 = vector.load %arg1[%c0, %c0_0, %c0_1, %c0_2] : memref<1x16x16x128xf32, #tpu.memory_space<vmem>>, vector<1x1x15x128xf32>
    %1 = vector.shape_cast %0 : vector<1x1x15x128xf32> to vector<15x128xf32>
    %c0_3 = arith.constant 0 : index
    %c0_4 = arith.constant 0 : index
    %2 = vector.load %arg9[%c0_3, %c0_4] : memref<232x512xf32, #tpu.memory_space<vmem>>, vector<15x128xf32>
    tpu.vector_store %arg9[%c0_3, %c0_4], %1 {strides = array<i32>} : memref<232x512xf32, #tpu.memory_space<vmem>>, vector<15x128xf32>,
    %c0_5 = arith.constant 0 : index
    %c1 = arith.constant 1 : index
    %c0_6 = arith.constant 0 : index
    %c0_7 = arith.constant 0 : index
    %3 = vector.load %arg1[%c0_5, %c1, %c0_6, %c0_7] : memref<1x16x16x128xf32, #tpu.memory_space<vmem>>, vector<1x1x15x128xf32>
    %4 = vector.shape_cast %3 : vector<1x1x15x128xf32> to vector<15x128xf32>
    %c15 = arith.constant 15 : index
    %c0_8 = arith.constant 0 : index
    %5 = vector.load %arg9[%c15, %c0_8] : memref<232x512xf32, #tpu.memory_space<vmem>>, vector<15x128xf32>
    tpu.vector_store %arg9[%c15, %c0_8], %4 {strides = array<i32>} : memref<232x512xf32, #tpu.memory_space<vmem>>, vector<15x128xf32>,
    %c0_9 = arith.constant 0 : index
    %c2 = arith.constant 2 : index
    %c0_10 = arith.constant 0 : index
    %c0_11 = arith.constant 0 : index
    %6 = vector.load %arg1[%c0_9, %c2, %c0_10, %c0_11] : memref<1x16x16x128xf32, #tpu.memory_space<vmem>>, vector<1x1x15x128xf32>
    %7 = vector.shape_cast %6 : vector<1x1x15x128xf32> to vector<15x128xf32>
    %c30 = arith.constant 30 : index
    %c0_12 = arith.constant 0 : index
    %8 = vector.load %arg9[%c30, %c0_12] : memref<232x512xf32, #tpu.memory_space<vmem>>, vector<15x128xf32>
    tpu.vector_store %arg9[%c30, %c0_12], %7 {strides = array<i32>} : memref<232x512xf32, #tpu.memory_space<vmem>>, vector<15x128xf32>,
    %c0_13 = arith.constant 0 : index
    %c3 = arith.constant 3 : index
    %c0_14 = arith.constant 0 : index
    %c0_15 = arith.constant 0 : index
    %9 = vector.load %arg1[%c0_13, %c3, %c0_14, %c0_15] : memref<1x16x16x128xf32, #tpu.memory_space<vmem>>, vector<1x1x15x128xf32>
    %10 = vector.shape_cast %9 : vector<1x1x15x128xf32> to vector<15x128xf32>
    %c45 = arith.constant 45 : index
    %c0_16 = arith.constant 0 : index
    %11 = vector.load %arg9[%c45, %c0_16] : memref<232x512xf32, #tpu.memory_space<vmem>>, vector<15x128xf32>
    tpu.vector_store %arg9[%c45, %c0_16], %10 {strides = array<i32>} : memref<232x512xf32, #tpu.memory_space<vmem>>, vector<15x128xf32>,
    %c0_17 = arith.constant 0 : index
    %c4 = arith.constant 4 : index
    %c0_18 = arith.constant 0 : index
    %c0_19 = arith.constant 0 : index
    %12 = vector.load %arg1[%c0_17, %c4, %c0_18, %c0_19] : memref<1x16x16x128xf32, #tpu.memory_space<vmem>>, vector<1x1x15x128xf32>
    %13 = vector.shape_cast %12 : vector<1x1x15x128xf32> to vector<15x128xf32>
    %c60 = arith.constant 60 : index
    %c0_20 = arith.constant 0 : index
    %14 = vector.load %arg9[%c60, %c0_20] : memref<232x512xf32, #tpu.memory_space<vmem>>, vector<15x128xf32>
    tpu.vector_store %arg9[%c60, %c0_20], %13 {strides = array<i32>} : memref<232x512xf32, #tpu.memory_space<vmem>>, vector<15x128xf32>,
    %c0_21 = arith.constant 0 : index
    %c5 = arith.constant 5 : index
    %c0_22 = arith.constant 0 : index
    %c0_23 = arith.constant 0 : index
    %15 = vector.load %arg1[%c0_21, %c5, %c0_22, %c0_23] : memref<1x16x16x128xf32, #tpu.memory_space<vmem>>, vector<1x1x15x128xf32>
    %16 = vector.shape_cast %15 : vector<1x1x15x128xf32> to vector<15x128xf32>
    %c75 = arith.constant 75 : index
    %c0_24 = arith.constant 0 : index
    %17 = vector.load %arg9[%c75, %c0_24] : memref<232x512xf32, #tpu.memory_space<vmem>>, vector<15x128xf32>
    tpu.vector_store %arg9[%c75, %c0_24], %16 {strides = array<i32>} : memref<232x512xf32, #tpu.memory_space<vmem>>, vector<15x128xf32>,
    %c0_25 = arith.constant 0 : index
    %c6 = arith.constant 6 : index
    %c0_26 = arith.constant 0 : index
    %c0_27 = arith.constant 0 : index
    %18 = vector.load %arg1[%c0_25, %c6, %c0_26, %c0_27] : memref<1x16x16x128xf32, #tpu.memory_space<vmem>>, vector<1x1x15x128xf32>
    %19 = vector.shape_cast %18 : vector<1x1x15x128xf32> to vector<15x128xf32>
    %c90 = arith.constant 90 : index
    %c0_28 = arith.constant 0 : index
    %20 = vector.load %arg9[%c90, %c0_28] : memref<232x512xf32, #tpu.memory_space<vmem>>, vector<15x128xf32>
    tpu.vector_store %arg9[%c90, %c0_28], %19 {strides = array<i32>} : memref<232x512xf32, #tpu.memory_space<vmem>>, vector<15x128xf32>,
    %c0_29 = arith.constant 0 : index
    %c7 = arith.constant 7 : index
    %c0_30 = arith.constant 0 : index
    %c0_31 = arith.constant 0 : index
    %21 = vector.load %arg1[%c0_29, %c7, %c0_30, %c0_31] : memref<1x16x16x128xf32, #tpu.memory_space<vmem>>, vector<1x1x15x128xf32>
    %22 = vector.shape_cast %21 : vector<1x1x15x128xf32> to vector<15x128xf32>
    %c105 = arith.constant 105 : index
    %c0_32 = arith.constant 0 : index
    %23 = vector.load %arg9[%c105, %c0_32] : memref<232x512xf32, #tpu.memory_space<vmem>>, vector<15x128xf32>
    tpu.vector_store %arg9[%c105, %c0_32], %22 {strides = array<i32>} : memref<232x512xf32, #tpu.memory_space<vmem>>, vector<15x128xf32>,
    %c0_33 = arith.constant 0 : index
    %c8 = arith.constant 8 : index
    %c0_34 = arith.constant 0 : index
    %c0_35 = arith.constant 0 : index
    %24 = vector.load %arg1[%c0_33, %c8, %c0_34, %c0_35] : memref<1x16x16x128xf32, #tpu.memory_space<vmem>>, vector<1x1x15x128xf32>
    %25 = vector.shape_cast %24 : vector<1x1x15x128xf32> to vector<15x128xf32>
    %c120 = arith.constant 120 : index
    %c0_36 = arith.constant 0 : index
    %26 = vector.load %arg9[%c120, %c0_36] : memref<232x512xf32, #tpu.memory_space<vmem>>, vector<15x128xf32>
    tpu.vector_store %arg9[%c120, %c0_36], %25 {strides = array<i32>} : memref<232x512xf32, #tpu.memory_space<vmem>>, vector<15x128xf32>,
    %c0_37 = arith.constant 0 : index
    %c9 = arith.constant 9 : index
    %c0_38 = arith.constant 0 : index
    %c0_39 = arith.constant 0 : index
    %27 = vector.load %arg1[%c0_37, %c9, %c0_38, %c0_39] : memref<1x16x16x128xf32, #tpu.memory_space<vmem>>, vector<1x1x15x128xf32>
    %28 = vector.shape_cast %27 : vector<1x1x15x128xf32> to vector<15x128xf32>
    %c135 = arith.constant 135 : index
    %c0_40 = arith.constant 0 : index
    %29 = vector.load %arg9[%c135, %c0_40] : memref<232x512xf32, #tpu.memory_space<vmem>>, vector<15x128xf32>
    tpu.vector_store %arg9[%c135, %c0_40], %28 {strides = array<i32>} : memref<232x512xf32, #tpu.memory_space<vmem>>, vector<15x128xf32>,
    %c0_41 = arith.constant 0 : index
    %c10 = arith.constant 10 : index
    %c0_42 = arith.constant 0 : index
    %c0_43 = arith.constant 0 : index
    %30 = vector.load %arg1[%c0_41, %c10, %c0_42, %c0_43] : memref<1x16x16x128xf32, #tpu.memory_space<vmem>>, vector<1x1x15x128xf32>
    %31 = vector.shape_cast %30 : vector<1x1x15x128xf32> to vector<15x128xf32>
    %c150 = arith.constant 150 : index
    %c0_44 = arith.constant 0 : index
    %32 = vector.load %arg9[%c150, %c0_44] : memref<232x512xf32, #tpu.memory_space<vmem>>, vector<15x128xf32>
    tpu.vector_store %arg9[%c150, %c0_44], %31 {strides = array<i32>} : memref<232x512xf32, #tpu.memory_space<vmem>>, vector<15x128xf32>,
    %c0_45 = arith.constant 0 : index
    %c11 = arith.constant 11 : index
    %c0_46 = arith.constant 0 : index
    %c0_47 = arith.constant 0 : index
    %33 = vector.load %arg1[%c0_45, %c11, %c0_46, %c0_47] : memref<1x16x16x128xf32, #tpu.memory_space<vmem>>, vector<1x1x15x128xf32>
    %34 = vector.shape_cast %33 : vector<1x1x15x128xf32> to vector<15x128xf32>
    %c165 = arith.constant 165 : index
    %c0_48 = arith.constant 0 : index
    %35 = vector.load %arg9[%c165, %c0_48] : memref<232x512xf32, #tpu.memory_space<vmem>>, vector<15x128xf32>
    tpu.vector_store %arg9[%c165, %c0_48], %34 {strides = array<i32>} : memref<232x512xf32, #tpu.memory_space<vmem>>, vector<15x128xf32>,
    %c0_49 = arith.constant 0 : index
    %c12 = arith.constant 12 : index
    %c0_50 = arith.constant 0 : index
    %c0_51 = arith.constant 0 : index
    %36 = vector.load %arg1[%c0_49, %c12, %c0_50, %c0_51] : memref<1x16x16x128xf32, #tpu.memory_space<vmem>>, vector<1x1x15x128xf32>
    %37 = vector.shape_cast %36 : vector<1x1x15x128xf32> to vector<15x128xf32>
    %c180 = arith.constant 180 : index
    %c0_52 = arith.constant 0 : index
    %38 = vector.load %arg9[%c180, %c0_52] : memref<232x512xf32, #tpu.memory_space<vmem>>, vector<15x128xf32>
    tpu.vector_store %arg9[%c180, %c0_52], %37 {strides = array<i32>} : memref<232x512xf32, #tpu.memory_space<vmem>>, vector<15x128xf32>,
    %c0_53 = arith.constant 0 : index
    %c13 = arith.constant 13 : index
    %c0_54 = arith.constant 0 : index
    %c0_55 = arith.constant 0 : index
    %39 = vector.load %arg1[%c0_53, %c13, %c0_54, %c0_55] : memref<1x16x16x128xf32, #tpu.memory_space<vmem>>, vector<1x1x15x128xf32>
    %40 = vector.shape_cast %39 : vector<1x1x15x128xf32> to vector<15x128xf32>
    %c195 = arith.constant 195 : index
    %c0_56 = arith.constant 0 : index
    %41 = vector.load %arg9[%c195, %c0_56] : memref<232x512xf32, #tpu.memory_space<vmem>>, vector<15x128xf32>
    tpu.vector_store %arg9[%c195, %c0_56], %40 {strides = array<i32>} : memref<232x512xf32, #tpu.memory_space<vmem>>, vector<15x128xf32>,
    %c0_57 = arith.constant 0 : index
    %c14 = arith.constant 14 : index
    %c0_58 = arith.constant 0 : index
    %c0_59 = arith.constant 0 : index
    %42 = vector.load %arg1[%c0_57, %c14, %c0_58, %c0_59] : memref<1x16x16x128xf32, #tpu.memory_space<vmem>>, vector<1x1x15x128xf32>
    %43 = vector.shape_cast %42 : vector<1x1x15x128xf32> to vector<15x128xf32>
    %c210 = arith.constant 210 : index
    %c0_60 = arith.constant 0 : index
    %44 = vector.load %arg9[%c210, %c0_60] : memref<232x512xf32, #tpu.memory_space<vmem>>, vector<15x128xf32>
    tpu.vector_store %arg9[%c210, %c0_60], %43 {strides = array<i32>} : memref<232x512xf32, #tpu.memory_space<vmem>>, vector<15x128xf32>,
    %c0_61 = arith.constant 0 : index
    %c0_62 = arith.constant 0 : index
    %c1_63 = arith.constant 1 : index
    %c0_64 = arith.constant 0 : index
    %45 = vector.load %arg1[%c0_61, %c0_62, %c1_63, %c0_64] : memref<1x16x16x128xf32, #tpu.memory_space<vmem>>, vector<1x1x15x128xf32>
    %46 = vector.shape_cast %45 : vector<1x1x15x128xf32> to vector<15x128xf32>
    %c0_65 = arith.constant 0 : index
    %c128 = arith.constant 128 : index
    %47 = vector.load %arg9[%c0_65, %c128] : memref<232x512xf32, #tpu.memory_space<vmem>>, vector<15x128xf32>
    tpu.vector_store %arg9[%c0_65, %c128], %46 {strides = array<i32>} : memref<232x512xf32, #tpu.memory_space<vmem>>, vector<15x128xf32>,
    %c0_66 = arith.constant 0 : index
    %c1_67 = arith.constant 1 : index
    %c1_68 = arith.constant 1 : index
    %c0_69 = arith.constant 0 : index
    %48 = vector.load %arg1[%c0_66, %c1_67, %c1_68, %c0_69] : memref<1x16x16x128xf32, #tpu.memory_space<vmem>>, vector<1x1x15x128xf32>
    %49 = vector.shape_cast %48 : vector<1x1x15x128xf32> to vector<15x128xf32>
    %c15_70 = arith.constant 15 : index
    %c128_71 = arith.constant 128 : index
    %50 = vector.load %arg9[%c15_70, %c128_71] : memref<232x512xf32, #tpu.memory_space<vmem>>, vector<15x128xf32>
    tpu.vector_store %arg9[%c15_70, %c128_71], %49 {strides = array<i32>} : memref<232x512xf32, #tpu.memory_space<vmem>>, vector<15x128xf32>,
    %c0_72 = arith.constant 0 : index
    %c2_73 = arith.constant 2 : index
    %c1_74 = arith.constant 1 : index
    %c0_75 = arith.constant 0 : index
    %51 = vector.load %arg1[%c0_72, %c2_73, %c1_74, %c0_75] : memref<1x16x16x128xf32, #tpu.memory_space<vmem>>, vector<1x1x15x128xf32>
    %52 = vector.shape_cast %51 : vector<1x1x15x128xf32> to vector<15x128xf32>
    %c30_76 = arith.constant 30 : index
    %c128_77 = arith.constant 128 : index
    %53 = vector.load %arg9[%c30_76, %c128_77] : memref<232x512xf32, #tpu.memory_space<vmem>>, vector<15x128xf32>
    tpu.vector_store %arg9[%c30_76, %c128_77], %52 {strides = array<i32>} : memref<232x512xf32, #tpu.memory_space<vmem>>, vector<15x128xf32>,
    %c0_78 = arith.constant 0 : index
    %c3_79 = arith.constant 3 : index
    %c1_80 = arith.constant 1 : index
    %c0_81 = arith.constant 0 : index
    %54 = vector.load %arg1[%c0_78, %c3_79, %c1_80, %c0_81] : memref<1x16x16x128xf32, #tpu.memory_space<vmem>>, vector<1x1x15x128xf32>
    %55 = vector.shape_cast %54 : vector<1x1x15x128xf32> to vector<15x128xf32>
    %c45_82 = arith.constant 45 : index
    %c128_83 = arith.constant 128 : index
    %56 = vector.load %arg9[%c45_82, %c128_83] : memref<232x512xf32, #tpu.memory_space<vmem>>, vector<15x128xf32>
    tpu.vector_store %arg9[%c45_82, %c128_83], %55 {strides = array<i32>} : memref<232x512xf32, #tpu.memory_space<vmem>>, vector<15x128xf32>,
    %c0_84 = arith.constant 0 : index
    %c4_85 = arith.constant 4 : index
    %c1_86 = arith.constant 1 : index
    %c0_87 = arith.constant 0 : index
    %57 = vector.load %arg1[%c0_84, %c4_85, %c1_86, %c0_87] : memref<1x16x16x128xf32, #tpu.memory_space<vmem>>, vector<1x1x15x128xf32>
    %58 = vector.shape_cast %57 : vector<1x1x15x128xf32> to vector<15x128xf32>
    %c60_88 = arith.constant 60 : index
    %c128_89 = arith.constant 128 : index
    %59 = vector.load %arg9[%c60_88, %c128_89] : memref<232x512xf32, #tpu.memory_space<vmem>>, vector<15x128xf32>
    tpu.vector_store %arg9[%c60_88, %c128_89], %58 {strides = array<i32>} : memref<232x512xf32, #tpu.memory_space<vmem>>, vector<15x128xf32>,
    %c0_90 = arith.constant 0 : index
    %c5_91 = arith.constant 5 : index
    %c1_92 = arith.constant 1 : index
    %c0_93 = arith.constant 0 : index
    %60 = vector.load %arg1[%c0_90, %c5_91, %c1_92, %c0_93] : memref<1x16x16x128xf32, #tpu.memory_space<vmem>>, vector<1x1x15x128xf32>
    %61 = vector.shape_cast %60 : vector<1x1x15x128xf32> to vector<15x128xf32>
    %c75_94 = arith.constant 75 : index
    %c128_95 = arith.constant 128 : index
    %62 = vector.load %arg9[%c75_94, %c128_95] : memref<232x512xf32, #tpu.memory_space<vmem>>, vector<15x128xf32>
    tpu.vector_store %arg9[%c75_94, %c128_95], %61 {strides = array<i32>} : memref<232x512xf32, #tpu.memory_space<vmem>>, vector<15x128xf32>,
    %c0_96 = arith.constant 0 : index
    %c6_97 = arith.constant 6 : index
    %c1_98 = arith.constant 1 : index
    %c0_99 = arith.constant 0 : index
    %63 = vector.load %arg1[%c0_96, %c6_97, %c1_98, %c0_99] : memref<1x16x16x128xf32, #tpu.memory_space<vmem>>, vector<1x1x15x128xf32>
    %64 = vector.shape_cast %63 : vector<1x1x15x128xf32> to vector<15x128xf32>
    %c90_100 = arith.constant 90 : index
    %c128_101 = arith.constant 128 : index
    %65 = vector.load %arg9[%c90_100, %c128_101] : memref<232x512xf32, #tpu.memory_space<vmem>>, vector<15x128xf32>
    tpu.vector_store %arg9[%c90_100, %c128_101], %64 {strides = array<i32>} : memref<232x512xf32, #tpu.memory_space<vmem>>, vector<15x128xf32>,
    %c0_102 = arith.constant 0 : index
    %c7_103 = arith.constant 7 : index
    %c1_104 = arith.constant 1 : index
    %c0_105 = arith.constant 0 : index
    %66 = vector.load %arg1[%c0_102, %c7_103, %c1_104, %c0_105] : memref<1x16x16x128xf32, #tpu.memory_space<vmem>>, vector<1x1x15x128xf32>
    %67 = vector.shape_cast %66 : vector<1x1x15x128xf32> to vector<15x128xf32>
    %c105_106 = arith.constant 105 : index
    %c128_107 = arith.constant 128 : index
    %68 = vector.load %arg9[%c105_106, %c128_107] : memref<232x512xf32, #tpu.memory_space<vmem>>, vector<15x128xf32>
    tpu.vector_store %arg9[%c105_106, %c128_107], %67 {strides = array<i32>} : memref<232x512xf32, #tpu.memory_space<vmem>>, vector<15x128xf32>,
    %c0_108 = arith.constant 0 : index
    %c8_109 = arith.constant 8 : index
    %c1_110 = arith.constant 1 : index
    %c0_111 = arith.constant 0 : index
    %69 = vector.load %arg1[%c0_108, %c8_109, %c1_110, %c0_111] : memref<1x16x16x128xf32, #tpu.memory_space<vmem>>, vector<1x1x15x128xf32>
    %70 = vector.shape_cast %69 : vector<1x1x15x128xf32> to vector<15x128xf32>
    %c120_112 = arith.constant 120 : index
    %c128_113 = arith.constant 128 : index
    %71 = vector.load %arg9[%c120_112, %c128_113] : memref<232x512xf32, #tpu.memory_space<vmem>>, vector<15x128xf32>
    tpu.vector_store %arg9[%c120_112, %c128_113], %70 {strides = array<i32>} : memref<232x512xf32, #tpu.memory_space<vmem>>, vector<15x128xf32>,
    %c0_114 = arith.constant 0 : index
    %c9_115 = arith.constant 9 : index
    %c1_116 = arith.constant 1 : index
    %c0_117 = arith.constant 0 : index
    %72 = vector.load %arg1[%c0_114, %c9_115, %c1_116, %c0_117] : memref<1x16x16x128xf32, #tpu.memory_space<vmem>>, vector<1x1x15x128xf32>
    %73 = vector.shape_cast %72 : vector<1x1x15x128xf32> to vector<15x128xf32>
    %c135_118 = arith.constant 135 : index
    %c128_119 = arith.constant 128 : index
    %74 = vector.load %arg9[%c135_118, %c128_119] : memref<232x512xf32, #tpu.memory_space<vmem>>, vector<15x128xf32>
    tpu.vector_store %arg9[%c135_118, %c128_119], %73 {strides = array<i32>} : memref<232x512xf32, #tpu.memory_space<vmem>>, vector<15x128xf32>,
    %c0_120 = arith.constant 0 : index
    %c10_121 = arith.constant 10 : index
    %c1_122 = arith.constant 1 : index
    %c0_123 = arith.constant 0 : index
    %75 = vector.load %arg1[%c0_120, %c10_121, %c1_122, %c0_123] : memref<1x16x16x128xf32, #tpu.memory_space<vmem>>, vector<1x1x15x128xf32>
    %76 = vector.shape_cast %75 : vector<1x1x15x128xf32> to vector<15x128xf32>
    %c150_124 = arith.constant 150 : index
    %c128_125 = arith.constant 128 : index
    %77 = vector.load %arg9[%c150_124, %c128_125] : memref<232x512xf32, #tpu.memory_space<vmem>>, vector<15x128xf32>
    tpu.vector_store %arg9[%c150_124, %c128_125], %76 {strides = array<i32>} : memref<232x512xf32, #tpu.memory_space<vmem>>, vector<15x128xf32>,
    %c0_126 = arith.constant 0 : index
    %c11_127 = arith.constant 11 : index
    %c1_128 = arith.constant 1 : index
    %c0_129 = arith.constant 0 : index
    %78 = vector.load %arg1[%c0_126, %c11_127, %c1_128, %c0_129] : memref<1x16x16x128xf32, #tpu.memory_space<vmem>>, vector<1x1x15x128xf32>
    %79 = vector.shape_cast %78 : vector<1x1x15x128xf32> to vector<15x128xf32>
    %c165_130 = arith.constant 165 : index
    %c128_131 = arith.constant 128 : index
    %80 = vector.load %arg9[%c165_130, %c128_131] : memref<232x512xf32, #tpu.memory_space<vmem>>, vector<15x128xf32>
    tpu.vector_store %arg9[%c165_130, %c128_131], %79 {strides = array<i32>} : memref<232x512xf32, #tpu.memory_space<vmem>>, vector<15x128xf32>,
    %c0_132 = arith.constant 0 : index
    %c12_133 = arith.constant 12 : index
    %c1_134 = arith.constant 1 : index
    %c0_135 = arith.constant 0 : index
    %81 = vector.load %arg1[%c0_132, %c12_133, %c1_134, %c0_135] : memref<1x16x16x128xf32, #tpu.memory_space<vmem>>, vector<1x1x15x128xf32>
    %82 = vector.shape_cast %81 : vector<1x1x15x128xf32> to vector<15x128xf32>
    %c180_136 = arith.constant 180 : index
    %c128_137 = arith.constant 128 : index
    %83 = vector.load %arg9[%c180_136, %c128_137] : memref<232x512xf32, #tpu.memory_space<vmem>>, vector<15x128xf32>
    tpu.vector_store %arg9[%c180_136, %c128_137], %82 {strides = array<i32>} : memref<232x512xf32, #tpu.memory_space<vmem>>, vector<15x128xf32>,
    %c0_138 = arith.constant 0 : index
    %c13_139 = arith.constant 13 : index
    %c1_140 = arith.constant 1 : index
    %c0_141 = arith.constant 0 : index
    %84 = vector.load %arg1[%c0_138, %c13_139, %c1_140, %c0_141] : memref<1x16x16x128xf32, #tpu.memory_space<vmem>>, vector<1x1x15x128xf32>
    %85 = vector.shape_cast %84 : vector<1x1x15x128xf32> to vector<15x128xf32>
    %c195_142 = arith.constant 195 : index
    %c128_143 = arith.constant 128 : index
    %86 = vector.load %arg9[%c195_142, %c128_143] : memref<232x512xf32, #tpu.memory_space<vmem>>, vector<15x128xf32>
    tpu.vector_store %arg9[%c195_142, %c128_143], %85 {strides = array<i32>} : memref<232x512xf32, #tpu.memory_space<vmem>>, vector<15x128xf32>,
    %c0_144 = arith.constant 0 : index
    %c14_145 = arith.constant 14 : index
    %c1_146 = arith.constant 1 : index
    %c0_147 = arith.constant 0 : index
    %87 = vector.load %arg1[%c0_144, %c14_145, %c1_146, %c0_147] : memref<1x16x16x128xf32, #tpu.memory_space<vmem>>, vector<1x1x15x128xf32>
    %88 = vector.shape_cast %87 : vector<1x1x15x128xf32> to vector<15x128xf32>
    %c210_148 = arith.constant 210 : index
    %c128_149 = arith.constant 128 : index
    %89 = vector.load %arg9[%c210_148, %c128_149] : memref<232x512xf32, #tpu.memory_space<vmem>>, vector<15x128xf32>
    tpu.vector_store %arg9[%c210_148, %c128_149], %88 {strides = array<i32>} : memref<232x512xf32, #tpu.memory_space<vmem>>, vector<15x128xf32>,
    %c0_150 = arith.constant 0 : index
    %c1_151 = arith.constant 1 : index
    %c0_152 = arith.constant 0 : index
    %c0_153 = arith.constant 0 : index
    %90 = vector.load %arg1[%c0_150, %c1_151, %c0_152, %c0_153] : memref<1x16x16x128xf32, #tpu.memory_space<vmem>>, vector<1x1x15x128xf32>
    %91 = vector.shape_cast %90 : vector<1x1x15x128xf32> to vector<15x128xf32>
    %c0_154 = arith.constant 0 : index
    %c256 = arith.constant 256 : index
    %92 = vector.load %arg9[%c0_154, %c256] : memref<232x512xf32, #tpu.memory_space<vmem>>, vector<15x128xf32>
    tpu.vector_store %arg9[%c0_154, %c256], %91 {strides = array<i32>} : memref<232x512xf32, #tpu.memory_space<vmem>>, vector<15x128xf32>,
    %c0_155 = arith.constant 0 : index
    %c2_156 = arith.constant 2 : index
    %c0_157 = arith.constant 0 : index
    %c0_158 = arith.constant 0 : index
    %93 = vector.load %arg1[%c0_155, %c2_156, %c0_157, %c0_158] : memref<1x16x16x128xf32, #tpu.memory_space<vmem>>, vector<1x1x15x128xf32>
    %94 = vector.shape_cast %93 : vector<1x1x15x128xf32> to vector<15x128xf32>
    %c15_159 = arith.constant 15 : index
    %c256_160 = arith.constant 256 : index
    %95 = vector.load %arg9[%c15_159, %c256_160] : memref<232x512xf32, #tpu.memory_space<vmem>>, vector<15x128xf32>
    tpu.vector_store %arg9[%c15_159, %c256_160], %94 {strides = array<i32>} : memref<232x512xf32, #tpu.memory_space<vmem>>, vector<15x128xf32>,
    %c0_161 = arith.constant 0 : index
    %c3_162 = arith.constant 3 : index
    %c0_163 = arith.constant 0 : index
    %c0_164 = arith.constant 0 : index
    %96 = vector.load %arg1[%c0_161, %c3_162, %c0_163, %c0_164] : memref<1x16x16x128xf32, #tpu.memory_space<vmem>>, vector<1x1x15x128xf32>
    %97 = vector.shape_cast %96 : vector<1x1x15x128xf32> to vector<15x128xf32>
    %c30_165 = arith.constant 30 : index
    %c256_166 = arith.constant 256 : index
    %98 = vector.load %arg9[%c30_165, %c256_166] : memref<232x512xf32, #tpu.memory_space<vmem>>, vector<15x128xf32>
    tpu.vector_store %arg9[%c30_165, %c256_166], %97 {strides = array<i32>} : memref<232x512xf32, #tpu.memory_space<vmem>>, vector<15x128xf32>,
    %c0_167 = arith.constant 0 : index
    %c4_168 = arith.constant 4 : index
    %c0_169 = arith.constant 0 : index
    %c0_170 = arith.constant 0 : index
    %99 = vector.load %arg1[%c0_167, %c4_168, %c0_169, %c0_170] : memref<1x16x16x128xf32, #tpu.memory_space<vmem>>, vector<1x1x15x128xf32>
    %100 = vector.shape_cast %99 : vector<1x1x15x128xf32> to vector<15x128xf32>
    %c45_171 = arith.constant 45 : index
    %c256_172 = arith.constant 256 : index
    %101 = vector.load %arg9[%c45_171, %c256_172] : memref<232x512xf32, #tpu.memory_space<vmem>>, vector<15x128xf32>
    tpu.vector_store %arg9[%c45_171, %c256_172], %100 {strides = array<i32>} : memref<232x512xf32, #tpu.memory_space<vmem>>, vector<15x128xf32>,
    %c0_173 = arith.constant 0 : index
    %c5_174 = arith.constant 5 : index
    %c0_175 = arith.constant 0 : index
    %c0_176 = arith.constant 0 : index
    %102 = vector.load %arg1[%c0_173, %c5_174, %c0_175, %c0_176] : memref<1x16x16x128xf32, #tpu.memory_space<vmem>>, vector<1x1x15x128xf32>
    %103 = vector.shape_cast %102 : vector<1x1x15x128xf32> to vector<15x128xf32>
    %c60_177 = arith.constant 60 : index
    %c256_178 = arith.constant 256 : index
    %104 = vector.load %arg9[%c60_177, %c256_178] : memref<232x512xf32, #tpu.memory_space<vmem>>, vector<15x128xf32>
    tpu.vector_store %arg9[%c60_177, %c256_178], %103 {strides = array<i32>} : memref<232x512xf32, #tpu.memory_space<vmem>>, vector<15x128xf32>,
    %c0_179 = arith.constant 0 : index
    %c6_180 = arith.constant 6 : index
    %c0_181 = arith.constant 0 : index
    %c0_182 = arith.constant 0 : index
    %105 = vector.load %arg1[%c0_179, %c6_180, %c0_181, %c0_182] : memref<1x16x16x128xf32, #tpu.memory_space<vmem>>, vector<1x1x15x128xf32>
    %106 = vector.shape_cast %105 : vector<1x1x15x128xf32> to vector<15x128xf32>
    %c75_183 = arith.constant 75 : index
    %c256_184 = arith.constant 256 : index
    %107 = vector.load %arg9[%c75_183, %c256_184] : memref<232x512xf32, #tpu.memory_space<vmem>>, vector<15x128xf32>
    tpu.vector_store %arg9[%c75_183, %c256_184], %106 {strides = array<i32>} : memref<232x512xf32, #tpu.memory_space<vmem>>, vector<15x128xf32>,
    %c0_185 = arith.constant 0 : index
    %c7_186 = arith.constant 7 : index
    %c0_187 = arith.constant 0 : index
    %c0_188 = arith.constant 0 : index
    %108 = vector.load %arg1[%c0_185, %c7_186, %c0_187, %c0_188] : memref<1x16x16x128xf32, #tpu.memory_space<vmem>>, vector<1x1x15x128xf32>
    %109 = vector.shape_cast %108 : vector<1x1x15x128xf32> to vector<15x128xf32>
    %c90_189 = arith.constant 90 : index
    %c256_190 = arith.constant 256 : index
    %110 = vector.load %arg9[%c90_189, %c256_190] : memref<232x512xf32, #tpu.memory_space<vmem>>, vector<15x128xf32>
    tpu.vector_store %arg9[%c90_189, %c256_190], %109 {strides = array<i32>} : memref<232x512xf32, #tpu.memory_space<vmem>>, vector<15x128xf32>,
    %c0_191 = arith.constant 0 : index
    %c8_192 = arith.constant 8 : index
    %c0_193 = arith.constant 0 : index
    %c0_194 = arith.constant 0 : index
    %111 = vector.load %arg1[%c0_191, %c8_192, %c0_193, %c0_194] : memref<1x16x16x128xf32, #tpu.memory_space<vmem>>, vector<1x1x15x128xf32>
    %112 = vector.shape_cast %111 : vector<1x1x15x128xf32> to vector<15x128xf32>
    %c105_195 = arith.constant 105 : index
    %c256_196 = arith.constant 256 : index
    %113 = vector.load %arg9[%c105_195, %c256_196] : memref<232x512xf32, #tpu.memory_space<vmem>>, vector<15x128xf32>
    tpu.vector_store %arg9[%c105_195, %c256_196], %112 {strides = array<i32>} : memref<232x512xf32, #tpu.memory_space<vmem>>, vector<15x128xf32>,
    %c0_197 = arith.constant 0 : index
    %c9_198 = arith.constant 9 : index
    %c0_199 = arith.constant 0 : index
    %c0_200 = arith.constant 0 : index
    %114 = vector.load %arg1[%c0_197, %c9_198, %c0_199, %c0_200] : memref<1x16x16x128xf32, #tpu.memory_space<vmem>>, vector<1x1x15x128xf32>
    %115 = vector.shape_cast %114 : vector<1x1x15x128xf32> to vector<15x128xf32>
    %c120_201 = arith.constant 120 : index
    %c256_202 = arith.constant 256 : index
    %116 = vector.load %arg9[%c120_201, %c256_202] : memref<232x512xf32, #tpu.memory_space<vmem>>, vector<15x128xf32>
    tpu.vector_store %arg9[%c120_201, %c256_202], %115 {strides = array<i32>} : memref<232x512xf32, #tpu.memory_space<vmem>>, vector<15x128xf32>,
    %c0_203 = arith.constant 0 : index
    %c10_204 = arith.constant 10 : index
    %c0_205 = arith.constant 0 : index
    %c0_206 = arith.constant 0 : index
    %117 = vector.load %arg1[%c0_203, %c10_204, %c0_205, %c0_206] : memref<1x16x16x128xf32, #tpu.memory_space<vmem>>, vector<1x1x15x128xf32>
    %118 = vector.shape_cast %117 : vector<1x1x15x128xf32> to vector<15x128xf32>
    %c135_207 = arith.constant 135 : index
    %c256_208 = arith.constant 256 : index
    %119 = vector.load %arg9[%c135_207, %c256_208] : memref<232x512xf32, #tpu.memory_space<vmem>>, vector<15x128xf32>
    tpu.vector_store %arg9[%c135_207, %c256_208], %118 {strides = array<i32>} : memref<232x512xf32, #tpu.memory_space<vmem>>, vector<15x128xf32>,
    %c0_209 = arith.constant 0 : index
    %c11_210 = arith.constant 11 : index
    %c0_211 = arith.constant 0 : index
    %c0_212 = arith.constant 0 : index
    %120 = vector.load %arg1[%c0_209, %c11_210, %c0_211, %c0_212] : memref<1x16x16x128xf32, #tpu.memory_space<vmem>>, vector<1x1x15x128xf32>
    %121 = vector.shape_cast %120 : vector<1x1x15x128xf32> to vector<15x128xf32>
    %c150_213 = arith.constant 150 : index
    %c256_214 = arith.constant 256 : index
    %122 = vector.load %arg9[%c150_213, %c256_214] : memref<232x512xf32, #tpu.memory_space<vmem>>, vector<15x128xf32>
    tpu.vector_store %arg9[%c150_213, %c256_214], %121 {strides = array<i32>} : memref<232x512xf32, #tpu.memory_space<vmem>>, vector<15x128xf32>,
    %c0_215 = arith.constant 0 : index
    %c12_216 = arith.constant 12 : index
    %c0_217 = arith.constant 0 : index
    %c0_218 = arith.constant 0 : index
    %123 = vector.load %arg1[%c0_215, %c12_216, %c0_217, %c0_218] : memref<1x16x16x128xf32, #tpu.memory_space<vmem>>, vector<1x1x15x128xf32>
    %124 = vector.shape_cast %123 : vector<1x1x15x128xf32> to vector<15x128xf32>
    %c165_219 = arith.constant 165 : index
    %c256_220 = arith.constant 256 : index
    %125 = vector.load %arg9[%c165_219, %c256_220] : memref<232x512xf32, #tpu.memory_space<vmem>>, vector<15x128xf32>
    tpu.vector_store %arg9[%c165_219, %c256_220], %124 {strides = array<i32>} : memref<232x512xf32, #tpu.memory_space<vmem>>, vector<15x128xf32>,
    %c0_221 = arith.constant 0 : index
    %c13_222 = arith.constant 13 : index
    %c0_223 = arith.constant 0 : index
    %c0_224 = arith.constant 0 : index
    %126 = vector.load %arg1[%c0_221, %c13_222, %c0_223, %c0_224] : memref<1x16x16x128xf32, #tpu.memory_space<vmem>>, vector<1x1x15x128xf32>
    %127 = vector.shape_cast %126 : vector<1x1x15x128xf32> to vector<15x128xf32>
    %c180_225 = arith.constant 180 : index
    %c256_226 = arith.constant 256 : index
    %128 = vector.load %arg9[%c180_225, %c256_226] : memref<232x512xf32, #tpu.memory_space<vmem>>, vector<15x128xf32>
    tpu.vector_store %arg9[%c180_225, %c256_226], %127 {strides = array<i32>} : memref<232x512xf32, #tpu.memory_space<vmem>>, vector<15x128xf32>,
    %c0_227 = arith.constant 0 : index
    %c14_228 = arith.constant 14 : index
    %c0_229 = arith.constant 0 : index
    %c0_230 = arith.constant 0 : index
    %129 = vector.load %arg1[%c0_227, %c14_228, %c0_229, %c0_230] : memref<1x16x16x128xf32, #tpu.memory_space<vmem>>, vector<1x1x15x128xf32>
    %130 = vector.shape_cast %129 : vector<1x1x15x128xf32> to vector<15x128xf32>
    %c195_231 = arith.constant 195 : index
    %c256_232 = arith.constant 256 : index
    %131 = vector.load %arg9[%c195_231, %c256_232] : memref<232x512xf32, #tpu.memory_space<vmem>>, vector<15x128xf32>
    tpu.vector_store %arg9[%c195_231, %c256_232], %130 {strides = array<i32>} : memref<232x512xf32, #tpu.memory_space<vmem>>, vector<15x128xf32>,
    %c0_233 = arith.constant 0 : index
    %c15_234 = arith.constant 15 : index
    %c0_235 = arith.constant 0 : index
    %c0_236 = arith.constant 0 : index
    %132 = vector.load %arg1[%c0_233, %c15_234, %c0_235, %c0_236] : memref<1x16x16x128xf32, #tpu.memory_space<vmem>>, vector<1x1x15x128xf32>
    %133 = vector.shape_cast %132 : vector<1x1x15x128xf32> to vector<15x128xf32>
    %c210_237 = arith.constant 210 : index
    %c256_238 = arith.constant 256 : index
    %134 = vector.load %arg9[%c210_237, %c256_238] : memref<232x512xf32, #tpu.memory_space<vmem>>, vector<15x128xf32>
    tpu.vector_store %arg9[%c210_237, %c256_238], %133 {strides = array<i32>} : memref<232x512xf32, #tpu.memory_space<vmem>>, vector<15x128xf32>,
    %c0_239 = arith.constant 0 : index
    %c1_240 = arith.constant 1 : index
    %c1_241 = arith.constant 1 : index
    %c0_242 = arith.constant 0 : index
    %135 = vector.load %arg1[%c0_239, %c1_240, %c1_241, %c0_242] : memref<1x16x16x128xf32, #tpu.memory_space<vmem>>, vector<1x1x15x128xf32>
    %136 = vector.shape_cast %135 : vector<1x1x15x128xf32> to vector<15x128xf32>
    %c0_243 = arith.constant 0 : index
    %c384 = arith.constant 384 : index
    %137 = vector.load %arg9[%c0_243, %c384] : memref<232x512xf32, #tpu.memory_space<vmem>>, vector<15x128xf32>
    tpu.vector_store %arg9[%c0_243, %c384], %136 {strides = array<i32>} : memref<232x512xf32, #tpu.memory_space<vmem>>, vector<15x128xf32>,
    %c0_244 = arith.constant 0 : index
    %c2_245 = arith.constant 2 : index
    %c1_246 = arith.constant 1 : index
    %c0_247 = arith.constant 0 : index
    %138 = vector.load %arg1[%c0_244, %c2_245, %c1_246, %c0_247] : memref<1x16x16x128xf32, #tpu.memory_space<vmem>>, vector<1x1x15x128xf32>
    %139 = vector.shape_cast %138 : vector<1x1x15x128xf32> to vector<15x128xf32>
    %c15_248 = arith.constant 15 : index
    %c384_249 = arith.constant 384 : index
    %140 = vector.load %arg9[%c15_248, %c384_249] : memref<232x512xf32, #tpu.memory_space<vmem>>, vector<15x128xf32>
    tpu.vector_store %arg9[%c15_248, %c384_249], %139 {strides = array<i32>} : memref<232x512xf32, #tpu.memory_space<vmem>>, vector<15x128xf32>,
    %c0_250 = arith.constant 0 : index
    %c3_251 = arith.constant 3 : index
    %c1_252 = arith.constant 1 : index
    %c0_253 = arith.constant 0 : index
    %141 = vector.load %arg1[%c0_250, %c3_251, %c1_252, %c0_253] : memref<1x16x16x128xf32, #tpu.memory_space<vmem>>, vector<1x1x15x128xf32>
    %142 = vector.shape_cast %141 : vector<1x1x15x128xf32> to vector<15x128xf32>
    %c30_254 = arith.constant 30 : index
    %c384_255 = arith.constant 384 : index
    %143 = vector.load %arg9[%c30_254, %c384_255] : memref<232x512xf32, #tpu.memory_space<vmem>>, vector<15x128xf32>
    tpu.vector_store %arg9[%c30_254, %c384_255], %142 {strides = array<i32>} : memref<232x512xf32, #tpu.memory_space<vmem>>, vector<15x128xf32>,
    %c0_256 = arith.constant 0 : index
    %c4_257 = arith.constant 4 : index
    %c1_258 = arith.constant 1 : index
    %c0_259 = arith.constant 0 : index
    %144 = vector.load %arg1[%c0_256, %c4_257, %c1_258, %c0_259] : memref<1x16x16x128xf32, #tpu.memory_space<vmem>>, vector<1x1x15x128xf32>
    %145 = vector.shape_cast %144 : vector<1x1x15x128xf32> to vector<15x128xf32>
    %c45_260 = arith.constant 45 : index
    %c384_261 = arith.constant 384 : index
    %146 = vector.load %arg9[%c45_260, %c384_261] : memref<232x512xf32, #tpu.memory_space<vmem>>, vector<15x128xf32>
    tpu.vector_store %arg9[%c45_260, %c384_261], %145 {strides = array<i32>} : memref<232x512xf32, #tpu.memory_space<vmem>>, vector<15x128xf32>,
    %c0_262 = arith.constant 0 : index
    %c5_263 = arith.constant 5 : index
    %c1_264 = arith.constant 1 : index
    %c0_265 = arith.constant 0 : index
    %147 = vector.load %arg1[%c0_262, %c5_263, %c1_264, %c0_265] : memref<1x16x16x128xf32, #tpu.memory_space<vmem>>, vector<1x1x15x128xf32>
    %148 = vector.shape_cast %147 : vector<1x1x15x128xf32> to vector<15x128xf32>
    %c60_266 = arith.constant 60 : index
    %c384_267 = arith.constant 384 : index
    %149 = vector.load %arg9[%c60_266, %c384_267] : memref<232x512xf32, #tpu.memory_space<vmem>>, vector<15x128xf32>
    tpu.vector_store %arg9[%c60_266, %c384_267], %148 {strides = array<i32>} : memref<232x512xf32, #tpu.memory_space<vmem>>, vector<15x128xf32>,
    %c0_268 = arith.constant 0 : index
    %c6_269 = arith.constant 6 : index
    %c1_270 = arith.constant 1 : index
    %c0_271 = arith.constant 0 : index
    %150 = vector.load %arg1[%c0_268, %c6_269, %c1_270, %c0_271] : memref<1x16x16x128xf32, #tpu.memory_space<vmem>>, vector<1x1x15x128xf32>
    %151 = vector.shape_cast %150 : vector<1x1x15x128xf32> to vector<15x128xf32>
    %c75_272 = arith.constant 75 : index
    %c384_273 = arith.constant 384 : index
    %152 = vector.load %arg9[%c75_272, %c384_273] : memref<232x512xf32, #tpu.memory_space<vmem>>, vector<15x128xf32>
    tpu.vector_store %arg9[%c75_272, %c384_273], %151 {strides = array<i32>} : memref<232x512xf32, #tpu.memory_space<vmem>>, vector<15x128xf32>,
    %c0_274 = arith.constant 0 : index
    %c7_275 = arith.constant 7 : index
    %c1_276 = arith.constant 1 : index
    %c0_277 = arith.constant 0 : index
    %153 = vector.load %arg1[%c0_274, %c7_275, %c1_276, %c0_277] : memref<1x16x16x128xf32, #tpu.memory_space<vmem>>, vector<1x1x15x128xf32>
    %154 = vector.shape_cast %153 : vector<1x1x15x128xf32> to vector<15x128xf32>
    %c90_278 = arith.constant 90 : index
    %c384_279 = arith.constant 384 : index
    %155 = vector.load %arg9[%c90_278, %c384_279] : memref<232x512xf32, #tpu.memory_space<vmem>>, vector<15x128xf32>
    tpu.vector_store %arg9[%c90_278, %c384_279], %154 {strides = array<i32>} : memref<232x512xf32, #tpu.memory_space<vmem>>, vector<15x128xf32>,
    %c0_280 = arith.constant 0 : index
    %c8_281 = arith.constant 8 : index
    %c1_282 = arith.constant 1 : index
    %c0_283 = arith.constant 0 : index
    %156 = vector.load %arg1[%c0_280, %c8_281, %c1_282, %c0_283] : memref<1x16x16x128xf32, #tpu.memory_space<vmem>>, vector<1x1x15x128xf32>
    %157 = vector.shape_cast %156 : vector<1x1x15x128xf32> to vector<15x128xf32>
    %c105_284 = arith.constant 105 : index
    %c384_285 = arith.constant 384 : index
    %158 = vector.load %arg9[%c105_284, %c384_285] : memref<232x512xf32, #tpu.memory_space<vmem>>, vector<15x128xf32>
    tpu.vector_store %arg9[%c105_284, %c384_285], %157 {strides = array<i32>} : memref<232x512xf32, #tpu.memory_space<vmem>>, vector<15x128xf32>,
    %c0_286 = arith.constant 0 : index
    %c9_287 = arith.constant 9 : index
    %c1_288 = arith.constant 1 : index
    %c0_289 = arith.constant 0 : index
    %159 = vector.load %arg1[%c0_286, %c9_287, %c1_288, %c0_289] : memref<1x16x16x128xf32, #tpu.memory_space<vmem>>, vector<1x1x15x128xf32>
    %160 = vector.shape_cast %159 : vector<1x1x15x128xf32> to vector<15x128xf32>
    %c120_290 = arith.constant 120 : index
    %c384_291 = arith.constant 384 : index
    %161 = vector.load %arg9[%c120_290, %c384_291] : memref<232x512xf32, #tpu.memory_space<vmem>>, vector<15x128xf32>
    tpu.vector_store %arg9[%c120_290, %c384_291], %160 {strides = array<i32>} : memref<232x512xf32, #tpu.memory_space<vmem>>, vector<15x128xf32>,
    %c0_292 = arith.constant 0 : index
    %c10_293 = arith.constant 10 : index
    %c1_294 = arith.constant 1 : index
    %c0_295 = arith.constant 0 : index
    %162 = vector.load %arg1[%c0_292, %c10_293, %c1_294, %c0_295] : memref<1x16x16x128xf32, #tpu.memory_space<vmem>>, vector<1x1x15x128xf32>
    %163 = vector.shape_cast %162 : vector<1x1x15x128xf32> to vector<15x128xf32>
    %c135_296 = arith.constant 135 : index
    %c384_297 = arith.constant 384 : index
    %164 = vector.load %arg9[%c135_296, %c384_297] : memref<232x512xf32, #tpu.memory_space<vmem>>, vector<15x128xf32>
    tpu.vector_store %arg9[%c135_296, %c384_297], %163 {strides = array<i32>} : memref<232x512xf32, #tpu.memory_space<vmem>>, vector<15x128xf32>,
    %c0_298 = arith.constant 0 : index
    %c11_299 = arith.constant 11 : index
    %c1_300 = arith.constant 1 : index
    %c0_301 = arith.constant 0 : index
    %165 = vector.load %arg1[%c0_298, %c11_299, %c1_300, %c0_301] : memref<1x16x16x128xf32, #tpu.memory_space<vmem>>, vector<1x1x15x128xf32>
    %166 = vector.shape_cast %165 : vector<1x1x15x128xf32> to vector<15x128xf32>
    %c150_302 = arith.constant 150 : index
    %c384_303 = arith.constant 384 : index
    %167 = vector.load %arg9[%c150_302, %c384_303] : memref<232x512xf32, #tpu.memory_space<vmem>>, vector<15x128xf32>
    tpu.vector_store %arg9[%c150_302, %c384_303], %166 {strides = array<i32>} : memref<232x512xf32, #tpu.memory_space<vmem>>, vector<15x128xf32>,
    %c0_304 = arith.constant 0 : index
    %c12_305 = arith.constant 12 : index
    %c1_306 = arith.constant 1 : index
    %c0_307 = arith.constant 0 : index
    %168 = vector.load %arg1[%c0_304, %c12_305, %c1_306, %c0_307] : memref<1x16x16x128xf32, #tpu.memory_space<vmem>>, vector<1x1x15x128xf32>
    %169 = vector.shape_cast %168 : vector<1x1x15x128xf32> to vector<15x128xf32>
    %c165_308 = arith.constant 165 : index
    %c384_309 = arith.constant 384 : index
    %170 = vector.load %arg9[%c165_308, %c384_309] : memref<232x512xf32, #tpu.memory_space<vmem>>, vector<15x128xf32>
    tpu.vector_store %arg9[%c165_308, %c384_309], %169 {strides = array<i32>} : memref<232x512xf32, #tpu.memory_space<vmem>>, vector<15x128xf32>,
    %c0_310 = arith.constant 0 : index
    %c13_311 = arith.constant 13 : index
    %c1_312 = arith.constant 1 : index
    %c0_313 = arith.constant 0 : index
    %171 = vector.load %arg1[%c0_310, %c13_311, %c1_312, %c0_313] : memref<1x16x16x128xf32, #tpu.memory_space<vmem>>, vector<1x1x15x128xf32>
    %172 = vector.shape_cast %171 : vector<1x1x15x128xf32> to vector<15x128xf32>
    %c180_314 = arith.constant 180 : index
    %c384_315 = arith.constant 384 : index
    %173 = vector.load %arg9[%c180_314, %c384_315] : memref<232x512xf32, #tpu.memory_space<vmem>>, vector<15x128xf32>
    tpu.vector_store %arg9[%c180_314, %c384_315], %172 {strides = array<i32>} : memref<232x512xf32, #tpu.memory_space<vmem>>, vector<15x128xf32>,
    %c0_316 = arith.constant 0 : index
    %c14_317 = arith.constant 14 : index
    %c1_318 = arith.constant 1 : index
    %c0_319 = arith.constant 0 : index
    %174 = vector.load %arg1[%c0_316, %c14_317, %c1_318, %c0_319] : memref<1x16x16x128xf32, #tpu.memory_space<vmem>>, vector<1x1x15x128xf32>
    %175 = vector.shape_cast %174 : vector<1x1x15x128xf32> to vector<15x128xf32>
    %c195_320 = arith.constant 195 : index
    %c384_321 = arith.constant 384 : index
    %176 = vector.load %arg9[%c195_320, %c384_321] : memref<232x512xf32, #tpu.memory_space<vmem>>, vector<15x128xf32>
    tpu.vector_store %arg9[%c195_320, %c384_321], %175 {strides = array<i32>} : memref<232x512xf32, #tpu.memory_space<vmem>>, vector<15x128xf32>,
    %c0_322 = arith.constant 0 : index
    %c15_323 = arith.constant 15 : index
    %c1_324 = arith.constant 1 : index
    %c0_325 = arith.constant 0 : index
    %177 = vector.load %arg1[%c0_322, %c15_323, %c1_324, %c0_325] : memref<1x16x16x128xf32, #tpu.memory_space<vmem>>, vector<1x1x15x128xf32>
    %178 = vector.shape_cast %177 : vector<1x1x15x128xf32> to vector<15x128xf32>
    %c210_326 = arith.constant 210 : index
    %c384_327 = arith.constant 384 : index
    %179 = vector.load %arg9[%c210_326, %c384_327] : memref<232x512xf32, #tpu.memory_space<vmem>>, vector<15x128xf32>
    tpu.vector_store %arg9[%c210_326, %c384_327], %178 {strides = array<i32>} : memref<232x512xf32, #tpu.memory_space<vmem>>, vector<15x128xf32>,
    %cst = arith.constant 0.000000e+00 : f32
    %180 = vector.broadcast %cst : f32 to vector<7x512xf32>
    %c225 = arith.constant 225 : index
    %c0_328 = arith.constant 0 : index
    %181 = vector.load %arg9[%c225, %c0_328] : memref<232x512xf32, #tpu.memory_space<vmem>>, vector<7x512xf32>
    tpu.vector_store %arg9[%c225, %c0_328], %180 {strides = array<i32>} : memref<232x512xf32, #tpu.memory_space<vmem>>, vector<7x512xf32>,
    %c0_329 = arith.constant 0 : index
    %c0_330 = arith.constant 0 : index
    %182 = vector.load %arg9[%c0_329, %c0_330] : memref<232x512xf32, #tpu.memory_space<vmem>>, vector<232x512xf32>
    %183 = arith.truncf %182 : vector<232x512xf32> to vector<232x512xbf16>
    %c0_331 = arith.constant 0 : index
    %c0_332 = arith.constant 0 : index
    %184 = vector.load %arg2[%c0_331, %c0_332] : memref<512x128xbf16, #tpu.memory_space<vmem>>, vector<512x128xbf16>
    %cst_333 = arith.constant dense<0.000000e+00> : vector<232x128xf32>
    %185 = tpu.matmul %183, %184, %cst_333 {dimension_numbers = #tpu.dot_dimension_numbers<[1], [0], [0], [1], [0, 0, 1, 1], [], []>} : vector<232x512xbf16>, vector<512x128xbf16>, vector<232x128xf32> -> vector<232x128xf32>
    %c0_334 = arith.constant 0 : index
    %c0_335 = arith.constant 0 : index
    %186 = vector.load %arg7[%c0_334, %c0_335] : memref<8x128xf32, #tpu.memory_space<vmem>>, vector<1x128xf32>
    %187 = vector.broadcast %186 : vector<1x128xf32> to vector<232x128xf32>
    %188 = arith.addf %185, %187 : vector<232x128xf32>
    %cst_336 = arith.constant 0.000000e+00 : f32
    %189 = vector.broadcast %cst_336 : f32 to vector<232x128xf32>
    %190 = arith.maximumf %188, %189 : vector<232x128xf32>
    %c0_337 = arith.constant 0 : index
    %c0_338 = arith.constant 0 : index
    %191 = vector.load %arg10[%c0_337, %c0_338] : memref<232x128xf32, #tpu.memory_space<vmem>>, vector<232x128xf32>
    tpu.vector_store %arg10[%c0_337, %c0_338], %190 {strides = array<i32>} : memref<232x128xf32, #tpu.memory_space<vmem>>, vector<232x128xf32>,
    %c0_339 = arith.constant 0 : index
    %c0_340 = arith.constant 0 : index
    %192 = tpu.strided_load %arg10[%c0_339, %c0_340] {strides = array<i32: 2, 1>} : memref<232x128xf32, #tpu.memory_space<vmem>>, vector<6x128xf32>
    %c0_341 = arith.constant 0 : index
    %c0_342 = arith.constant 0 : index
    %193 = vector.load %arg11[%c0_341, %c0_342] : memref<40x2048xf32, #tpu.memory_space<vmem>>, vector<6x128xf32>
    tpu.vector_store %arg11[%c0_341, %c0_342], %192 {strides = array<i32>} : memref<40x2048xf32, #tpu.memory_space<vmem>>, vector<6x128xf32>,
    %c30_343 = arith.constant 30 : index
    %c0_344 = arith.constant 0 : index
    %194 = tpu.strided_load %arg10[%c30_343, %c0_344] {strides = array<i32: 2, 1>} : memref<232x128xf32, #tpu.memory_space<vmem>>, vector<6x128xf32>
    %c6_345 = arith.constant 6 : index
    %c0_346 = arith.constant 0 : index
    %195 = vector.load %arg11[%c6_345, %c0_346] : memref<40x2048xf32, #tpu.memory_space<vmem>>, vector<6x128xf32>
    tpu.vector_store %arg11[%c6_345, %c0_346], %194 {strides = array<i32>} : memref<40x2048xf32, #tpu.memory_space<vmem>>, vector<6x128xf32>,
    %c60_347 = arith.constant 60 : index
    %c0_348 = arith.constant 0 : index
    %196 = tpu.strided_load %arg10[%c60_347, %c0_348] {strides = array<i32: 2, 1>} : memref<232x128xf32, #tpu.memory_space<vmem>>, vector<6x128xf32>
    %c12_349 = arith.constant 12 : index
    %c0_350 = arith.constant 0 : index
    %197 = vector.load %arg11[%c12_349, %c0_350] : memref<40x2048xf32, #tpu.memory_space<vmem>>, vector<6x128xf32>
    tpu.vector_store %arg11[%c12_349, %c0_350], %196 {strides = array<i32>} : memref<40x2048xf32, #tpu.memory_space<vmem>>, vector<6x128xf32>,
    %c90_351 = arith.constant 90 : index
    %c0_352 = arith.constant 0 : index
    %198 = tpu.strided_load %arg10[%c90_351, %c0_352] {strides = array<i32: 2, 1>} : memref<232x128xf32, #tpu.memory_space<vmem>>, vector<6x128xf32>
    %c18 = arith.constant 18 : index
    %c0_353 = arith.constant 0 : index
    %199 = vector.load %arg11[%c18, %c0_353] : memref<40x2048xf32, #tpu.memory_space<vmem>>, vector<6x128xf32>
    tpu.vector_store %arg11[%c18, %c0_353], %198 {strides = array<i32>} : memref<40x2048xf32, #tpu.memory_space<vmem>>, vector<6x128xf32>,
    %c120_354 = arith.constant 120 : index
    %c0_355 = arith.constant 0 : index
    %200 = tpu.strided_load %arg10[%c120_354, %c0_355] {strides = array<i32: 2, 1>} : memref<232x128xf32, #tpu.memory_space<vmem>>, vector<6x128xf32>
    %c24 = arith.constant 24 : index
    %c0_356 = arith.constant 0 : index
    %201 = vector.load %arg11[%c24, %c0_356] : memref<40x2048xf32, #tpu.memory_space<vmem>>, vector<6x128xf32>
    tpu.vector_store %arg11[%c24, %c0_356], %200 {strides = array<i32>} : memref<40x2048xf32, #tpu.memory_space<vmem>>, vector<6x128xf32>,
    %c150_357 = arith.constant 150 : index
    %c0_358 = arith.constant 0 : index
    %202 = tpu.strided_load %arg10[%c150_357, %c0_358] {strides = array<i32: 2, 1>} : memref<232x128xf32, #tpu.memory_space<vmem>>, vector<6x128xf32>
    %c30_359 = arith.constant 30 : index
    %c0_360 = arith.constant 0 : index
    %203 = vector.load %arg11[%c30_359, %c0_360] : memref<40x2048xf32, #tpu.memory_space<vmem>>, vector<6x128xf32>
    tpu.vector_store %arg11[%c30_359, %c0_360], %202 {strides = array<i32>} : memref<40x2048xf32, #tpu.memory_space<vmem>>, vector<6x128xf32>,
    %c1_361 = arith.constant 1 : index
    %c0_362 = arith.constant 0 : index
    %204 = tpu.strided_load %arg10[%c1_361, %c0_362] {strides = array<i32: 2, 1>} : memref<232x128xf32, #tpu.memory_space<vmem>>, vector<6x128xf32>
    %c0_363 = arith.constant 0 : index
    %c128_364 = arith.constant 128 : index
    %205 = vector.load %arg11[%c0_363, %c128_364] : memref<40x2048xf32, #tpu.memory_space<vmem>>, vector<6x128xf32>
    tpu.vector_store %arg11[%c0_363, %c128_364], %204 {strides = array<i32>} : memref<40x2048xf32, #tpu.memory_space<vmem>>, vector<6x128xf32>,
    %c31 = arith.constant 31 : index
    %c0_365 = arith.constant 0 : index
    %206 = tpu.strided_load %arg10[%c31, %c0_365] {strides = array<i32: 2, 1>} : memref<232x128xf32, #tpu.memory_space<vmem>>, vector<6x128xf32>
    %c6_366 = arith.constant 6 : index
    %c128_367 = arith.constant 128 : index
    %207 = vector.load %arg11[%c6_366, %c128_367] : memref<40x2048xf32, #tpu.memory_space<vmem>>, vector<6x128xf32>
    tpu.vector_store %arg11[%c6_366, %c128_367], %206 {strides = array<i32>} : memref<40x2048xf32, #tpu.memory_space<vmem>>, vector<6x128xf32>,
    %c61 = arith.constant 61 : index
    %c0_368 = arith.constant 0 : index
    %208 = tpu.strided_load %arg10[%c61, %c0_368] {strides = array<i32: 2, 1>} : memref<232x128xf32, #tpu.memory_space<vmem>>, vector<6x128xf32>
    %c12_369 = arith.constant 12 : index
    %c128_370 = arith.constant 128 : index
    %209 = vector.load %arg11[%c12_369, %c128_370] : memref<40x2048xf32, #tpu.memory_space<vmem>>, vector<6x128xf32>
    tpu.vector_store %arg11[%c12_369, %c128_370], %208 {strides = array<i32>} : memref<40x2048xf32, #tpu.memory_space<vmem>>, vector<6x128xf32>,
    %c91 = arith.constant 91 : index
    %c0_371 = arith.constant 0 : index
    %210 = tpu.strided_load %arg10[%c91, %c0_371] {strides = array<i32: 2, 1>} : memref<232x128xf32, #tpu.memory_space<vmem>>, vector<6x128xf32>
    %c18_372 = arith.constant 18 : index
    %c128_373 = arith.constant 128 : index
    %211 = vector.load %arg11[%c18_372, %c128_373] : memref<40x2048xf32, #tpu.memory_space<vmem>>, vector<6x128xf32>
    tpu.vector_store %arg11[%c18_372, %c128_373], %210 {strides = array<i32>} : memref<40x2048xf32, #tpu.memory_space<vmem>>, vector<6x128xf32>,
    %c121 = arith.constant 121 : index
    %c0_374 = arith.constant 0 : index
    %212 = tpu.strided_load %arg10[%c121, %c0_374] {strides = array<i32: 2, 1>} : memref<232x128xf32, #tpu.memory_space<vmem>>, vector<6x128xf32>
    %c24_375 = arith.constant 24 : index
    %c128_376 = arith.constant 128 : index
    %213 = vector.load %arg11[%c24_375, %c128_376] : memref<40x2048xf32, #tpu.memory_space<vmem>>, vector<6x128xf32>
    tpu.vector_store %arg11[%c24_375, %c128_376], %212 {strides = array<i32>} : memref<40x2048xf32, #tpu.memory_space<vmem>>, vector<6x128xf32>,
    %c151 = arith.constant 151 : index
    %c0_377 = arith.constant 0 : index
    %214 = tpu.strided_load %arg10[%c151, %c0_377] {strides = array<i32: 2, 1>} : memref<232x128xf32, #tpu.memory_space<vmem>>, vector<6x128xf32>
    %c30_378 = arith.constant 30 : index
    %c128_379 = arith.constant 128 : index
    %215 = vector.load %arg11[%c30_378, %c128_379] : memref<40x2048xf32, #tpu.memory_space<vmem>>, vector<6x128xf32>
    tpu.vector_store %arg11[%c30_378, %c128_379], %214 {strides = array<i32>} : memref<40x2048xf32, #tpu.memory_space<vmem>>, vector<6x128xf32>,
    %c2_380 = arith.constant 2 : index
    %c0_381 = arith.constant 0 : index
    %216 = tpu.strided_load %arg10[%c2_380, %c0_381] {strides = array<i32: 2, 1>} : memref<232x128xf32, #tpu.memory_space<vmem>>, vector<6x128xf32>
    %c0_382 = arith.constant 0 : index
    %c256_383 = arith.constant 256 : index
    %217 = vector.load %arg11[%c0_382, %c256_383] : memref<40x2048xf32, #tpu.memory_space<vmem>>, vector<6x128xf32>
    tpu.vector_store %arg11[%c0_382, %c256_383], %216 {strides = array<i32>} : memref<40x2048xf32, #tpu.memory_space<vmem>>, vector<6x128xf32>,
    %c32 = arith.constant 32 : index
    %c0_384 = arith.constant 0 : index
    %218 = tpu.strided_load %arg10[%c32, %c0_384] {strides = array<i32: 2, 1>} : memref<232x128xf32, #tpu.memory_space<vmem>>, vector<6x128xf32>
    %c6_385 = arith.constant 6 : index
    %c256_386 = arith.constant 256 : index
    %219 = vector.load %arg11[%c6_385, %c256_386] : memref<40x2048xf32, #tpu.memory_space<vmem>>, vector<6x128xf32>
    tpu.vector_store %arg11[%c6_385, %c256_386], %218 {strides = array<i32>} : memref<40x2048xf32, #tpu.memory_space<vmem>>, vector<6x128xf32>,
    %c62 = arith.constant 62 : index
    %c0_387 = arith.constant 0 : index
    %220 = tpu.strided_load %arg10[%c62, %c0_387] {strides = array<i32: 2, 1>} : memref<232x128xf32, #tpu.memory_space<vmem>>, vector<6x128xf32>
    %c12_388 = arith.constant 12 : index
    %c256_389 = arith.constant 256 : index
    %221 = vector.load %arg11[%c12_388, %c256_389] : memref<40x2048xf32, #tpu.memory_space<vmem>>, vector<6x128xf32>
    tpu.vector_store %arg11[%c12_388, %c256_389], %220 {strides = array<i32>} : memref<40x2048xf32, #tpu.memory_space<vmem>>, vector<6x128xf32>,
    %c92 = arith.constant 92 : index
    %c0_390 = arith.constant 0 : index
    %222 = tpu.strided_load %arg10[%c92, %c0_390] {strides = array<i32: 2, 1>} : memref<232x128xf32, #tpu.memory_space<vmem>>, vector<6x128xf32>
    %c18_391 = arith.constant 18 : index
    %c256_392 = arith.constant 256 : index
    %223 = vector.load %arg11[%c18_391, %c256_392] : memref<40x2048xf32, #tpu.memory_space<vmem>>, vector<6x128xf32>
    tpu.vector_store %arg11[%c18_391, %c256_392], %222 {strides = array<i32>} : memref<40x2048xf32, #tpu.memory_space<vmem>>, vector<6x128xf32>,
    %c122 = arith.constant 122 : index
    %c0_393 = arith.constant 0 : index
    %224 = tpu.strided_load %arg10[%c122, %c0_393] {strides = array<i32: 2, 1>} : memref<232x128xf32, #tpu.memory_space<vmem>>, vector<6x128xf32>
    %c24_394 = arith.constant 24 : index
    %c256_395 = arith.constant 256 : index
    %225 = vector.load %arg11[%c24_394, %c256_395] : memref<40x2048xf32, #tpu.memory_space<vmem>>, vector<6x128xf32>
    tpu.vector_store %arg11[%c24_394, %c256_395], %224 {strides = array<i32>} : memref<40x2048xf32, #tpu.memory_space<vmem>>, vector<6x128xf32>,
    %c152 = arith.constant 152 : index
    %c0_396 = arith.constant 0 : index
    %226 = tpu.strided_load %arg10[%c152, %c0_396] {strides = array<i32: 2, 1>} : memref<232x128xf32, #tpu.memory_space<vmem>>, vector<6x128xf32>
    %c30_397 = arith.constant 30 : index
    %c256_398 = arith.constant 256 : index
    %227 = vector.load %arg11[%c30_397, %c256_398] : memref<40x2048xf32, #tpu.memory_space<vmem>>, vector<6x128xf32>
    tpu.vector_store %arg11[%c30_397, %c256_398], %226 {strides = array<i32>} : memref<40x2048xf32, #tpu.memory_space<vmem>>, vector<6x128xf32>,
    %c3_399 = arith.constant 3 : index
    %c0_400 = arith.constant 0 : index
    %228 = tpu.strided_load %arg10[%c3_399, %c0_400] {strides = array<i32: 2, 1>} : memref<232x128xf32, #tpu.memory_space<vmem>>, vector<6x128xf32>
    %c0_401 = arith.constant 0 : index
    %c384_402 = arith.constant 384 : index
    %229 = vector.load %arg11[%c0_401, %c384_402] : memref<40x2048xf32, #tpu.memory_space<vmem>>, vector<6x128xf32>
    tpu.vector_store %arg11[%c0_401, %c384_402], %228 {strides = array<i32>} : memref<40x2048xf32, #tpu.memory_space<vmem>>, vector<6x128xf32>,
    %c33 = arith.constant 33 : index
    %c0_403 = arith.constant 0 : index
    %230 = tpu.strided_load %arg10[%c33, %c0_403] {strides = array<i32: 2, 1>} : memref<232x128xf32, #tpu.memory_space<vmem>>, vector<6x128xf32>
    %c6_404 = arith.constant 6 : index
    %c384_405 = arith.constant 384 : index
    %231 = vector.load %arg11[%c6_404, %c384_405] : memref<40x2048xf32, #tpu.memory_space<vmem>>, vector<6x128xf32>
    tpu.vector_store %arg11[%c6_404, %c384_405], %230 {strides = array<i32>} : memref<40x2048xf32, #tpu.memory_space<vmem>>, vector<6x128xf32>,
    %c63 = arith.constant 63 : index
    %c0_406 = arith.constant 0 : index
    %232 = tpu.strided_load %arg10[%c63, %c0_406] {strides = array<i32: 2, 1>} : memref<232x128xf32, #tpu.memory_space<vmem>>, vector<6x128xf32>
    %c12_407 = arith.constant 12 : index
    %c384_408 = arith.constant 384 : index
    %233 = vector.load %arg11[%c12_407, %c384_408] : memref<40x2048xf32, #tpu.memory_space<vmem>>, vector<6x128xf32>
    tpu.vector_store %arg11[%c12_407, %c384_408], %232 {strides = array<i32>} : memref<40x2048xf32, #tpu.memory_space<vmem>>, vector<6x128xf32>,
    %c93 = arith.constant 93 : index
    %c0_409 = arith.constant 0 : index
    %234 = tpu.strided_load %arg10[%c93, %c0_409] {strides = array<i32: 2, 1>} : memref<232x128xf32, #tpu.memory_space<vmem>>, vector<6x128xf32>
    %c18_410 = arith.constant 18 : index
    %c384_411 = arith.constant 384 : index
    %235 = vector.load %arg11[%c18_410, %c384_411] : memref<40x2048xf32, #tpu.memory_space<vmem>>, vector<6x128xf32>
    tpu.vector_store %arg11[%c18_410, %c384_411], %234 {strides = array<i32>} : memref<40x2048xf32, #tpu.memory_space<vmem>>, vector<6x128xf32>,
    %c123 = arith.constant 123 : index
    %c0_412 = arith.constant 0 : index
    %236 = tpu.strided_load %arg10[%c123, %c0_412] {strides = array<i32: 2, 1>} : memref<232x128xf32, #tpu.memory_space<vmem>>, vector<6x128xf32>
    %c24_413 = arith.constant 24 : index
    %c384_414 = arith.constant 384 : index
    %237 = vector.load %arg11[%c24_413, %c384_414] : memref<40x2048xf32, #tpu.memory_space<vmem>>, vector<6x128xf32>
    tpu.vector_store %arg11[%c24_413, %c384_414], %236 {strides = array<i32>} : memref<40x2048xf32, #tpu.memory_space<vmem>>, vector<6x128xf32>,
    %c153 = arith.constant 153 : index
    %c0_415 = arith.constant 0 : index
    %238 = tpu.strided_load %arg10[%c153, %c0_415] {strides = array<i32: 2, 1>} : memref<232x128xf32, #tpu.memory_space<vmem>>, vector<6x128xf32>
    %c30_416 = arith.constant 30 : index
    %c384_417 = arith.constant 384 : index
    %239 = vector.load %arg11[%c30_416, %c384_417] : memref<40x2048xf32, #tpu.memory_space<vmem>>, vector<6x128xf32>
    tpu.vector_store %arg11[%c30_416, %c384_417], %238 {strides = array<i32>} : memref<40x2048xf32, #tpu.memory_space<vmem>>, vector<6x128xf32>,
    %c15_418 = arith.constant 15 : index
    %c0_419 = arith.constant 0 : index
    %240 = tpu.strided_load %arg10[%c15_418, %c0_419] {strides = array<i32: 2, 1>} : memref<232x128xf32, #tpu.memory_space<vmem>>, vector<6x128xf32>
    %c0_420 = arith.constant 0 : index
    %c512 = arith.constant 512 : index
    %241 = vector.load %arg11[%c0_420, %c512] : memref<40x2048xf32, #tpu.memory_space<vmem>>, vector<6x128xf32>
    tpu.vector_store %arg11[%c0_420, %c512], %240 {strides = array<i32>} : memref<40x2048xf32, #tpu.memory_space<vmem>>, vector<6x128xf32>,
    %c45_421 = arith.constant 45 : index
    %c0_422 = arith.constant 0 : index
    %242 = tpu.strided_load %arg10[%c45_421, %c0_422] {strides = array<i32: 2, 1>} : memref<232x128xf32, #tpu.memory_space<vmem>>, vector<6x128xf32>
    %c6_423 = arith.constant 6 : index
    %c512_424 = arith.constant 512 : index
    %243 = vector.load %arg11[%c6_423, %c512_424] : memref<40x2048xf32, #tpu.memory_space<vmem>>, vector<6x128xf32>
    tpu.vector_store %arg11[%c6_423, %c512_424], %242 {strides = array<i32>} : memref<40x2048xf32, #tpu.memory_space<vmem>>, vector<6x128xf32>,
    %c75_425 = arith.constant 75 : index
    %c0_426 = arith.constant 0 : index
    %244 = tpu.strided_load %arg10[%c75_425, %c0_426] {strides = array<i32: 2, 1>} : memref<232x128xf32, #tpu.memory_space<vmem>>, vector<6x128xf32>
    %c12_427 = arith.constant 12 : index
    %c512_428 = arith.constant 512 : index
    %245 = vector.load %arg11[%c12_427, %c512_428] : memref<40x2048xf32, #tpu.memory_space<vmem>>, vector<6x128xf32>
    tpu.vector_store %arg11[%c12_427, %c512_428], %244 {strides = array<i32>} : memref<40x2048xf32, #tpu.memory_space<vmem>>, vector<6x128xf32>,
    %c105_429 = arith.constant 105 : index
    %c0_430 = arith.constant 0 : index
    %246 = tpu.strided_load %arg10[%c105_429, %c0_430] {strides = array<i32: 2, 1>} : memref<232x128xf32, #tpu.memory_space<vmem>>, vector<6x128xf32>
    %c18_431 = arith.constant 18 : index
    %c512_432 = arith.constant 512 : index
    %247 = vector.load %arg11[%c18_431, %c512_432] : memref<40x2048xf32, #tpu.memory_space<vmem>>, vector<6x128xf32>
    tpu.vector_store %arg11[%c18_431, %c512_432], %246 {strides = array<i32>} : memref<40x2048xf32, #tpu.memory_space<vmem>>, vector<6x128xf32>,
    %c135_433 = arith.constant 135 : index
    %c0_434 = arith.constant 0 : index
    %248 = tpu.strided_load %arg10[%c135_433, %c0_434] {strides = array<i32: 2, 1>} : memref<232x128xf32, #tpu.memory_space<vmem>>, vector<6x128xf32>
    %c24_435 = arith.constant 24 : index
    %c512_436 = arith.constant 512 : index
    %249 = vector.load %arg11[%c24_435, %c512_436] : memref<40x2048xf32, #tpu.memory_space<vmem>>, vector<6x128xf32>
    tpu.vector_store %arg11[%c24_435, %c512_436], %248 {strides = array<i32>} : memref<40x2048xf32, #tpu.memory_space<vmem>>, vector<6x128xf32>,
    %c165_437 = arith.constant 165 : index
    %c0_438 = arith.constant 0 : index
    %250 = tpu.strided_load %arg10[%c165_437, %c0_438] {strides = array<i32: 2, 1>} : memref<232x128xf32, #tpu.memory_space<vmem>>, vector<6x128xf32>
    %c30_439 = arith.constant 30 : index
    %c512_440 = arith.constant 512 : index
    %251 = vector.load %arg11[%c30_439, %c512_440] : memref<40x2048xf32, #tpu.memory_space<vmem>>, vector<6x128xf32>
    tpu.vector_store %arg11[%c30_439, %c512_440], %250 {strides = array<i32>} : memref<40x2048xf32, #tpu.memory_space<vmem>>, vector<6x128xf32>,
    %c16 = arith.constant 16 : index
    %c0_441 = arith.constant 0 : index
    %252 = tpu.strided_load %arg10[%c16, %c0_441] {strides = array<i32: 2, 1>} : memref<232x128xf32, #tpu.memory_space<vmem>>, vector<6x128xf32>
    %c0_442 = arith.constant 0 : index
    %c640 = arith.constant 640 : index
    %253 = vector.load %arg11[%c0_442, %c640] : memref<40x2048xf32, #tpu.memory_space<vmem>>, vector<6x128xf32>
    tpu.vector_store %arg11[%c0_442, %c640], %252 {strides = array<i32>} : memref<40x2048xf32, #tpu.memory_space<vmem>>, vector<6x128xf32>,
    %c46 = arith.constant 46 : index
    %c0_443 = arith.constant 0 : index
    %254 = tpu.strided_load %arg10[%c46, %c0_443] {strides = array<i32: 2, 1>} : memref<232x128xf32, #tpu.memory_space<vmem>>, vector<6x128xf32>
    %c6_444 = arith.constant 6 : index
    %c640_445 = arith.constant 640 : index
    %255 = vector.load %arg11[%c6_444, %c640_445] : memref<40x2048xf32, #tpu.memory_space<vmem>>, vector<6x128xf32>
    tpu.vector_store %arg11[%c6_444, %c640_445], %254 {strides = array<i32>} : memref<40x2048xf32, #tpu.memory_space<vmem>>, vector<6x128xf32>,
    %c76 = arith.constant 76 : index
    %c0_446 = arith.constant 0 : index
    %256 = tpu.strided_load %arg10[%c76, %c0_446] {strides = array<i32: 2, 1>} : memref<232x128xf32, #tpu.memory_space<vmem>>, vector<6x128xf32>
    %c12_447 = arith.constant 12 : index
    %c640_448 = arith.constant 640 : index
    %257 = vector.load %arg11[%c12_447, %c640_448] : memref<40x2048xf32, #tpu.memory_space<vmem>>, vector<6x128xf32>
    tpu.vector_store %arg11[%c12_447, %c640_448], %256 {strides = array<i32>} : memref<40x2048xf32, #tpu.memory_space<vmem>>, vector<6x128xf32>,
    %c106 = arith.constant 106 : index
    %c0_449 = arith.constant 0 : index
    %258 = tpu.strided_load %arg10[%c106, %c0_449] {strides = array<i32: 2, 1>} : memref<232x128xf32, #tpu.memory_space<vmem>>, vector<6x128xf32>
    %c18_450 = arith.constant 18 : index
    %c640_451 = arith.constant 640 : index
    %259 = vector.load %arg11[%c18_450, %c640_451] : memref<40x2048xf32, #tpu.memory_space<vmem>>, vector<6x128xf32>
    tpu.vector_store %arg11[%c18_450, %c640_451], %258 {strides = array<i32>} : memref<40x2048xf32, #tpu.memory_space<vmem>>, vector<6x128xf32>,
    %c136 = arith.constant 136 : index
    %c0_452 = arith.constant 0 : index
    %260 = tpu.strided_load %arg10[%c136, %c0_452] {strides = array<i32: 2, 1>} : memref<232x128xf32, #tpu.memory_space<vmem>>, vector<6x128xf32>
    %c24_453 = arith.constant 24 : index
    %c640_454 = arith.constant 640 : index
    %261 = vector.load %arg11[%c24_453, %c640_454] : memref<40x2048xf32, #tpu.memory_space<vmem>>, vector<6x128xf32>
    tpu.vector_store %arg11[%c24_453, %c640_454], %260 {strides = array<i32>} : memref<40x2048xf32, #tpu.memory_space<vmem>>, vector<6x128xf32>,
    %c166 = arith.constant 166 : index
    %c0_455 = arith.constant 0 : index
    %262 = tpu.strided_load %arg10[%c166, %c0_455] {strides = array<i32: 2, 1>} : memref<232x128xf32, #tpu.memory_space<vmem>>, vector<6x128xf32>
    %c30_456 = arith.constant 30 : index
    %c640_457 = arith.constant 640 : index
    %263 = vector.load %arg11[%c30_456, %c640_457] : memref<40x2048xf32, #tpu.memory_space<vmem>>, vector<6x128xf32>
    tpu.vector_store %arg11[%c30_456, %c640_457], %262 {strides = array<i32>} : memref<40x2048xf32, #tpu.memory_space<vmem>>, vector<6x128xf32>,
    %c17 = arith.constant 17 : index
    %c0_458 = arith.constant 0 : index
    %264 = tpu.strided_load %arg10[%c17, %c0_458] {strides = array<i32: 2, 1>} : memref<232x128xf32, #tpu.memory_space<vmem>>, vector<6x128xf32>
    %c0_459 = arith.constant 0 : index
    %c768 = arith.constant 768 : index
    %265 = vector.load %arg11[%c0_459, %c768] : memref<40x2048xf32, #tpu.memory_space<vmem>>, vector<6x128xf32>
    tpu.vector_store %arg11[%c0_459, %c768], %264 {strides = array<i32>} : memref<40x2048xf32, #tpu.memory_space<vmem>>, vector<6x128xf32>,
    %c47 = arith.constant 47 : index
    %c0_460 = arith.constant 0 : index
    %266 = tpu.strided_load %arg10[%c47, %c0_460] {strides = array<i32: 2, 1>} : memref<232x128xf32, #tpu.memory_space<vmem>>, vector<6x128xf32>
    %c6_461 = arith.constant 6 : index
    %c768_462 = arith.constant 768 : index
    %267 = vector.load %arg11[%c6_461, %c768_462] : memref<40x2048xf32, #tpu.memory_space<vmem>>, vector<6x128xf32>
    tpu.vector_store %arg11[%c6_461, %c768_462], %266 {strides = array<i32>} : memref<40x2048xf32, #tpu.memory_space<vmem>>, vector<6x128xf32>,
    %c77 = arith.constant 77 : index
    %c0_463 = arith.constant 0 : index
    %268 = tpu.strided_load %arg10[%c77, %c0_463] {strides = array<i32: 2, 1>} : memref<232x128xf32, #tpu.memory_space<vmem>>, vector<6x128xf32>
    %c12_464 = arith.constant 12 : index
    %c768_465 = arith.constant 768 : index
    %269 = vector.load %arg11[%c12_464, %c768_465] : memref<40x2048xf32, #tpu.memory_space<vmem>>, vector<6x128xf32>
    tpu.vector_store %arg11[%c12_464, %c768_465], %268 {strides = array<i32>} : memref<40x2048xf32, #tpu.memory_space<vmem>>, vector<6x128xf32>,
    %c107 = arith.constant 107 : index
    %c0_466 = arith.constant 0 : index
    %270 = tpu.strided_load %arg10[%c107, %c0_466] {strides = array<i32: 2, 1>} : memref<232x128xf32, #tpu.memory_space<vmem>>, vector<6x128xf32>
    %c18_467 = arith.constant 18 : index
    %c768_468 = arith.constant 768 : index
    %271 = vector.load %arg11[%c18_467, %c768_468] : memref<40x2048xf32, #tpu.memory_space<vmem>>, vector<6x128xf32>
    tpu.vector_store %arg11[%c18_467, %c768_468], %270 {strides = array<i32>} : memref<40x2048xf32, #tpu.memory_space<vmem>>, vector<6x128xf32>,
    %c137 = arith.constant 137 : index
    %c0_469 = arith.constant 0 : index
    %272 = tpu.strided_load %arg10[%c137, %c0_469] {strides = array<i32: 2, 1>} : memref<232x128xf32, #tpu.memory_space<vmem>>, vector<6x128xf32>
    %c24_470 = arith.constant 24 : index
    %c768_471 = arith.constant 768 : index
    %273 = vector.load %arg11[%c24_470, %c768_471] : memref<40x2048xf32, #tpu.memory_space<vmem>>, vector<6x128xf32>
    tpu.vector_store %arg11[%c24_470, %c768_471], %272 {strides = array<i32>} : memref<40x2048xf32, #tpu.memory_space<vmem>>, vector<6x128xf32>,
    %c167 = arith.constant 167 : index
    %c0_472 = arith.constant 0 : index
    %274 = tpu.strided_load %arg10[%c167, %c0_472] {strides = array<i32: 2, 1>} : memref<232x128xf32, #tpu.memory_space<vmem>>, vector<6x128xf32>
    %c30_473 = arith.constant 30 : index
    %c768_474 = arith.constant 768 : index
    %275 = vector.load %arg11[%c30_473, %c768_474] : memref<40x2048xf32, #tpu.memory_space<vmem>>, vector<6x128xf32>
    tpu.vector_store %arg11[%c30_473, %c768_474], %274 {strides = array<i32>} : memref<40x2048xf32, #tpu.memory_space<vmem>>, vector<6x128xf32>,
    %c18_475 = arith.constant 18 : index
    %c0_476 = arith.constant 0 : index
    %276 = tpu.strided_load %arg10[%c18_475, %c0_476] {strides = array<i32: 2, 1>} : memref<232x128xf32, #tpu.memory_space<vmem>>, vector<6x128xf32>
    %c0_477 = arith.constant 0 : index
    %c896 = arith.constant 896 : index
    %277 = vector.load %arg11[%c0_477, %c896] : memref<40x2048xf32, #tpu.memory_space<vmem>>, vector<6x128xf32>
    tpu.vector_store %arg11[%c0_477, %c896], %276 {strides = array<i32>} : memref<40x2048xf32, #tpu.memory_space<vmem>>, vector<6x128xf32>,
    %c48 = arith.constant 48 : index
    %c0_478 = arith.constant 0 : index
    %278 = tpu.strided_load %arg10[%c48, %c0_478] {strides = array<i32: 2, 1>} : memref<232x128xf32, #tpu.memory_space<vmem>>, vector<6x128xf32>
    %c6_479 = arith.constant 6 : index
    %c896_480 = arith.constant 896 : index
    %279 = vector.load %arg11[%c6_479, %c896_480] : memref<40x2048xf32, #tpu.memory_space<vmem>>, vector<6x128xf32>
    tpu.vector_store %arg11[%c6_479, %c896_480], %278 {strides = array<i32>} : memref<40x2048xf32, #tpu.memory_space<vmem>>, vector<6x128xf32>,
    %c78 = arith.constant 78 : index
    %c0_481 = arith.constant 0 : index
    %280 = tpu.strided_load %arg10[%c78, %c0_481] {strides = array<i32: 2, 1>} : memref<232x128xf32, #tpu.memory_space<vmem>>, vector<6x128xf32>
    %c12_482 = arith.constant 12 : index
    %c896_483 = arith.constant 896 : index
    %281 = vector.load %arg11[%c12_482, %c896_483] : memref<40x2048xf32, #tpu.memory_space<vmem>>, vector<6x128xf32>
    tpu.vector_store %arg11[%c12_482, %c896_483], %280 {strides = array<i32>} : memref<40x2048xf32, #tpu.memory_space<vmem>>, vector<6x128xf32>,
    %c108 = arith.constant 108 : index
    %c0_484 = arith.constant 0 : index
    %282 = tpu.strided_load %arg10[%c108, %c0_484] {strides = array<i32: 2, 1>} : memref<232x128xf32, #tpu.memory_space<vmem>>, vector<6x128xf32>
    %c18_485 = arith.constant 18 : index
    %c896_486 = arith.constant 896 : index
    %283 = vector.load %arg11[%c18_485, %c896_486] : memref<40x2048xf32, #tpu.memory_space<vmem>>, vector<6x128xf32>
    tpu.vector_store %arg11[%c18_485, %c896_486], %282 {strides = array<i32>} : memref<40x2048xf32, #tpu.memory_space<vmem>>, vector<6x128xf32>,
    %c138 = arith.constant 138 : index
    %c0_487 = arith.constant 0 : index
    %284 = tpu.strided_load %arg10[%c138, %c0_487] {strides = array<i32: 2, 1>} : memref<232x128xf32, #tpu.memory_space<vmem>>, vector<6x128xf32>
    %c24_488 = arith.constant 24 : index
    %c896_489 = arith.constant 896 : index
    %285 = vector.load %arg11[%c24_488, %c896_489] : memref<40x2048xf32, #tpu.memory_space<vmem>>, vector<6x128xf32>
    tpu.vector_store %arg11[%c24_488, %c896_489], %284 {strides = array<i32>} : memref<40x2048xf32, #tpu.memory_space<vmem>>, vector<6x128xf32>,
    %c168 = arith.constant 168 : index
    %c0_490 = arith.constant 0 : index
    %286 = tpu.strided_load %arg10[%c168, %c0_490] {strides = array<i32: 2, 1>} : memref<232x128xf32, #tpu.memory_space<vmem>>, vector<6x128xf32>
    %c30_491 = arith.constant 30 : index
    %c896_492 = arith.constant 896 : index
    %287 = vector.load %arg11[%c30_491, %c896_492] : memref<40x2048xf32, #tpu.memory_space<vmem>>, vector<6x128xf32>
    tpu.vector_store %arg11[%c30_491, %c896_492], %286 {strides = array<i32>} : memref<40x2048xf32, #tpu.memory_space<vmem>>, vector<6x128xf32>,
    %c30_493 = arith.constant 30 : index
    %c0_494 = arith.constant 0 : index
    %288 = tpu.strided_load %arg10[%c30_493, %c0_494] {strides = array<i32: 2, 1>} : memref<232x128xf32, #tpu.memory_space<vmem>>, vector<6x128xf32>
    %c0_495 = arith.constant 0 : index
    %c1024 = arith.constant 1024 : index
    %289 = vector.load %arg11[%c0_495, %c1024] : memref<40x2048xf32, #tpu.memory_space<vmem>>, vector<6x128xf32>
    tpu.vector_store %arg11[%c0_495, %c1024], %288 {strides = array<i32>} : memref<40x2048xf32, #tpu.memory_space<vmem>>, vector<6x128xf32>,
    %c60_496 = arith.constant 60 : index
    %c0_497 = arith.constant 0 : index
    %290 = tpu.strided_load %arg10[%c60_496, %c0_497] {strides = array<i32: 2, 1>} : memref<232x128xf32, #tpu.memory_space<vmem>>, vector<6x128xf32>
    %c6_498 = arith.constant 6 : index
    %c1024_499 = arith.constant 1024 : index
    %291 = vector.load %arg11[%c6_498, %c1024_499] : memref<40x2048xf32, #tpu.memory_space<vmem>>, vector<6x128xf32>
    tpu.vector_store %arg11[%c6_498, %c1024_499], %290 {strides = array<i32>} : memref<40x2048xf32, #tpu.memory_space<vmem>>, vector<6x128xf32>,
    %c90_500 = arith.constant 90 : index
    %c0_501 = arith.constant 0 : index
    %292 = tpu.strided_load %arg10[%c90_500, %c0_501] {strides = array<i32: 2, 1>} : memref<232x128xf32, #tpu.memory_space<vmem>>, vector<6x128xf32>
    %c12_502 = arith.constant 12 : index
    %c1024_503 = arith.constant 1024 : index
    %293 = vector.load %arg11[%c12_502, %c1024_503] : memref<40x2048xf32, #tpu.memory_space<vmem>>, vector<6x128xf32>
    tpu.vector_store %arg11[%c12_502, %c1024_503], %292 {strides = array<i32>} : memref<40x2048xf32, #tpu.memory_space<vmem>>, vector<6x128xf32>,
    %c120_504 = arith.constant 120 : index
    %c0_505 = arith.constant 0 : index
    %294 = tpu.strided_load %arg10[%c120_504, %c0_505] {strides = array<i32: 2, 1>} : memref<232x128xf32, #tpu.memory_space<vmem>>, vector<6x128xf32>
    %c18_506 = arith.constant 18 : index
    %c1024_507 = arith.constant 1024 : index
    %295 = vector.load %arg11[%c18_506, %c1024_507] : memref<40x2048xf32, #tpu.memory_space<vmem>>, vector<6x128xf32>
    tpu.vector_store %arg11[%c18_506, %c1024_507], %294 {strides = array<i32>} : memref<40x2048xf32, #tpu.memory_space<vmem>>, vector<6x128xf32>,
    %c150_508 = arith.constant 150 : index
    %c0_509 = arith.constant 0 : index
    %296 = tpu.strided_load %arg10[%c150_508, %c0_509] {strides = array<i32: 2, 1>} : memref<232x128xf32, #tpu.memory_space<vmem>>, vector<6x128xf32>
    %c24_510 = arith.constant 24 : index
    %c1024_511 = arith.constant 1024 : index
    %297 = vector.load %arg11[%c24_510, %c1024_511] : memref<40x2048xf32, #tpu.memory_space<vmem>>, vector<6x128xf32>
    tpu.vector_store %arg11[%c24_510, %c1024_511], %296 {strides = array<i32>} : memref<40x2048xf32, #tpu.memory_space<vmem>>, vector<6x128xf32>,
    %c180_512 = arith.constant 180 : index
    %c0_513 = arith.constant 0 : index
    %298 = tpu.strided_load %arg10[%c180_512, %c0_513] {strides = array<i32: 2, 1>} : memref<232x128xf32, #tpu.memory_space<vmem>>, vector<6x128xf32>
    %c30_514 = arith.constant 30 : index
    %c1024_515 = arith.constant 1024 : index
    %299 = vector.load %arg11[%c30_514, %c1024_515] : memref<40x2048xf32, #tpu.memory_space<vmem>>, vector<6x128xf32>
    tpu.vector_store %arg11[%c30_514, %c1024_515], %298 {strides = array<i32>} : memref<40x2048xf32, #tpu.memory_space<vmem>>, vector<6x128xf32>,
    %c31_516 = arith.constant 31 : index
    %c0_517 = arith.constant 0 : index
    %300 = tpu.strided_load %arg10[%c31_516, %c0_517] {strides = array<i32: 2, 1>} : memref<232x128xf32, #tpu.memory_space<vmem>>, vector<6x128xf32>
    %c0_518 = arith.constant 0 : index
    %c1152 = arith.constant 1152 : index
    %301 = vector.load %arg11[%c0_518, %c1152] : memref<40x2048xf32, #tpu.memory_space<vmem>>, vector<6x128xf32>
    tpu.vector_store %arg11[%c0_518, %c1152], %300 {strides = array<i32>} : memref<40x2048xf32, #tpu.memory_space<vmem>>, vector<6x128xf32>,
    %c61_519 = arith.constant 61 : index
    %c0_520 = arith.constant 0 : index
    %302 = tpu.strided_load %arg10[%c61_519, %c0_520] {strides = array<i32: 2, 1>} : memref<232x128xf32, #tpu.memory_space<vmem>>, vector<6x128xf32>
    %c6_521 = arith.constant 6 : index
    %c1152_522 = arith.constant 1152 : index
    %303 = vector.load %arg11[%c6_521, %c1152_522] : memref<40x2048xf32, #tpu.memory_space<vmem>>, vector<6x128xf32>
    tpu.vector_store %arg11[%c6_521, %c1152_522], %302 {strides = array<i32>} : memref<40x2048xf32, #tpu.memory_space<vmem>>, vector<6x128xf32>,
    %c91_523 = arith.constant 91 : index
    %c0_524 = arith.constant 0 : index
    %304 = tpu.strided_load %arg10[%c91_523, %c0_524] {strides = array<i32: 2, 1>} : memref<232x128xf32, #tpu.memory_space<vmem>>, vector<6x128xf32>
    %c12_525 = arith.constant 12 : index
    %c1152_526 = arith.constant 1152 : index
    %305 = vector.load %arg11[%c12_525, %c1152_526] : memref<40x2048xf32, #tpu.memory_space<vmem>>, vector<6x128xf32>
    tpu.vector_store %arg11[%c12_525, %c1152_526], %304 {strides = array<i32>} : memref<40x2048xf32, #tpu.memory_space<vmem>>, vector<6x128xf32>,
    %c121_527 = arith.constant 121 : index
    %c0_528 = arith.constant 0 : index
    %306 = tpu.strided_load %arg10[%c121_527, %c0_528] {strides = array<i32: 2, 1>} : memref<232x128xf32, #tpu.memory_space<vmem>>, vector<6x128xf32>
    %c18_529 = arith.constant 18 : index
    %c1152_530 = arith.constant 1152 : index
    %307 = vector.load %arg11[%c18_529, %c1152_530] : memref<40x2048xf32, #tpu.memory_space<vmem>>, vector<6x128xf32>
    tpu.vector_store %arg11[%c18_529, %c1152_530], %306 {strides = array<i32>} : memref<40x2048xf32, #tpu.memory_space<vmem>>, vector<6x128xf32>,
    %c151_531 = arith.constant 151 : index
    %c0_532 = arith.constant 0 : index
    %308 = tpu.strided_load %arg10[%c151_531, %c0_532] {strides = array<i32: 2, 1>} : memref<232x128xf32, #tpu.memory_space<vmem>>, vector<6x128xf32>
    %c24_533 = arith.constant 24 : index
    %c1152_534 = arith.constant 1152 : index
    %309 = vector.load %arg11[%c24_533, %c1152_534] : memref<40x2048xf32, #tpu.memory_space<vmem>>, vector<6x128xf32>
    tpu.vector_store %arg11[%c24_533, %c1152_534], %308 {strides = array<i32>} : memref<40x2048xf32, #tpu.memory_space<vmem>>, vector<6x128xf32>,
    %c181 = arith.constant 181 : index
    %c0_535 = arith.constant 0 : index
    %310 = tpu.strided_load %arg10[%c181, %c0_535] {strides = array<i32: 2, 1>} : memref<232x128xf32, #tpu.memory_space<vmem>>, vector<6x128xf32>
    %c30_536 = arith.constant 30 : index
    %c1152_537 = arith.constant 1152 : index
    %311 = vector.load %arg11[%c30_536, %c1152_537] : memref<40x2048xf32, #tpu.memory_space<vmem>>, vector<6x128xf32>
    tpu.vector_store %arg11[%c30_536, %c1152_537], %310 {strides = array<i32>} : memref<40x2048xf32, #tpu.memory_space<vmem>>, vector<6x128xf32>,
    %c32_538 = arith.constant 32 : index
    %c0_539 = arith.constant 0 : index
    %312 = tpu.strided_load %arg10[%c32_538, %c0_539] {strides = array<i32: 2, 1>} : memref<232x128xf32, #tpu.memory_space<vmem>>, vector<6x128xf32>
    %c0_540 = arith.constant 0 : index
    %c1280 = arith.constant 1280 : index
    %313 = vector.load %arg11[%c0_540, %c1280] : memref<40x2048xf32, #tpu.memory_space<vmem>>, vector<6x128xf32>
    tpu.vector_store %arg11[%c0_540, %c1280], %312 {strides = array<i32>} : memref<40x2048xf32, #tpu.memory_space<vmem>>, vector<6x128xf32>,
    %c62_541 = arith.constant 62 : index
    %c0_542 = arith.constant 0 : index
    %314 = tpu.strided_load %arg10[%c62_541, %c0_542] {strides = array<i32: 2, 1>} : memref<232x128xf32, #tpu.memory_space<vmem>>, vector<6x128xf32>
    %c6_543 = arith.constant 6 : index
    %c1280_544 = arith.constant 1280 : index
    %315 = vector.load %arg11[%c6_543, %c1280_544] : memref<40x2048xf32, #tpu.memory_space<vmem>>, vector<6x128xf32>
    tpu.vector_store %arg11[%c6_543, %c1280_544], %314 {strides = array<i32>} : memref<40x2048xf32, #tpu.memory_space<vmem>>, vector<6x128xf32>,
    %c92_545 = arith.constant 92 : index
    %c0_546 = arith.constant 0 : index
    %316 = tpu.strided_load %arg10[%c92_545, %c0_546] {strides = array<i32: 2, 1>} : memref<232x128xf32, #tpu.memory_space<vmem>>, vector<6x128xf32>
    %c12_547 = arith.constant 12 : index
    %c1280_548 = arith.constant 1280 : index
    %317 = vector.load %arg11[%c12_547, %c1280_548] : memref<40x2048xf32, #tpu.memory_space<vmem>>, vector<6x128xf32>
    tpu.vector_store %arg11[%c12_547, %c1280_548], %316 {strides = array<i32>} : memref<40x2048xf32, #tpu.memory_space<vmem>>, vector<6x128xf32>,
    %c122_549 = arith.constant 122 : index
    %c0_550 = arith.constant 0 : index
    %318 = tpu.strided_load %arg10[%c122_549, %c0_550] {strides = array<i32: 2, 1>} : memref<232x128xf32, #tpu.memory_space<vmem>>, vector<6x128xf32>
    %c18_551 = arith.constant 18 : index
    %c1280_552 = arith.constant 1280 : index
    %319 = vector.load %arg11[%c18_551, %c1280_552] : memref<40x2048xf32, #tpu.memory_space<vmem>>, vector<6x128xf32>
    tpu.vector_store %arg11[%c18_551, %c1280_552], %318 {strides = array<i32>} : memref<40x2048xf32, #tpu.memory_space<vmem>>, vector<6x128xf32>,
    %c152_553 = arith.constant 152 : index
    %c0_554 = arith.constant 0 : index
    %320 = tpu.strided_load %arg10[%c152_553, %c0_554] {strides = array<i32: 2, 1>} : memref<232x128xf32, #tpu.memory_space<vmem>>, vector<6x128xf32>
    %c24_555 = arith.constant 24 : index
    %c1280_556 = arith.constant 1280 : index
    %321 = vector.load %arg11[%c24_555, %c1280_556] : memref<40x2048xf32, #tpu.memory_space<vmem>>, vector<6x128xf32>
    tpu.vector_store %arg11[%c24_555, %c1280_556], %320 {strides = array<i32>} : memref<40x2048xf32, #tpu.memory_space<vmem>>, vector<6x128xf32>,
    %c182 = arith.constant 182 : index
    %c0_557 = arith.constant 0 : index
    %322 = tpu.strided_load %arg10[%c182, %c0_557] {strides = array<i32: 2, 1>} : memref<232x128xf32, #tpu.memory_space<vmem>>, vector<6x128xf32>
    %c30_558 = arith.constant 30 : index
    %c1280_559 = arith.constant 1280 : index
    %323 = vector.load %arg11[%c30_558, %c1280_559] : memref<40x2048xf32, #tpu.memory_space<vmem>>, vector<6x128xf32>
    tpu.vector_store %arg11[%c30_558, %c1280_559], %322 {strides = array<i32>} : memref<40x2048xf32, #tpu.memory_space<vmem>>, vector<6x128xf32>,
    %c33_560 = arith.constant 33 : index
    %c0_561 = arith.constant 0 : index
    %324 = tpu.strided_load %arg10[%c33_560, %c0_561] {strides = array<i32: 2, 1>} : memref<232x128xf32, #tpu.memory_space<vmem>>, vector<6x128xf32>
    %c0_562 = arith.constant 0 : index
    %c1408 = arith.constant 1408 : index
    %325 = vector.load %arg11[%c0_562, %c1408] : memref<40x2048xf32, #tpu.memory_space<vmem>>, vector<6x128xf32>
    tpu.vector_store %arg11[%c0_562, %c1408], %324 {strides = array<i32>} : memref<40x2048xf32, #tpu.memory_space<vmem>>, vector<6x128xf32>,
    %c63_563 = arith.constant 63 : index
    %c0_564 = arith.constant 0 : index
    %326 = tpu.strided_load %arg10[%c63_563, %c0_564] {strides = array<i32: 2, 1>} : memref<232x128xf32, #tpu.memory_space<vmem>>, vector<6x128xf32>
    %c6_565 = arith.constant 6 : index
    %c1408_566 = arith.constant 1408 : index
    %327 = vector.load %arg11[%c6_565, %c1408_566] : memref<40x2048xf32, #tpu.memory_space<vmem>>, vector<6x128xf32>
    tpu.vector_store %arg11[%c6_565, %c1408_566], %326 {strides = array<i32>} : memref<40x2048xf32, #tpu.memory_space<vmem>>, vector<6x128xf32>,
    %c93_567 = arith.constant 93 : index
    %c0_568 = arith.constant 0 : index
    %328 = tpu.strided_load %arg10[%c93_567, %c0_568] {strides = array<i32: 2, 1>} : memref<232x128xf32, #tpu.memory_space<vmem>>, vector<6x128xf32>
    %c12_569 = arith.constant 12 : index
    %c1408_570 = arith.constant 1408 : index
    %329 = vector.load %arg11[%c12_569, %c1408_570] : memref<40x2048xf32, #tpu.memory_space<vmem>>, vector<6x128xf32>
    tpu.vector_store %arg11[%c12_569, %c1408_570], %328 {strides = array<i32>} : memref<40x2048xf32, #tpu.memory_space<vmem>>, vector<6x128xf32>,
    %c123_571 = arith.constant 123 : index
    %c0_572 = arith.constant 0 : index
    %330 = tpu.strided_load %arg10[%c123_571, %c0_572] {strides = array<i32: 2, 1>} : memref<232x128xf32, #tpu.memory_space<vmem>>, vector<6x128xf32>
    %c18_573 = arith.constant 18 : index
    %c1408_574 = arith.constant 1408 : index
    %331 = vector.load %arg11[%c18_573, %c1408_574] : memref<40x2048xf32, #tpu.memory_space<vmem>>, vector<6x128xf32>
    tpu.vector_store %arg11[%c18_573, %c1408_574], %330 {strides = array<i32>} : memref<40x2048xf32, #tpu.memory_space<vmem>>, vector<6x128xf32>,
    %c153_575 = arith.constant 153 : index
    %c0_576 = arith.constant 0 : index
    %332 = tpu.strided_load %arg10[%c153_575, %c0_576] {strides = array<i32: 2, 1>} : memref<232x128xf32, #tpu.memory_space<vmem>>, vector<6x128xf32>
    %c24_577 = arith.constant 24 : index
    %c1408_578 = arith.constant 1408 : index
    %333 = vector.load %arg11[%c24_577, %c1408_578] : memref<40x2048xf32, #tpu.memory_space<vmem>>, vector<6x128xf32>
    tpu.vector_store %arg11[%c24_577, %c1408_578], %332 {strides = array<i32>} : memref<40x2048xf32, #tpu.memory_space<vmem>>, vector<6x128xf32>,
    %c183 = arith.constant 183 : index
    %c0_579 = arith.constant 0 : index
    %334 = tpu.strided_load %arg10[%c183, %c0_579] {strides = array<i32: 2, 1>} : memref<232x128xf32, #tpu.memory_space<vmem>>, vector<6x128xf32>
    %c30_580 = arith.constant 30 : index
    %c1408_581 = arith.constant 1408 : index
    %335 = vector.load %arg11[%c30_580, %c1408_581] : memref<40x2048xf32, #tpu.memory_space<vmem>>, vector<6x128xf32>
    tpu.vector_store %arg11[%c30_580, %c1408_581], %334 {strides = array<i32>} : memref<40x2048xf32, #tpu.memory_space<vmem>>, vector<6x128xf32>,
    %c45_582 = arith.constant 45 : index
    %c0_583 = arith.constant 0 : index
    %336 = tpu.strided_load %arg10[%c45_582, %c0_583] {strides = array<i32: 2, 1>} : memref<232x128xf32, #tpu.memory_space<vmem>>, vector<6x128xf32>
    %c0_584 = arith.constant 0 : index
    %c1536 = arith.constant 1536 : index
    %337 = vector.load %arg11[%c0_584, %c1536] : memref<40x2048xf32, #tpu.memory_space<vmem>>, vector<6x128xf32>
    tpu.vector_store %arg11[%c0_584, %c1536], %336 {strides = array<i32>} : memref<40x2048xf32, #tpu.memory_space<vmem>>, vector<6x128xf32>,
    %c75_585 = arith.constant 75 : index
    %c0_586 = arith.constant 0 : index
    %338 = tpu.strided_load %arg10[%c75_585, %c0_586] {strides = array<i32: 2, 1>} : memref<232x128xf32, #tpu.memory_space<vmem>>, vector<6x128xf32>
    %c6_587 = arith.constant 6 : index
    %c1536_588 = arith.constant 1536 : index
    %339 = vector.load %arg11[%c6_587, %c1536_588] : memref<40x2048xf32, #tpu.memory_space<vmem>>, vector<6x128xf32>
    tpu.vector_store %arg11[%c6_587, %c1536_588], %338 {strides = array<i32>} : memref<40x2048xf32, #tpu.memory_space<vmem>>, vector<6x128xf32>,
    %c105_589 = arith.constant 105 : index
    %c0_590 = arith.constant 0 : index
    %340 = tpu.strided_load %arg10[%c105_589, %c0_590] {strides = array<i32: 2, 1>} : memref<232x128xf32, #tpu.memory_space<vmem>>, vector<6x128xf32>
    %c12_591 = arith.constant 12 : index
    %c1536_592 = arith.constant 1536 : index
    %341 = vector.load %arg11[%c12_591, %c1536_592] : memref<40x2048xf32, #tpu.memory_space<vmem>>, vector<6x128xf32>
    tpu.vector_store %arg11[%c12_591, %c1536_592], %340 {strides = array<i32>} : memref<40x2048xf32, #tpu.memory_space<vmem>>, vector<6x128xf32>,
    %c135_593 = arith.constant 135 : index
    %c0_594 = arith.constant 0 : index
    %342 = tpu.strided_load %arg10[%c135_593, %c0_594] {strides = array<i32: 2, 1>} : memref<232x128xf32, #tpu.memory_space<vmem>>, vector<6x128xf32>
    %c18_595 = arith.constant 18 : index
    %c1536_596 = arith.constant 1536 : index
    %343 = vector.load %arg11[%c18_595, %c1536_596] : memref<40x2048xf32, #tpu.memory_space<vmem>>, vector<6x128xf32>
    tpu.vector_store %arg11[%c18_595, %c1536_596], %342 {strides = array<i32>} : memref<40x2048xf32, #tpu.memory_space<vmem>>, vector<6x128xf32>,
    %c165_597 = arith.constant 165 : index
    %c0_598 = arith.constant 0 : index
    %344 = tpu.strided_load %arg10[%c165_597, %c0_598] {strides = array<i32: 2, 1>} : memref<232x128xf32, #tpu.memory_space<vmem>>, vector<6x128xf32>
    %c24_599 = arith.constant 24 : index
    %c1536_600 = arith.constant 1536 : index
    %345 = vector.load %arg11[%c24_599, %c1536_600] : memref<40x2048xf32, #tpu.memory_space<vmem>>, vector<6x128xf32>
    tpu.vector_store %arg11[%c24_599, %c1536_600], %344 {strides = array<i32>} : memref<40x2048xf32, #tpu.memory_space<vmem>>, vector<6x128xf32>,
    %c195_601 = arith.constant 195 : index
    %c0_602 = arith.constant 0 : index
    %346 = tpu.strided_load %arg10[%c195_601, %c0_602] {strides = array<i32: 2, 1>} : memref<232x128xf32, #tpu.memory_space<vmem>>, vector<6x128xf32>
    %c30_603 = arith.constant 30 : index
    %c1536_604 = arith.constant 1536 : index
    %347 = vector.load %arg11[%c30_603, %c1536_604] : memref<40x2048xf32, #tpu.memory_space<vmem>>, vector<6x128xf32>
    tpu.vector_store %arg11[%c30_603, %c1536_604], %346 {strides = array<i32>} : memref<40x2048xf32, #tpu.memory_space<vmem>>, vector<6x128xf32>,
    %c46_605 = arith.constant 46 : index
    %c0_606 = arith.constant 0 : index
    %348 = tpu.strided_load %arg10[%c46_605, %c0_606] {strides = array<i32: 2, 1>} : memref<232x128xf32, #tpu.memory_space<vmem>>, vector<6x128xf32>
    %c0_607 = arith.constant 0 : index
    %c1664 = arith.constant 1664 : index
    %349 = vector.load %arg11[%c0_607, %c1664] : memref<40x2048xf32, #tpu.memory_space<vmem>>, vector<6x128xf32>
    tpu.vector_store %arg11[%c0_607, %c1664], %348 {strides = array<i32>} : memref<40x2048xf32, #tpu.memory_space<vmem>>, vector<6x128xf32>,
    %c76_608 = arith.constant 76 : index
    %c0_609 = arith.constant 0 : index
    %350 = tpu.strided_load %arg10[%c76_608, %c0_609] {strides = array<i32: 2, 1>} : memref<232x128xf32, #tpu.memory_space<vmem>>, vector<6x128xf32>
    %c6_610 = arith.constant 6 : index
    %c1664_611 = arith.constant 1664 : index
    %351 = vector.load %arg11[%c6_610, %c1664_611] : memref<40x2048xf32, #tpu.memory_space<vmem>>, vector<6x128xf32>
    tpu.vector_store %arg11[%c6_610, %c1664_611], %350 {strides = array<i32>} : memref<40x2048xf32, #tpu.memory_space<vmem>>, vector<6x128xf32>,
    %c106_612 = arith.constant 106 : index
    %c0_613 = arith.constant 0 : index
    %352 = tpu.strided_load %arg10[%c106_612, %c0_613] {strides = array<i32: 2, 1>} : memref<232x128xf32, #tpu.memory_space<vmem>>, vector<6x128xf32>
    %c12_614 = arith.constant 12 : index
    %c1664_615 = arith.constant 1664 : index
    %353 = vector.load %arg11[%c12_614, %c1664_615] : memref<40x2048xf32, #tpu.memory_space<vmem>>, vector<6x128xf32>
    tpu.vector_store %arg11[%c12_614, %c1664_615], %352 {strides = array<i32>} : memref<40x2048xf32, #tpu.memory_space<vmem>>, vector<6x128xf32>,
    %c136_616 = arith.constant 136 : index
    %c0_617 = arith.constant 0 : index
    %354 = tpu.strided_load %arg10[%c136_616, %c0_617] {strides = array<i32: 2, 1>} : memref<232x128xf32, #tpu.memory_space<vmem>>, vector<6x128xf32>
    %c18_618 = arith.constant 18 : index
    %c1664_619 = arith.constant 1664 : index
    %355 = vector.load %arg11[%c18_618, %c1664_619] : memref<40x2048xf32, #tpu.memory_space<vmem>>, vector<6x128xf32>
    tpu.vector_store %arg11[%c18_618, %c1664_619], %354 {strides = array<i32>} : memref<40x2048xf32, #tpu.memory_space<vmem>>, vector<6x128xf32>,
    %c166_620 = arith.constant 166 : index
    %c0_621 = arith.constant 0 : index
    %356 = tpu.strided_load %arg10[%c166_620, %c0_621] {strides = array<i32: 2, 1>} : memref<232x128xf32, #tpu.memory_space<vmem>>, vector<6x128xf32>
    %c24_622 = arith.constant 24 : index
    %c1664_623 = arith.constant 1664 : index
    %357 = vector.load %arg11[%c24_622, %c1664_623] : memref<40x2048xf32, #tpu.memory_space<vmem>>, vector<6x128xf32>
    tpu.vector_store %arg11[%c24_622, %c1664_623], %356 {strides = array<i32>} : memref<40x2048xf32, #tpu.memory_space<vmem>>, vector<6x128xf32>,
    %c196 = arith.constant 196 : index
    %c0_624 = arith.constant 0 : index
    %358 = tpu.strided_load %arg10[%c196, %c0_624] {strides = array<i32: 2, 1>} : memref<232x128xf32, #tpu.memory_space<vmem>>, vector<6x128xf32>
    %c30_625 = arith.constant 30 : index
    %c1664_626 = arith.constant 1664 : index
    %359 = vector.load %arg11[%c30_625, %c1664_626] : memref<40x2048xf32, #tpu.memory_space<vmem>>, vector<6x128xf32>
    tpu.vector_store %arg11[%c30_625, %c1664_626], %358 {strides = array<i32>} : memref<40x2048xf32, #tpu.memory_space<vmem>>, vector<6x128xf32>,
    %c47_627 = arith.constant 47 : index
    %c0_628 = arith.constant 0 : index
    %360 = tpu.strided_load %arg10[%c47_627, %c0_628] {strides = array<i32: 2, 1>} : memref<232x128xf32, #tpu.memory_space<vmem>>, vector<6x128xf32>
    %c0_629 = arith.constant 0 : index
    %c1792 = arith.constant 1792 : index
    %361 = vector.load %arg11[%c0_629, %c1792] : memref<40x2048xf32, #tpu.memory_space<vmem>>, vector<6x128xf32>
    tpu.vector_store %arg11[%c0_629, %c1792], %360 {strides = array<i32>} : memref<40x2048xf32, #tpu.memory_space<vmem>>, vector<6x128xf32>,
    %c77_630 = arith.constant 77 : index
    %c0_631 = arith.constant 0 : index
    %362 = tpu.strided_load %arg10[%c77_630, %c0_631] {strides = array<i32: 2, 1>} : memref<232x128xf32, #tpu.memory_space<vmem>>, vector<6x128xf32>
    %c6_632 = arith.constant 6 : index
    %c1792_633 = arith.constant 1792 : index
    %363 = vector.load %arg11[%c6_632, %c1792_633] : memref<40x2048xf32, #tpu.memory_space<vmem>>, vector<6x128xf32>
    tpu.vector_store %arg11[%c6_632, %c1792_633], %362 {strides = array<i32>} : memref<40x2048xf32, #tpu.memory_space<vmem>>, vector<6x128xf32>,
    %c107_634 = arith.constant 107 : index
    %c0_635 = arith.constant 0 : index
    %364 = tpu.strided_load %arg10[%c107_634, %c0_635] {strides = array<i32: 2, 1>} : memref<232x128xf32, #tpu.memory_space<vmem>>, vector<6x128xf32>
    %c12_636 = arith.constant 12 : index
    %c1792_637 = arith.constant 1792 : index
    %365 = vector.load %arg11[%c12_636, %c1792_637] : memref<40x2048xf32, #tpu.memory_space<vmem>>, vector<6x128xf32>
    tpu.vector_store %arg11[%c12_636, %c1792_637], %364 {strides = array<i32>} : memref<40x2048xf32, #tpu.memory_space<vmem>>, vector<6x128xf32>,
    %c137_638 = arith.constant 137 : index
    %c0_639 = arith.constant 0 : index
    %366 = tpu.strided_load %arg10[%c137_638, %c0_639] {strides = array<i32: 2, 1>} : memref<232x128xf32, #tpu.memory_space<vmem>>, vector<6x128xf32>
    %c18_640 = arith.constant 18 : index
    %c1792_641 = arith.constant 1792 : index
    %367 = vector.load %arg11[%c18_640, %c1792_641] : memref<40x2048xf32, #tpu.memory_space<vmem>>, vector<6x128xf32>
    tpu.vector_store %arg11[%c18_640, %c1792_641], %366 {strides = array<i32>} : memref<40x2048xf32, #tpu.memory_space<vmem>>, vector<6x128xf32>,
    %c167_642 = arith.constant 167 : index
    %c0_643 = arith.constant 0 : index
    %368 = tpu.strided_load %arg10[%c167_642, %c0_643] {strides = array<i32: 2, 1>} : memref<232x128xf32, #tpu.memory_space<vmem>>, vector<6x128xf32>
    %c24_644 = arith.constant 24 : index
    %c1792_645 = arith.constant 1792 : index
    %369 = vector.load %arg11[%c24_644, %c1792_645] : memref<40x2048xf32, #tpu.memory_space<vmem>>, vector<6x128xf32>
    tpu.vector_store %arg11[%c24_644, %c1792_645], %368 {strides = array<i32>} : memref<40x2048xf32, #tpu.memory_space<vmem>>, vector<6x128xf32>,
    %c197 = arith.constant 197 : index
    %c0_646 = arith.constant 0 : index
    %370 = tpu.strided_load %arg10[%c197, %c0_646] {strides = array<i32: 2, 1>} : memref<232x128xf32, #tpu.memory_space<vmem>>, vector<6x128xf32>
    %c30_647 = arith.constant 30 : index
    %c1792_648 = arith.constant 1792 : index
    %371 = vector.load %arg11[%c30_647, %c1792_648] : memref<40x2048xf32, #tpu.memory_space<vmem>>, vector<6x128xf32>
    tpu.vector_store %arg11[%c30_647, %c1792_648], %370 {strides = array<i32>} : memref<40x2048xf32, #tpu.memory_space<vmem>>, vector<6x128xf32>,
    %c48_649 = arith.constant 48 : index
    %c0_650 = arith.constant 0 : index
    %372 = tpu.strided_load %arg10[%c48_649, %c0_650] {strides = array<i32: 2, 1>} : memref<232x128xf32, #tpu.memory_space<vmem>>, vector<6x128xf32>
    %c0_651 = arith.constant 0 : index
    %c1920 = arith.constant 1920 : index
    %373 = vector.load %arg11[%c0_651, %c1920] : memref<40x2048xf32, #tpu.memory_space<vmem>>, vector<6x128xf32>
    tpu.vector_store %arg11[%c0_651, %c1920], %372 {strides = array<i32>} : memref<40x2048xf32, #tpu.memory_space<vmem>>, vector<6x128xf32>,
    %c78_652 = arith.constant 78 : index
    %c0_653 = arith.constant 0 : index
    %374 = tpu.strided_load %arg10[%c78_652, %c0_653] {strides = array<i32: 2, 1>} : memref<232x128xf32, #tpu.memory_space<vmem>>, vector<6x128xf32>
    %c6_654 = arith.constant 6 : index
    %c1920_655 = arith.constant 1920 : index
    %375 = vector.load %arg11[%c6_654, %c1920_655] : memref<40x2048xf32, #tpu.memory_space<vmem>>, vector<6x128xf32>
    tpu.vector_store %arg11[%c6_654, %c1920_655], %374 {strides = array<i32>} : memref<40x2048xf32, #tpu.memory_space<vmem>>, vector<6x128xf32>,
    %c108_656 = arith.constant 108 : index
    %c0_657 = arith.constant 0 : index
    %376 = tpu.strided_load %arg10[%c108_656, %c0_657] {strides = array<i32: 2, 1>} : memref<232x128xf32, #tpu.memory_space<vmem>>, vector<6x128xf32>
    %c12_658 = arith.constant 12 : index
    %c1920_659 = arith.constant 1920 : index
    %377 = vector.load %arg11[%c12_658, %c1920_659] : memref<40x2048xf32, #tpu.memory_space<vmem>>, vector<6x128xf32>
    tpu.vector_store %arg11[%c12_658, %c1920_659], %376 {strides = array<i32>} : memref<40x2048xf32, #tpu.memory_space<vmem>>, vector<6x128xf32>,
    %c138_660 = arith.constant 138 : index
    %c0_661 = arith.constant 0 : index
    %378 = tpu.strided_load %arg10[%c138_660, %c0_661] {strides = array<i32: 2, 1>} : memref<232x128xf32, #tpu.memory_space<vmem>>, vector<6x128xf32>
    %c18_662 = arith.constant 18 : index
    %c1920_663 = arith.constant 1920 : index
    %379 = vector.load %arg11[%c18_662, %c1920_663] : memref<40x2048xf32, #tpu.memory_space<vmem>>, vector<6x128xf32>
    tpu.vector_store %arg11[%c18_662, %c1920_663], %378 {strides = array<i32>} : memref<40x2048xf32, #tpu.memory_space<vmem>>, vector<6x128xf32>,
    %c168_664 = arith.constant 168 : index
    %c0_665 = arith.constant 0 : index
    %380 = tpu.strided_load %arg10[%c168_664, %c0_665] {strides = array<i32: 2, 1>} : memref<232x128xf32, #tpu.memory_space<vmem>>, vector<6x128xf32>
    %c24_666 = arith.constant 24 : index
    %c1920_667 = arith.constant 1920 : index
    %381 = vector.load %arg11[%c24_666, %c1920_667] : memref<40x2048xf32, #tpu.memory_space<vmem>>, vector<6x128xf32>
    tpu.vector_store %arg11[%c24_666, %c1920_667], %380 {strides = array<i32>} : memref<40x2048xf32, #tpu.memory_space<vmem>>, vector<6x128xf32>,
    %c198 = arith.constant 198 : index
    %c0_668 = arith.constant 0 : index
    %382 = tpu.strided_load %arg10[%c198, %c0_668] {strides = array<i32: 2, 1>} : memref<232x128xf32, #tpu.memory_space<vmem>>, vector<6x128xf32>
    %c30_669 = arith.constant 30 : index
    %c1920_670 = arith.constant 1920 : index
    %383 = vector.load %arg11[%c30_669, %c1920_670] : memref<40x2048xf32, #tpu.memory_space<vmem>>, vector<6x128xf32>
    tpu.vector_store %arg11[%c30_669, %c1920_670], %382 {strides = array<i32>} : memref<40x2048xf32, #tpu.memory_space<vmem>>, vector<6x128xf32>,
    %cst_671 = arith.constant 0.000000e+00 : f32
    %384 = vector.broadcast %cst_671 : f32 to vector<4x2048xf32>
    %c36 = arith.constant 36 : index
    %c0_672 = arith.constant 0 : index
    %385 = vector.load %arg11[%c36, %c0_672] : memref<40x2048xf32, #tpu.memory_space<vmem>>, vector<4x2048xf32>
    tpu.vector_store %arg11[%c36, %c0_672], %384 {strides = array<i32>} : memref<40x2048xf32, #tpu.memory_space<vmem>>, vector<4x2048xf32>,
    %c0_673 = arith.constant 0 : index
    %c0_674 = arith.constant 0 : index
    %386 = vector.load %arg11[%c0_673, %c0_674] : memref<40x2048xf32, #tpu.memory_space<vmem>>, vector<40x2048xf32>
    %387 = arith.truncf %386 : vector<40x2048xf32> to vector<40x2048xbf16>
    %c0_675 = arith.constant 0 : index
    %c0_676 = arith.constant 0 : index
    %388 = vector.load %arg3[%c0_675, %c0_676] : memref<2048x128xbf16, #tpu.memory_space<vmem>>, vector<2048x128xbf16>
    %cst_677 = arith.constant dense<0.000000e+00> : vector<40x128xf32>
    %389 = tpu.matmul %387, %388, %cst_677 {dimension_numbers = #tpu.dot_dimension_numbers<[1], [0], [0], [1], [0, 0, 1, 1], [], []>} : vector<40x2048xbf16>, vector<2048x128xbf16>, vector<40x128xf32> -> vector<40x128xf32>
    %c1_678 = arith.constant 1 : index
    %c0_679 = arith.constant 0 : index
    %390 = vector.load %arg7[%c1_678, %c0_679] : memref<8x128xf32, #tpu.memory_space<vmem>>, vector<1x128xf32>
    %391 = vector.broadcast %390 : vector<1x128xf32> to vector<40x128xf32>
    %392 = arith.addf %389, %391 : vector<40x128xf32>
    %cst_680 = arith.constant 0.000000e+00 : f32
    %393 = vector.broadcast %cst_680 : f32 to vector<40x128xf32>
    %394 = arith.maximumf %392, %393 : vector<40x128xf32>
    %c0_681 = arith.constant 0 : index
    %c0_682 = arith.constant 0 : index
    %395 = vector.load %arg12[%c0_681, %c0_682] : memref<40x128xf32, #tpu.memory_space<vmem>>, vector<40x128xf32>
    tpu.vector_store %arg12[%c0_681, %c0_682], %394 {strides = array<i32>} : memref<40x128xf32, #tpu.memory_space<vmem>>, vector<40x128xf32>,
    %c0_683 = arith.constant 0 : index
    %c0_684 = arith.constant 0 : index
    %396 = vector.load %arg12[%c0_683, %c0_684] : memref<40x128xf32, #tpu.memory_space<vmem>>, vector<4x128xf32>
    %c0_685 = arith.constant 0 : index
    %c0_686 = arith.constant 0 : index
    %397 = vector.load %arg13[%c0_685, %c0_686] : memref<16x1152xf32, #tpu.memory_space<vmem>>, vector<4x128xf32>
    tpu.vector_store %arg13[%c0_685, %c0_686], %396 {strides = array<i32>} : memref<16x1152xf32, #tpu.memory_space<vmem>>, vector<4x128xf32>,
    %c6_687 = arith.constant 6 : index
    %c0_688 = arith.constant 0 : index
    %398 = vector.load %arg12[%c6_687, %c0_688] : memref<40x128xf32, #tpu.memory_space<vmem>>, vector<4x128xf32>
    %c4_689 = arith.constant 4 : index
    %c0_690 = arith.constant 0 : index
    %399 = vector.load %arg13[%c4_689, %c0_690] : memref<16x1152xf32, #tpu.memory_space<vmem>>, vector<4x128xf32>
    tpu.vector_store %arg13[%c4_689, %c0_690], %398 {strides = array<i32>} : memref<16x1152xf32, #tpu.memory_space<vmem>>, vector<4x128xf32>,
    %c12_691 = arith.constant 12 : index
    %c0_692 = arith.constant 0 : index
    %400 = vector.load %arg12[%c12_691, %c0_692] : memref<40x128xf32, #tpu.memory_space<vmem>>, vector<4x128xf32>
    %c8_693 = arith.constant 8 : index
    %c0_694 = arith.constant 0 : index
    %401 = vector.load %arg13[%c8_693, %c0_694] : memref<16x1152xf32, #tpu.memory_space<vmem>>, vector<4x128xf32>
    tpu.vector_store %arg13[%c8_693, %c0_694], %400 {strides = array<i32>} : memref<16x1152xf32, #tpu.memory_space<vmem>>, vector<4x128xf32>,
    %c18_695 = arith.constant 18 : index
    %c0_696 = arith.constant 0 : index
    %402 = vector.load %arg12[%c18_695, %c0_696] : memref<40x128xf32, #tpu.memory_space<vmem>>, vector<4x128xf32>
    %c12_697 = arith.constant 12 : index
    %c0_698 = arith.constant 0 : index
    %403 = vector.load %arg13[%c12_697, %c0_698] : memref<16x1152xf32, #tpu.memory_space<vmem>>, vector<4x128xf32>
    tpu.vector_store %arg13[%c12_697, %c0_698], %402 {strides = array<i32>} : memref<16x1152xf32, #tpu.memory_space<vmem>>, vector<4x128xf32>,
    %c1_699 = arith.constant 1 : index
    %c0_700 = arith.constant 0 : index
    %404 = vector.load %arg12[%c1_699, %c0_700] : memref<40x128xf32, #tpu.memory_space<vmem>>, vector<4x128xf32>
    %c0_701 = arith.constant 0 : index
    %c128_702 = arith.constant 128 : index
    %405 = vector.load %arg13[%c0_701, %c128_702] : memref<16x1152xf32, #tpu.memory_space<vmem>>, vector<4x128xf32>
    tpu.vector_store %arg13[%c0_701, %c128_702], %404 {strides = array<i32>} : memref<16x1152xf32, #tpu.memory_space<vmem>>, vector<4x128xf32>,
    %c7_703 = arith.constant 7 : index
    %c0_704 = arith.constant 0 : index
    %406 = vector.load %arg12[%c7_703, %c0_704] : memref<40x128xf32, #tpu.memory_space<vmem>>, vector<4x128xf32>
    %c4_705 = arith.constant 4 : index
    %c128_706 = arith.constant 128 : index
    %407 = vector.load %arg13[%c4_705, %c128_706] : memref<16x1152xf32, #tpu.memory_space<vmem>>, vector<4x128xf32>
    tpu.vector_store %arg13[%c4_705, %c128_706], %406 {strides = array<i32>} : memref<16x1152xf32, #tpu.memory_space<vmem>>, vector<4x128xf32>,
    %c13_707 = arith.constant 13 : index
    %c0_708 = arith.constant 0 : index
    %408 = vector.load %arg12[%c13_707, %c0_708] : memref<40x128xf32, #tpu.memory_space<vmem>>, vector<4x128xf32>
    %c8_709 = arith.constant 8 : index
    %c128_710 = arith.constant 128 : index
    %409 = vector.load %arg13[%c8_709, %c128_710] : memref<16x1152xf32, #tpu.memory_space<vmem>>, vector<4x128xf32>
    tpu.vector_store %arg13[%c8_709, %c128_710], %408 {strides = array<i32>} : memref<16x1152xf32, #tpu.memory_space<vmem>>, vector<4x128xf32>,
    %c19 = arith.constant 19 : index
    %c0_711 = arith.constant 0 : index
    %410 = vector.load %arg12[%c19, %c0_711] : memref<40x128xf32, #tpu.memory_space<vmem>>, vector<4x128xf32>
    %c12_712 = arith.constant 12 : index
    %c128_713 = arith.constant 128 : index
    %411 = vector.load %arg13[%c12_712, %c128_713] : memref<16x1152xf32, #tpu.memory_space<vmem>>, vector<4x128xf32>
    tpu.vector_store %arg13[%c12_712, %c128_713], %410 {strides = array<i32>} : memref<16x1152xf32, #tpu.memory_space<vmem>>, vector<4x128xf32>,
    %c2_714 = arith.constant 2 : index
    %c0_715 = arith.constant 0 : index
    %412 = vector.load %arg12[%c2_714, %c0_715] : memref<40x128xf32, #tpu.memory_space<vmem>>, vector<4x128xf32>
    %c0_716 = arith.constant 0 : index
    %c256_717 = arith.constant 256 : index
    %413 = vector.load %arg13[%c0_716, %c256_717] : memref<16x1152xf32, #tpu.memory_space<vmem>>, vector<4x128xf32>
    tpu.vector_store %arg13[%c0_716, %c256_717], %412 {strides = array<i32>} : memref<16x1152xf32, #tpu.memory_space<vmem>>, vector<4x128xf32>,
    %c8_718 = arith.constant 8 : index
    %c0_719 = arith.constant 0 : index
    %414 = vector.load %arg12[%c8_718, %c0_719] : memref<40x128xf32, #tpu.memory_space<vmem>>, vector<4x128xf32>
    %c4_720 = arith.constant 4 : index
    %c256_721 = arith.constant 256 : index
    %415 = vector.load %arg13[%c4_720, %c256_721] : memref<16x1152xf32, #tpu.memory_space<vmem>>, vector<4x128xf32>
    tpu.vector_store %arg13[%c4_720, %c256_721], %414 {strides = array<i32>} : memref<16x1152xf32, #tpu.memory_space<vmem>>, vector<4x128xf32>,
    %c14_722 = arith.constant 14 : index
    %c0_723 = arith.constant 0 : index
    %416 = vector.load %arg12[%c14_722, %c0_723] : memref<40x128xf32, #tpu.memory_space<vmem>>, vector<4x128xf32>
    %c8_724 = arith.constant 8 : index
    %c256_725 = arith.constant 256 : index
    %417 = vector.load %arg13[%c8_724, %c256_725] : memref<16x1152xf32, #tpu.memory_space<vmem>>, vector<4x128xf32>
    tpu.vector_store %arg13[%c8_724, %c256_725], %416 {strides = array<i32>} : memref<16x1152xf32, #tpu.memory_space<vmem>>, vector<4x128xf32>,
    %c20 = arith.constant 20 : index
    %c0_726 = arith.constant 0 : index
    %418 = vector.load %arg12[%c20, %c0_726] : memref<40x128xf32, #tpu.memory_space<vmem>>, vector<4x128xf32>
    %c12_727 = arith.constant 12 : index
    %c256_728 = arith.constant 256 : index
    %419 = vector.load %arg13[%c12_727, %c256_728] : memref<16x1152xf32, #tpu.memory_space<vmem>>, vector<4x128xf32>
    tpu.vector_store %arg13[%c12_727, %c256_728], %418 {strides = array<i32>} : memref<16x1152xf32, #tpu.memory_space<vmem>>, vector<4x128xf32>,
    %c6_729 = arith.constant 6 : index
    %c0_730 = arith.constant 0 : index
    %420 = vector.load %arg12[%c6_729, %c0_730] : memref<40x128xf32, #tpu.memory_space<vmem>>, vector<4x128xf32>
    %c0_731 = arith.constant 0 : index
    %c384_732 = arith.constant 384 : index
    %421 = vector.load %arg13[%c0_731, %c384_732] : memref<16x1152xf32, #tpu.memory_space<vmem>>, vector<4x128xf32>
    tpu.vector_store %arg13[%c0_731, %c384_732], %420 {strides = array<i32>} : memref<16x1152xf32, #tpu.memory_space<vmem>>, vector<4x128xf32>,
    %c12_733 = arith.constant 12 : index
    %c0_734 = arith.constant 0 : index
    %422 = vector.load %arg12[%c12_733, %c0_734] : memref<40x128xf32, #tpu.memory_space<vmem>>, vector<4x128xf32>
    %c4_735 = arith.constant 4 : index
    %c384_736 = arith.constant 384 : index
    %423 = vector.load %arg13[%c4_735, %c384_736] : memref<16x1152xf32, #tpu.memory_space<vmem>>, vector<4x128xf32>
    tpu.vector_store %arg13[%c4_735, %c384_736], %422 {strides = array<i32>} : memref<16x1152xf32, #tpu.memory_space<vmem>>, vector<4x128xf32>,
    %c18_737 = arith.constant 18 : index
    %c0_738 = arith.constant 0 : index
    %424 = vector.load %arg12[%c18_737, %c0_738] : memref<40x128xf32, #tpu.memory_space<vmem>>, vector<4x128xf32>
    %c8_739 = arith.constant 8 : index
    %c384_740 = arith.constant 384 : index
    %425 = vector.load %arg13[%c8_739, %c384_740] : memref<16x1152xf32, #tpu.memory_space<vmem>>, vector<4x128xf32>
    tpu.vector_store %arg13[%c8_739, %c384_740], %424 {strides = array<i32>} : memref<16x1152xf32, #tpu.memory_space<vmem>>, vector<4x128xf32>,
    %c24_741 = arith.constant 24 : index
    %c0_742 = arith.constant 0 : index
    %426 = vector.load %arg12[%c24_741, %c0_742] : memref<40x128xf32, #tpu.memory_space<vmem>>, vector<4x128xf32>
    %c12_743 = arith.constant 12 : index
    %c384_744 = arith.constant 384 : index
    %427 = vector.load %arg13[%c12_743, %c384_744] : memref<16x1152xf32, #tpu.memory_space<vmem>>, vector<4x128xf32>
    tpu.vector_store %arg13[%c12_743, %c384_744], %426 {strides = array<i32>} : memref<16x1152xf32, #tpu.memory_space<vmem>>, vector<4x128xf32>,
    %c7_745 = arith.constant 7 : index
    %c0_746 = arith.constant 0 : index
    %428 = vector.load %arg12[%c7_745, %c0_746] : memref<40x128xf32, #tpu.memory_space<vmem>>, vector<4x128xf32>
    %c0_747 = arith.constant 0 : index
    %c512_748 = arith.constant 512 : index
    %429 = vector.load %arg13[%c0_747, %c512_748] : memref<16x1152xf32, #tpu.memory_space<vmem>>, vector<4x128xf32>
    tpu.vector_store %arg13[%c0_747, %c512_748], %428 {strides = array<i32>} : memref<16x1152xf32, #tpu.memory_space<vmem>>, vector<4x128xf32>,
    %c13_749 = arith.constant 13 : index
    %c0_750 = arith.constant 0 : index
    %430 = vector.load %arg12[%c13_749, %c0_750] : memref<40x128xf32, #tpu.memory_space<vmem>>, vector<4x128xf32>
    %c4_751 = arith.constant 4 : index
    %c512_752 = arith.constant 512 : index
    %431 = vector.load %arg13[%c4_751, %c512_752] : memref<16x1152xf32, #tpu.memory_space<vmem>>, vector<4x128xf32>
    tpu.vector_store %arg13[%c4_751, %c512_752], %430 {strides = array<i32>} : memref<16x1152xf32, #tpu.memory_space<vmem>>, vector<4x128xf32>,
    %c19_753 = arith.constant 19 : index
    %c0_754 = arith.constant 0 : index
    %432 = vector.load %arg12[%c19_753, %c0_754] : memref<40x128xf32, #tpu.memory_space<vmem>>, vector<4x128xf32>
    %c8_755 = arith.constant 8 : index
    %c512_756 = arith.constant 512 : index
    %433 = vector.load %arg13[%c8_755, %c512_756] : memref<16x1152xf32, #tpu.memory_space<vmem>>, vector<4x128xf32>
    tpu.vector_store %arg13[%c8_755, %c512_756], %432 {strides = array<i32>} : memref<16x1152xf32, #tpu.memory_space<vmem>>, vector<4x128xf32>,
    %c25 = arith.constant 25 : index
    %c0_757 = arith.constant 0 : index
    %434 = vector.load %arg12[%c25, %c0_757] : memref<40x128xf32, #tpu.memory_space<vmem>>, vector<4x128xf32>
    %c12_758 = arith.constant 12 : index
    %c512_759 = arith.constant 512 : index
    %435 = vector.load %arg13[%c12_758, %c512_759] : memref<16x1152xf32, #tpu.memory_space<vmem>>, vector<4x128xf32>
    tpu.vector_store %arg13[%c12_758, %c512_759], %434 {strides = array<i32>} : memref<16x1152xf32, #tpu.memory_space<vmem>>, vector<4x128xf32>,
    %c8_760 = arith.constant 8 : index
    %c0_761 = arith.constant 0 : index
    %436 = vector.load %arg12[%c8_760, %c0_761] : memref<40x128xf32, #tpu.memory_space<vmem>>, vector<4x128xf32>
    %c0_762 = arith.constant 0 : index
    %c640_763 = arith.constant 640 : index
    %437 = vector.load %arg13[%c0_762, %c640_763] : memref<16x1152xf32, #tpu.memory_space<vmem>>, vector<4x128xf32>
    tpu.vector_store %arg13[%c0_762, %c640_763], %436 {strides = array<i32>} : memref<16x1152xf32, #tpu.memory_space<vmem>>, vector<4x128xf32>,
    %c14_764 = arith.constant 14 : index
    %c0_765 = arith.constant 0 : index
    %438 = vector.load %arg12[%c14_764, %c0_765] : memref<40x128xf32, #tpu.memory_space<vmem>>, vector<4x128xf32>
    %c4_766 = arith.constant 4 : index
    %c640_767 = arith.constant 640 : index
    %439 = vector.load %arg13[%c4_766, %c640_767] : memref<16x1152xf32, #tpu.memory_space<vmem>>, vector<4x128xf32>
    tpu.vector_store %arg13[%c4_766, %c640_767], %438 {strides = array<i32>} : memref<16x1152xf32, #tpu.memory_space<vmem>>, vector<4x128xf32>,
    %c20_768 = arith.constant 20 : index
    %c0_769 = arith.constant 0 : index
    %440 = vector.load %arg12[%c20_768, %c0_769] : memref<40x128xf32, #tpu.memory_space<vmem>>, vector<4x128xf32>
    %c8_770 = arith.constant 8 : index
    %c640_771 = arith.constant 640 : index
    %441 = vector.load %arg13[%c8_770, %c640_771] : memref<16x1152xf32, #tpu.memory_space<vmem>>, vector<4x128xf32>
    tpu.vector_store %arg13[%c8_770, %c640_771], %440 {strides = array<i32>} : memref<16x1152xf32, #tpu.memory_space<vmem>>, vector<4x128xf32>,
    %c26 = arith.constant 26 : index
    %c0_772 = arith.constant 0 : index
    %442 = vector.load %arg12[%c26, %c0_772] : memref<40x128xf32, #tpu.memory_space<vmem>>, vector<4x128xf32>
    %c12_773 = arith.constant 12 : index
    %c640_774 = arith.constant 640 : index
    %443 = vector.load %arg13[%c12_773, %c640_774] : memref<16x1152xf32, #tpu.memory_space<vmem>>, vector<4x128xf32>
    tpu.vector_store %arg13[%c12_773, %c640_774], %442 {strides = array<i32>} : memref<16x1152xf32, #tpu.memory_space<vmem>>, vector<4x128xf32>,
    %c12_775 = arith.constant 12 : index
    %c0_776 = arith.constant 0 : index
    %444 = vector.load %arg12[%c12_775, %c0_776] : memref<40x128xf32, #tpu.memory_space<vmem>>, vector<4x128xf32>
    %c0_777 = arith.constant 0 : index
    %c768_778 = arith.constant 768 : index
    %445 = vector.load %arg13[%c0_777, %c768_778] : memref<16x1152xf32, #tpu.memory_space<vmem>>, vector<4x128xf32>
    tpu.vector_store %arg13[%c0_777, %c768_778], %444 {strides = array<i32>} : memref<16x1152xf32, #tpu.memory_space<vmem>>, vector<4x128xf32>,
    %c18_779 = arith.constant 18 : index
    %c0_780 = arith.constant 0 : index
    %446 = vector.load %arg12[%c18_779, %c0_780] : memref<40x128xf32, #tpu.memory_space<vmem>>, vector<4x128xf32>
    %c4_781 = arith.constant 4 : index
    %c768_782 = arith.constant 768 : index
    %447 = vector.load %arg13[%c4_781, %c768_782] : memref<16x1152xf32, #tpu.memory_space<vmem>>, vector<4x128xf32>
    tpu.vector_store %arg13[%c4_781, %c768_782], %446 {strides = array<i32>} : memref<16x1152xf32, #tpu.memory_space<vmem>>, vector<4x128xf32>,
    %c24_783 = arith.constant 24 : index
    %c0_784 = arith.constant 0 : index
    %448 = vector.load %arg12[%c24_783, %c0_784] : memref<40x128xf32, #tpu.memory_space<vmem>>, vector<4x128xf32>
    %c8_785 = arith.constant 8 : index
    %c768_786 = arith.constant 768 : index
    %449 = vector.load %arg13[%c8_785, %c768_786] : memref<16x1152xf32, #tpu.memory_space<vmem>>, vector<4x128xf32>
    tpu.vector_store %arg13[%c8_785, %c768_786], %448 {strides = array<i32>} : memref<16x1152xf32, #tpu.memory_space<vmem>>, vector<4x128xf32>,
    %c30_787 = arith.constant 30 : index
    %c0_788 = arith.constant 0 : index
    %450 = vector.load %arg12[%c30_787, %c0_788] : memref<40x128xf32, #tpu.memory_space<vmem>>, vector<4x128xf32>
    %c12_789 = arith.constant 12 : index
    %c768_790 = arith.constant 768 : index
    %451 = vector.load %arg13[%c12_789, %c768_790] : memref<16x1152xf32, #tpu.memory_space<vmem>>, vector<4x128xf32>
    tpu.vector_store %arg13[%c12_789, %c768_790], %450 {strides = array<i32>} : memref<16x1152xf32, #tpu.memory_space<vmem>>, vector<4x128xf32>,
    %c13_791 = arith.constant 13 : index
    %c0_792 = arith.constant 0 : index
    %452 = vector.load %arg12[%c13_791, %c0_792] : memref<40x128xf32, #tpu.memory_space<vmem>>, vector<4x128xf32>
    %c0_793 = arith.constant 0 : index
    %c896_794 = arith.constant 896 : index
    %453 = vector.load %arg13[%c0_793, %c896_794] : memref<16x1152xf32, #tpu.memory_space<vmem>>, vector<4x128xf32>
    tpu.vector_store %arg13[%c0_793, %c896_794], %452 {strides = array<i32>} : memref<16x1152xf32, #tpu.memory_space<vmem>>, vector<4x128xf32>,
    %c19_795 = arith.constant 19 : index
    %c0_796 = arith.constant 0 : index
    %454 = vector.load %arg12[%c19_795, %c0_796] : memref<40x128xf32, #tpu.memory_space<vmem>>, vector<4x128xf32>
    %c4_797 = arith.constant 4 : index
    %c896_798 = arith.constant 896 : index
    %455 = vector.load %arg13[%c4_797, %c896_798] : memref<16x1152xf32, #tpu.memory_space<vmem>>, vector<4x128xf32>
    tpu.vector_store %arg13[%c4_797, %c896_798], %454 {strides = array<i32>} : memref<16x1152xf32, #tpu.memory_space<vmem>>, vector<4x128xf32>,
    %c25_799 = arith.constant 25 : index
    %c0_800 = arith.constant 0 : index
    %456 = vector.load %arg12[%c25_799, %c0_800] : memref<40x128xf32, #tpu.memory_space<vmem>>, vector<4x128xf32>
    %c8_801 = arith.constant 8 : index
    %c896_802 = arith.constant 896 : index
    %457 = vector.load %arg13[%c8_801, %c896_802] : memref<16x1152xf32, #tpu.memory_space<vmem>>, vector<4x128xf32>
    tpu.vector_store %arg13[%c8_801, %c896_802], %456 {strides = array<i32>} : memref<16x1152xf32, #tpu.memory_space<vmem>>, vector<4x128xf32>,
    %c31_803 = arith.constant 31 : index
    %c0_804 = arith.constant 0 : index
    %458 = vector.load %arg12[%c31_803, %c0_804] : memref<40x128xf32, #tpu.memory_space<vmem>>, vector<4x128xf32>
    %c12_805 = arith.constant 12 : index
    %c896_806 = arith.constant 896 : index
    %459 = vector.load %arg13[%c12_805, %c896_806] : memref<16x1152xf32, #tpu.memory_space<vmem>>, vector<4x128xf32>
    tpu.vector_store %arg13[%c12_805, %c896_806], %458 {strides = array<i32>} : memref<16x1152xf32, #tpu.memory_space<vmem>>, vector<4x128xf32>,
    %c14_807 = arith.constant 14 : index
    %c0_808 = arith.constant 0 : index
    %460 = vector.load %arg12[%c14_807, %c0_808] : memref<40x128xf32, #tpu.memory_space<vmem>>, vector<4x128xf32>
    %c0_809 = arith.constant 0 : index
    %c1024_810 = arith.constant 1024 : index
    %461 = vector.load %arg13[%c0_809, %c1024_810] : memref<16x1152xf32, #tpu.memory_space<vmem>>, vector<4x128xf32>
    tpu.vector_store %arg13[%c0_809, %c1024_810], %460 {strides = array<i32>} : memref<16x1152xf32, #tpu.memory_space<vmem>>, vector<4x128xf32>,
    %c20_811 = arith.constant 20 : index
    %c0_812 = arith.constant 0 : index
    %462 = vector.load %arg12[%c20_811, %c0_812] : memref<40x128xf32, #tpu.memory_space<vmem>>, vector<4x128xf32>
    %c4_813 = arith.constant 4 : index
    %c1024_814 = arith.constant 1024 : index
    %463 = vector.load %arg13[%c4_813, %c1024_814] : memref<16x1152xf32, #tpu.memory_space<vmem>>, vector<4x128xf32>
    tpu.vector_store %arg13[%c4_813, %c1024_814], %462 {strides = array<i32>} : memref<16x1152xf32, #tpu.memory_space<vmem>>, vector<4x128xf32>,
    %c26_815 = arith.constant 26 : index
    %c0_816 = arith.constant 0 : index
    %464 = vector.load %arg12[%c26_815, %c0_816] : memref<40x128xf32, #tpu.memory_space<vmem>>, vector<4x128xf32>
    %c8_817 = arith.constant 8 : index
    %c1024_818 = arith.constant 1024 : index
    %465 = vector.load %arg13[%c8_817, %c1024_818] : memref<16x1152xf32, #tpu.memory_space<vmem>>, vector<4x128xf32>
    tpu.vector_store %arg13[%c8_817, %c1024_818], %464 {strides = array<i32>} : memref<16x1152xf32, #tpu.memory_space<vmem>>, vector<4x128xf32>,
    %c32_819 = arith.constant 32 : index
    %c0_820 = arith.constant 0 : index
    %466 = vector.load %arg12[%c32_819, %c0_820] : memref<40x128xf32, #tpu.memory_space<vmem>>, vector<4x128xf32>
    %c12_821 = arith.constant 12 : index
    %c1024_822 = arith.constant 1024 : index
    %467 = vector.load %arg13[%c12_821, %c1024_822] : memref<16x1152xf32, #tpu.memory_space<vmem>>, vector<4x128xf32>
    tpu.vector_store %arg13[%c12_821, %c1024_822], %466 {strides = array<i32>} : memref<16x1152xf32, #tpu.memory_space<vmem>>, vector<4x128xf32>,
    %c0_823 = arith.constant 0 : index
    %c0_824 = arith.constant 0 : index
    %468 = vector.load %arg13[%c0_823, %c0_824] : memref<16x1152xf32, #tpu.memory_space<vmem>>, vector<16x1152xf32>
    %469 = arith.truncf %468 : vector<16x1152xf32> to vector<16x1152xbf16>
    %c0_825 = arith.constant 0 : index
    %c0_826 = arith.constant 0 : index
    %470 = vector.load %arg4[%c0_825, %c0_826] : memref<1152x128xbf16, #tpu.memory_space<vmem>>, vector<1152x128xbf16>
    %cst_827 = arith.constant dense<0.000000e+00> : vector<16x128xf32>
    %471 = tpu.matmul %469, %470, %cst_827 {dimension_numbers = #tpu.dot_dimension_numbers<[1], [0], [0], [1], [0, 0, 1, 1], [], []>} : vector<16x1152xbf16>, vector<1152x128xbf16>, vector<16x128xf32> -> vector<16x128xf32>
    %c2_828 = arith.constant 2 : index
    %c0_829 = arith.constant 0 : index
    %472 = vector.load %arg7[%c2_828, %c0_829] : memref<8x128xf32, #tpu.memory_space<vmem>>, vector<1x128xf32>
    %473 = vector.broadcast %472 : vector<1x128xf32> to vector<16x128xf32>
    %474 = arith.addf %471, %473 : vector<16x128xf32>
    %cst_830 = arith.constant 0.000000e+00 : f32
    %475 = vector.broadcast %cst_830 : f32 to vector<16x128xf32>
    %476 = arith.maximumf %474, %475 : vector<16x128xf32>
    %477 = vector.extract_strided_slice %476 {offsets = [0, 0], sizes = [1, 128], strides = [1, 1]} : vector<16x128xf32> to vector<1x128xf32>
    %478 = vector.extract_strided_slice %476 {offsets = [1, 0], sizes = [1, 128], strides = [1, 1]} : vector<16x128xf32> to vector<1x128xf32>
    %479 = arith.addf %477, %478 : vector<1x128xf32>
    %480 = vector.extract_strided_slice %476 {offsets = [4, 0], sizes = [1, 128], strides = [1, 1]} : vector<16x128xf32> to vector<1x128xf32>
    %481 = arith.addf %479, %480 : vector<1x128xf32>
    %482 = vector.extract_strided_slice %476 {offsets = [5, 0], sizes = [1, 128], strides = [1, 1]} : vector<16x128xf32> to vector<1x128xf32>
    %483 = arith.addf %481, %482 : vector<1x128xf32>
    %cst_831 = arith.constant 2.500000e-01 : f32
    %484 = vector.broadcast %cst_831 : f32 to vector<1x128xf32>
    %485 = arith.mulf %484, %483 : vector<1x128xf32>
    %486 = vector.extract_strided_slice %476 {offsets = [2, 0], sizes = [1, 128], strides = [1, 1]} : vector<16x128xf32> to vector<1x128xf32>
    %487 = vector.extract_strided_slice %476 {offsets = [3, 0], sizes = [1, 128], strides = [1, 1]} : vector<16x128xf32> to vector<1x128xf32>
    %488 = arith.addf %486, %487 : vector<1x128xf32>
    %489 = vector.extract_strided_slice %476 {offsets = [6, 0], sizes = [1, 128], strides = [1, 1]} : vector<16x128xf32> to vector<1x128xf32>
    %490 = arith.addf %488, %489 : vector<1x128xf32>
    %491 = vector.extract_strided_slice %476 {offsets = [7, 0], sizes = [1, 128], strides = [1, 1]} : vector<16x128xf32> to vector<1x128xf32>
    %492 = arith.addf %490, %491 : vector<1x128xf32>
    %cst_832 = arith.constant 2.500000e-01 : f32
    %493 = vector.broadcast %cst_832 : f32 to vector<1x128xf32>
    %494 = arith.mulf %493, %492 : vector<1x128xf32>
    %495 = vector.extract_strided_slice %476 {offsets = [8, 0], sizes = [1, 128], strides = [1, 1]} : vector<16x128xf32> to vector<1x128xf32>
    %496 = vector.extract_strided_slice %476 {offsets = [9, 0], sizes = [1, 128], strides = [1, 1]} : vector<16x128xf32> to vector<1x128xf32>
    %497 = arith.addf %495, %496 : vector<1x128xf32>
    %498 = vector.extract_strided_slice %476 {offsets = [12, 0], sizes = [1, 128], strides = [1, 1]} : vector<16x128xf32> to vector<1x128xf32>
    %499 = arith.addf %497, %498 : vector<1x128xf32>
    %500 = vector.extract_strided_slice %476 {offsets = [13, 0], sizes = [1, 128], strides = [1, 1]} : vector<16x128xf32> to vector<1x128xf32>
    %501 = arith.addf %499, %500 : vector<1x128xf32>
    %cst_833 = arith.constant 2.500000e-01 : f32
    %502 = vector.broadcast %cst_833 : f32 to vector<1x128xf32>
    %503 = arith.mulf %502, %501 : vector<1x128xf32>
    %504 = vector.extract_strided_slice %476 {offsets = [10, 0], sizes = [1, 128], strides = [1, 1]} : vector<16x128xf32> to vector<1x128xf32>
    %505 = vector.extract_strided_slice %476 {offsets = [11, 0], sizes = [1, 128], strides = [1, 1]} : vector<16x128xf32> to vector<1x128xf32>
    %506 = arith.addf %504, %505 : vector<1x128xf32>
    %507 = vector.extract_strided_slice %476 {offsets = [14, 0], sizes = [1, 128], strides = [1, 1]} : vector<16x128xf32> to vector<1x128xf32>
    %508 = arith.addf %506, %507 : vector<1x128xf32>
    %509 = vector.extract_strided_slice %476 {offsets = [15, 0], sizes = [1, 128], strides = [1, 1]} : vector<16x128xf32> to vector<1x128xf32>
    %510 = arith.addf %508, %509 : vector<1x128xf32>
    %cst_834 = arith.constant 2.500000e-01 : f32
    %511 = vector.broadcast %cst_834 : f32 to vector<1x128xf32>
    %512 = arith.mulf %511, %510 : vector<1x128xf32>
    %513 = tpu.concatenate %485, %494, %503, %512 in 1 : vector<1x128xf32>, vector<1x128xf32>, vector<1x128xf32>, vector<1x128xf32> -> vector<1x512xf32>
    %514 = vector.shape_cast %513 : vector<1x512xf32> to vector<1x512xf32>
    %515 = vector.broadcast %514 : vector<1x512xf32> to vector<8x512xf32>
    %516 = arith.truncf %515 : vector<8x512xf32> to vector<8x512xbf16>
    %c0_835 = arith.constant 0 : index
    %c0_836 = arith.constant 0 : index
    %517 = vector.load %arg5[%c0_835, %c0_836] : memref<512x128xbf16, #tpu.memory_space<vmem>>, vector<512x128xbf16>
    %cst_837 = arith.constant dense<0.000000e+00> : vector<8x128xf32>
    %518 = tpu.matmul %516, %517, %cst_837 {dimension_numbers = #tpu.dot_dimension_numbers<[1], [0], [0], [1], [0, 0, 1, 1], [], []>} : vector<8x512xbf16>, vector<512x128xbf16>, vector<8x128xf32> -> vector<8x128xf32>
    %c3_838 = arith.constant 3 : index
    %c0_839 = arith.constant 0 : index
    %519 = vector.load %arg7[%c3_838, %c0_839] : memref<8x128xf32, #tpu.memory_space<vmem>>, vector<1x128xf32>
    %520 = vector.broadcast %519 : vector<1x128xf32> to vector<8x128xf32>
    %521 = arith.addf %518, %520 : vector<8x128xf32>
    %cst_840 = arith.constant 0.000000e+00 : f32
    %522 = vector.broadcast %cst_840 : f32 to vector<8x128xf32>
    %523 = arith.maximumf %521, %522 : vector<8x128xf32>
    %524 = arith.truncf %523 : vector<8x128xf32> to vector<8x128xbf16>
    %c0_841 = arith.constant 0 : index
    %c0_842 = arith.constant 0 : index
    %525 = vector.load %arg6[%c0_841, %c0_842] : memref<128x128xbf16, #tpu.memory_space<vmem>>, vector<128x128xbf16>
    %cst_843 = arith.constant dense<0.000000e+00> : vector<8x128xf32>
    %526 = tpu.matmul %524, %525, %cst_843 {dimension_numbers = #tpu.dot_dimension_numbers<[1], [0], [0], [1], [0, 0, 1, 1], [], []>} : vector<8x128xbf16>, vector<128x128xbf16>, vector<8x128xf32> -> vector<8x128xf32>
    %c4_844 = arith.constant 4 : index
    %c0_845 = arith.constant 0 : index
    %527 = vector.load %arg7[%c4_844, %c0_845] : memref<8x128xf32, #tpu.memory_space<vmem>>, vector<1x128xf32>
    %528 = vector.broadcast %527 : vector<1x128xf32> to vector<8x128xf32>
    %529 = arith.addf %526, %528 : vector<8x128xf32>
    %c0_846 = arith.constant 0 : index
    %c0_847 = arith.constant 0 : index
    %c0_848 = arith.constant 0 : index
    %530 = vector.load %arg8[%c0_846, %c0_847, %c0_848] : memref<1x8x128xf32, #tpu.memory_space<vmem>>, vector<1x8x128xf32>
    %531 = vector.shape_cast %530 : vector<1x8x128xf32> to vector<8x128xf32>
    %532 = vector.shape_cast %529 : vector<8x128xf32> to vector<1x8x128xf32>
    tpu.vector_store %arg8[%c0_846, %c0_847, %c0_848], %532 {strides = array<i32>} : memref<1x8x128xf32, #tpu.memory_space<vmem>>, vector<1x8x128xf32>,
    return
  }
  func.func @transform_0(%arg0: i32) -> (i32, i32, i32, i32) {
    %c0_i32 = arith.constant 0 : i32
    %c0_i32_0 = arith.constant 0 : i32
    %c0_i32_1 = arith.constant 0 : i32
    %c0_i32_2 = arith.constant 0 : i32
    return %arg0, %c0_i32, %c0_i32_0, %c0_i32_1 : i32, i32, i32, i32
  }
  func.func @transform_1(%arg0: i32) -> (i32, i32) {
    %c0_i32 = arith.constant 0 : i32
    %c0_i32_0 = arith.constant 0 : i32
    %c0_i32_1 = arith.constant 0 : i32
    return %c0_i32, %c0_i32_0 : i32, i32
  }
  func.func @transform_2(%arg0: i32) -> (i32, i32) {
    %c0_i32 = arith.constant 0 : i32
    %c0_i32_0 = arith.constant 0 : i32
    %c0_i32_1 = arith.constant 0 : i32
    return %c0_i32, %c0_i32_0 : i32, i32
  }
  func.func @transform_3(%arg0: i32) -> (i32, i32) {
    %c0_i32 = arith.constant 0 : i32
    %c0_i32_0 = arith.constant 0 : i32
    %c0_i32_1 = arith.constant 0 : i32
    return %c0_i32, %c0_i32_0 : i32, i32
  }
  func.func @transform_4(%arg0: i32) -> (i32, i32) {
    %c0_i32 = arith.constant 0 : i32
    %c0_i32_0 = arith.constant 0 : i32
    %c0_i32_1 = arith.constant 0 : i32
    return %c0_i32, %c0_i32_0 : i32, i32
  }
  func.func @transform_5(%arg0: i32) -> (i32, i32) {
    %c0_i32 = arith.constant 0 : i32
    %c0_i32_0 = arith.constant 0 : i32
    %c0_i32_1 = arith.constant 0 : i32
    return %c0_i32, %c0_i32_0 : i32, i32
  }
  func.func @transform_6(%arg0: i32) -> (i32, i32) {
    %c0_i32 = arith.constant 0 : i32
    %c0_i32_0 = arith.constant 0 : i32
    %c0_i32_1 = arith.constant 0 : i32
    return %c0_i32, %c0_i32_0 : i32, i32
  }
  func.func @transform_7(%arg0: i32) -> (i32, i32, i32) {
    %c0_i32 = arith.constant 0 : i32
    %c0_i32_0 = arith.constant 0 : i32
    %c0_i32_1 = arith.constant 0 : i32
    return %arg0, %c0_i32, %c0_i32_0 : i32, i32, i32
  }
}

</mosaic_0001>

<bundles_post_ra>
// kernel: image_only_extractor.1
= control target key start
LH: loop header
LB: loop body
LE: loop exit
PB: predicated region body
PF: predicated region fallthrough
CT: control target
= control target key end

     0   :  { %s6827_s24 = smov 0   ;;  %s8204_s0 = inlined_call_operand.vmem [shape: f32[2,16,16,128], index: 0, kind: input, shape index: {}]   ;;  %s8205_s1 = inlined_call_operand.vmem [shape: bf16[512,128], index: 1, kind: input, shape index: {}]   ;;  %s8206_s2 = inlined_call_operand.vmem [shape: bf16[2048,128], index: 2, kind: input, shape index: {}]   ;;  %s8207_s3 = inlined_call_operand.vmem [shape: bf16[1152,128], index: 3, kind: input, shape index: {}]   ;;  %s8208_s4 = inlined_call_operand.vmem [shape: bf16[512,128], index: 4, kind: input, shape index: {}]   ;;  %s8209_s5 = inlined_call_operand.vmem [shape: bf16[128,128], index: 5, kind: input, shape index: {}]   ;;  %s8210_s6 = inlined_call_operand.vmem [shape: f32[8,128], index: 6, kind: input, shape index: {}]   ;;  %s8211_s7 = inlined_call_operand.vmem [shape: f32[2,8,128], index: 7, kind: output, shape index: {}]  }
   0x1 LB: > { %s5416_s25 = sadd.s32 4294967295, %s6783_s24   ;;  %p5420_p0 = scmp.ge.s32.totalorder %s6783_s24, 1  ;;  %s6783_s24 = sphi %s6827_s24, %s17_s24  }
   0x2   : > { %p237_p1 = scmp.lt.s32.totalorder %s6783_s24, 3 }
   0x4   : > { %p238_p2 = pnand %p5420_p0, %p237_p1 }
   0x5   : > { %v6504_v0 = vld [vmem:[%s8205_s1 + $0x40] sm:$0xff] (!%p238_p2)   ;;  %v6508_v4 = vld [vmem:[%s8205_s1 + $0x48] sm:$0xff] (!%p238_p2)   ;;  %v6512_v8 = vld [vmem:[%s8205_s1 + $0x50] sm:$0xff] (!%p238_p2)   ;;  %p268_p3 = scmp.lt.s32.totalorder (!%p238_p2), %s5416_s25, 1  ;;  %vm287_vm0 = vcmask (!%p238_p2), 1046528   ;;  %vm302_vm1 = vcmask (!%p238_p2), 1045504  }
   0x6   : > { %241 = sbr.rel (%p238_p2) target bundleno = 1482 (0x5ca), region = 48  ;;  %v6505_v1 = vld [vmem:[%s8205_s1 + $0xc0] sm:$0xff] (!%p238_p2)   ;;  %5820 = vmatprep.subr.bf16.mxu0 (!%p238_p2), %v6504_v0  ;;  %v6509_v5 = vld [vmem:[%s8205_s1 + $0xc8] sm:$0xff] (!%p238_p2)   ;;  %v6513_v9 = vld [vmem:[%s8205_s1 + $0xd0] sm:$0xff] (!%p238_p2)   ;;  %vm317_vm2 = vcmask (!%p238_p2), 1044480   ;;  %vm332_vm3 = vcmask (!%p238_p2), 1043456  }
   0x7   : > { %v6506_v2 = vld [vmem:[%s8205_s1] sm:$0xff] (!%p238_p2)   ;;  %5926 = vmatprep.subr.bf16.mxu1 (!%p238_p2), %v6505_v1  ;;  %v6510_v6 = vld [vmem:[%s8205_s1 + $0x8] sm:$0xff] (!%p238_p2)   ;;  %v6514_v10 = vld [vmem:[%s8205_s1 + $0x10] sm:$0xff] (!%p238_p2)   ;;  %vm347_vm4 = vcmask (!%p238_p2), 1042432   ;;  %vm362_vm5 = vcmask (!%p238_p2), 1041408   ;;  %vm377_vm6 = vcmask (!%p238_p2), 1040384  }
   0x8   : > { %v6507_v3 = vld [vmem:[%s8205_s1 + $0x80] sm:$0xff] (!%p238_p2)   ;;  %5821 = vmatpush3.bf16.msra.mxu0 (!%p238_p2), %v6506_v2  ;;  %v6511_v7 = vld [vmem:[%s8205_s1 + $0x88] sm:$0xff] (!%p238_p2)   ;;  %v6515_v11 = vld [vmem:[%s8205_s1 + $0x90] sm:$0xff] (!%p238_p2)   ;;  %vm6786_vm7 = vmmov (!%p238_p2), 0  }
   0x9   : > { %5927 = vmatpush3.bf16.msra.mxu1 (!%p238_p2), %v6507_v3  ;;  %5822 = vmatprep.subr.bf16.mxu0 (!%p238_p2), %v6508_v4  ;;  %v6516_v12 = vld [vmem:[%s8205_s1 + $0x58] sm:$0xff] (!%p238_p2)   ;;  %v6520_v16 = vld [vmem:[%s8205_s1 + $0x60] sm:$0xff] (!%p238_p2)   ;;  %v6524_v20 = vld [vmem:[%s8205_s1 + $0x68] sm:$0xff] (!%p238_p2)  }
   0xa   : > { %5928 = vmatprep.subr.bf16.mxu1 (!%p238_p2), %v6509_v5  ;;  %v6517_v13 = vld [vmem:[%s8205_s1 + $0xd8] sm:$0xff] (!%p238_p2)   ;;  %v6521_v17 = vld [vmem:[%s8205_s1 + $0xe0] sm:$0xff] (!%p238_p2)   ;;  %v6525_v21 = vld [vmem:[%s8205_s1 + $0xe8] sm:$0xff] (!%p238_p2)  }
   0xb   : > { %v6518_v14 = vld [vmem:[%s8205_s1 + $0x18] sm:$0xff] (!%p238_p2)   ;;  %v6522_v18 = vld [vmem:[%s8205_s1 + $0x20] sm:$0xff] (!%p238_p2)   ;;  %v6526_v22 = vld [vmem:[%s8205_s1 + $0x28] sm:$0xff] (!%p238_p2)  }
   0xc   : > { %5823 = vmatpush3.bf16.msra.mxu0 (!%p238_p2), %v6510_v6  ;;  %v6519_v15 = vld [vmem:[%s8205_s1 + $0x98] sm:$0xff] (!%p238_p2)   ;;  %v6523_v19 = vld [vmem:[%s8205_s1 + $0xa0] sm:$0xff] (!%p238_p2)   ;;  %v6527_v23 = vld [vmem:[%s8205_s1 + $0xa8] sm:$0xff] (!%p238_p2)  }
   0xd   : > { %5929 = vmatpush3.bf16.msra.mxu1 %v6511_v7  ;;  %5824 = vmatprep.subr.bf16.mxu0 %v6512_v8  ;;  %s8213_s25 = smov (!%p268_p3, %s5416_s25), 1  ;;  %v6528_v24 = vld [vmem:[%s8205_s1 + $0x70] sm:$0xff]   ;;  %v6532_v28 = vld [vmem:[%s8205_s1 + $0x78] sm:$0xff]  }
   0xe   : > { %5930 = vmatprep.subr.bf16.mxu1 %v6513_v9  ;;  %v6529_v25 = vld [vmem:[%s8205_s1 + $0xf0] sm:$0xff]   ;;  %s5819_s15 = sshll.u32 %s8213_s25, 8  ;;  %v6533_v29 = vld [vmem:[%s8205_s1 + $0xf8] sm:$0xff]  }
   0xf   : > { %v6530_v26 = vld [vmem:[%s8205_s1 + $0x30] sm:$0xff]   ;;  %s6935_s26 = scalar_lea.vmem %s8204_s0, %s5819_s15  ;;  %v6534_v30 = vld [vmem:[%s8205_s1 + $0x38] sm:$0xff]   ;;  %s5423_s15 = sshll.u32 %s8213_s25, 3 }
  0x10   : > { %5825 = vmatpush3.bf16.msra.mxu0 %v6514_v10  ;;  %v6531_v27 = vld [vmem:[%s8205_s1 + $0xb0] sm:$0xff]   ;;  %v6535_v31 = vld [vmem:[%s8205_s1 + $0xb8] sm:$0xff]   ;;  %v6944_v32 = vld [vmem:[%s6935_s26 + $0x1] sm:$0xff]  ;;  %s276_s20 = scalar_lea.vmem %s8211_s7, %s5423_s15 }
  0x11   : > { %5931 = vmatpush3.bf16.msra.mxu1 %v6515_v11  ;;  %5826 = vmatprep.subr.bf16.mxu0 %v6516_v12  ;;  %v475_v33 = vld [vmem:[%s6935_s26 + $0x9] sm:$0x7f]  ;;  %v6948_v34 = vld [vmem:[%s6935_s26 + $0x11] sm:$0xff]  ;;  %v5511_v36 = vld [vmem:[%s6935_s26 + $0x19] sm:$0x7f] }
  0x12   : > { %5932 = vmatprep.subr.bf16.mxu1 %v6517_v13  ;;  %477 = vst [vmem:[#allocation2 + $0x28] sm:$0x7f] %v475_v33  ;;  %v482_v35 = vrot.slane %v6948_v34, 1  ;;  %v5512_v37 = vld [vmem:[%s6935_s26 + $0x21] sm:$0xff]  ;;  %828 = vst [vmem:[#allocation2 + $0x38] sm:$0x7f] %v5511_v36 }
  0x13   : > { %v6954_v38 = vld [vmem:[%s6935_s26] sm:$0xff]  ;;  %v833_v39 = vrot.slane %v5512_v37, 1  ;;  %v279_v40 = vld [vmem:[%s6935_s26 + $0x8] sm:$0x7f]  ;;  %v6958_v41 = vld [vmem:[%s6935_s26 + $0x10] sm:$0xff]  ;;  %v495_v46 = vrot.slane %v5512_v37, 2 }
  0x14   : > { %5827 = vmatpush3.bf16.msra.mxu0 %v6518_v14  ;;  %v5481_v42 = vld [vmem:[%s6935_s26 + $0x18] sm:$0x7f]  ;;  %488 = vst [vmem:[#allocation2 + $0x28] sm:$0x80] %v482_v35  ;;  %281 = vst [vmem:[#allocation2 + $0x20] sm:$0x7f] %v279_v40 }
  0x15   : > { %5933 = vmatpush3.bf16.msra.mxu1 %v6519_v15  ;;  %5828 = vmatprep.subr.bf16.mxu0 %v6520_v16  ;;  %v288_v43 = vrot.slane %v6958_v41, 1  ;;  %652 = vst [vmem:[#allocation2 + $0x30] sm:$0x7f] %v5481_v42  ;;  %v6963_v44 = vld [vmem:[%s6935_s26 + $0x20] sm:$0xff]  ;;  %v5453_v45 = vld [vmem:[%s6935_s26 + $0x19] sm:$0x7f] }
  0x16   : > { %5934 = vmatprep.subr.bf16.mxu1 %v6521_v17  ;;  %v6967_v47 = vld [vmem:[%s6935_s26 + $0x31] sm:$0xff]  ;;  %839 = vst [vmem:[#allocation2 + $0x38] sm:$0x80] %v833_v39  ;;  %v657_v48 = vrot.slane %v6963_v44, 1  ;;  %v483_v49 = vrot.slane %v5453_v45, 1  ;;  %v303_v52 = vrot.slane %v6963_v44, 2 }
  0x17   : > { %v5513_v50 = vld [vmem:[%s6935_s26 + $0x29] sm:$0x7f]  ;;  %v846_v51 = vrot.slane %v6967_v47, 2  ;;  %294 = vst [vmem:[#allocation2 + $0x20] sm:$0x80] %v288_v43  ;;  %v6976_v56 = vld [vmem:[%s6935_s26 + $0x30] sm:$0xff] }
  0x18   : > { %5829 = vmatpush3.bf16.msra.mxu0 %v6522_v18  ;;  %501 = vst [vmem:[#allocation2 + $0x68] sm:$0xc0] %v495_v46  ;;  %v834_v53 = vrot.slane %v5513_v50, 1  ;;  %v5425_v54 = vld [vmem:[%s6935_s26 + $0x18] sm:$0x7f]  ;;  %v6979_v57 = vsel %vm287_vm0, %v482_v35, %v483_v49  ;;  %v670_v60 = vrot.slane %v6976_v56, 2 }
  0x19   : > { %5935 = vmatpush3.bf16.msra.mxu1 %v6523_v19  ;;  %5830 = vmatprep.subr.bf16.mxu0 %v6524_v20  ;;  %v5483_v55 = vld [vmem:[%s6935_s26 + $0x28] sm:$0x7f]  ;;  %663 = vst [vmem:[#allocation2 + $0x30] sm:$0x80] %v657_v48  ;;  %490 = vst [vmem:[#allocation2 + $0x68] sm:$0x3f] %v483_v49 }
  0x1a   : > { %5936 = vmatprep.subr.bf16.mxu1 %v6525_v21  ;;  %852 = vst [vmem:[#allocation2 + $0x78] sm:$0xc0] %v846_v51  ;;  %v289_v58 = vrot.slane %v5425_v54, 1  ;;  %309 = vst [vmem:[#allocation2 + $0x60] sm:$0xc0] %v303_v52  ;;  %v658_v59 = vrot.slane %v5483_v55, 1  ;;  %v6987_v63 = vsel %vm287_vm0, %v833_v39, %v834_v53 }
  0x1b   : > { %v5455_v61 = vld [vmem:[%s6935_s26 + $0x29] sm:$0x7f]  ;;  %v6984_v62 = vld [vmem:[%s6935_s26 + $0x41] sm:$0xff]  ;;  %841 = vst [vmem:[#allocation2 + $0x78] sm:$0x3f] %v834_v53  ;;  %v508_v1 = vrot.slane %v6967_v47, 3 }
  0x1c   : > { %5831 = vmatpush3.bf16.msra.mxu0 %v6526_v22  ;;  %v496_v0 = vrot.slane %v5455_v61, 2  ;;  %v5515_v2 = vld [vmem:[%s6935_s26 + $0x39] sm:$0x7f]  ;;  %v859_v3 = vrot.slane %v6984_v62, 3  ;;  %v6993_v4 = vld [vmem:[%s6935_s26 + $0x40] sm:$0xff]  ;;  %v6996_v5 = vsel %vm287_vm0, %v288_v43, %v289_v58  ;;  %v6999_v6 = vsel %vm287_vm0, %v657_v48, %v658_v59  ;;  %v7010_v16 = vld [vmem:[%s6935_s26 + $0x51] sm:$0xff] }
  0x1d   : > { %5937 = vmatpush3.bf16.msra.mxu1 %v6527_v23  ;;  %5832 = vmatprep.subr.bf16.mxu0 %v6528_v24  ;;  %296 = vst [vmem:[#allocation2 + $0x60] sm:$0x3f] %v289_v58  ;;  %665 = vst [vmem:[#allocation2 + $0x70] sm:$0x3f] %v658_v59  ;;  %v847_v7 = vrot.slane %v5515_v2, 2  ;;  %v318_v9 = vrot.slane %v6976_v56, 3 }
  0x1e   : > { %5938 = vmatprep.subr.bf16.mxu1 %v6529_v25  ;;  %676 = vst [vmem:[#allocation2 + $0x70] sm:$0xc0] %v670_v60  ;;  %v5427_v8 = vld [vmem:[%s6935_s26 + $0x28] sm:$0x7f]  ;;  %v5485_v10 = vld [vmem:[%s6935_s26 + $0x38] sm:$0x7f]  ;;  %v7005_v11 = vsel %vm302_vm1, %v495_v46, %v496_v0 }
  0x1f   : > { %503 = vst [vmem:[#allocation2 + $0xa8] sm:$0x1f] %v496_v0  ;;  %514 = vst [vmem:[#allocation2 + $0xa8] sm:$0xe0] %v508_v1  ;;  %v304_v12 = vrot.slane %v5427_v8, 2  ;;  %v671_v13 = vrot.slane %v5485_v10, 2  ;;  %v7013_v18 = vsel %vm302_vm1, %v846_v51, %v847_v7 }
  0x20   : > { %5833 = vmatpush3.bf16.msra.mxu0 %v6530_v26  ;;  %865 = vst [vmem:[#allocation2 + $0xb8] sm:$0xe0] %v859_v3  ;;  %v683_v14 = vrot.slane %v6993_v4, 3  ;;  %v5457_v15 = vld [vmem:[%s6935_s26 + $0x39] sm:$0x7f]  ;;  %v1009_v17 = vld [vmem:[#allocation2 + $0x28] sm:$0xff] }
  0x21   : > { %5939 = vmatpush3.bf16.msra.mxu1 %v6531_v27  ;;  %5834 = vmatprep.subr.bf16.mxu0 %v6532_v28  ;;  %854 = vst [vmem:[#allocation2 + $0xb8] sm:$0x1f] %v847_v7  ;;  %324 = vst [vmem:[#allocation2 + $0xa0] sm:$0xe0] %v318_v9  ;;  %v509_v19 = vrot.slane %v5457_v15, 3  ;;  %v521_v20 = vrot.slane %v6984_v62, 4  ;;  %v1121_v23 = vpack.c.bf16 %v1009_v17, %v6944_v32 }
  0x22   : > { %5940 = vmatprep.subr.bf16.mxu1 %v6533_v29  ;;  %v5517_v21 = vld [vmem:[%s6935_s26 + $0x49] sm:$0x7f]  ;;  %v872_v22 = vrot.slane %v7010_v16, 4  ;;  %v1011_v24 = vld [vmem:[#allocation2 + $0x38] sm:$0xff]  ;;  %v7020_v25 = vsel %vm302_vm1, %v303_v52, %v304_v12  ;;  %311 = vst [vmem:[#allocation2 + $0xa0] sm:$0x1f] %v304_v12  ;;  %v7023_v26 = vsel %vm302_vm1, %v670_v60, %v671_v13 }
  0x23   : > { %678 = vst [vmem:[#allocation2 + $0xb0] sm:$0x1f] %v671_v13  ;;  %689 = vst [vmem:[#allocation2 + $0xb0] sm:$0xe0] %v683_v14  ;;  %v860_v27 = vrot.slane %v5517_v21, 3  ;;  %v7029_v32 = vsel %vm317_vm2, %v508_v1, %v509_v19  ;;  %v333_v35 = vrot.slane %v6993_v4, 4  ;;  %1473 = vmatprep.mubr.bf16.mxu0 %v1121_v23 }
  0x24   : > { %5835 = vmatpush3.bf16.msra.mxu0 %v6534_v30  ;;  %v5429_v28 = vld [vmem:[%s6935_s26 + $0x38] sm:$0x7f]  ;;  %v5487_v29 = vld [vmem:[%s6935_s26 + $0x48] sm:$0x7f]  ;;  %v1123_v30 = vpack.c.bf16 %v1011_v24, %v6948_v34  ;;  %516 = vst [vmem:[#allocation2 + $0xe8] sm:$0xf] %v509_v19 }
  0x25   : > { %5941 = vmatpush3.bf16.msra.mxu1 %v6535_v31  ;;  %v1008_v31 = vld [vmem:[#allocation2 + $0x20] sm:$0xff]  ;;  %527 = vst [vmem:[#allocation2 + $0xe8] sm:$0xf0] %v521_v20  ;;  %878 = vst [vmem:[#allocation2 + $0xf8] sm:$0xf0] %v872_v22  ;;  %v319_v33 = vrot.slane %v5429_v28, 3  ;;  %v7038_v42 = vsel %vm317_vm2, %v859_v3, %v860_v27 }
  0x26   : > { %v7033_v36 = vld [vmem:[%s6935_s26 + $0x50] sm:$0xff]  ;;  %v5459_v37 = vld [vmem:[%s6935_s26 + $0x49] sm:$0x7f]  ;;  %v1120_v39 = vpack.c.bf16 %v1008_v31, %v6954_v38  ;;  %867 = vst [vmem:[#allocation2 + $0xf8] sm:$0xf] %v860_v27  ;;  %v684_v43 = vrot.slane %v5487_v29, 3  ;;  %1625 = vmatprep.mubr.bf16.mxu1 %v1123_v30 }
  0x27   : > { %v1010_v40 = vld [vmem:[#allocation2 + $0x30] sm:$0xff]  ;;  %v1017_v34 = vld [vmem:[#allocation2 + $0x68] sm:$0xff]  ;;  %v696_v44 = vrot.slane %v7033_v36, 4  ;;  %v5519_v45 = vld [vmem:[%s6935_s26 + $0x59] sm:$0x7f]  ;;  %v7045_v38 = vsel %vm317_vm2, %v318_v9, %v319_v33  ;;  %v522_v49 = vrot.slane %v5459_v37, 4 }
  0x28   : > { %v1122_v46 = vpack.c.bf16 %v1010_v40, %v6958_v41  ;;  %v1125_v47 = vpack.c.bf16 %v1017_v34, %v6979_v57  ;;  %v1019_v48 = vld [vmem:[#allocation2 + $0x78] sm:$0xff]  ;;  %326 = vst [vmem:[#allocation2 + $0xe0] sm:$0xf] %v319_v33  ;;  %339 = vst [vmem:[#allocation2 + $0xe0] sm:$0xf0] %v333_v35  ;;  %v7048_v50 = vld [vmem:[%s6935_s26 + $0x61] sm:$0xff]  ;;  %1474 = vmatmul.mubr.bf16.vlgmr.msra.gmra.mrb[0].mxu0 %v1120_v39  ;;  %v7055_v41 = vsel %vm317_vm2, %v683_v14, %v684_v43 }
  0x29   : > { %v5431_v51 = vld [vmem:[%s6935_s26 + $0x48] sm:$0x7f]  ;;  %v1127_v52 = vpack.c.bf16 %v1019_v48, %v6987_v63  ;;  %v7052_v53 = vld [vmem:[#allocation2 + $0x60] sm:$0xff]  ;;  %691 = vst [vmem:[#allocation2 + $0xf0] sm:$0xf] %v684_v43  ;;  %v534_v54 = vrot.slane %v7010_v16, 5  ;;  %v7062_v58 = vsel %vm332_vm3, %v521_v20, %v522_v49 }
  0x2a   : > { %702 = vst [vmem:[#allocation2 + $0xf0] sm:$0xf0] %v696_v44  ;;  %v873_v55 = vrot.slane %v5519_v45, 4  ;;  %v5489_v56 = vld [vmem:[%s6935_s26 + $0x58] sm:$0x7f]  ;;  %1626 = vmatmul.mubr.bf16.vlgmr.msra.gmra.mrb[0].mxu1 %v1122_v46  ;;  %1481 = vmatprep.mubr.bf16.mxu0 %v1125_v47  ;;  %v7059_v57 = vld [vmem:[#allocation2 + $0x70] sm:$0xff]  ;;  %v1124_v10 = vpack.c.bf16 %v7052_v53, %v6996_v5 }
  0x2b   : > { %529 = vst [vmem:[#allocation2 + $0x128] sm:$0x7] %v522_v49  ;;  %v885_v59 = vrot.slane %v7048_v50, 5  ;;  %v7066_v60 = vld [vmem:[%s6935_s26 + $0x60] sm:$0xff]  ;;  %v5461_v61 = vld [vmem:[%s6935_s26 + $0x59] sm:$0x7f]  ;;  %1633 = vmatprep.mubr.bf16.mxu1 %v1127_v52  ;;  %v1126_v12 = vpack.c.bf16 %v7059_v57, %v6999_v6 }
  0x2c   : > { %v1025_v62 = vld [vmem:[#allocation2 + $0xa8] sm:$0xff]  ;;  %540 = vst [vmem:[#allocation2 + $0x128] sm:$0xf8] %v534_v54  ;;  %v7070_v63 = vsel %vm332_vm3, %v872_v22, %v873_v55  ;;  %880 = vst [vmem:[#allocation2 + $0x138] sm:$0x7] %v873_v55  ;;  %v334_v0 = vrot.slane %v5431_v51, 4 }
  0x2d   : > { %v348_v1 = vrot.slane %v7033_v36, 5  ;;  %v5521_v2 = vld [vmem:[%s6935_s26 + $0x69] sm:$0x7f]  ;;  %v1027_v3 = vld [vmem:[#allocation2 + $0xb8] sm:$0xff]  ;;  %891 = vst [vmem:[#allocation2 + $0x138] sm:$0xf8] %v885_v59  ;;  %v1129_v5 = vpack.c.bf16 %v1025_v62, %v7005_v11 }
  0x2e   : > { %v697_v4 = vrot.slane %v5489_v56, 4  ;;  %v709_v7 = vrot.slane %v7066_v60, 5  ;;  %v535_v8 = vrot.slane %v5461_v61, 5  ;;  %v7076_v9 = vld [vmem:[%s6935_s26 + $0x71] sm:$0xff]  ;;  %v7083_v13 = vsel %vm332_vm3, %v333_v35, %v334_v0  ;;  %341 = vst [vmem:[#allocation2 + $0x120] sm:$0x7] %v334_v0 }
  0x2f   : > { %354 = vst [vmem:[#allocation2 + $0x120] sm:$0xf8] %v348_v1  ;;  %v547_v14 = vrot.slane %v7048_v50, 6  ;;  %v5433_v15 = vld [vmem:[%s6935_s26 + $0x58] sm:$0x7f]  ;;  %v7089_v17 = vld [vmem:[%s6935_s26 + $0x70] sm:$0xff]  ;;  %v1131_v23 = vpack.c.bf16 %v1027_v3, %v7013_v18 }
  0x30   : > { %v5491_v16 = vld [vmem:[%s6935_s26 + $0x68] sm:$0x7f]  ;;  %v7093_v19 = vsel %vm332_vm3, %v696_v44, %v697_v4  ;;  %704 = vst [vmem:[#allocation2 + $0x130] sm:$0x7] %v697_v4  ;;  %715 = vst [vmem:[#allocation2 + $0x130] sm:$0xf8] %v709_v7  ;;  %v7096_v6 = vsel %vm347_vm4, %v534_v54, %v535_v8  ;;  %1482 = vmatmul.mubr.bf16.gmra.mrb[4].mxu0 %v1124_v10 }
  0x31   : > { %542 = vst [vmem:[#allocation2 + $0x168] sm:$0x3] %v535_v8  ;;  %v886_v20 = vrot.slane %v5521_v2, 5  ;;  %v5463_v21 = vld [vmem:[%s6935_s26 + $0x69] sm:$0x7f]  ;;  %v898_v24 = vrot.slane %v7076_v9, 6  ;;  %1489 = vmatprep.mubr.bf16.mxu0 %v1129_v5 }
  0x32   : > { %v5523_v22 = vld [vmem:[%s6935_s26 + $0x79] sm:$0x7f]  ;;  %553 = vst [vmem:[#allocation2 + $0x168] sm:$0xfc] %v547_v14  ;;  %v349_v11 = vrot.slane %v5433_v15, 5  ;;  %v363_v27 = vrot.slane %v7066_v60, 6  ;;  %1634 = vmatmul.mubr.bf16.gmra.mrb[4].mxu1 %v1126_v12 }
  0x33   : > { %v7104_v28 = vld [vmem:[%s6935_s26 + $0x81] sm:$0xff]  ;;  %v7112_v31 = vsel %vm347_vm4, %v885_v59, %v886_v20  ;;  %893 = vst [vmem:[#allocation2 + $0x178] sm:$0x3] %v886_v20  ;;  %v710_v33 = vrot.slane %v5491_v16, 5  ;;  %v722_v18 = vrot.slane %v7089_v17, 6  ;;  %v7117_v36 = vld [vmem:[%s6935_s26 + $0x91] sm:$0xff]  ;;  %1641 = vmatprep.mubr.bf16.mxu1 %v1131_v23 }
  0x34   : > { %v7107_v29 = vld [vmem:[%s6935_s26 + $0x80] sm:$0xff]  ;;  %v5435_v35 = vld [vmem:[%s6935_s26 + $0x68] sm:$0x7f]  ;;  %904 = vst [vmem:[#allocation2 + $0x178] sm:$0xfc] %v898_v24  ;;  %v7120_v37 = vsel %vm347_vm4, %v348_v1, %v349_v11  ;;  %v548_v39 = vrot.slane %v5463_v21, 6 }
  0x35   : > { %v7109_v30 = vld [vmem:[#allocation2 + $0xa0] sm:$0xff]  ;;  %356 = vst [vmem:[#allocation2 + $0x160] sm:$0x3] %v349_v11  ;;  %369 = vst [vmem:[#allocation2 + $0x160] sm:$0xfc] %v363_v27  ;;  %v560_v40 = vrot.slane %v7076_v9, 7  ;;  %v7126_v45 = vsel %vm347_vm4, %v709_v7, %v710_v33 }
  0x36   : > { %v5493_v34 = vld [vmem:[%s6935_s26 + $0x78] sm:$0x7f]  ;;  %v1026_v44 = vld [vmem:[#allocation2 + $0xb0] sm:$0xff]  ;;  %717 = vst [vmem:[#allocation2 + $0x170] sm:$0x3] %v710_v33  ;;  %v899_v46 = vrot.slane %v5523_v22, 6  ;;  %v7131_v51 = vsel %vm362_vm5, %v547_v14, %v548_v39  ;;  %v1128_v56 = vpack.c.bf16 %v7109_v30, %v7020_v25 }
  0x37   : > { %v5465_v43 = vld [vmem:[%s6935_s26 + $0x79] sm:$0x7f]  ;;  %728 = vst [vmem:[#allocation2 + $0x170] sm:$0xfc] %v722_v18  ;;  %v911_v47 = vrot.slane %v7104_v28, 7  ;;  %v364_v48 = vrot.slane %v5435_v35, 6  ;;  %v1130_v1 = vpack.c.bf16 %v1026_v44, %v7023_v26 }
  0x38   : > { %v5525_v49 = vld [vmem:[%s6935_s26 + $0x89] sm:$0x7f]  ;;  %555 = vst [vmem:[#allocation2 + $0x1a8] sm:$0x1] %v548_v39  ;;  %565 = vst [vmem:[#allocation2 + $0x1a8] sm:$0xfe] %v560_v40  ;;  %v7141_v59 = vsel %vm362_vm5, %v898_v24, %v899_v46  ;;  %1490 = vmatmul.mubr.bf16.gmra.mrb[8].mxu0 %v1128_v56 }
  0x39   : > { %v1033_v50 = vld [vmem:[#allocation2 + $0xe8] sm:$0xff]  ;;  %v378_v52 = vrot.slane %v7089_v17, 7  ;;  %v723_v53 = vrot.slane %v5493_v34, 6  ;;  %v5437_v54 = vld [vmem:[%s6935_s26 + $0x78] sm:$0x7f]  ;;  %v7136_v55 = vld [vmem:[%s6935_s26 + $0x90] sm:$0xff]  ;;  %v7144_v60 = vsel %vm362_vm5, %v363_v27, %v364_v48 }
  0x3a   : > { %v1035_v57 = vld [vmem:[#allocation2 + $0xf8] sm:$0xff]  ;;  %906 = vst [vmem:[#allocation2 + $0x1b8] sm:$0x1] %v899_v46  ;;  %916 = vst [vmem:[#allocation2 + $0x1b8] sm:$0xfe] %v911_v47  ;;  %v735_v61 = vrot.slane %v7107_v29, 7  ;;  %v1133_v7 = vpack.c.bf16 %v1033_v50, %v7029_v32  ;;  %1642 = vmatmul.mubr.bf16.gmra.mrb[8].mxu1 %v1130_v1 }
  0x3b   : > { %371 = vst [vmem:[#allocation2 + $0x1a0] sm:$0x1] %v364_v48  ;;  %v5495_v62 = vld [vmem:[%s6935_s26 + $0x88] sm:$0x7f]  ;;  %383 = vst [vmem:[#allocation2 + $0x1a0] sm:$0xfe] %v378_v52  ;;  %v7151_v25 = vsel %vm362_vm5, %v722_v18, %v723_v53  ;;  %v1135_v12 = vpack.c.bf16 %v1035_v57, %v7038_v42 }
  0x3c   : > { %v5467_v0 = vld [vmem:[%s6935_s26 + $0x89] sm:$0x7f]  ;;  %730 = vst [vmem:[#allocation2 + $0x1b0] sm:$0x1] %v723_v53  ;;  %v561_v2 = vrot.slane %v5465_v43, 7  ;;  %v912_v3 = vrot.slane %v5525_v49, 7  ;;  %1497 = vmatprep.mubr.bf16.mxu0 %v1133_v7 }
  0x3d   : > { %570 = vst [vmem:[#allocation2 + $0x208] sm:$0x7f] %v5467_v0  ;;  %v5469_v4 = vld [vmem:[%s6935_s26 + $0x99] sm:$0x7f]  ;;  %740 = vst [vmem:[#allocation2 + $0x1b0] sm:$0xfe] %v735_v61  ;;  %1649 = vmatprep.mubr.bf16.mxu1 %v1135_v12 }
  0x3e   : > { %v379_v8 = vrot.slane %v5437_v54, 7  ;;  %v736_v9 = vrot.slane %v5495_v62, 7  ;;  %v575_v26 = vrot.slane %v7117_v36, 1  ;;  %v5527_v10 = vld [vmem:[%s6935_s26 + $0x99] sm:$0x7f]  ;;  %v7159_v14 = vsel %vm377_vm6, %v560_v40, %v561_v2  ;;  %v5528_v32 = vld [vmem:[%s6935_s26 + $0xa1] sm:$0xff] }
  0x3f   : > { %v7162_v15 = vsel %vm377_vm6, %v911_v47, %v912_v3  ;;  %v576_v16 = vrot.slane %v5469_v4, 1  ;;  %921 = vst [vmem:[#allocation2 + $0x218] sm:$0x7f] %v5527_v10  ;;  %v5529_v17 = vld [vmem:[%s6935_s26 + $0xa9] sm:$0x7f]  ;;  %v7167_v20 = vld [vmem:[#allocation2 + $0xe0] sm:$0xff] }
  0x40   : > { %v5439_v5 = vld [vmem:[%s6935_s26 + $0x88] sm:$0x7f]  ;;  %v7170_v21 = vsel %vm377_vm6, %v378_v52, %v379_v8  ;;  %v7173_v42 = vsel %vm377_vm6, %v735_v61, %v736_v9  ;;  %581 = vst [vmem:[#allocation2 + $0x208] sm:$0x80] %v575_v26  ;;  %v5441_v22 = vld [vmem:[%s6935_s26 + $0x98] sm:$0x7f]  ;;  %v1132_v34 = vpack.c.bf16 %v7167_v20, %v7045_v38 }
  0x41   : > { %389 = vst [vmem:[#allocation2 + $0x200] sm:$0x7f] %v5439_v5  ;;  %v7177_v23 = vld [vmem:[%s6935_s26 + $0xa0] sm:$0xff]  ;;  %v7179_v24 = vld [vmem:[#allocation2 + $0xf0] sm:$0xff]  ;;  %583 = vst [vmem:[#allocation2 + $0x248] sm:$0x3f] %v576_v16  ;;  %v7186_v33 = vsel %vm287_vm0, %v575_v26, %v576_v16 }
  0x42   : > { %v5497_v11 = vld [vmem:[%s6935_s26 + $0x98] sm:$0x7f]  ;;  %v5499_v27 = vld [vmem:[%s6935_s26 + $0xa8] sm:$0x7f]  ;;  %v926_v18 = vrot.slane %v5528_v32, 1  ;;  %v927_v35 = vrot.slane %v5529_v17, 1  ;;  %v1134_v49 = vpack.c.bf16 %v7179_v24, %v7055_v41  ;;  %1498 = vmatmul.mubr.bf16.gmra.mrb[12].mxu0 %v1132_v34 }
  0x43   : > { %v7183_v30 = vld [vmem:[#allocation2 + $0x128] sm:$0xff]  ;;  %745 = vst [vmem:[#allocation2 + $0x210] sm:$0x7f] %v5497_v11  ;;  %v7190_v40 = vld [vmem:[%s6935_s26 + $0xb1] sm:$0xff]  ;;  %v395_v44 = vrot.slane %v7136_v55, 1  ;;  %v396_v46 = vrot.slane %v5441_v22, 1 }
  0x44   : > { %v5471_v39 = vld [vmem:[%s6935_s26 + $0xa9] sm:$0x7f]  ;;  %v7194_v43 = vld [vmem:[#allocation2 + $0x138] sm:$0xff]  ;;  %v750_v47 = vrot.slane %v7177_v23, 1  ;;  %v7202_v50 = vsel %vm287_vm0, %v926_v18, %v927_v35  ;;  %932 = vst [vmem:[#allocation2 + $0x218] sm:$0x80] %v926_v18  ;;  %v1137_v56 = vpack.c.bf16 %v7183_v30, %v7062_v58  ;;  %1650 = vmatmul.mubr.bf16.gmra.mrb[12].mxu1 %v1134_v49 }
  0x45   : > { %v5531_v48 = vld [vmem:[%s6935_s26 + $0xb9] sm:$0x7f]  ;;  %934 = vst [vmem:[#allocation2 + $0x258] sm:$0x3f] %v927_v35  ;;  %v751_v52 = vrot.slane %v5499_v27, 1  ;;  %v588_v38 = vrot.slane %v5528_v32, 2  ;;  %v7211_v57 = vsel %vm287_vm0, %v395_v44, %v396_v46  ;;  %v1139_v1 = vpack.c.bf16 %v7194_v43, %v7070_v63 }
  0x46   : > { %v5443_v53 = vld [vmem:[%s6935_s26 + $0xa8] sm:$0x7f]  ;;  %v7206_v54 = vld [vmem:[%s6935_s26 + $0xb0] sm:$0xff]  ;;  %401 = vst [vmem:[#allocation2 + $0x200] sm:$0x80] %v395_v44  ;;  %v589_v41 = vrot.slane %v5471_v39, 2  ;;  %1505 = vmatprep.mubr.bf16.mxu0 %v1137_v56 }
  0x47   : > { %403 = vst [vmem:[#allocation2 + $0x240] sm:$0x3f] %v396_v46  ;;  %756 = vst [vmem:[#allocation2 + $0x210] sm:$0x80] %v750_v47  ;;  %v939_v61 = vrot.slane %v7190_v40, 2  ;;  %v7216_v0 = vld [vmem:[%s6935_s26 + $0xc1] sm:$0xff]  ;;  %v7221_v2 = vsel %vm287_vm0, %v750_v47, %v751_v52  ;;  %1657 = vmatprep.mubr.bf16.mxu1 %v1139_v1 }
  0x48   : > { %v5501_v62 = vld [vmem:[%s6935_s26 + $0xb8] sm:$0x7f]  ;;  %758 = vst [vmem:[#allocation2 + $0x250] sm:$0x3f] %v751_v52  ;;  %594 = vst [vmem:[#allocation2 + $0x248] sm:$0xc0] %v588_v38  ;;  %v7227_v8 = vsel %vm302_vm1, %v588_v38, %v589_v41 }
  0x49   : > { %v940_v58 = vrot.slane %v5531_v48, 2  ;;  %v409_v3 = vrot.slane %v7177_v23, 2  ;;  %v5473_v4 = vld [vmem:[%s6935_s26 + $0xb9] sm:$0x7f]  ;;  %v5533_v7 = vld [vmem:[%s6935_s26 + $0xc9] sm:$0x7f] }
  0x4a   : > { %596 = vst [vmem:[#allocation2 + $0x288] sm:$0x1f] %v589_v41  ;;  %945 = vst [vmem:[#allocation2 + $0x258] sm:$0xc0] %v939_v61  ;;  %v410_v9 = vrot.slane %v5443_v53, 2  ;;  %v763_v63 = vrot.slane %v7206_v54, 2 }
  0x4b   : > { %v764_v26 = vrot.slane %v5501_v62, 2  ;;  %v5445_v10 = vld [vmem:[%s6935_s26 + $0xb8] sm:$0x7f]  ;;  %v7232_v12 = vsel %vm302_vm1, %v939_v61, %v940_v58  ;;  %947 = vst [vmem:[#allocation2 + $0x298] sm:$0x1f] %v940_v58  ;;  %v601_v16 = vrot.slane %v7190_v40, 3 }
  0x4c   : > { %415 = vst [vmem:[#allocation2 + $0x240] sm:$0xc0] %v409_v3  ;;  %v602_v32 = vrot.slane %v5473_v4, 3  ;;  %v5502_v17 = vld [vmem:[%s6935_s26 + $0xc0] sm:$0xff]  ;;  %v5503_v5 = vld [vmem:[%s6935_s26 + $0xc8] sm:$0x7f]  ;;  %v7238_v20 = vsel %vm302_vm1, %v409_v3, %v410_v9 }
  0x4d   : > { %417 = vst [vmem:[#allocation2 + $0x280] sm:$0x1f] %v410_v9  ;;  %v7241_v22 = vsel %vm302_vm1, %v763_v63, %v764_v26  ;;  %769 = vst [vmem:[#allocation2 + $0x250] sm:$0xc0] %v763_v63  ;;  %v952_v23 = vrot.slane %v7216_v0, 3  ;;  %v953_v24 = vrot.slane %v5533_v7, 3 }
  0x4e   : > { %771 = vst [vmem:[#allocation2 + $0x290] sm:$0x1f] %v764_v26  ;;  %v5475_v11 = vld [vmem:[%s6935_s26 + $0xc9] sm:$0x7f]  ;;  %v1040_v30 = vld [vmem:[#allocation2 + $0x120] sm:$0xff]  ;;  %v7246_v18 = vld [vmem:[#allocation2 + $0x130] sm:$0xff]  ;;  %v7251_v39 = vsel %vm317_vm2, %v601_v16, %v602_v32 }
  0x4f   : > { %v5447_v27 = vld [vmem:[%s6935_s26 + $0xc8] sm:$0x7f]  ;;  %607 = vst [vmem:[#allocation2 + $0x288] sm:$0xe0] %v601_v16  ;;  %609 = vst [vmem:[#allocation2 + $0x2c8] sm:$0xf] %v602_v32  ;;  %v7255_v44 = vsel %vm317_vm2, %v952_v23, %v953_v24  ;;  %v1136_v62 = vpack.c.bf16 %v1040_v30, %v7083_v13 }
  0x50   : > { %v7248_v35 = vld [vmem:[#allocation2 + $0x168] sm:$0xff]  ;;  %v423_v40 = vrot.slane %v7206_v54, 3  ;;  %v424_v34 = vrot.slane %v5445_v10, 3  ;;  %v776_v43 = vrot.slane %v5502_v17, 3  ;;  %958 = vst [vmem:[#allocation2 + $0x298] sm:$0xe0] %v952_v23 }
  0x51   : > { %960 = vst [vmem:[#allocation2 + $0x2d8] sm:$0xf] %v953_v24  ;;  %v777_v46 = vrot.slane %v5503_v5, 3  ;;  %v614_v47 = vrot.slane %v7216_v0, 4  ;;  %v615_v48 = vrot.slane %v5475_v11, 4  ;;  %v5534_v49 = vld [vmem:[%s6935_s26 + $0xd1] sm:$0xff]  ;;  %v1138_v0 = vpack.c.bf16 %v7246_v18, %v7093_v19  ;;  %1506 = vmatmul.mubr.bf16.gmra.mrb[16].mxu0 %v1136_v62 }
  0x52   : > { %v5535_v52 = vld [vmem:[%s6935_s26 + $0xd9] sm:$0x7f]  ;;  %v7261_v53 = vsel %vm317_vm2, %v423_v40, %v424_v34  ;;  %429 = vst [vmem:[#allocation2 + $0x280] sm:$0xe0] %v423_v40  ;;  %431 = vst [vmem:[#allocation2 + $0x2c0] sm:$0xf] %v424_v34  ;;  %v1141_v4 = vpack.c.bf16 %v7248_v35, %v7096_v6 }
  0x53   : > { %v1051_v38 = vld [vmem:[#allocation2 + $0x178] sm:$0xff]  ;;  %782 = vst [vmem:[#allocation2 + $0x290] sm:$0xe0] %v776_v43  ;;  %v437_v54 = vrot.slane %v5502_v17, 4  ;;  %v438_v56 = vrot.slane %v5447_v27, 4  ;;  %v5504_v41 = vld [vmem:[%s6935_s26 + $0xd0] sm:$0xff]  ;;  %v7269_v1 = vsel %vm317_vm2, %v776_v43, %v777_v46  ;;  %v7272_v58 = vsel %vm332_vm3, %v614_v47, %v615_v48  ;;  %1658 = vmatmul.mubr.bf16.gmra.mrb[16].mxu1 %v1138_v0 }
  0x54   : > { %v5505_v61 = vld [vmem:[%s6935_s26 + $0xd8] sm:$0x7f]  ;;  %784 = vst [vmem:[#allocation2 + $0x2d0] sm:$0xf] %v777_v46  ;;  %620 = vst [vmem:[#allocation2 + $0x2c8] sm:$0xf0] %v614_v47  ;;  %v1143_v26 = vpack.c.bf16 %v1051_v38, %v7112_v31  ;;  %1513 = vmatprep.mubr.bf16.mxu0 %v1141_v4 }
  0x55   : > { %622 = vst [vmem:[#allocation2 + $0x308] sm:$0x7] %v615_v48  ;;  %v5477_v3 = vld [vmem:[%s6935_s26 + $0xd9] sm:$0x7f]  ;;  %v7278_v13 = vsel %vm332_vm3, %v437_v54, %v438_v56  ;;  %443 = vst [vmem:[#allocation2 + $0x2c0] sm:$0xf0] %v437_v54 }
  0x56   : > { %445 = vst [vmem:[#allocation2 + $0x300] sm:$0x7] %v438_v56  ;;  %v965_v19 = vrot.slane %v5534_v49, 4  ;;  %v966_v7 = vrot.slane %v5535_v52, 4  ;;  %v5449_v9 = vld [vmem:[%s6935_s26 + $0xd8] sm:$0x7f]  ;;  %1665 = vmatprep.mubr.bf16.mxu1 %v1143_v26 }
  0x57   : > { %v5536_v63 = vld [vmem:[%s6935_s26 + $0xe1] sm:$0xff]  ;;  %v789_v10 = vrot.slane %v5504_v41, 4  ;;  %v790_v16 = vrot.slane %v5505_v61, 4  ;;  %v627_v32 = vrot.slane %v5534_v49, 5  ;;  %v5537_v17 = vld [vmem:[%s6935_s26 + $0xe9] sm:$0x7f] }
  0x58   : > { %v5506_v5 = vld [vmem:[%s6935_s26 + $0xe0] sm:$0xff]  ;;  %v7288_v6 = vsel %vm332_vm3, %v965_v19, %v966_v7  ;;  %971 = vst [vmem:[#allocation2 + $0x2d8] sm:$0xf0] %v965_v19  ;;  %973 = vst [vmem:[#allocation2 + $0x318] sm:$0x7] %v966_v7  ;;  %v628_v24 = vrot.slane %v5477_v3, 5 }
  0x59   : > { %v7285_v23 = vld [vmem:[#allocation2 + $0x160] sm:$0xff]  ;;  %v451_v11 = vrot.slane %v5504_v41, 5  ;;  %v5507_v27 = vld [vmem:[%s6935_s26 + $0xe8] sm:$0x7f]  ;;  %v7291_v30 = vld [vmem:[#allocation2 + $0x170] sm:$0xff]  ;;  %v7296_v18 = vsel %vm332_vm3, %v789_v10, %v790_v16  ;;  %v452_v35 = vrot.slane %v5449_v9, 5 }
  0x5a   : > { %v7293_v31 = vld [vmem:[#allocation2 + $0x1a8] sm:$0xff]  ;;  %795 = vst [vmem:[#allocation2 + $0x2d0] sm:$0xf0] %v789_v10  ;;  %797 = vst [vmem:[#allocation2 + $0x310] sm:$0x7] %v790_v16  ;;  %v978_v40 = vrot.slane %v5536_v63, 5  ;;  %v7300_v46 = vsel %vm347_vm4, %v627_v32, %v628_v24  ;;  %v1140_v0 = vpack.c.bf16 %v7285_v23, %v7120_v37  ;;  %v1142_v7 = vpack.c.bf16 %v7291_v30, %v7126_v45 }
  0x5b   : > { %633 = vst [vmem:[#allocation2 + $0x308] sm:$0xf8] %v627_v32  ;;  %v5479_v34 = vld [vmem:[%s6935_s26 + $0xe9] sm:$0x7f]  ;;  %v1059_v43 = vld [vmem:[#allocation2 + $0x1b8] sm:$0xff]  ;;  %v979_v47 = vrot.slane %v5537_v17, 5  ;;  %v7308_v54 = vsel %vm347_vm4, %v451_v11, %v452_v35  ;;  %v1145_v10 = vpack.c.bf16 %v7293_v31, %v7131_v51 }
  0x5c   : > { %635 = vst [vmem:[#allocation2 + $0x348] sm:$0x3] %v628_v24  ;;  %457 = vst [vmem:[#allocation2 + $0x300] sm:$0xf8] %v451_v11  ;;  %v802_v48 = vrot.slane %v5506_v5, 5  ;;  %v5538_v52 = vld [vmem:[%s6935_s26 + $0xf1] sm:$0xff]  ;;  %v1147_v17 = vpack.c.bf16 %v1059_v43, %v7141_v59  ;;  %1514 = vmatmul.mubr.bf16.gmra.mrb[20].mxu0 %v1140_v0  ;;  %1666 = vmatmul.mubr.bf16.gmra.mrb[20].mxu1 %v1142_v7 }
  0x5d   : > { %v5451_v49 = vld [vmem:[%s6935_s26 + $0xe8] sm:$0x7f]  ;;  %v6536_v38 = vld [vmem:[%s8206_s2 + $0x40] sm:$0xff]   ;;  %459 = vst [vmem:[#allocation2 + $0x340] sm:$0x3] %v452_v35  ;;  %v803_v56 = vrot.slane %v5507_v27, 5  ;;  %v7315_v3 = vsel %vm347_vm4, %v978_v40, %v979_v47  ;;  %1521 = vmatprep.mubr.bf16.mxu0 %v1145_v10 }
  0x5e   : > { %984 = vst [vmem:[#allocation2 + $0x318] sm:$0xf8] %v978_v40  ;;  %v640_v41 = vrot.slane %v5536_v63, 6  ;;  %v5539_v61 = vld [vmem:[%s6935_s26 + $0xf9] sm:$0x7f]  ;;  %v641_v4 = vrot.slane %v5479_v34, 6  ;;  %6032 = vmatprep.subr.bf16.mxu0 %v6536_v38  ;;  %1673 = vmatprep.mubr.bf16.mxu1 %v1147_v17 }
  0x5f   : > { %v5509_v62 = vld [vmem:[%s6935_s26 + $0xf8] sm:$0x7f]  ;;  %986 = vst [vmem:[#allocation2 + $0x358] sm:$0x3] %v979_v47  ;;  %808 = vst [vmem:[#allocation2 + $0x310] sm:$0xf8] %v802_v48  ;;  %v7321_v9 = vsel %vm347_vm4, %v802_v48, %v803_v56  ;;  %v1149_v48 = vpack.c.bf16 %v7104_v28, %v7159_v14  ;;  %v1150_v28 = vpack.c.bf16 %v7136_v55, %v7173_v42 }
  0x60   : > { %v5508_v19 = vld [vmem:[%s6935_s26 + $0xf0] sm:$0xff]  ;;  %810 = vst [vmem:[#allocation2 + $0x350] sm:$0x3] %v803_v56  ;;  %646 = vst [vmem:[#allocation2 + $0x348] sm:$0xfc] %v640_v41  ;;  %v465_v63 = vrot.slane %v5506_v5, 6  ;;  %v7329_v16 = vsel %vm362_vm5, %v640_v41, %v641_v4 }
  0x61   : > { %v466_v26 = vrot.slane %v5451_v49, 6  ;;  %v6537_v37 = vld [vmem:[%s8206_s2] sm:$0xff]   ;;  %648 = vst [vmem:[#allocation2 + $0x388] sm:$0x1] %v641_v4  ;;  %v991_v32 = vrot.slane %v5538_v52, 6  ;;  %v992_v45 = vrot.slane %v5539_v61, 6  ;;  %v1151_v49 = vpack.c.bf16 %v7117_v36, %v7162_v15 }
  0x62   : > { %471 = vst [vmem:[#allocation2 + $0x340] sm:$0xfc] %v465_v63  ;;  %v816_v5 = vrot.slane %v5508_v19, 6  ;;  %v817_v24 = vrot.slane %v5509_v62, 6  ;;  %6033 = vmatpush3.bf16.msra.mxu0 %v6537_v37  ;;  %v6538_v51 = vld [vmem:[%s8206_s2 + $0xc0] sm:$0xff]   ;;  %v1058_v31 = vld [vmem:[#allocation2 + $0x1b0] sm:$0xff] }
  0x63   : > { %v7333_v23 = vsel %vm362_vm5, %v465_v63, %v466_v26  ;;  %473 = vst [vmem:[#allocation2 + $0x380] sm:$0x1] %v466_v26  ;;  %v7339_v11 = vsel %vm362_vm5, %v991_v32, %v992_v45  ;;  %997 = vst [vmem:[#allocation2 + $0x358] sm:$0xfc] %v991_v32  ;;  %6066 = vmatprep.subr.bf16.mxu1 %v6538_v51  ;;  %v6539_v27 = vld [vmem:[%s8206_s2 + $0x80] sm:$0xff]   ;;  %v6540_v35 = vld [vmem:[%s8206_s2 + $0x48] sm:$0xff]   ;;  %v1146_v47 = vpack.c.bf16 %v1058_v31, %v7151_v25 }
  0x64   : > { %999 = vst [vmem:[#allocation2 + $0x398] sm:$0x1] %v992_v45  ;;  %v7342_v59 = vsel %vm362_vm5, %v816_v5, %v817_v24  ;;  %822 = vst [vmem:[#allocation2 + $0x350] sm:$0xfc] %v816_v5  ;;  %v1056_v30 = vld [vmem:[#allocation2 + $0x1a0] sm:$0xff]  ;;  %6067 = vmatpush3.bf16.msra.mxu1 %v6539_v27  ;;  %v6541_v40 = vld [vmem:[%s8206_s2 + $0x8] sm:$0xff]   ;;  %6034 = vmatprep.subr.bf16.mxu0 %v6540_v35  ;;  %v1148_v25 = vpack.c.bf16 %v7107_v29, %v7170_v21 }
  0x65   : > { %824 = vst [vmem:[#allocation2 + $0x390] sm:$0x1] %v817_v24  ;;  %v1144_v34 = vpack.c.bf16 %v1056_v30, %v7144_v60  ;;  %v6542_v43 = vld [vmem:[%s8206_s2 + $0xc8] sm:$0xff]   ;;  %1674 = vmatmul.mubr.bf16.gmra.mrb[24].mxu1 %v1146_v47  ;;  %v1071_v38 = vld [vmem:[#allocation2 + $0x218] sm:$0xff]  ;;  %v1068_v15 = vld [vmem:[#allocation2 + $0x200] sm:$0xff]  ;;  %v6785_v47 = vmov 0.0  }
  0x66   : > { %6035 = vmatpush3.bf16.msra.mxu0 %v6541_v40  ;;  %6068 = vmatprep.subr.bf16.mxu1 %v6542_v43  ;;  %v6543_v52 = vld [vmem:[%s8206_s2 + $0x88] sm:$0xff]   ;;  %v1155_v14 = vpack.c.bf16 %v7202_v50, %v1071_v38  ;;  %v1070_v56 = vld [vmem:[#allocation2 + $0x210] sm:$0xff]  ;;  %v1079_v61 = vld [vmem:[#allocation2 + $0x258] sm:$0xff]  ;;  %v1152_v62 = vpack.c.bf16 %v7211_v57, %v1068_v15  ;;  %1001 = vst [vmem:[#allocation2 + $0x388] sm:$0xfe] %v6785_v47 }
  0x67   : > { %1522 = vmatmul.mubr.bf16.gmra.mrb[24].mxu0 %v1144_v34  ;;  %v1069_v60 = vld [vmem:[#allocation2 + $0x208] sm:$0xff]  ;;  %1681 = vmatprep.mubr.bf16.mxu1 %v1151_v49  ;;  %v1154_v0 = vpack.c.bf16 %v7221_v2, %v1070_v56  ;;  %v1159_v55 = vpack.c.bf16 %v7232_v12, %v1079_v61  ;;  %v1076_v21 = vld [vmem:[#allocation2 + $0x240] sm:$0xff]  ;;  %v1078_v42 = vld [vmem:[#allocation2 + $0x250] sm:$0xff]  ;;  %1000 = vst [vmem:[#allocation2 + $0x380] sm:$0xfe] %v6785_v47 }
  0x68   : > { %6069 = vmatpush3.bf16.msra.mxu1 %v6543_v52  ;;  %1529 = vmatprep.mubr.bf16.mxu0 %v1149_v48  ;;  %v1153_v36 = vpack.c.bf16 %v7186_v33, %v1069_v60  ;;  %v1077_v41 = vld [vmem:[#allocation2 + $0x248] sm:$0xff]  ;;  %v1087_v50 = vld [vmem:[#allocation2 + $0x298] sm:$0xff]  ;;  %v1156_v4 = vpack.c.bf16 %v7238_v20, %v1076_v21  ;;  %v1158_v19 = vpack.c.bf16 %v7241_v22, %v1078_v42  ;;  %v1084_v7 = vld [vmem:[#allocation2 + $0x280] sm:$0xff] }
  0x69   : > { %v1157_v29 = vpack.c.bf16 %v7227_v8, %v1077_v41  ;;  %v1085_v33 = vld [vmem:[#allocation2 + $0x288] sm:$0xff]  ;;  %v1163_v2 = vpack.c.bf16 %v7255_v44, %v1087_v50  ;;  %v1086_v8 = vld [vmem:[#allocation2 + $0x290] sm:$0xff]  ;;  %v1095_v63 = vld [vmem:[#allocation2 + $0x2d8] sm:$0xff]  ;;  %v1160_v26 = vpack.c.bf16 %v7261_v53, %v1084_v7  ;;  %1002 = vst [vmem:[#allocation2 + $0x390] sm:$0xfe] %v6785_v47 }
  0x6a   : > { %v1161_v57 = vpack.c.bf16 %v7251_v39, %v1085_v33  ;;  %v1093_v12 = vld [vmem:[#allocation2 + $0x2c8] sm:$0xff]  ;;  %v1162_v37 = vpack.c.bf16 %v7269_v1, %v1086_v8  ;;  %v1167_v22 = vpack.c.bf16 %v7288_v6, %v1095_v63  ;;  %v1092_v10 = vld [vmem:[#allocation2 + $0x2c0] sm:$0xff]  ;;  %v1094_v39 = vld [vmem:[#allocation2 + $0x2d0] sm:$0xff]  ;;  %1003 = vst [vmem:[#allocation2 + $0x398] sm:$0xfe] %v6785_v47 }
  0x6b   : > { %v1165_v20 = vpack.c.bf16 %v7272_v58, %v1093_v12  ;;  %v1101_v44 = vld [vmem:[#allocation2 + $0x308] sm:$0xff]  ;;  %v1103_v32 = vld [vmem:[#allocation2 + $0x318] sm:$0xff]  ;;  %v1164_v45 = vpack.c.bf16 %v7278_v13, %v1092_v10  ;;  %v1166_v17 = vpack.c.bf16 %v7296_v18, %v1094_v39  ;;  %v1100_v5 = vld [vmem:[#allocation2 + $0x300] sm:$0xff]  ;;  %2290 = vst [vmem:[#allocation4 + $0x200] sm:$0xf0] %v6785_v47 }
  0x6c   : > { %v1169_v53 = vpack.c.bf16 %v7300_v46, %v1101_v44  ;;  %v1171_v1 = vpack.c.bf16 %v7315_v3, %v1103_v32  ;;  %v1102_v58 = vld [vmem:[#allocation2 + $0x310] sm:$0xff]  ;;  %v1109_v6 = vld [vmem:[#allocation2 + $0x348] sm:$0xff]  ;;  %v1111_v24 = vld [vmem:[#allocation2 + $0x358] sm:$0xff]  ;;  %v1168_v51 = vpack.c.bf16 %v7308_v54, %v1100_v5  ;;  %2291 = vst [vmem:[#allocation4 + $0x208] sm:$0xf0] %v6785_v47 }
  0x6d   : > { %1682 = vmatmul.mubr.bf16.gmra.mrb[28].mxu1 %v1150_v28  ;;  %v1170_v27 = vpack.c.bf16 %v7321_v9, %v1102_v58  ;;  %v1173_v13 = vpack.c.bf16 %v7329_v16, %v1109_v6  ;;  %v1175_v18 = vpack.c.bf16 %v7339_v11, %v1111_v24  ;;  %v1108_v30 = vld [vmem:[#allocation2 + $0x340] sm:$0xff]  ;;  %v1110_v46 = vld [vmem:[#allocation2 + $0x350] sm:$0xff]  ;;  %v6548_v11 = vld [vmem:[%s8206_s2 + $0x58] sm:$0xff]   ;;  %2292 = vst [vmem:[#allocation4 + $0x210] sm:$0xf0] %v6785_v47 }
  0x6e   : > { %1689 = vmatprep.mubr.bf16.mxu1 %v1155_v14  ;;  %v1172_v3 = vpack.c.bf16 %v7333_v23, %v1108_v30  ;;  %v1174_v31 = vpack.c.bf16 %v7342_v59, %v1110_v46  ;;  %v6544_v54 = vld [vmem:[%s8206_s2 + $0x50] sm:$0xff]   ;;  %v6549_v59 = vld [vmem:[%s8206_s2 + $0x18] sm:$0xff]   ;;  %v6552_v34 = vld [vmem:[%s8206_s2 + $0x60] sm:$0xff]   ;;  %2293 = vst [vmem:[#allocation4 + $0x218] sm:$0xf0] %v6785_v47 }
  0x6f   : > { %1530 = vmatmul.mubr.bf16.gmra.mrb[28].mxu0 %v1148_v25  ;;  %v6545_v9 = vld [vmem:[%s8206_s2 + $0x10] sm:$0xff]   ;;  %6036 = vmatprep.subr.bf16.mxu0 %v6544_v54  ;;  %v6550_v35 = vld [vmem:[%s8206_s2 + $0xd8] sm:$0xff]   ;;  %v6553_v43 = vld [vmem:[%s8206_s2 + $0x20] sm:$0xff]   ;;  %2294 = vst [vmem:[#allocation4 + $0x220] sm:$0xf0] %v6785_v47 }
  0x70   : > { %1537 = vmatprep.mubr.bf16.mxu0 %v1153_v36  ;;  %v6546_v16 = vld [vmem:[%s8206_s2 + $0xd0] sm:$0xff]   ;;  %6037 = vmatpush3.bf16.msra.mxu0 %v6545_v9  ;;  %v6551_v40 = vld [vmem:[%s8206_s2 + $0x98] sm:$0xff]   ;;  %2295 = vst [vmem:[#allocation4 + $0x228] sm:$0xf0] %v6785_v47  ;;  %2296 = vst [vmem:[#allocation4 + $0x230] sm:$0xf0] %v6785_v47 }
  0x71   : > { %v6547_v23 = vld [vmem:[%s8206_s2 + $0x90] sm:$0xff]   ;;  %6070 = vmatprep.subr.bf16.mxu1 %v6546_v16  ;;  %6038 = vmatprep.subr.bf16.mxu0 %v6548_v11  ;;  %2297 = vst [vmem:[#allocation4 + $0x238] sm:$0xf0] %v6785_v47  ;;  %2298 = vst [vmem:[#allocation4 + $0x240] sm:$0xf0] %v6785_v47  ;;  %v6554_v48 = vld [vmem:[%s8206_s2 + $0xe0] sm:$0xff]  }
  0x72   : > { %6071 = vmatpush3.bf16.msra.mxu1 %v6547_v23  ;;  %2299 = vst [vmem:[#allocation4 + $0x248] sm:$0xf0] %v6785_v47  ;;  %2300 = vst [vmem:[#allocation4 + $0x250] sm:$0xf0] %v6785_v47  ;;  %v6555_v49 = vld [vmem:[%s8206_s2 + $0xa0] sm:$0xff]   ;;  %v6556_v52 = vld [vmem:[%s8206_s2 + $0x68] sm:$0xff]  }
  0x73   : > { %6072 = vmatprep.subr.bf16.mxu1 %v6550_v35  ;;  %2301 = vst [vmem:[#allocation4 + $0x258] sm:$0xf0] %v6785_v47  ;;  %2302 = vst [vmem:[#allocation4 + $0x260] sm:$0xf0] %v6785_v47  ;;  %v6557_v60 = vld [vmem:[%s8206_s2 + $0x28] sm:$0xff]   ;;  %v1116_v14 = vld [vmem:[#allocation2 + $0x380] sm:$0xff] }
  0x74   : > { %6039 = vmatpush3.bf16.msra.mxu0 %v6549_v59  ;;  %2303 = vst [vmem:[#allocation4 + $0x268] sm:$0xf0] %v6785_v47  ;;  %2304 = vst [vmem:[#allocation4 + $0x270] sm:$0xf0] %v6785_v47  ;;  %v6558_v38 = vld [vmem:[%s8206_s2 + $0xe8] sm:$0xff]   ;;  %v1176_v15 = vpack.c.bf16 %v1116_v14, %v1116_v14  ;;  %v6560_v56 = vld [vmem:[%s8206_s2 + $0x70] sm:$0xff]  }
  0x75   : > { %1690 = vmatmul.mubr.bf16.gmra.mrb[32].mxu1 %v1154_v0  ;;  %2305 = vst [vmem:[#allocation4 + $0x278] sm:$0xf0] %v6785_v47  ;;  %6040 = vmatprep.subr.bf16.mxu0 %v6552_v34  ;;  %v1117_v25 = vld [vmem:[#allocation2 + $0x388] sm:$0xff]  ;;  %v1119_v41 = vld [vmem:[#allocation2 + $0x398] sm:$0xff]  ;;  %v1118_v0 = vld [vmem:[#allocation2 + $0x390] sm:$0xff] }
  0x76   : > { %1697 = vmatprep.mubr.bf16.mxu1 %v1159_v55  ;;  %6073 = vmatpush3.bf16.msra.mxu1 %v6551_v40  ;;  %v6559_v28 = vld [vmem:[%s8206_s2 + $0xa8] sm:$0xff]   ;;  %v1177_v36 = vpack.c.bf16 %v1117_v25, %v1117_v25  ;;  %v1179_v61 = vpack.c.bf16 %v1119_v41, %v1119_v41  ;;  %v6562_v55 = vld [vmem:[%s8206_s2 + $0xf0] sm:$0xff]   ;;  %v6564_v42 = vld [vmem:[%s8206_s2 + $0x78] sm:$0xff]  }
  0x77   : > { %1538 = vmatmul.mubr.bf16.gmra.mrb[32].mxu0 %v1152_v62  ;;  %6074 = vmatprep.subr.bf16.mxu1 %v6554_v48  ;;  %v6561_v62 = vld [vmem:[%s8206_s2 + $0x30] sm:$0xff]   ;;  %v6565_v33 = vld [vmem:[%s8206_s2 + $0x38] sm:$0xff]   ;;  %v7494_v7 = vld [vmem:[%s8210_s6] ss:$0 sm:$0xff] }
  0x78   : > { %1545 = vmatprep.mubr.bf16.mxu0 %v1157_v29  ;;  %6041 = vmatpush3.bf16.msra.mxu0 %v6553_v43  ;;  %v1178_v29 = vpack.c.bf16 %v1118_v0, %v1118_v0  ;;  %v6563_v21 = vld [vmem:[%s8206_s2 + $0xb0] sm:$0xff]   ;;  %v6566_v50 = vld [vmem:[%s8206_s2 + $0xf8] sm:$0xff]  }
  0x79   : > { %6042 = vmatprep.subr.bf16.mxu0 %v6556_v52 }
  0x7a   : > { %6075 = vmatpush3.bf16.msra.mxu1 %v6555_v49 }
  0x7b   : > { %6076 = vmatprep.subr.bf16.mxu1 %v6558_v38 }
  0x7c   : > { %6043 = vmatpush3.bf16.msra.mxu0 %v6557_v60 }
  0x7d   : > { %1698 = vmatmul.mubr.bf16.gmra.mrb[36].mxu1 %v1158_v19  ;;  %6044 = vmatprep.subr.bf16.mxu0 %v6560_v56  ;;  %v6568_v19 = vld [vmem:[%s8206_s2 + $0x140] sm:$0xff]  }
  0x7e   : > { %1705 = vmatprep.mubr.bf16.mxu1 %v1163_v2  ;;  %6077 = vmatpush3.bf16.msra.mxu1 %v6559_v28 }
  0x7f   : > { %1546 = vmatmul.mubr.bf16.gmra.mrb[36].mxu0 %v1156_v4  ;;  %6078 = vmatprep.subr.bf16.mxu1 %v6562_v55  ;;  %v6567_v4 = vld [vmem:[%s8206_s2 + $0xb8] sm:$0xff]  }
  0x80   : > { %1553 = vmatprep.mubr.bf16.mxu0 %v1161_v57  ;;  %6045 = vmatpush3.bf16.msra.mxu0 %v6561_v62  ;;  %v6569_v57 = vld [vmem:[%s8206_s2 + $0x1c0] sm:$0xff]  }
  0x81   : > { %6046 = vmatprep.subr.bf16.mxu0 %v6564_v42 }
  0x82   : > { %6079 = vmatpush3.bf16.msra.mxu1 %v6563_v21 }
  0x83   : > { %6080 = vmatprep.subr.bf16.mxu1 %v6566_v50 }
  0x84   : > { %6047 = vmatpush3.bf16.msra.mxu0 %v6565_v33 }
  0x85   : > { %1706 = vmatmul.mubr.bf16.gmra.mrb[40].mxu1 %v1162_v37  ;;  %6100 = vmatprep.subr.bf16.mxu0 %v6568_v19 }
  0x86   : > { %1713 = vmatprep.mubr.bf16.mxu1 %v1167_v22  ;;  %6081 = vmatpush3.bf16.msra.mxu1 %v6567_v4 }
  0x87   : > { %1554 = vmatmul.mubr.bf16.gmra.mrb[40].mxu0 %v1160_v26  ;;  %6134 = vmatprep.subr.bf16.mxu1 %v6569_v57 }
  0x88   : > { %1561 = vmatprep.mubr.bf16.mxu0 %v1165_v20 }
  0x8d   : > { %1714 = vmatmul.mubr.bf16.gmra.mrb[44].mxu1 %v1166_v17 }
  0x8e   : > { %1721 = vmatprep.mubr.bf16.mxu1 %v1171_v1 }
  0x8f   : > { %1562 = vmatmul.mubr.bf16.gmra.mrb[44].mxu0 %v1164_v45 }
  0x90   : > { %1569 = vmatprep.mubr.bf16.mxu0 %v1169_v53 }
  0x95   : > { %1722 = vmatmul.mubr.bf16.gmra.mrb[48].mxu1 %v1170_v27 }
  0x96   : > { %1729 = vmatprep.mubr.bf16.mxu1 %v1175_v18 }
  0x97   : > { %1570 = vmatmul.mubr.bf16.gmra.mrb[48].mxu0 %v1168_v51 }
  0x98   : > { %1577 = vmatprep.mubr.bf16.mxu0 %v1173_v13 }
  0x9d   : > { %1730 = vmatmul.mubr.bf16.gmra.mrb[52].mxu1 %v1174_v31 }
  0x9e   : > { %1737 = vmatprep.mubr.bf16.mxu1 %v1179_v61 }
  0x9f   : > { %1578 = vmatmul.mubr.bf16.gmra.mrb[52].mxu0 %v1172_v3 }
  0xa0   : > { %1585 = vmatprep.mubr.bf16.mxu0 %v1177_v36 }
  0xa5   : > { %1738 = vmatmul.mubr.bf16.gmra.mrb[56].mxu1 %v1178_v29 }
  0xa7   : > { %1586 = vmatmul.mubr.bf16.gmra.mrb[56].mxu0 %v1176_v15 }
  0xfb   : > { %v5836_v2 = vpop.f32.mrb[0].mxu0 }
  0xfc   : > { %v5837_v12 = vpop.f32.mrb[1].mxu0 }
  0xfd   : > { %v5942_v8 = vpop.f32.mrb[0].mxu1  ;;  %v5838_v63 = vadd.f32 %v5837_v12, %v5836_v2  ;;  %v5839_v37 = vpop.f32.mrb[2].mxu0 }
  0xfe   : > { %v5943_v26 = vpop.f32.mrb[1].mxu1  ;;  %v5840_v10 = vpop.f32.mrb[3].mxu0 }
  0xff   : > { %v5944_v20 = vadd.f32 %v5943_v26, %v5942_v8  ;;  %v5945_v22 = vpop.f32.mrb[2].mxu1  ;;  %v1476_v39 = vadd.f32 %v5838_v63, %v7494_v7  ;;  %v5841_v44 = vadd.f32 %v5840_v10, %v5839_v37 }
 0x100   : > { %v5946_v32 = vpop.f32.mrb[3].mxu1 }
 0x101   : > { %v5947_v45 = vadd.f32 %v5946_v32, %v5945_v22  ;;  %v1628_v17 = vadd.f32 %v5944_v20, %v1476_v39  ;;  %v1479_v53 = vadd.f32 %v5841_v44, %v7494_v7 }
 0x103   : > { %v1745_v1 = vmax.f32 %v1628_v17, 0.0  ;;  %v1631_v5 = vadd.f32 %v5947_v45, %v1479_v53  ;;  %v5842_v58 = vpop.f32.mrb[4].mxu0 }
 0x104   : > { %v5843_v24 = vpop.f32.mrb[5].mxu0 }
 0x105   : > { %v5948_v6 = vpop.f32.mrb[4].mxu1  ;;  %1774 = vst [vmem:[#allocation3] sm:$0xff] %v1745_v1  ;;  %v1746_v51 = vmax.f32 %v1631_v5, 0.0  ;;  %v5844_v27 = vadd.f32 %v5843_v24, %v5842_v58  ;;  %v5845_v18 = vpop.f32.mrb[6].mxu0 }
 0x106   : > { %v5949_v13 = vpop.f32.mrb[5].mxu1  ;;  %v5846_v3 = vpop.f32.mrb[7].mxu0 }
 0x107   : > { %v5950_v30 = vadd.f32 %v5949_v13, %v5948_v6  ;;  %v5951_v46 = vpop.f32.mrb[6].mxu1  ;;  %1775 = vst [vmem:[#allocation3 + $0x8] sm:$0xff] %v1746_v51  ;;  %v1484_v31 = vadd.f32 %v5844_v27, %v7494_v7  ;;  %v5847_v54 = vadd.f32 %v5846_v3, %v5845_v18 }
 0x108   : > { %v5952_v9 = vpop.f32.mrb[7].mxu1 }
 0x109   : > { %v5953_v16 = vadd.f32 %v5952_v9, %v5951_v46  ;;  %v1636_v23 = vadd.f32 %v5950_v30, %v1484_v31  ;;  %v1487_v11 = vadd.f32 %v5847_v54, %v7494_v7 }
 0x10b   : > { %v1747_v59 = vmax.f32 %v1636_v23, 0.0  ;;  %v1639_v35 = vadd.f32 %v5953_v16, %v1487_v11  ;;  %v5848_v40 = vpop.f32.mrb[8].mxu0 }
 0x10c   : > { %v5849_v43 = vpop.f32.mrb[9].mxu0 }
 0x10d   : > { %v5954_v34 = vpop.f32.mrb[8].mxu1  ;;  %1776 = vst [vmem:[#allocation3 + $0x10] sm:$0xff] %v1747_v59  ;;  %v1748_v48 = vmax.f32 %v1639_v35, 0.0  ;;  %v5850_v49 = vadd.f32 %v5849_v43, %v5848_v40  ;;  %v5851_v60 = vpop.f32.mrb[10].mxu0 }
 0x10e   : > { %v5955_v52 = vpop.f32.mrb[9].mxu1  ;;  %v1803_v38 = vld [vmem:[#allocation3] ss:$2 sm:$0x3f]  ;;  %v5852_v41 = vpop.f32.mrb[11].mxu0 }
 0x10f   : > { %v1836_v25 = vld [vmem:[#allocation3 + $0x1] ss:$2 sm:$0x3f]  ;;  %v5956_v28 = vadd.f32 %v5955_v52, %v5954_v34  ;;  %1804 = vst [vmem:[#allocation4] sm:$0x3f] %v1803_v38  ;;  %1777 = vst [vmem:[#allocation3 + $0x18] sm:$0xff] %v1748_v48  ;;  %v1492_v15 = vadd.f32 %v5850_v49, %v7494_v7  ;;  %v5853_v62 = vadd.f32 %v5852_v41, %v5851_v60 }
 0x110   : > { %1837 = vst [vmem:[#allocation4 + $0x8] sm:$0x3f] %v1836_v25  ;;  %v1869_v36 = vld [vmem:[#allocation3 + $0x2] ss:$2 sm:$0x3f]  ;;  %v5957_v56 = vpop.f32.mrb[10].mxu1 }
 0x111   : > { %v1902_v14 = vld [vmem:[#allocation3 + $0x3] ss:$2 sm:$0x3f]  ;;  %1870 = vst [vmem:[#allocation4 + $0x10] sm:$0x3f] %v1869_v36  ;;  %v1644_v61 = vadd.f32 %v5956_v28, %v1492_v15  ;;  %v5958_v0 = vpop.f32.mrb[11].mxu1  ;;  %v1495_v21 = vadd.f32 %v5853_v62, %v7494_v7 }
 0x112   : > { %1903 = vst [vmem:[#allocation4 + $0x18] sm:$0x3f] %v1902_v14  ;;  %v5959_v29 = vadd.f32 %v5958_v0, %v5957_v56 }
 0x113   : > { %v1749_v55 = vmax.f32 %v1644_v61, 0.0 }
 0x114   : > { %v1647_v4 = vadd.f32 %v5959_v29, %v1495_v21 }
 0x115   : > { %v5854_v42 = vpop.f32.mrb[12].mxu0  ;;  %1778 = vst [vmem:[#allocation3 + $0x20] sm:$0xff] %v1749_v55 }
 0x116   : > { %v5855_v50 = vpop.f32.mrb[13].mxu0  ;;  %v1935_v8 = vld [vmem:[#allocation3 + $0xf] ss:$2 sm:$0x3f]  ;;  %v1750_v22 = vmax.f32 %v1647_v4, 0.0 }
 0x117   : > { %v5960_v33 = vpop.f32.mrb[12].mxu1  ;;  %v5856_v19 = vadd.f32 %v5855_v50, %v5854_v42  ;;  %v5857_v2 = vpop.f32.mrb[14].mxu0  ;;  %v1968_v12 = vld [vmem:[#allocation3 + $0x10] ss:$2 sm:$0x3f] }
 0x118   : > { %v5961_v57 = vpop.f32.mrb[13].mxu1  ;;  %1936 = vst [vmem:[#allocation4 + $0x20] sm:$0x3f] %v1935_v8  ;;  %1969 = vst [vmem:[#allocation4 + $0x28] sm:$0x3f] %v1968_v12  ;;  %v5858_v39 = vpop.f32.mrb[15].mxu0 }
 0x119   : > { %v5962_v63 = vadd.f32 %v5961_v57, %v5960_v33  ;;  %v2001_v26 = vld [vmem:[#allocation3 + $0x11] ss:$2 sm:$0x3f]  ;;  %v2034_v37 = vld [vmem:[#allocation3 + $0x12] ss:$2 sm:$0x3f]  ;;  %v1500_v20 = vadd.f32 %v5856_v19, %v7494_v7  ;;  %v5859_v32 = vadd.f32 %v5858_v39, %v5857_v2 }
 0x11a   : > { %2002 = vst [vmem:[#allocation4 + $0x30] sm:$0x3f] %v2001_v26  ;;  %2035 = vst [vmem:[#allocation4 + $0x38] sm:$0x3f] %v2034_v37  ;;  %v5963_v10 = vpop.f32.mrb[14].mxu1 }
 0x11b   : > { %v1652_v44 = vadd.f32 %v5962_v63, %v1500_v20  ;;  %v5964_v45 = vpop.f32.mrb[15].mxu1  ;;  %1779 = vst [vmem:[#allocation3 + $0x28] sm:$0xff] %v1750_v22  ;;  %v1503_v1 = vadd.f32 %v5859_v32, %v7494_v7 }
 0x11c   : > { %v5965_v17 = vadd.f32 %v5964_v45, %v5963_v10 }
 0x11d   : > { %v1751_v53 = vmax.f32 %v1652_v44, 0.0 }
 0x11e   : > { %v1655_v24 = vadd.f32 %v5965_v17, %v1503_v1 }
 0x11f   : > { %1780 = vst [vmem:[#allocation3 + $0x30] sm:$0xff] %v1751_v53 }
 0x120   : > { %v1752_v3 = vmax.f32 %v1655_v24, 0.0 }
 0x122   : > { %v1806_v23 = vld [vmem:[#allocation3 + $0x1e] ss:$2 sm:$0x3f]  ;;  %v1839_v11 = vld [vmem:[#allocation3 + $0x1f] ss:$2 sm:$0x3f] }
 0x123   : > { %1781 = vst [vmem:[#allocation3 + $0x38] sm:$0xff] %v1752_v3  ;;  %v1808_v40 = vrot.slane %v1806_v23, 2  ;;  %v1841_v34 = vrot.slane %v1839_v11, 2  ;;  %v1872_v43 = vld [vmem:[#allocation3 + $0x20] ss:$2 sm:$0x3f] }
 0x124   : > { %v5860_v5 = vpop.f32.mrb[16].mxu0  ;;  %v1874_v48 = vrot.slane %v1872_v43, 2  ;;  %v1905_v49 = vld [vmem:[#allocation3 + $0x21] ss:$2 sm:$0x3f] }
 0x125   : > { %v5861_v6 = vpop.f32.mrb[17].mxu0  ;;  %1810 = vst [vmem:[#allocation4 + $0x80] ss:$-124 sps:$4 sm:$0xcf] %v1808_v40   ;;  %v1907_v25 = vrot.slane %v1905_v49, 2 }
 0x126   : > { %v5966_v58 = vpop.f32.mrb[16].mxu1  ;;  %v5862_v51 = vadd.f32 %v5861_v6, %v5860_v5  ;;  %v5863_v13 = vpop.f32.mrb[18].mxu0  ;;  %v2066_v28 = vld [vmem:[#allocation3 + $0x1e] ss:$2 sm:$0x3f] }
 0x127   : > { %v5967_v27 = vpop.f32.mrb[17].mxu1  ;;  %v5864_v46 = vpop.f32.mrb[19].mxu0  ;;  %1843 = vst [vmem:[#allocation4 + $0x88] ss:$-124 sps:$4 sm:$0xcf] %v1841_v34  }
 0x128   : > { %v5968_v18 = vadd.f32 %v5967_v27, %v5966_v58  ;;  %v5969_v30 = vpop.f32.mrb[18].mxu1  ;;  %v1508_v31 = vadd.f32 %v5862_v51, %v7494_v7  ;;  %v5865_v54 = vadd.f32 %v5864_v46, %v5863_v13  ;;  %1876 = vst [vmem:[#allocation4 + $0x90] ss:$-124 sps:$4 sm:$0xcf] %v1874_v48   ;;  %2067 = vst [vmem:[#allocation4 + $0x40] sm:$0x3f] %v2066_v28 }
 0x129   : > { %v5970_v9 = vpop.f32.mrb[19].mxu1  ;;  %v2094_v15 = vld [vmem:[#allocation3 + $0x1f] ss:$2 sm:$0x3f] }
 0x12a   : > { %v5971_v16 = vadd.f32 %v5970_v9, %v5969_v30  ;;  %v1660_v59 = vadd.f32 %v5968_v18, %v1508_v31  ;;  %v1511_v35 = vadd.f32 %v5865_v54, %v7494_v7  ;;  %v2122_v56 = vld [vmem:[#allocation3 + $0x20] ss:$2 sm:$0x3f]  ;;  %2095 = vst [vmem:[#allocation4 + $0x48] sm:$0x3f] %v2094_v15 }
 0x12b   : > { %2123 = vst [vmem:[#allocation4 + $0x50] sm:$0x3f] %v2122_v56  ;;  %v2150_v61 = vld [vmem:[#allocation3 + $0x21] ss:$2 sm:$0x3f] }
 0x12c   : > { %v1753_v52 = vmax.f32 %v1660_v59, 0.0  ;;  %v1663_v60 = vadd.f32 %v5971_v16, %v1511_v35  ;;  %1909 = vst [vmem:[#allocation4 + $0x98] ss:$-124 sps:$4 sm:$0xcf] %v1907_v25   ;;  %2151 = vst [vmem:[#allocation4 + $0x58] sm:$0x3f] %v2150_v61 }
 0x12d   : > { %v1938_v62 = vld [vmem:[#allocation3 + $0x2d] ss:$2 sm:$0x3f]  ;;  %v1971_v33 = vld [vmem:[#allocation3 + $0x2e] ss:$2 sm:$0x3f] }
 0x12e   : > { %1782 = vst [vmem:[#allocation3 + $0x40] sm:$0xff] %v1753_v52  ;;  %v1940_v0 = vrot.slane %v1938_v62, 2  ;;  %v2178_v29 = vld [vmem:[#allocation3 + $0x2d] ss:$2 sm:$0x3f]  ;;  %v1754_v55 = vmax.f32 %v1663_v60, 0.0 }
 0x12f   : > { %v5866_v38 = vpop.f32.mrb[20].mxu0  ;;  %v5972_v36 = vpop.f32.mrb[20].mxu1  ;;  %2179 = vst [vmem:[#allocation4 + $0x60] sm:$0x3f] %v2178_v29  ;;  %v1973_v19 = vrot.slane %v1971_v33, 2 }
 0x130   : > { %v5867_v14 = vpop.f32.mrb[21].mxu0  ;;  %v5973_v42 = vpop.f32.mrb[21].mxu1  ;;  %v2004_v50 = vld [vmem:[#allocation3 + $0x2f] ss:$2 sm:$0x3f]  ;;  %1783 = vst [vmem:[#allocation3 + $0x48] sm:$0xff] %v1754_v55 }
 0x131   : > { %v5868_v41 = vadd.f32 %v5867_v14, %v5866_v38  ;;  %v5974_v4 = vadd.f32 %v5973_v42, %v5972_v36  ;;  %1942 = vst [vmem:[#allocation4 + $0xa0] ss:$-124 sps:$4 sm:$0xcf] %v1940_v0   ;;  %v2006_v57 = vrot.slane %v2004_v50, 2  ;;  %v5869_v8 = vpop.f32.mrb[22].mxu0  ;;  %v5975_v37 = vpop.f32.mrb[22].mxu1 }
 0x132   : > { %v2037_v2 = vld [vmem:[#allocation3 + $0x30] ss:$2 sm:$0x3f]  ;;  %v5870_v20 = vpop.f32.mrb[23].mxu0  ;;  %v5976_v24 = vpop.f32.mrb[23].mxu1 }
 0x133   : > { %v1516_v21 = vadd.f32 %v5868_v41, %v7494_v7  ;;  %v2039_v12 = vrot.slane %v2037_v2, 2  ;;  %v2206_v63 = vld [vmem:[#allocation3 + $0x2e] ss:$2 sm:$0x3f]  ;;  %v5871_v39 = vadd.f32 %v5870_v20, %v5869_v8  ;;  %v5977_v13 = vadd.f32 %v5976_v24, %v5975_v37 }
 0x134   : > { %2008 = vst [vmem:[#allocation4 + $0xb0] ss:$-124 sps:$4 sm:$0xcf] %v2006_v57   ;;  %2207 = vst [vmem:[#allocation4 + $0x68] sm:$0x3f] %v2206_v63  ;;  %v2307_v63 = vld [vmem:[#allocation4 + $0x8] sm:$0xff] }
 0x135   : > { %v1668_v26 = vadd.f32 %v5974_v4, %v1516_v21  ;;  %v2234_v22 = vld [vmem:[#allocation3 + $0x2f] ss:$2 sm:$0x3f]  ;;  %v2262_v10 = vld [vmem:[#allocation3 + $0x30] ss:$2 sm:$0x3f]  ;;  %v1519_v5 = vadd.f32 %v5871_v39, %v7494_v7 }
 0x136   : > { %1975 = vst [vmem:[#allocation4 + $0xa8] ss:$-124 sps:$4 sm:$0xcf] %v1973_v19   ;;  %2235 = vst [vmem:[#allocation4 + $0x70] sm:$0x3f] %v2234_v22  ;;  %v2309_v39 = vld [vmem:[#allocation4 + $0x18] sm:$0xff] }
 0x137   : > { %2263 = vst [vmem:[#allocation4 + $0x78] sm:$0x3f] %v2262_v10  ;;  %2041 = vst [vmem:[#allocation4 + $0xb8] ss:$-124 sps:$4 sm:$0xcf] %v2039_v12   ;;  %v1755_v1 = vmax.f32 %v1668_v26, 0.0  ;;  %v1671_v23 = vadd.f32 %v5977_v13, %v1519_v5 }
 0x138   : > { %v1813_v44 = vld [vmem:[#allocation3 + $0x3c] ss:$2 sm:$0x3f]  ;;  %v1846_v32 = vld [vmem:[#allocation3 + $0x3d] ss:$2 sm:$0x3f] }
 0x139   : > { %v1815_v45 = vrot.slane %v1813_v44, 4  ;;  %v1848_v17 = vrot.slane %v1846_v32, 4  ;;  %v2068_v53 = vld [vmem:[#allocation3 + $0x3c] ss:$2 sm:$0x3f]  ;;  %1784 = vst [vmem:[#allocation3 + $0x50] sm:$0xff] %v1755_v1 }
 0x13a   : > { %v2070_v58 = vrot.slane %v2068_v53, 2  ;;  %v2096_v6 = vld [vmem:[#allocation3 + $0x3d] ss:$2 sm:$0x3f]  ;;  %v5872_v51 = vpop.f32.mrb[24].mxu0  ;;  %v5978_v18 = vpop.f32.mrb[24].mxu1 }
 0x13b   : > { %1817 = vst [vmem:[#allocation4 + $0x100] ss:$-124 sps:$4 sm:$0xf3] %v1815_v45   ;;  %v2098_v27 = vrot.slane %v2096_v6, 2  ;;  %v5873_v30 = vpop.f32.mrb[25].mxu0  ;;  %v5979_v11 = vpop.f32.mrb[25].mxu1 }
 0x13c   : > { %1850 = vst [vmem:[#allocation4 + $0x108] ss:$-124 sps:$4 sm:$0xf3] %v1848_v17   ;;  %2072 = vst [vmem:[#allocation4 + $0xc0] ss:$-124 sps:$4 sm:$0xcf] %v2070_v58   ;;  %v5874_v31 = vadd.f32 %v5873_v30, %v5872_v51  ;;  %v5980_v34 = vadd.f32 %v5979_v11, %v5978_v18 }
 0x13d   : > { %v1879_v46 = vld [vmem:[#allocation3 + $0x3e] ss:$2 sm:$0x3f]  ;;  %v1912_v3 = vld [vmem:[#allocation3 + $0x3f] ss:$2 sm:$0x3f] }
 0x13e   : > { %2100 = vst [vmem:[#allocation4 + $0xc8] ss:$-124 sps:$4 sm:$0xcf] %v2098_v27   ;;  %v1881_v54 = vrot.slane %v1879_v46, 4  ;;  %v1914_v9 = vrot.slane %v1912_v3, 4  ;;  %v1524_v40 = vadd.f32 %v5874_v31, %v7494_v7  ;;  %v5875_v43 = vpop.f32.mrb[26].mxu0 }
 0x13f   : > { %v2124_v16 = vld [vmem:[#allocation3 + $0x3e] ss:$2 sm:$0x3f]  ;;  %v2152_v35 = vld [vmem:[#allocation3 + $0x3f] ss:$2 sm:$0x3f] }
 0x140   : > { %v2126_v59 = vrot.slane %v2124_v16, 2  ;;  %v5981_v48 = vpop.f32.mrb[26].mxu1  ;;  %1883 = vst [vmem:[#allocation4 + $0x110] ss:$-124 sps:$4 sm:$0xf3] %v1881_v54   ;;  %v2154_v49 = vrot.slane %v2152_v35, 2  ;;  %v1676_v25 = vadd.f32 %v5980_v34, %v1524_v40 }
 0x141   : > { %1916 = vst [vmem:[#allocation4 + $0x118] ss:$-124 sps:$4 sm:$0xf3] %v1914_v9   ;;  %v1756_v52 = vmax.f32 %v1671_v23, 0.0  ;;  %v5876_v60 = vpop.f32.mrb[27].mxu0  ;;  %v5982_v38 = vpop.f32.mrb[27].mxu1 }
 0x142   : > { %2128 = vst [vmem:[#allocation4 + $0xd0] ss:$-124 sps:$4 sm:$0xcf] %v2126_v59   ;;  %v5877_v28 = vadd.f32 %v5876_v60, %v5875_v43  ;;  %v5983_v36 = vadd.f32 %v5982_v38, %v5981_v48  ;;  %v5878_v14 = vpop.f32.mrb[28].mxu0  ;;  %v5984_v15 = vpop.f32.mrb[28].mxu1  ;;  %v1757_v50 = vmax.f32 %v1676_v25, 0.0 }
 0x143   : > { %2156 = vst [vmem:[#allocation4 + $0xd8] ss:$-124 sps:$4 sm:$0xcf] %v2154_v49   ;;  %1785 = vst [vmem:[#allocation3 + $0x58] sm:$0xff] %v1756_v52  ;;  %v5879_v56 = vpop.f32.mrb[29].mxu0  ;;  %v5985_v41 = vpop.f32.mrb[29].mxu1 }
 0x144   : > { %v1945_v61 = vld [vmem:[#allocation3 + $0x4b] ss:$2 sm:$0x3f]  ;;  %v1978_v62 = vld [vmem:[#allocation3 + $0x4c] ss:$2 sm:$0x3f]  ;;  %v1527_v0 = vadd.f32 %v5877_v28, %v7494_v7  ;;  %v5880_v29 = vadd.f32 %v5879_v56, %v5878_v14  ;;  %v5986_v55 = vadd.f32 %v5985_v41, %v5984_v15 }
 0x145   : > { %v1947_v21 = vrot.slane %v1945_v61, 4  ;;  %v1980_v42 = vrot.slane %v1978_v62, 4  ;;  %v2011_v33 = vld [vmem:[#allocation3 + $0x4d] ss:$2 sm:$0x3f]  ;;  %v5881_v8 = vpop.f32.mrb[30].mxu0 }
 0x146   : > { %v2013_v4 = vrot.slane %v2011_v33, 4  ;;  %v2180_v19 = vld [vmem:[#allocation3 + $0x4b] ss:$2 sm:$0x3f]  ;;  %v1679_v57 = vadd.f32 %v5983_v36, %v1527_v0  ;;  %v1532_v2 = vadd.f32 %v5880_v29, %v7494_v7  ;;  %v5987_v12 = vpop.f32.mrb[30].mxu1  ;;  %1786 = vst [vmem:[#allocation3 + $0x60] sm:$0xff] %v1757_v50 }
 0x147   : > { %1949 = vst [vmem:[#allocation4 + $0x120] ss:$-124 sps:$4 sm:$0xf3] %v1947_v21   ;;  %v2182_v26 = vrot.slane %v2180_v19, 2  ;;  %v5882_v20 = vpop.f32.mrb[31].mxu0  ;;  %v5988_v22 = vpop.f32.mrb[31].mxu1 }
 0x148   : > { %v2208_v37 = vld [vmem:[#allocation3 + $0x4c] ss:$2 sm:$0x3f]  ;;  %1982 = vst [vmem:[#allocation4 + $0x128] ss:$-124 sps:$4 sm:$0xf3] %v1980_v42   ;;  %v1684_v1 = vadd.f32 %v5986_v55, %v1532_v2  ;;  %v5883_v5 = vadd.f32 %v5882_v20, %v5881_v8  ;;  %v5989_v27 = vadd.f32 %v5988_v22, %v5987_v12 }
 0x149   : > { %v2306_v10 = vld [vmem:[#allocation4] sm:$0xff]  ;;  %v2308_v44 = vld [vmem:[#allocation4 + $0x10] sm:$0xff]  ;;  %v6570_v32 = vld [vmem:[%s8206_s2 + $0x100] sm:$0xff]   ;;  %2015 = vst [vmem:[#allocation4 + $0x130] ss:$-124 sps:$4 sm:$0xf3] %v2013_v4  }
 0x14a   : > { %v2210_v45 = vrot.slane %v2208_v37, 2  ;;  %v2236_v17 = vld [vmem:[#allocation3 + $0x4d] ss:$2 sm:$0x3f]  ;;  %v1758_v53 = vmax.f32 %v1679_v57, 0.0  ;;  %v6571_v6 = vld [vmem:[%s8206_s2 + $0x180] sm:$0xff]   ;;  %v1535_v9 = vadd.f32 %v5883_v5, %v7494_v7 }
 0x14b   : > { %v2323_v58 = vld [vmem:[#allocation4 + $0x88] sm:$0xff]  ;;  %v6572_v24 = vld [vmem:[%s8206_s2 + $0x148] sm:$0xff]   ;;  %2184 = vst [vmem:[#allocation4 + $0xe0] ss:$-124 sps:$4 sm:$0xcf] %v2182_v26   ;;  %v2238_v51 = vrot.slane %v2236_v17, 2 }
 0x14c   : > { %v2387_v13 = vpack.c.bf16 %v2323_v58, %v2307_v63  ;;  %v2322_v18 = vld [vmem:[#allocation4 + $0x80] sm:$0xff]  ;;  %v5884_v30 = vpop.f32.mrb[32].mxu0  ;;  %v2325_v46 = vld [vmem:[#allocation4 + $0x98] sm:$0xff]  ;;  %v2324_v3 = vld [vmem:[#allocation4 + $0x90] sm:$0xff]  ;;  %1787 = vst [vmem:[#allocation3 + $0x68] sm:$0xff] %v1758_v53  ;;  %v1759_v40 = vmax.f32 %v1684_v1, 0.0  ;;  %v1687_v49 = vadd.f32 %v5989_v27, %v1535_v9 }
 0x14d   : > { %2212 = vst [vmem:[#allocation4 + $0xe8] ss:$-124 sps:$4 sm:$0xcf] %v2210_v45   ;;  %v2044_v31 = vld [vmem:[#allocation3 + $0x4e] ss:$2 sm:$0x3f]  ;;  %v2386_v16 = vpack.c.bf16 %v2322_v18, %v2306_v10  ;;  %v2389_v23 = vpack.c.bf16 %v2325_v46, %v2309_v39  ;;  %v2388_v11 = vpack.c.bf16 %v2324_v3, %v2308_v44 }
 0x14e   : > { %v2264_v54 = vld [vmem:[#allocation3 + $0x4e] ss:$2 sm:$0x3f]  ;;  %2240 = vst [vmem:[#allocation4 + $0xf0] ss:$-124 sps:$4 sm:$0xcf] %v2238_v51   ;;  %3495 = vmatprep.mubr.bf16.mxu0 %v2387_v13 }
 0x14f   : > { %v2046_v59 = vrot.slane %v2044_v31, 4  ;;  %v2266_v35 = vrot.slane %v2264_v54, 2  ;;  %v5990_v34 = vpop.f32.mrb[32].mxu1  ;;  %v5885_v43 = vpop.f32.mrb[33].mxu0  ;;  %v6573_v48 = vld [vmem:[%s8206_s2 + $0x1c8] sm:$0xff]   ;;  %3496 = vmatmul.mubr.bf16.vlgmr.msra.gmra.mrb[60].mxu0 %v2386_v16  ;;  %3551 = vmatprep.mubr.bf16.mxu1 %v2389_v23  ;;  %1788 = vst [vmem:[#allocation3 + $0x70] sm:$0xff] %v1759_v40 }
 0x150   : > { %v5886_v52 = vadd.f32 %v5885_v43, %v5884_v30  ;;  %v5991_v60 = vpop.f32.mrb[33].mxu1  ;;  %v5887_v38 = vpop.f32.mrb[34].mxu0  ;;  %v6574_v25 = vld [vmem:[%s8206_s2 + $0x108] sm:$0xff]   ;;  %3552 = vmatmul.mubr.bf16.vlgmr.msra.gmra.mrb[60].mxu1 %v2388_v11  ;;  %6101 = vmatpush3.bf16.msra.mxu0 %v6570_v32  ;;  %v6576_v56 = vld [vmem:[%s8206_s2 + $0x150] sm:$0xff]   ;;  %v1760_v33 = vmax.f32 %v1687_v49, 0.0  ;;  %v6580_v63 = vld [vmem:[%s8206_s2 + $0x158] sm:$0xff]  }
 0x151   : > { %2048 = vst [vmem:[#allocation4 + $0x138] ss:$-124 sps:$4 sm:$0xf3] %v2046_v59   ;;  %2268 = vst [vmem:[#allocation4 + $0xf8] ss:$-124 sps:$4 sm:$0xcf] %v2266_v35   ;;  %v5992_v28 = vadd.f32 %v5991_v60, %v5990_v34  ;;  %6135 = vmatpush3.bf16.msra.mxu1 %v6571_v6  ;;  %6102 = vmatprep.subr.bf16.mxu0 %v6572_v24 }
 0x152   : > { %v5993_v36 = vpop.f32.mrb[34].mxu1  ;;  %v5888_v14 = vpop.f32.mrb[35].mxu0  ;;  %v6575_v15 = vld [vmem:[%s8206_s2 + $0x188] sm:$0xff]   ;;  %v6577_v41 = vld [vmem:[%s8206_s2 + $0x1d0] sm:$0xff]   ;;  %v1540_v0 = vadd.f32 %v5886_v52, %v7494_v7  ;;  %6136 = vmatprep.subr.bf16.mxu1 %v6573_v48  ;;  %1789 = vst [vmem:[#allocation3 + $0x78] sm:$0xff] %v1760_v33  ;;  %v6581_v10 = vld [vmem:[%s8206_s2 + $0x1d8] sm:$0xff]  }
 0x153   : > { %v1820_v61 = vld [vmem:[#allocation3 + $0x5a] ss:$2 sm:$0x3f]  ;;  %v1853_v62 = vld [vmem:[#allocation3 + $0x5b] ss:$2 sm:$0x3f]  ;;  %v5889_v29 = vadd.f32 %v5888_v14, %v5887_v38 }
 0x154   : > { %v1822_v55 = vrot.slane %v1820_v61, 6  ;;  %v1855_v21 = vrot.slane %v1853_v62, 6  ;;  %v1886_v42 = vld [vmem:[#allocation3 + $0x5c] ss:$2 sm:$0x3f]  ;;  %v6578_v50 = vld [vmem:[%s8206_s2 + $0x110] sm:$0xff]   ;;  %v1692_v57 = vadd.f32 %v5992_v28, %v1540_v0  ;;  %6103 = vmatpush3.bf16.msra.mxu0 %v6574_v25 }
 0x155   : > { %v1888_v4 = vrot.slane %v1886_v42, 6  ;;  %v1919_v19 = vld [vmem:[#allocation3 + $0x5d] ss:$2 sm:$0x3f]  ;;  %v1543_v2 = vadd.f32 %v5889_v29, %v7494_v7  ;;  %v5994_v8 = vpop.f32.mrb[35].mxu1  ;;  %v6579_v12 = vld [vmem:[%s8206_s2 + $0x190] sm:$0xff]   ;;  %6137 = vmatpush3.bf16.msra.mxu1 %v6575_v15  ;;  %6104 = vmatprep.subr.bf16.mxu0 %v6576_v56 }
 0x156   : > { %1824 = vst [vmem:[#allocation4 + $0x100] sm:$0xfc] %v1822_v55  ;;  %1857 = vst [vmem:[#allocation4 + $0x108] sm:$0xfc] %v1855_v21  ;;  %v1921_v26 = vrot.slane %v1919_v19, 6  ;;  %v5995_v20 = vadd.f32 %v5994_v8, %v5993_v36  ;;  %v5890_v22 = vpop.f32.mrb[36].mxu0  ;;  %6138 = vmatprep.subr.bf16.mxu1 %v6577_v41 }
 0x157   : > { %v2074_v37 = vld [vmem:[#allocation3 + $0x5a] ss:$2 sm:$0x3f]  ;;  %1890 = vst [vmem:[#allocation4 + $0x110] sm:$0xfc] %v1888_v4  ;;  %v1761_v32 = vmax.f32 %v1692_v57, 0.0 }
 0x158   : > { %v2076_v39 = vrot.slane %v2074_v37, 4  ;;  %v2102_v44 = vld [vmem:[#allocation3 + $0x5b] ss:$2 sm:$0x3f]  ;;  %v5996_v45 = vpop.f32.mrb[36].mxu1  ;;  %v1695_v1 = vadd.f32 %v5995_v20, %v1543_v2  ;;  %v5891_v5 = vpop.f32.mrb[37].mxu0  ;;  %6105 = vmatpush3.bf16.msra.mxu0 %v6578_v50 }
 0x159   : > { %1923 = vst [vmem:[#allocation4 + $0x118] sm:$0xfc] %v1921_v26  ;;  %v2104_v17 = vrot.slane %v2102_v44, 4  ;;  %v2130_v53 = vld [vmem:[#allocation3 + $0x5c] ss:$2 sm:$0x3f]  ;;  %v5892_v27 = vadd.f32 %v5891_v5, %v5890_v22  ;;  %6139 = vmatpush3.bf16.msra.mxu1 %v6579_v12  ;;  %6106 = vmatprep.subr.bf16.mxu0 %v6580_v63 }
 0x15a   : > { %v5997_v58 = vpop.f32.mrb[37].mxu1  ;;  %v6582_v6 = vld [vmem:[%s8206_s2 + $0x118] sm:$0xff]   ;;  %2078 = vst [vmem:[#allocation4 + $0x140] ss:$-124 sps:$4 sm:$0xf3] %v2076_v39   ;;  %v2132_v24 = vrot.slane %v2130_v53, 4  ;;  %6140 = vmatprep.subr.bf16.mxu1 %v6581_v10 }
 0x15b   : > { %v2158_v51 = vld [vmem:[#allocation3 + $0x5d] ss:$2 sm:$0x3f]  ;;  %1790 = vst [vmem:[#allocation3 + $0x80] sm:$0xff] %v1761_v32  ;;  %v5998_v13 = vadd.f32 %v5997_v58, %v5996_v45  ;;  %v5893_v18 = vpop.f32.mrb[38].mxu0  ;;  %v5999_v30 = vpop.f32.mrb[38].mxu1  ;;  %v1548_v11 = vadd.f32 %v5892_v27, %v7494_v7 }
 0x15c   : > { %v6583_v46 = vld [vmem:[%s8206_s2 + $0x198] sm:$0xff]   ;;  %v2160_v3 = vrot.slane %v2158_v51, 4  ;;  %2106 = vst [vmem:[#allocation4 + $0x148] ss:$-124 sps:$4 sm:$0xf3] %v2104_v17   ;;  %v1762_v54 = vmax.f32 %v1695_v1, 0.0  ;;  %6107 = vmatpush3.bf16.msra.mxu0 %v6582_v6 }
 0x15d   : > { %v1952_v31 = vld [vmem:[#allocation3 + $0x69] ss:$2 sm:$0x3f]  ;;  %v5894_v9 = vpop.f32.mrb[39].mxu0  ;;  %v6000_v35 = vpop.f32.mrb[39].mxu1  ;;  %v6584_v40 = vld [vmem:[%s8206_s2 + $0x160] sm:$0xff]   ;;  %v1700_v25 = vadd.f32 %v5998_v13, %v1548_v11  ;;  %6141 = vmatpush3.bf16.msra.mxu1 %v6583_v46 }
 0x15e   : > { %2134 = vst [vmem:[#allocation4 + $0x150] ss:$-124 sps:$4 sm:$0xf3] %v2132_v24   ;;  %v1954_v16 = vrot.slane %v1952_v31, 6  ;;  %v5895_v59 = vadd.f32 %v5894_v9, %v5893_v18  ;;  %1791 = vst [vmem:[#allocation3 + $0x88] sm:$0xff] %v1762_v54  ;;  %v6001_v48 = vadd.f32 %v6000_v35, %v5999_v30  ;;  %v6585_v49 = vld [vmem:[%s8206_s2 + $0x1e0] sm:$0xff]   ;;  %6108 = vmatprep.subr.bf16.mxu0 %v6584_v40 }
 0x15f   : > { %v1985_v23 = vld [vmem:[#allocation3 + $0x6a] ss:$2 sm:$0x3f]  ;;  %2162 = vst [vmem:[#allocation4 + $0x158] ss:$-124 sps:$4 sm:$0xf3] %v2160_v3   ;;  %6142 = vmatprep.subr.bf16.mxu1 %v6585_v49 }
 0x160   : > { %v1987_v34 = vrot.slane %v1985_v23, 6  ;;  %v2018_v43 = vld [vmem:[#allocation3 + $0x6b] ss:$2 sm:$0x3f]  ;;  %v6586_v52 = vld [vmem:[%s8206_s2 + $0x120] sm:$0xff]   ;;  %v1551_v28 = vadd.f32 %v5895_v59, %v7494_v7  ;;  %v5896_v41 = vpop.f32.mrb[40].mxu0 }
 0x161   : > { %1956 = vst [vmem:[#allocation4 + $0x120] sm:$0xfc] %v1954_v16  ;;  %v2020_v60 = vrot.slane %v2018_v43, 6  ;;  %v2051_v38 = vld [vmem:[#allocation3 + $0x6c] ss:$2 sm:$0x3f]  ;;  %6109 = vmatpush3.bf16.msra.mxu0 %v6586_v52 }
 0x162   : > { %v6587_v36 = vld [vmem:[%s8206_s2 + $0x1a0] sm:$0xff]   ;;  %v6588_v14 = vld [vmem:[%s8206_s2 + $0x168] sm:$0xff]   ;;  %1989 = vst [vmem:[#allocation4 + $0x128] sm:$0xfc] %v1987_v34  ;;  %v2053_v15 = vrot.slane %v2051_v38, 6  ;;  %v1763_v29 = vmax.f32 %v1700_v25, 0.0  ;;  %v1703_v55 = vadd.f32 %v6001_v48, %v1551_v28 }
 0x163   : > { %v2186_v56 = vld [vmem:[#allocation3 + $0x69] ss:$2 sm:$0x3f]  ;;  %2022 = vst [vmem:[#allocation4 + $0x130] sm:$0xfc] %v2020_v60  ;;  %v6002_v21 = vpop.f32.mrb[40].mxu1  ;;  %6143 = vmatpush3.bf16.msra.mxu1 %v6587_v36  ;;  %6110 = vmatprep.subr.bf16.mxu0 %v6588_v14 }
 0x164   : > { %v6589_v61 = vld [vmem:[%s8206_s2 + $0x1e8] sm:$0xff]   ;;  %v2188_v62 = vrot.slane %v2186_v56, 4  ;;  %2055 = vst [vmem:[#allocation4 + $0x138] sm:$0xfc] %v2053_v15  ;;  %v5897_v50 = vpop.f32.mrb[41].mxu0  ;;  %v6003_v4 = vpop.f32.mrb[41].mxu1 }
 0x165   : > { %v2214_v0 = vld [vmem:[#allocation3 + $0x6a] ss:$2 sm:$0x3f]  ;;  %v2242_v33 = vld [vmem:[#allocation3 + $0x6b] ss:$2 sm:$0x3f]  ;;  %v5898_v12 = vadd.f32 %v5897_v50, %v5896_v41  ;;  %v6004_v63 = vadd.f32 %v6003_v4, %v6002_v21  ;;  %6144 = vmatprep.subr.bf16.mxu1 %v6589_v61 }
 0x166   : > { %v2216_v42 = vrot.slane %v2214_v0, 4  ;;  %v6590_v19 = vld [vmem:[%s8206_s2 + $0x128] sm:$0xff]   ;;  %2190 = vst [vmem:[#allocation4 + $0x160] ss:$-124 sps:$4 sm:$0xf3] %v2188_v62   ;;  %v2244_v57 = vrot.slane %v2242_v33, 4 }
 0x167   : > { %v2270_v2 = vld [vmem:[#allocation3 + $0x6c] ss:$2 sm:$0x3f]  ;;  %1792 = vst [vmem:[#allocation3 + $0x90] sm:$0xff] %v1763_v29  ;;  %v1764_v8 = vmax.f32 %v1703_v55, 0.0  ;;  %v5899_v26 = vpop.f32.mrb[42].mxu0  ;;  %v1556_v53 = vadd.f32 %v5898_v12, %v7494_v7  ;;  %6111 = vmatpush3.bf16.msra.mxu0 %v6590_v19 }
 0x168   : > { %v6591_v37 = vld [vmem:[%s8206_s2 + $0x1a8] sm:$0xff]   ;;  %v6592_v20 = vld [vmem:[%s8206_s2 + $0x170] sm:$0xff]   ;;  %v2272_v22 = vrot.slane %v2270_v2, 4  ;;  %2218 = vst [vmem:[#allocation4 + $0x168] ss:$-124 sps:$4 sm:$0xf3] %v2216_v42  }
 0x169   : > { %v1826_v10 = vld [vmem:[#allocation3 + $0x78] ss:$2 sm:$0x3f]  ;;  %v6005_v39 = vpop.f32.mrb[42].mxu1  ;;  %v5900_v44 = vpop.f32.mrb[43].mxu0  ;;  %v6593_v32 = vld [vmem:[%s8206_s2 + $0x1f0] sm:$0xff]   ;;  %v1708_v27 = vadd.f32 %v6004_v63, %v1556_v53  ;;  %6145 = vmatpush3.bf16.msra.mxu1 %v6591_v37  ;;  %6112 = vmatprep.subr.bf16.mxu0 %v6592_v20 }
 0x16a   : > { %2246 = vst [vmem:[#allocation4 + $0x170] ss:$-124 sps:$4 sm:$0xf3] %v2244_v57   ;;  %1827 = vst [vmem:[#allocation4 + $0x180] sm:$0x3f] %v1826_v10  ;;  %v5901_v1 = vadd.f32 %v5900_v44, %v5899_v26  ;;  %v6594_v6 = vld [vmem:[%s8206_s2 + $0x130] sm:$0xff]   ;;  %6146 = vmatprep.subr.bf16.mxu1 %v6593_v32 }
 0x16b   : > { %v1859_v45 = vld [vmem:[#allocation3 + $0x79] ss:$2 sm:$0x3f]  ;;  %v1892_v17 = vld [vmem:[#allocation3 + $0x7a] ss:$2 sm:$0x3f]  ;;  %6113 = vmatpush3.bf16.msra.mxu0 %v6594_v6 }
 0x16c   : > { %1793 = vst [vmem:[#allocation3 + $0x98] sm:$0xff] %v1764_v8  ;;  %2274 = vst [vmem:[#allocation4 + $0x178] ss:$-124 sps:$4 sm:$0xf3] %v2272_v22   ;;  %v1559_v13 = vadd.f32 %v5901_v1, %v7494_v7  ;;  %v6006_v18 = vpop.f32.mrb[43].mxu1  ;;  %v6595_v30 = vld [vmem:[%s8206_s2 + $0x1b0] sm:$0xff]  }
 0x16d   : > { %1860 = vst [vmem:[#allocation4 + $0x188] sm:$0x3f] %v1859_v45  ;;  %1893 = vst [vmem:[#allocation4 + $0x190] sm:$0x3f] %v1892_v17  ;;  %v6596_v46 = vld [vmem:[%s8206_s2 + $0x178] sm:$0xff]   ;;  %v6007_v54 = vadd.f32 %v6006_v18, %v6005_v39  ;;  %v5902_v9 = vpop.f32.mrb[44].mxu0  ;;  %6147 = vmatpush3.bf16.msra.mxu1 %v6595_v30 }
 0x16e   : > { %v1925_v5 = vld [vmem:[#allocation3 + $0x7b] ss:$2 sm:$0x3f]  ;;  %v2080_v58 = vld [vmem:[#allocation3 + $0x78] ss:$2 sm:$0x3f]  ;;  %6114 = vmatprep.subr.bf16.mxu0 %v6596_v46 }
 0x16f   : > { %1926 = vst [vmem:[#allocation4 + $0x198] sm:$0x3f] %v1925_v5  ;;  %v2082_v24 = vrot.slane %v2080_v58, 6  ;;  %v2108_v51 = vld [vmem:[#allocation3 + $0x79] ss:$2 sm:$0x3f]  ;;  %v1711_v43 = vadd.f32 %v6007_v54, %v1559_v13 }
 0x170   : > { %v2110_v3 = vrot.slane %v2108_v51, 6  ;;  %v2136_v31 = vld [vmem:[#allocation3 + $0x7a] ss:$2 sm:$0x3f]  ;;  %v1765_v59 = vmax.f32 %v1708_v27, 0.0  ;;  %v5903_v35 = vpop.f32.mrb[45].mxu0 }
 0x171   : > { %v6597_v16 = vld [vmem:[%s8206_s2 + $0x1f8] sm:$0xff]   ;;  %2084 = vst [vmem:[#allocation4 + $0x140] sm:$0xfc] %v2082_v24  ;;  %v2138_v23 = vrot.slane %v2136_v31, 6  ;;  %v5904_v48 = vadd.f32 %v5903_v35, %v5902_v9  ;;  %v5905_v49 = vpop.f32.mrb[46].mxu0  ;;  %v6008_v52 = vpop.f32.mrb[44].mxu1 }
 0x172   : > { %v2164_v11 = vld [vmem:[#allocation3 + $0x7b] ss:$2 sm:$0x3f]  ;;  %2112 = vst [vmem:[#allocation4 + $0x148] sm:$0xfc] %v2110_v3  ;;  %1794 = vst [vmem:[#allocation3 + $0xa0] sm:$0xff] %v1765_v59  ;;  %6148 = vmatprep.subr.bf16.mxu1 %v6597_v16 }
 0x173   : > { %v2166_v40 = vrot.slane %v2164_v11, 6  ;;  %v1958_v34 = vld [vmem:[#allocation3 + $0x87] ss:$2 sm:$0x3f]  ;;  %v6598_v60 = vld [vmem:[%s8206_s2 + $0x138] sm:$0xff]   ;;  %v1766_v61 = vmax.f32 %v1711_v43, 0.0  ;;  %v1564_v62 = vadd.f32 %v5904_v48, %v7494_v7 }
 0x174   : > { %2140 = vst [vmem:[#allocation4 + $0x150] sm:$0xfc] %v2138_v23  ;;  %1959 = vst [vmem:[#allocation4 + $0x1a0] sm:$0x3f] %v1958_v34  ;;  %v6599_v28 = vld [vmem:[%s8206_s2 + $0x1b8] sm:$0xff]   ;;  %v6600_v36 = vld [vmem:[%s8206_s2 + $0x240] sm:$0xff]   ;;  %6115 = vmatpush3.bf16.msra.mxu0 %v6598_v60 }
 0x175   : > { %v1991_v38 = vld [vmem:[#allocation3 + $0x88] ss:$2 sm:$0x3f]  ;;  %v2024_v25 = vld [vmem:[#allocation3 + $0x89] ss:$2 sm:$0x3f]  ;;  %6149 = vmatpush3.bf16.msra.mxu1 %v6599_v28  ;;  %6168 = vmatprep.subr.bf16.mxu0 %v6600_v36 }
 0x176   : > { %2168 = vst [vmem:[#allocation4 + $0x158] sm:$0xfc] %v2166_v40  ;;  %1992 = vst [vmem:[#allocation4 + $0x1a8] sm:$0x3f] %v1991_v38  ;;  %v5906_v0 = vpop.f32.mrb[47].mxu0  ;;  %v6009_v42 = vpop.f32.mrb[45].mxu1 }
 0x177   : > { %2025 = vst [vmem:[#allocation4 + $0x1b0] sm:$0x3f] %v2024_v25  ;;  %v2057_v14 = vld [vmem:[#allocation3 + $0x8a] ss:$2 sm:$0x3f]  ;;  %v5907_v21 = vadd.f32 %v5906_v0, %v5905_v49  ;;  %v6601_v33 = vld [vmem:[%s8206_s2 + $0x2c0] sm:$0xff]   ;;  %v6010_v19 = vadd.f32 %v6009_v42, %v6008_v52 }
 0x178   : > { %v2192_v15 = vld [vmem:[#allocation3 + $0x87] ss:$2 sm:$0x3f]  ;;  %2058 = vst [vmem:[#allocation4 + $0x1b8] sm:$0x3f] %v2057_v14  ;;  %1795 = vst [vmem:[#allocation3 + $0xa8] sm:$0xff] %v1766_v61  ;;  %6202 = vmatprep.subr.bf16.mxu1 %v6601_v33 }
 0x179   : > { %v2194_v56 = vrot.slane %v2192_v15, 6  ;;  %v2220_v41 = vld [vmem:[#allocation3 + $0x88] ss:$2 sm:$0x3f]  ;;  %v6011_v57 = vpop.f32.mrb[46].mxu1  ;;  %v5908_v63 = vpop.f32.mrb[48].mxu0  ;;  %v1716_v26 = vadd.f32 %v6010_v19, %v1564_v62 }
 0x17a   : > { %v2222_v29 = vrot.slane %v2220_v41, 6  ;;  %v2248_v55 = vld [vmem:[#allocation3 + $0x89] ss:$2 sm:$0x3f]  ;;  %v7618_v2 = vld [vmem:[%s8210_s6] ss:$0 sm:$0xff] }
 0x17b   : > { %2196 = vst [vmem:[#allocation4 + $0x160] sm:$0xfc] %v2194_v56  ;;  %v2250_v50 = vrot.slane %v2248_v55, 6  ;;  %v2276_v4 = vld [vmem:[#allocation3 + $0x8a] ss:$2 sm:$0x3f]  ;;  %v1567_v8 = vadd.f32 %v7618_v2, %v5907_v21 }
 0x17c   : > { %2224 = vst [vmem:[#allocation4 + $0x168] sm:$0xfc] %v2222_v29  ;;  %v2278_v7 = vrot.slane %v2276_v4, 6  ;;  %v6012_v12 = vpop.f32.mrb[47].mxu1  ;;  %v5909_v20 = vpop.f32.mrb[49].mxu0  ;;  %v1767_v53 = vmax.f32 %v1716_v26, 0.0 }
 0x17d   : > { %2252 = vst [vmem:[#allocation4 + $0x170] sm:$0xfc] %v2250_v50  ;;  %v6013_v37 = vadd.f32 %v6012_v12, %v6011_v57  ;;  %v6014_v22 = vpop.f32.mrb[48].mxu1  ;;  %v1829_v10 = vld [vmem:[#allocation3 + $0x96] ss:$2 sm:$0x3f]  ;;  %v5910_v44 = vadd.f32 %v5909_v20, %v5908_v63 }
 0x17e   : > { %2280 = vst [vmem:[#allocation4 + $0x178] sm:$0xfc] %v2278_v7  ;;  %v1862_v39 = vld [vmem:[#allocation3 + $0x97] ss:$2 sm:$0x3f]  ;;  %v1831_v32 = vrot.slane %v1829_v10, 2 }
 0x17f   : > { %v1864_v45 = vrot.slane %v1862_v39, 2  ;;  %v1895_v17 = vld [vmem:[#allocation3 + $0x98] ss:$2 sm:$0x3f]  ;;  %v1719_v1 = vadd.f32 %v6013_v37, %v1567_v8  ;;  %v1572_v6 = vadd.f32 %v7618_v2, %v5910_v44  ;;  %v5911_v24 = vpop.f32.mrb[50].mxu0  ;;  %v6015_v51 = vpop.f32.mrb[49].mxu1 }
 0x180   : > { %v1897_v5 = vrot.slane %v1895_v17, 2  ;;  %v1928_v58 = vld [vmem:[#allocation3 + $0x99] ss:$2 sm:$0x3f]  ;;  %1796 = vst [vmem:[#allocation3 + $0xb0] sm:$0xff] %v1767_v53  ;;  %v5912_v30 = vpop.f32.mrb[51].mxu0  ;;  %v6016_v46 = vadd.f32 %v6015_v51, %v6014_v22 }
 0x181   : > { %v1930_v27 = vrot.slane %v1928_v58, 2  ;;  %v2085_v13 = vld [vmem:[#allocation3 + $0x96] ss:$2 sm:$0x3f]  ;;  %v1768_v18 = vmax.f32 %v1719_v1, 0.0  ;;  %v5913_v54 = vadd.f32 %v5912_v30, %v5911_v24  ;;  %v6017_v40 = vpop.f32.mrb[50].mxu1 }
 0x182   : > { %1833 = vst [vmem:[#allocation4 + $0x200] ss:$-124 sps:$4 sm:$0xcf] %v1831_v32   ;;  %1866 = vst [vmem:[#allocation4 + $0x208] ss:$-124 sps:$4 sm:$0xcf] %v1864_v45   ;;  %v1724_v23 = vadd.f32 %v6016_v46, %v1572_v6 }
 0x183   : > { %2086 = vst [vmem:[#allocation4 + $0x1c0] sm:$0x3f] %v2085_v13  ;;  %v2113_v3 = vld [vmem:[#allocation3 + $0x97] ss:$2 sm:$0x3f]  ;;  %1797 = vst [vmem:[#allocation3 + $0xb8] sm:$0xff] %v1768_v18  ;;  %v1575_v35 = vadd.f32 %v7618_v2, %v5913_v54 }
 0x184   : > { %v2141_v31 = vld [vmem:[#allocation3 + $0x98] ss:$2 sm:$0x3f]  ;;  %1899 = vst [vmem:[#allocation4 + $0x210] ss:$-124 sps:$4 sm:$0xcf] %v1897_v5  }
 0x185   : > { %2114 = vst [vmem:[#allocation4 + $0x1c8] sm:$0x3f] %v2113_v3  ;;  %2142 = vst [vmem:[#allocation4 + $0x1d0] sm:$0x3f] %v2141_v31  ;;  %v5914_v34 = vpop.f32.mrb[52].mxu0  ;;  %v1769_v43 = vmax.f32 %v1724_v23, 0.0 }
 0x186   : > { %v2169_v9 = vld [vmem:[#allocation3 + $0x99] ss:$2 sm:$0x3f]  ;;  %1932 = vst [vmem:[#allocation4 + $0x218] ss:$-124 sps:$4 sm:$0xcf] %v1930_v27  }
 0x187   : > { %v1961_v16 = vld [vmem:[#allocation3 + $0xa5] ss:$2 sm:$0x3f]  ;;  %2170 = vst [vmem:[#allocation4 + $0x1d8] sm:$0x3f] %v2169_v9  ;;  %v6018_v48 = vpop.f32.mrb[51].mxu1 }
 0x188   : > { %v1963_v11 = vrot.slane %v1961_v16, 2  ;;  %v2197_v59 = vld [vmem:[#allocation3 + $0xa5] ss:$2 sm:$0x3f]  ;;  %v5915_v49 = vpop.f32.mrb[53].mxu0  ;;  %v6019_v52 = vadd.f32 %v6018_v48, %v6017_v40  ;;  %v6020_v38 = vpop.f32.mrb[52].mxu1 }
 0x189   : > { %2198 = vst [vmem:[#allocation4 + $0x1e0] sm:$0x3f] %v2197_v59  ;;  %v5916_v60 = vadd.f32 %v5915_v49, %v5914_v34  ;;  %v5917_v25 = vpop.f32.mrb[54].mxu0  ;;  %1798 = vst [vmem:[#allocation3 + $0xc0] sm:$0xff] %v1769_v43  ;;  %v6021_v28 = vpop.f32.mrb[53].mxu1  ;;  %v2339_v36 = vld [vmem:[#allocation4 + $0x108] sm:$0xff] }
 0x18a   : > { %1965 = vst [vmem:[#allocation4 + $0x220] ss:$-124 sps:$4 sm:$0xcf] %v1963_v11   ;;  %v5918_v14 = vpop.f32.mrb[55].mxu0  ;;  %v1727_v41 = vadd.f32 %v6019_v52, %v1575_v35  ;;  %v6022_v62 = vadd.f32 %v6021_v28, %v6020_v38  ;;  %v2341_v0 = vld [vmem:[#allocation4 + $0x118] sm:$0xff]  ;;  %v2355_v42 = vld [vmem:[#allocation4 + $0x188] sm:$0xff] }
 0x18b   : > { %v1994_v15 = vld [vmem:[#allocation3 + $0xa6] ss:$2 sm:$0x3f]  ;;  %v2027_v56 = vld [vmem:[#allocation3 + $0xa7] ss:$2 sm:$0x3f]  ;;  %v1580_v61 = vadd.f32 %v7618_v2, %v5916_v60  ;;  %v2403_v57 = vpack.c.bf16 %v2355_v42, %v2339_v36 }
 0x18c   : > { %v1996_v29 = vrot.slane %v1994_v15, 2  ;;  %v2029_v55 = vrot.slane %v2027_v56, 2  ;;  %v2060_v21 = vld [vmem:[#allocation3 + $0xa8] ss:$2 sm:$0x3f]  ;;  %v1770_v4 = vmax.f32 %v1727_v41, 0.0 }
 0x18d   : > { %v2062_v33 = vrot.slane %v2060_v21, 2  ;;  %v2225_v50 = vld [vmem:[#allocation3 + $0xa6] ss:$2 sm:$0x3f]  ;;  %v1732_v19 = vadd.f32 %v6022_v62, %v1580_v61  ;;  %v2340_v2 = vld [vmem:[#allocation4 + $0x110] sm:$0xff]  ;;  %3503 = vmatprep.mubr.bf16.mxu0 %v2403_v57  ;;  %v6023_v27 = vpop.f32.mrb[54].mxu1 }
 0x18e   : > { %v2357_v7 = vld [vmem:[#allocation4 + $0x198] sm:$0xff]  ;;  %2226 = vst [vmem:[#allocation4 + $0x1e8] sm:$0x3f] %v2225_v50  ;;  %v2281_v12 = vld [vmem:[#allocation3 + $0xa8] ss:$2 sm:$0x3f] }
 0x18f   : > { %v2253_v8 = vld [vmem:[#allocation3 + $0xa7] ss:$2 sm:$0x3f]  ;;  %1998 = vst [vmem:[#allocation4 + $0x228] ss:$-124 sps:$4 sm:$0xcf] %v1996_v29   ;;  %v2405_v63 = vpack.c.bf16 %v2357_v7, %v2341_v0 }
 0x190   : > { %2031 = vst [vmem:[#allocation4 + $0x230] ss:$-124 sps:$4 sm:$0xcf] %v2029_v55   ;;  %v2338_v26 = vld [vmem:[#allocation4 + $0x100] sm:$0xff]  ;;  %2254 = vst [vmem:[#allocation4 + $0x1f0] sm:$0x3f] %v2253_v8 }
 0x191   : > { %2282 = vst [vmem:[#allocation4 + $0x1f8] sm:$0x3f] %v2281_v12  ;;  %2064 = vst [vmem:[#allocation4 + $0x238] ss:$-124 sps:$4 sm:$0xcf] %v2062_v33   ;;  %v1771_v39 = vmax.f32 %v1732_v19, 0.0  ;;  %3559 = vmatprep.mubr.bf16.mxu1 %v2405_v63 }
 0x192   : > { %v2088_v37 = vld [vmem:[#allocation3 + $0xb4] ss:$2 sm:$0x3f]  ;;  %v2116_v20 = vld [vmem:[#allocation3 + $0xb5] ss:$2 sm:$0x3f] }
 0x193   : > { %1799 = vst [vmem:[#allocation3 + $0xc8] sm:$0xff] %v1770_v4  ;;  %v2090_v22 = vrot.slane %v2088_v37, 2  ;;  %v2118_v10 = vrot.slane %v2116_v20, 2  ;;  %v2354_v44 = vld [vmem:[#allocation4 + $0x180] sm:$0xff]  ;;  %v2356_v32 = vld [vmem:[#allocation4 + $0x190] sm:$0xff]  ;;  %v2371_v45 = vld [vmem:[#allocation4 + $0x208] sm:$0xff] }
 0x194   : > { %v2144_v17 = vld [vmem:[#allocation3 + $0xb6] ss:$2 sm:$0x3f]  ;;  %v2172_v53 = vld [vmem:[#allocation3 + $0xb7] ss:$2 sm:$0x3f]  ;;  %v2402_v1 = vpack.c.bf16 %v2354_v44, %v2338_v26  ;;  %v2404_v5 = vpack.c.bf16 %v2356_v32, %v2340_v2  ;;  %v2419_v24 = vpack.c.bf16 %v2371_v45, %v2371_v45 }
 0x195   : > { %2092 = vst [vmem:[#allocation4 + $0x240] ss:$-124 sps:$4 sm:$0xcf] %v2090_v22   ;;  %2120 = vst [vmem:[#allocation4 + $0x248] ss:$-124 sps:$4 sm:$0xcf] %v2118_v10  }
 0x196   : > { %v2146_v58 = vrot.slane %v2144_v17, 2  ;;  %v2174_v6 = vrot.slane %v2172_v53, 2  ;;  %1800 = vst [vmem:[#allocation3 + $0xd0] sm:$0xff] %v1771_v39  ;;  %v2373_v51 = vld [vmem:[#allocation4 + $0x218] sm:$0xff]  ;;  %3504 = vmatmul.mubr.bf16.gmra.mrb[64].mxu0 %v2402_v1  ;;  %3560 = vmatmul.mubr.bf16.gmra.mrb[64].mxu1 %v2404_v5  ;;  %v6024_v18 = vpop.f32.mrb[55].mxu1  ;;  %v2370_v30 = vld [vmem:[#allocation4 + $0x200] sm:$0xff] }
 0x197   : > { %v2421_v13 = vpack.c.bf16 %v2373_v51, %v2373_v51  ;;  %3511 = vmatprep.mubr.bf16.mxu0 %v2419_v24  ;;  %v2372_v46 = vld [vmem:[#allocation4 + $0x210] sm:$0xff]  ;;  %v2327_v3 = vld [vmem:[#allocation4 + $0xa8] sm:$0xff]  ;;  %v2329_v11 = vld [vmem:[#allocation4 + $0xb8] sm:$0xff]  ;;  %v2418_v40 = vpack.c.bf16 %v2370_v30, %v2370_v30 }
 0x198   : > { %2148 = vst [vmem:[#allocation4 + $0x250] ss:$-124 sps:$4 sm:$0xcf] %v2146_v58   ;;  %2176 = vst [vmem:[#allocation4 + $0x258] ss:$-124 sps:$4 sm:$0xcf] %v2174_v6   ;;  %v2420_v34 = vpack.c.bf16 %v2372_v46, %v2372_v46 }
 0x199   : > { %3567 = vmatprep.mubr.bf16.mxu1 %v2421_v13  ;;  %v2311_v43 = vld [vmem:[#allocation4 + $0x28] sm:$0xff]  ;;  %v2313_v48 = vld [vmem:[#allocation4 + $0x38] sm:$0xff]  ;;  %v2326_v38 = vld [vmem:[#allocation4 + $0xa0] sm:$0xff] }
 0x19a   : > { %v2200_v31 = vld [vmem:[#allocation3 + $0xc3] ss:$2 sm:$0x3f]  ;;  %v2228_v54 = vld [vmem:[#allocation3 + $0xc4] ss:$2 sm:$0x3f]  ;;  %v2391_v52 = vpack.c.bf16 %v2327_v3, %v2311_v43  ;;  %v2393_v60 = vpack.c.bf16 %v2329_v11, %v2313_v48 }
 0x19b   : > { %v2202_v9 = vrot.slane %v2200_v31, 2  ;;  %v2230_v16 = vrot.slane %v2228_v54, 2  ;;  %v2256_v23 = vld [vmem:[#allocation3 + $0xc5] ss:$2 sm:$0x3f]  ;;  %v2328_v25 = vld [vmem:[#allocation4 + $0xb0] sm:$0xff] }
 0x19c   : > { %v2258_v59 = vrot.slane %v2256_v23, 2  ;;  %v2310_v28 = vld [vmem:[#allocation4 + $0x20] sm:$0xff]  ;;  %v6602_v36 = vld [vmem:[%s8206_s2 + $0x200] sm:$0xff]   ;;  %v2312_v15 = vld [vmem:[#allocation4 + $0x30] sm:$0xff]  ;;  %v5920_v23 = vpop.f32.mrb[56].mxu0  ;;  %v6026_v48 = vpop.f32.mrb[56].mxu1 }
 0x19d   : > { %2204 = vst [vmem:[#allocation4 + $0x260] ss:$-124 sps:$4 sm:$0xcf] %v2202_v9   ;;  %2232 = vst [vmem:[#allocation4 + $0x268] ss:$-124 sps:$4 sm:$0xcf] %v2230_v16   ;;  %v2390_v61 = vpack.c.bf16 %v2326_v38, %v2310_v28  ;;  %v2392_v62 = vpack.c.bf16 %v2328_v25, %v2312_v15 }
 0x19e   : > { %v2284_v35 = vld [vmem:[#allocation3 + $0xc6] ss:$2 sm:$0x3f]  ;;  %2260 = vst [vmem:[#allocation4 + $0x270] ss:$-124 sps:$4 sm:$0xcf] %v2258_v59   ;;  %3512 = vmatmul.mubr.bf16.gmra.mrb[68].mxu0 %v2418_v40  ;;  %3568 = vmatmul.mubr.bf16.gmra.mrb[68].mxu1 %v2420_v34 }
 0x19f   : > { %v2286_v49 = vrot.slane %v2284_v35, 2  ;;  %3607 = vmatprep.mubr.bf16.mxu0 %v2391_v52  ;;  %3663 = vmatprep.mubr.bf16.mxu1 %v2393_v60  ;;  %v6603_v14 = vld [vmem:[%s8206_s2 + $0x280] sm:$0xff]   ;;  %v2359_v56 = vld [vmem:[#allocation4 + $0x1a8] sm:$0xff]  ;;  %v6604_v0 = vld [vmem:[%s8206_s2 + $0x248] sm:$0xff]   ;;  %v5921_v35 = vpop.f32.mrb[57].mxu0  ;;  %v6027_v52 = vpop.f32.mrb[57].mxu1 }
 0x1a0   : > { %v2361_v41 = vld [vmem:[#allocation4 + $0x1b8] sm:$0xff]  ;;  %v2343_v29 = vld [vmem:[#allocation4 + $0x128] sm:$0xff]  ;;  %v6605_v21 = vld [vmem:[%s8206_s2 + $0x2c8] sm:$0xff]   ;;  %v5923_v43 = vpop.f32.mrb[58].mxu0  ;;  %v6029_v60 = vpop.f32.mrb[58].mxu1 }
 0x1a1   : > { %2288 = vst [vmem:[#allocation4 + $0x278] ss:$-124 sps:$4 sm:$0xcf] %v2286_v49   ;;  %v2345_v55 = vld [vmem:[#allocation4 + $0x138] sm:$0xff]  ;;  %v2407_v42 = vpack.c.bf16 %v2359_v56, %v2343_v29  ;;  %v6606_v50 = vld [vmem:[%s8206_s2 + $0x208] sm:$0xff]   ;;  %v6608_v19 = vld [vmem:[%s8206_s2 + $0x250] sm:$0xff]  }
 0x1a2   : > { %v2409_v33 = vpack.c.bf16 %v2361_v41, %v2345_v55  ;;  %v6607_v4 = vld [vmem:[%s8206_s2 + $0x288] sm:$0xff]   ;;  %v6609_v57 = vld [vmem:[%s8206_s2 + $0x2d0] sm:$0xff]   ;;  %v2360_v8 = vld [vmem:[#allocation4 + $0x1b0] sm:$0xff]  ;;  %v5924_v49 = vpop.f32.mrb[59].mxu0  ;;  %v6030_v28 = vpop.f32.mrb[59].mxu1 }
 0x1a3   : > { %v2358_v7 = vld [vmem:[#allocation4 + $0x1a0] sm:$0xff]  ;;  %v6610_v63 = vld [vmem:[%s8206_s2 + $0x210] sm:$0xff]   ;;  %v2344_v2 = vld [vmem:[#allocation4 + $0x130] sm:$0xff] }
 0x1a4   : > { %v2342_v12 = vld [vmem:[#allocation4 + $0x120] sm:$0xff]  ;;  %v6611_v26 = vld [vmem:[%s8206_s2 + $0x290] sm:$0xff]   ;;  %v2377_v20 = vld [vmem:[#allocation4 + $0x238] sm:$0xff]  ;;  %v2408_v10 = vpack.c.bf16 %v2360_v8, %v2344_v2 }
 0x1a5   : > { %v2375_v37 = vld [vmem:[#allocation4 + $0x228] sm:$0xff]  ;;  %v2406_v22 = vpack.c.bf16 %v2358_v7, %v2342_v12  ;;  %v6612_v39 = vld [vmem:[%s8206_s2 + $0x258] sm:$0xff]   ;;  %v2425_v45 = vpack.c.bf16 %v2377_v20, %v2377_v20  ;;  %v6616_v1 = vld [vmem:[%s8206_s2 + $0x260] sm:$0xff]  }
 0x1a6   : > { %3608 = vmatmul.mubr.bf16.vlgmr.msra.gmra.mrb[72].mxu0 %v2390_v61  ;;  %3664 = vmatmul.mubr.bf16.vlgmr.msra.gmra.mrb[72].mxu1 %v2392_v62  ;;  %v6613_v44 = vld [vmem:[%s8206_s2 + $0x2d8] sm:$0xff]   ;;  %v2423_v32 = vpack.c.bf16 %v2375_v37, %v2375_v37  ;;  %v6617_v5 = vld [vmem:[%s8206_s2 + $0x2e0] sm:$0xff]   ;;  %v2374_v58 = vld [vmem:[#allocation4 + $0x220] sm:$0xff] }
 0x1a7   : > { %6169 = vmatpush3.bf16.msra.mxu0 %v6602_v36  ;;  %6203 = vmatpush3.bf16.msra.mxu1 %v6603_v14  ;;  %v6614_v17 = vld [vmem:[%s8206_s2 + $0x218] sm:$0xff]   ;;  %v6618_v24 = vld [vmem:[%s8206_s2 + $0x220] sm:$0xff]   ;;  %v2331_v27 = vld [vmem:[#allocation4 + $0xc8] sm:$0xff]  ;;  %v2422_v18 = vpack.c.bf16 %v2374_v58, %v2374_v58 }
 0x1a8   : > { %3615 = vmatprep.mubr.bf16.mxu0 %v2407_v42  ;;  %3671 = vmatprep.mubr.bf16.mxu1 %v2409_v33  ;;  %v6615_v53 = vld [vmem:[%s8206_s2 + $0x298] sm:$0xff]   ;;  %v6619_v51 = vld [vmem:[%s8206_s2 + $0x2a0] sm:$0xff]   ;;  %v6620_v46 = vld [vmem:[%s8206_s2 + $0x268] sm:$0xff]  }
 0x1a9   : > { %6170 = vmatprep.subr.bf16.mxu0 %v6604_v0  ;;  %6204 = vmatprep.subr.bf16.mxu1 %v6605_v21  ;;  %v2376_v6 = vld [vmem:[#allocation4 + $0x230] sm:$0xff]  ;;  %v2333_v13 = vld [vmem:[#allocation4 + $0xd8] sm:$0xff]  ;;  %v2315_v3 = vld [vmem:[#allocation4 + $0x48] sm:$0xff] }
 0x1aa   : > { %v2424_v30 = vpack.c.bf16 %v2376_v6, %v2376_v6  ;;  %v2317_v31 = vld [vmem:[#allocation4 + $0x58] sm:$0xff]  ;;  %v6621_v54 = vld [vmem:[%s8206_s2 + $0x2e8] sm:$0xff]   ;;  %v2395_v9 = vpack.c.bf16 %v2331_v27, %v2315_v3  ;;  %v6624_v40 = vld [vmem:[%s8206_s2 + $0x270] sm:$0xff]  }
 0x1ab   : > { %6171 = vmatpush3.bf16.msra.mxu0 %v6606_v50  ;;  %6205 = vmatpush3.bf16.msra.mxu1 %v6607_v4  ;;  %v2397_v16 = vpack.c.bf16 %v2333_v13, %v2317_v31  ;;  %v6622_v11 = vld [vmem:[%s8206_s2 + $0x228] sm:$0xff]   ;;  %v6625_v34 = vld [vmem:[%s8206_s2 + $0x2f0] sm:$0xff]   ;;  %v6628_v36 = vld [vmem:[%s8206_s2 + $0x278] sm:$0xff]  }
 0x1ac   : > { %6172 = vmatprep.subr.bf16.mxu0 %v6608_v19  ;;  %6206 = vmatprep.subr.bf16.mxu1 %v6609_v57  ;;  %v6623_v59 = vld [vmem:[%s8206_s2 + $0x2a8] sm:$0xff]   ;;  %v6626_v38 = vld [vmem:[%s8206_s2 + $0x230] sm:$0xff]   ;;  %v6629_v14 = vld [vmem:[%s8206_s2 + $0x2f8] sm:$0xff]  }
 0x1ad   : > { %v6627_v25 = vld [vmem:[%s8206_s2 + $0x2b0] sm:$0xff]   ;;  %v6630_v15 = vld [vmem:[%s8206_s2 + $0x238] sm:$0xff]   ;;  %v6632_v41 = vld [vmem:[%s8206_s2 + $0x340] sm:$0xff]  }
 0x1ae   : > { %3616 = vmatmul.mubr.bf16.gmra.mrb[76].mxu0 %v2406_v22  ;;  %3672 = vmatmul.mubr.bf16.gmra.mrb[76].mxu1 %v2408_v10  ;;  %v6631_v56 = vld [vmem:[%s8206_s2 + $0x2b8] sm:$0xff]   ;;  %v6633_v61 = vld [vmem:[%s8206_s2 + $0x3c0] sm:$0xff]   ;;  %v2330_v62 = vld [vmem:[#allocation4 + $0xc0] sm:$0xff] }
 0x1af   : > { %6173 = vmatpush3.bf16.msra.mxu0 %v6610_v63  ;;  %6207 = vmatpush3.bf16.msra.mxu1 %v6611_v26  ;;  %v2332_v0 = vld [vmem:[#allocation4 + $0xd0] sm:$0xff]  ;;  %v2363_v29 = vld [vmem:[#allocation4 + $0x1c8] sm:$0xff]  ;;  %v2365_v55 = vld [vmem:[#allocation4 + $0x1d8] sm:$0xff] }
 0x1b0   : > { %3623 = vmatprep.mubr.bf16.mxu0 %v2423_v32  ;;  %3679 = vmatprep.mubr.bf16.mxu1 %v2425_v45  ;;  %v2314_v21 = vld [vmem:[#allocation4 + $0x40] sm:$0xff]  ;;  %v2316_v42 = vld [vmem:[#allocation4 + $0x50] sm:$0xff]  ;;  %v6634_v33 = vld [vmem:[%s8206_s2 + $0x300] sm:$0xff]  }
 0x1b1   : > { %6174 = vmatprep.subr.bf16.mxu0 %v6612_v39  ;;  %6208 = vmatprep.subr.bf16.mxu1 %v6613_v44  ;;  %v2394_v50 = vpack.c.bf16 %v2330_v62, %v2314_v21  ;;  %v2396_v4 = vpack.c.bf16 %v2332_v0, %v2316_v42  ;;  %v2347_v19 = vld [vmem:[#allocation4 + $0x148] sm:$0xff]  ;;  %v2349_v57 = vld [vmem:[#allocation4 + $0x158] sm:$0xff]  ;;  %v6636_v63 = vld [vmem:[%s8206_s2 + $0x348] sm:$0xff]  }
 0x1b2   : > { %v6635_v7 = vld [vmem:[%s8206_s2 + $0x380] sm:$0xff]   ;;  %v2411_v8 = vpack.c.bf16 %v2363_v29, %v2347_v19  ;;  %v2413_v12 = vpack.c.bf16 %v2365_v55, %v2349_v57  ;;  %v6637_v26 = vld [vmem:[%s8206_s2 + $0x3c8] sm:$0xff]   ;;  %v6640_v20 = vld [vmem:[%s8206_s2 + $0x350] sm:$0xff]  }
 0x1b3   : > { %6175 = vmatpush3.bf16.msra.mxu0 %v6614_v17  ;;  %6209 = vmatpush3.bf16.msra.mxu1 %v6615_v53  ;;  %v6638_v2 = vld [vmem:[%s8206_s2 + $0x308] sm:$0xff]   ;;  %v2364_v10 = vld [vmem:[#allocation4 + $0x1d0] sm:$0xff]  ;;  %v6641_v39 = vld [vmem:[%s8206_s2 + $0x3d0] sm:$0xff]  }
 0x1b4   : > { %6176 = vmatprep.subr.bf16.mxu0 %v6616_v1  ;;  %6210 = vmatprep.subr.bf16.mxu1 %v6617_v5  ;;  %v6639_v37 = vld [vmem:[%s8206_s2 + $0x388] sm:$0xff]   ;;  %v2379_v44 = vld [vmem:[#allocation4 + $0x248] sm:$0xff]  ;;  %v2381_v32 = vld [vmem:[#allocation4 + $0x258] sm:$0xff] }
 0x1b5   : > { %v2362_v22 = vld [vmem:[#allocation4 + $0x1c0] sm:$0xff]  ;;  %v2348_v17 = vld [vmem:[#allocation4 + $0x150] sm:$0xff]  ;;  %v6642_v5 = vld [vmem:[%s8206_s2 + $0x310] sm:$0xff]   ;;  %v2427_v6 = vpack.c.bf16 %v2379_v44, %v2379_v44 }
 0x1b6   : > { %3624 = vmatmul.mubr.bf16.gmra.mrb[80].mxu0 %v2422_v18  ;;  %3680 = vmatmul.mubr.bf16.gmra.mrb[80].mxu1 %v2424_v30  ;;  %v2346_v45 = vld [vmem:[#allocation4 + $0x140] sm:$0xff]  ;;  %v2412_v1 = vpack.c.bf16 %v2364_v10, %v2348_v17  ;;  %v6643_v58 = vld [vmem:[%s8206_s2 + $0x390] sm:$0xff]   ;;  %v6645_v27 = vld [vmem:[%s8206_s2 + $0x3d8] sm:$0xff]  }
 0x1b7   : > { %6177 = vmatpush3.bf16.msra.mxu0 %v6618_v24  ;;  %6211 = vmatpush3.bf16.msra.mxu1 %v6619_v51  ;;  %v2410_v53 = vpack.c.bf16 %v2362_v22, %v2346_v45  ;;  %v2429_v24 = vpack.c.bf16 %v2381_v32, %v2381_v32  ;;  %v6644_v51 = vld [vmem:[%s8206_s2 + $0x358] sm:$0xff]   ;;  %v6648_v30 = vld [vmem:[%s8206_s2 + $0x360] sm:$0xff]   ;;  %v6652_v48 = vld [vmem:[%s8206_s2 + $0x368] sm:$0xff]  }
 0x1b8   : > { %3719 = vmatprep.mubr.bf16.mxu0 %v2395_v9  ;;  %3775 = vmatprep.mubr.bf16.mxu1 %v2397_v16  ;;  %v6646_v13 = vld [vmem:[%s8206_s2 + $0x318] sm:$0xff]   ;;  %v6649_v31 = vld [vmem:[%s8206_s2 + $0x3e0] sm:$0xff]   ;;  %v6653_v49 = vld [vmem:[%s8206_s2 + $0x3e8] sm:$0xff]  }
 0x1b9   : > { %6178 = vmatprep.subr.bf16.mxu0 %v6620_v46  ;;  %6212 = vmatprep.subr.bf16.mxu1 %v6621_v54  ;;  %v6647_v18 = vld [vmem:[%s8206_s2 + $0x398] sm:$0xff]   ;;  %v2378_v46 = vld [vmem:[#allocation4 + $0x240] sm:$0xff]  ;;  %v2335_v54 = vld [vmem:[#allocation4 + $0xe8] sm:$0xff] }
 0x1ba   : > { %v2380_v3 = vld [vmem:[#allocation4 + $0x250] sm:$0xff]  ;;  %v2337_v9 = vld [vmem:[#allocation4 + $0xf8] sm:$0xff]  ;;  %v2426_v23 = vpack.c.bf16 %v2378_v46, %v2378_v46  ;;  %v6654_v52 = vld [vmem:[%s8206_s2 + $0x328] sm:$0xff]  }
 0x1bb   : > { %6179 = vmatpush3.bf16.msra.mxu0 %v6622_v11  ;;  %6213 = vmatpush3.bf16.msra.mxu1 %v6623_v59  ;;  %v6650_v16 = vld [vmem:[%s8206_s2 + $0x320] sm:$0xff]   ;;  %v2428_v11 = vpack.c.bf16 %v2380_v3, %v2380_v3  ;;  %v2319_v59 = vld [vmem:[#allocation4 + $0x68] sm:$0xff]  ;;  %v6655_v60 = vld [vmem:[%s8206_s2 + $0x3a8] sm:$0xff]  }
 0x1bc   : > { %6180 = vmatprep.subr.bf16.mxu0 %v6624_v40  ;;  %6214 = vmatprep.subr.bf16.mxu1 %v6625_v34  ;;  %v6651_v35 = vld [vmem:[%s8206_s2 + $0x3a0] sm:$0xff]   ;;  %v2399_v34 = vpack.c.bf16 %v2335_v54, %v2319_v59  ;;  %v6658_v28 = vld [vmem:[%s8206_s2 + $0x330] sm:$0xff]   ;;  %v2336_v62 = vld [vmem:[#allocation4 + $0xf0] sm:$0xff] }
 0x1bd   : > { %v2321_v40 = vld [vmem:[#allocation4 + $0x78] sm:$0xff]  ;;  %v2367_v0 = vld [vmem:[#allocation4 + $0x1e8] sm:$0xff]  ;;  %v2318_v55 = vld [vmem:[#allocation4 + $0x60] sm:$0xff] }
 0x1be   : > { %v2401_v43 = vpack.c.bf16 %v2337_v9, %v2321_v40  ;;  %v2369_v29 = vld [vmem:[#allocation4 + $0x1f8] sm:$0xff]  ;;  %v2320_v21 = vld [vmem:[#allocation4 + $0x70] sm:$0xff]  ;;  %v6669_v40 = vld [vmem:[%s8207_s3 + $0x8] sm:$0xff]  }
 0x1bf   : > { %6181 = vmatpush3.bf16.msra.mxu0 %v6626_v38  ;;  %6215 = vmatpush3.bf16.msra.mxu1 %v6627_v25  ;;  %v6656_v38 = vld [vmem:[%s8206_s2 + $0x370] sm:$0xff]   ;;  %v2384_v44 = vld [vmem:[#allocation4 + $0x270] sm:$0xff]  ;;  %v6667_v59 = vld [vmem:[%s8207_s3 + $0x80] sm:$0xff]  }
 0x1c0   : > { %6182 = vmatprep.subr.bf16.mxu0 %v6628_v36  ;;  %6216 = vmatprep.subr.bf16.mxu1 %v6629_v14  ;;  %v6657_v25 = vld [vmem:[%s8206_s2 + $0x3f0] sm:$0xff]   ;;  %v6660_v14 = vld [vmem:[%s8206_s2 + $0x378] sm:$0xff]   ;;  %v2432_v45 = vpack.c.bf16 %v2384_v44, %v2384_v44 }
 0x1c1   : > { %v6659_v36 = vld [vmem:[%s8206_s2 + $0x3b0] sm:$0xff]  }
 0x1c3   : > { %6183 = vmatpush3.bf16.msra.mxu0 %v6630_v15  ;;  %6217 = vmatpush3.bf16.msra.mxu1 %v6631_v56  ;;  %v6661_v15 = vld [vmem:[%s8206_s2 + $0x3f8] sm:$0xff]  }
 0x1c4   : > { %6236 = vmatprep.subr.bf16.mxu0 %v6632_v41  ;;  %6270 = vmatprep.subr.bf16.mxu1 %v6633_v61  ;;  %v6662_v56 = vld [vmem:[%s8206_s2 + $0x338] sm:$0xff]   ;;  %v2334_v61 = vld [vmem:[#allocation4 + $0xe0] sm:$0xff] }
 0x1c5   : > { %v6663_v41 = vld [vmem:[%s8206_s2 + $0x3b8] sm:$0xff]   ;;  %v2398_v42 = vpack.c.bf16 %v2334_v61, %v2318_v55  ;;  %v6683_v55 = vld [vmem:[%s8207_s3 + $0xa0] sm:$0xff]  }
 0x1c6   : > { %3720 = vmatmul.mubr.bf16.vlgmr.msra.gmra.mrb[84].mxu0 %v2394_v50  ;;  %3776 = vmatmul.mubr.bf16.vlgmr.msra.gmra.mrb[84].mxu1 %v2396_v4  ;;  %v2351_v50 = vld [vmem:[#allocation4 + $0x168] sm:$0xff]  ;;  %v2353_v4 = vld [vmem:[#allocation4 + $0x178] sm:$0xff] }
 0x1c7   : > { %3727 = vmatprep.mubr.bf16.mxu0 %v2411_v8  ;;  %3783 = vmatprep.mubr.bf16.mxu1 %v2413_v12  ;;  %v2415_v19 = vpack.c.bf16 %v2367_v0, %v2351_v50  ;;  %v2417_v57 = vpack.c.bf16 %v2369_v29, %v2353_v4  ;;  %v2368_v8 = vld [vmem:[#allocation4 + $0x1f0] sm:$0xff]  ;;  %v2383_v12 = vld [vmem:[#allocation4 + $0x268] sm:$0xff]  ;;  %v6686_v4 = vld [vmem:[%s8207_s3 + $0xe8] sm:$0xff]  }
 0x1c8   : > { %6237 = vmatpush3.bf16.msra.mxu0 %v6634_v33  ;;  %6271 = vmatpush3.bf16.msra.mxu1 %v6635_v7  ;;  %v2400_v33 = vpack.c.bf16 %v2336_v62, %v2320_v21  ;;  %v2366_v7 = vld [vmem:[#allocation4 + $0x1e0] sm:$0xff]  ;;  %v2431_v22 = vpack.c.bf16 %v2383_v12, %v2383_v12 }
 0x1c9   : > { %6238 = vmatprep.subr.bf16.mxu0 %v6636_v63  ;;  %6272 = vmatprep.subr.bf16.mxu1 %v6637_v26  ;;  %v2385_v63 = vld [vmem:[#allocation4 + $0x278] sm:$0xff]  ;;  %v2350_v26 = vld [vmem:[#allocation4 + $0x160] sm:$0xff] }
 0x1ca   : > { %v2433_v10 = vpack.c.bf16 %v2385_v63, %v2385_v63  ;;  %v6684_v62 = vld [vmem:[%s8207_s3 + $0x68] sm:$0xff]  }
 0x1cc   : > { %6239 = vmatpush3.bf16.msra.mxu0 %v6638_v2  ;;  %6273 = vmatpush3.bf16.msra.mxu1 %v6639_v37  ;;  %v2352_v2 = vld [vmem:[#allocation4 + $0x170] sm:$0xff]  ;;  %v2414_v37 = vpack.c.bf16 %v2366_v7, %v2350_v26  ;;  %v6685_v7 = vld [vmem:[%s8207_s3 + $0x28] sm:$0xff]   ;;  %v6688_v26 = vld [vmem:[%s8207_s3 + $0x70] sm:$0xff]  }
 0x1cd   : > { %6240 = vmatprep.subr.bf16.mxu0 %v6640_v20  ;;  %6274 = vmatprep.subr.bf16.mxu1 %v6641_v39  ;;  %v2416_v20 = vpack.c.bf16 %v2368_v8, %v2352_v2  ;;  %v2382_v39 = vld [vmem:[#allocation4 + $0x260] sm:$0xff] }
 0x1ce   : > { %3728 = vmatmul.mubr.bf16.gmra.mrb[88].mxu0 %v2410_v53  ;;  %3784 = vmatmul.mubr.bf16.gmra.mrb[88].mxu1 %v2412_v1  ;;  %v2430_v32 = vpack.c.bf16 %v2382_v39, %v2382_v39  ;;  %v7813_v53 = vld [vmem:[%s8210_s6 + $0x1] ss:$0 sm:$0xff]  ;;  %v6687_v2 = vld [vmem:[%s8207_s3 + $0xa8] sm:$0xff]  }
 0x1cf   : > { %3735 = vmatprep.mubr.bf16.mxu0 %v2427_v6  ;;  %3791 = vmatprep.mubr.bf16.mxu1 %v2429_v24 }
 0x1d0   : > { %6241 = vmatpush3.bf16.msra.mxu0 %v6642_v5  ;;  %6275 = vmatpush3.bf16.msra.mxu1 %v6643_v58 }
 0x1d1   : > { %6242 = vmatprep.subr.bf16.mxu0 %v6644_v51  ;;  %6276 = vmatprep.subr.bf16.mxu1 %v6645_v27 }
 0x1d4   : > { %6243 = vmatpush3.bf16.msra.mxu0 %v6646_v13  ;;  %6277 = vmatpush3.bf16.msra.mxu1 %v6647_v18 }
 0x1d5   : > { %6244 = vmatprep.subr.bf16.mxu0 %v6648_v30  ;;  %6278 = vmatprep.subr.bf16.mxu1 %v6649_v31 }
 0x1d6   : > { %3736 = vmatmul.mubr.bf16.gmra.mrb[92].mxu0 %v2426_v23  ;;  %3792 = vmatmul.mubr.bf16.gmra.mrb[92].mxu1 %v2428_v11  ;;  %v6665_v23 = vld [vmem:[%s8207_s3] sm:$0xff]  }
 0x1d7   : > { %3831 = vmatprep.mubr.bf16.mxu0 %v2399_v34  ;;  %3887 = vmatprep.mubr.bf16.mxu1 %v2401_v43  ;;  %v6666_v11 = vld [vmem:[%s8207_s3 + $0xc0] sm:$0xff]   ;;  %v6670_v34 = vld [vmem:[%s8207_s3 + $0xc8] sm:$0xff]  }
 0x1d8   : > { %6245 = vmatpush3.bf16.msra.mxu0 %v6650_v16  ;;  %6279 = vmatpush3.bf16.msra.mxu1 %v6651_v35  ;;  %v6664_v16 = vld [vmem:[%s8207_s3 + $0x40] sm:$0xff]   ;;  %v6668_v35 = vld [vmem:[%s8207_s3 + $0x48] sm:$0xff]  }
 0x1d9   : > { %6246 = vmatprep.subr.bf16.mxu0 %v6652_v48  ;;  %6280 = vmatprep.subr.bf16.mxu1 %v6653_v49  ;;  %v6671_v43 = vld [vmem:[%s8207_s3 + $0x88] sm:$0xff]   ;;  %v6672_v48 = vld [vmem:[%s8207_s3 + $0x50] sm:$0xff]  }
 0x1da   : > { %v6674_v49 = vld [vmem:[%s8207_s3 + $0xd0] sm:$0xff]  }
 0x1dc   : > { %6247 = vmatpush3.bf16.msra.mxu0 %v6654_v52  ;;  %6281 = vmatpush3.bf16.msra.mxu1 %v6655_v60  ;;  %v6673_v52 = vld [vmem:[%s8207_s3 + $0x10] sm:$0xff]   ;;  %v6676_v60 = vld [vmem:[%s8207_s3 + $0x58] sm:$0xff]  }
 0x1dd   : > { %6248 = vmatprep.subr.bf16.mxu0 %v6656_v38  ;;  %6282 = vmatprep.subr.bf16.mxu1 %v6657_v25  ;;  %v6675_v38 = vld [vmem:[%s8207_s3 + $0x90] sm:$0xff]   ;;  %v6678_v25 = vld [vmem:[%s8207_s3 + $0xd8] sm:$0xff]  }
 0x1e0   : > { %6249 = vmatpush3.bf16.msra.mxu0 %v6658_v28  ;;  %6283 = vmatpush3.bf16.msra.mxu1 %v6659_v36  ;;  %v6677_v28 = vld [vmem:[%s8207_s3 + $0x18] sm:$0xff]   ;;  %v6680_v36 = vld [vmem:[%s8207_s3 + $0x60] sm:$0xff]  }
 0x1e1   : > { %6250 = vmatprep.subr.bf16.mxu0 %v6660_v14  ;;  %6284 = vmatprep.subr.bf16.mxu1 %v6661_v15  ;;  %v6679_v14 = vld [vmem:[%s8207_s3 + $0x98] sm:$0xff]   ;;  %v6682_v15 = vld [vmem:[%s8207_s3 + $0xe0] sm:$0xff]  }
 0x1e4   : > { %6251 = vmatpush3.bf16.msra.mxu0 %v6662_v56  ;;  %6285 = vmatpush3.bf16.msra.mxu1 %v6663_v41  ;;  %v6681_v56 = vld [vmem:[%s8207_s3 + $0x20] sm:$0xff]  }
 0x1e5   : > { %6304 = vmatprep.subr.bf16.mxu0 %v6664_v16  ;;  %6326 = vmatprep.subr.bf16.mxu1 %v6666_v11 }
 0x1e7   : > { %3832 = vmatmul.mubr.bf16.vlgmr.msra.gmra.mrb[96].mxu0 %v2398_v42  ;;  %3888 = vmatmul.mubr.bf16.vlgmr.msra.gmra.mrb[96].mxu1 %v2400_v33 }
 0x1e8   : > { %3839 = vmatprep.mubr.bf16.mxu0 %v2415_v19  ;;  %3895 = vmatprep.mubr.bf16.mxu1 %v2417_v57 }
 0x1e9   : > { %6305 = vmatpush3.bf16.msra.mxu0 %v6665_v23  ;;  %6327 = vmatpush3.bf16.msra.mxu1 %v6667_v59  ;;  %v6698_v23 = vld [vmem:[%s8207_s3 + $0x1c0] sm:$0xff]  }
 0x1ea   : > { %6306 = vmatprep.subr.bf16.mxu0 %v6668_v35  ;;  %6328 = vmatprep.subr.bf16.mxu1 %v6670_v34 }
 0x1ed   : > { %6307 = vmatpush3.bf16.msra.mxu0 %v6669_v40  ;;  %6329 = vmatpush3.bf16.msra.mxu1 %v6671_v43 }
 0x1ee   : > { %6308 = vmatprep.subr.bf16.mxu0 %v6672_v48  ;;  %6330 = vmatprep.subr.bf16.mxu1 %v6674_v49 }
 0x1ef   : > { %3840 = vmatmul.mubr.bf16.gmra.mrb[100].mxu0 %v2414_v37  ;;  %3896 = vmatmul.mubr.bf16.gmra.mrb[100].mxu1 %v2416_v20 }
 0x1f0   : > { %3847 = vmatprep.mubr.bf16.mxu0 %v2431_v22  ;;  %3903 = vmatprep.mubr.bf16.mxu1 %v2433_v10  ;;  %v6690_v22 = vld [vmem:[%s8207_s3 + $0xf0] sm:$0xff]  }
 0x1f1   : > { %6309 = vmatpush3.bf16.msra.mxu0 %v6673_v52  ;;  %6331 = vmatpush3.bf16.msra.mxu1 %v6675_v38  ;;  %v6689_v10 = vld [vmem:[%s8207_s3 + $0x30] sm:$0xff]  }
 0x1f2   : > { %6310 = vmatprep.subr.bf16.mxu0 %v6676_v60  ;;  %6332 = vmatprep.subr.bf16.mxu1 %v6678_v25 }
 0x1f5   : > { %6311 = vmatpush3.bf16.msra.mxu0 %v6677_v28  ;;  %6333 = vmatpush3.bf16.msra.mxu1 %v6679_v14 }
 0x1f6   : > { %6312 = vmatprep.subr.bf16.mxu0 %v6680_v36  ;;  %6334 = vmatprep.subr.bf16.mxu1 %v6682_v15 }
 0x1f7   : > { %3848 = vmatmul.mubr.bf16.gmra.mrb[104].mxu0 %v2430_v32  ;;  %3904 = vmatmul.mubr.bf16.gmra.mrb[104].mxu1 %v2432_v45  ;;  %v6692_v45 = vld [vmem:[%s8207_s3 + $0x78] sm:$0xff]  }
 0x1f9   : > { %6313 = vmatpush3.bf16.msra.mxu0 %v6681_v56  ;;  %6335 = vmatpush3.bf16.msra.mxu1 %v6683_v55 }
 0x1fa   : > { %6314 = vmatprep.subr.bf16.mxu0 %v6684_v62  ;;  %6336 = vmatprep.subr.bf16.mxu1 %v6686_v4 }
 0x1fd   : > { %6315 = vmatpush3.bf16.msra.mxu0 %v6685_v7  ;;  %6337 = vmatpush3.bf16.msra.mxu1 %v6687_v2 }
 0x1fe   : > { %6316 = vmatprep.subr.bf16.mxu0 %v6688_v26  ;;  %6338 = vmatprep.subr.bf16.mxu1 %v6690_v22 }
 0x201   : > { %6317 = vmatpush3.bf16.msra.mxu0 %v6689_v10 }
 0x202   : > { %6318 = vmatprep.subr.bf16.mxu0 %v6692_v45 }
 0x222   : > { %v6048_v17 = vpop.f32.mrb[60].mxu0 }
 0x223   : > { %v6049_v1 = vpop.f32.mrb[61].mxu0  ;;  %v6082_v5 = vpop.f32.mrb[60].mxu1 }
 0x224   : > { %v6050_v58 = vadd.f32 %v6049_v1, %v6048_v17  ;;  %v6051_v6 = vpop.f32.mrb[62].mxu0  ;;  %v6083_v24 = vpop.f32.mrb[61].mxu1 }
 0x225   : > { %v6052_v51 = vpop.f32.mrb[63].mxu0  ;;  %v6084_v27 = vadd.f32 %v6083_v24, %v6082_v5  ;;  %v6085_v13 = vpop.f32.mrb[62].mxu1  ;;  %v6691_v5 = vld [vmem:[%s8207_s3 + $0xb0] sm:$0xff]  }
 0x226   : > { %v3498_v18 = vadd.f32 %v6050_v58, %v7813_v53  ;;  %v6053_v30 = vadd.f32 %v6052_v51, %v6051_v6  ;;  %v6086_v46 = vpop.f32.mrb[63].mxu1  ;;  %6339 = vmatpush3.bf16.msra.mxu1 %v6691_v5 }
 0x227   : > { %v6087_v3 = vadd.f32 %v6086_v46, %v6085_v13 }
 0x228   : > { %v3501_v31 = vadd.f32 %v6053_v30, %v7813_v53  ;;  %v7817_v54 = vadd.f32 %v6084_v27, %v3498_v18  ;;  %v6694_v27 = vld [vmem:[%s8207_s3 + $0xf8] sm:$0xff]  }
 0x229   : > { %v6693_v30 = vld [vmem:[%s8207_s3 + $0x38] sm:$0xff]   ;;  %6340 = vmatprep.subr.bf16.mxu1 %v6694_v27 }
 0x22a   : > { %v7819_v9 = vadd.f32 %v6087_v3, %v3501_v31  ;;  %v6696_v3 = vld [vmem:[%s8207_s3 + $0x140] sm:$0xff]   ;;  %v6695_v31 = vld [vmem:[%s8207_s3 + $0xb8] sm:$0xff]   ;;  %6319 = vmatpush3.bf16.msra.mxu0 %v6693_v30 }
 0x22b   : > { %6348 = vmatprep.subr.bf16.mxu0 %v6696_v3  ;;  %6341 = vmatpush3.bf16.msra.mxu1 %v6695_v31 }
 0x22c   : > { %6370 = vmatprep.subr.bf16.mxu1 %v6698_v23 }
 0x269   : > { %v6054_v41 = vpop.f32.mrb[64].mxu0  ;;  %v6088_v61 = vpop.f32.mrb[64].mxu1 }
 0x26a   : > { %v6055_v0 = vpop.f32.mrb[65].mxu0  ;;  %v6089_v29 = vpop.f32.mrb[65].mxu1 }
 0x26b   : > { %v6056_v21 = vadd.f32 %v6055_v0, %v6054_v41  ;;  %v6090_v42 = vadd.f32 %v6089_v29, %v6088_v61  ;;  %v6057_v33 = vpop.f32.mrb[66].mxu0  ;;  %v6091_v50 = vpop.f32.mrb[66].mxu1 }
 0x26c   : > { %v6058_v19 = vpop.f32.mrb[67].mxu0  ;;  %v6092_v57 = vpop.f32.mrb[67].mxu1 }
 0x26d   : > { %v3506_v8 = vadd.f32 %v6056_v21, %v7813_v53  ;;  %v6059_v12 = vadd.f32 %v6058_v19, %v6057_v33  ;;  %v6093_v63 = vadd.f32 %v6092_v57, %v6091_v50 }
 0x26f   : > { %v7897_v37 = vadd.f32 %v6090_v42, %v3506_v8  ;;  %v3509_v20 = vadd.f32 %v6059_v12, %v7813_v53 }
 0x271   : > { %v3565_v39 = vadd.f32 %v6093_v63, %v3509_v20  ;;  %v6060_v44 = vpop.f32.mrb[68].mxu0  ;;  %v6094_v32 = vpop.f32.mrb[68].mxu1 }
 0x272   : > { %v6061_v17 = vpop.f32.mrb[69].mxu0  ;;  %v6095_v1 = vpop.f32.mrb[69].mxu1 }
 0x273   : > { %v6062_v58 = vadd.f32 %v6061_v17, %v6060_v44  ;;  %v6096_v6 = vadd.f32 %v6095_v1, %v6094_v32  ;;  %v6063_v24 = vpop.f32.mrb[70].mxu0  ;;  %v6097_v51 = vpop.f32.mrb[70].mxu1 }
 0x274   : > { %v6064_v13 = vpop.f32.mrb[71].mxu0  ;;  %v6098_v18 = vpop.f32.mrb[71].mxu1 }
 0x275   : > { %v3514_v46 = vadd.f32 %v6062_v58, %v7813_v53 }
 0x277   : > { %v3570_v16 = vadd.f32 %v6096_v6, %v3514_v46 }
 0x279   : > { %v6116_v11 = vpop.f32.mrb[72].mxu0  ;;  %v6150_v59 = vpop.f32.mrb[72].mxu1 }
 0x27a   : > { %v6117_v53 = vpop.f32.mrb[73].mxu0  ;;  %v6151_v35 = vpop.f32.mrb[73].mxu1 }
 0x27b   : > { %v6118_v40 = vadd.f32 %v6117_v53, %v6116_v11  ;;  %v6152_v34 = vadd.f32 %v6151_v35, %v6150_v59  ;;  %v6119_v43 = vpop.f32.mrb[74].mxu0  ;;  %v6153_v48 = vpop.f32.mrb[74].mxu1 }
 0x27c   : > { %v6120_v49 = vpop.f32.mrb[75].mxu0  ;;  %v6154_v52 = vpop.f32.mrb[75].mxu1 }
 0x27d   : > { %v3610_v60 = vadd.f32 %v6118_v40, %v7817_v54  ;;  %v6121_v38 = vadd.f32 %v6120_v49, %v6119_v43  ;;  %v6155_v25 = vadd.f32 %v6154_v52, %v6153_v48 }
 0x27f   : > { %v3666_v28 = vadd.f32 %v6152_v34, %v3610_v60  ;;  %v3613_v36 = vadd.f32 %v6121_v38, %v7819_v9 }
 0x281   : > { %v3669_v14 = vadd.f32 %v6155_v25, %v3613_v36  ;;  %v6122_v15 = vpop.f32.mrb[76].mxu0  ;;  %v6156_v56 = vpop.f32.mrb[76].mxu1 }
 0x282   : > { %v6123_v41 = vpop.f32.mrb[77].mxu0  ;;  %v6157_v61 = vpop.f32.mrb[77].mxu1 }
 0x283   : > { %v6124_v62 = vadd.f32 %v6123_v41, %v6122_v15  ;;  %v6158_v0 = vadd.f32 %v6157_v61, %v6156_v56  ;;  %v6125_v29 = vpop.f32.mrb[78].mxu0  ;;  %v6159_v55 = vpop.f32.mrb[78].mxu1 }
 0x284   : > { %v6126_v21 = vpop.f32.mrb[79].mxu0  ;;  %v6160_v42 = vpop.f32.mrb[79].mxu1 }
 0x285   : > { %v3618_v33 = vadd.f32 %v6124_v62, %v7897_v37  ;;  %v6127_v50 = vadd.f32 %v6126_v21, %v6125_v29  ;;  %v6161_v54 = vadd.f32 %v6160_v42, %v6159_v55 }
 0x287   : > { %v3674_v4 = vadd.f32 %v6158_v0, %v3618_v33  ;;  %v3621_v19 = vadd.f32 %v6127_v50, %v3565_v39 }
 0x289   : > { %v3677_v57 = vadd.f32 %v6161_v54, %v3621_v19  ;;  %v6128_v7 = vpop.f32.mrb[80].mxu0  ;;  %v6162_v9 = vpop.f32.mrb[80].mxu1 }
 0x28a   : > { %v6129_v8 = vpop.f32.mrb[81].mxu0  ;;  %v6163_v12 = vpop.f32.mrb[81].mxu1 }
 0x28b   : > { %v6130_v63 = vadd.f32 %v6129_v8, %v6128_v7  ;;  %v6164_v26 = vadd.f32 %v6163_v12, %v6162_v9  ;;  %v6131_v2 = vpop.f32.mrb[82].mxu0  ;;  %v6165_v20 = vpop.f32.mrb[82].mxu1 }
 0x28c   : > { %v6132_v22 = vpop.f32.mrb[83].mxu0  ;;  %v6166_v10 = vpop.f32.mrb[83].mxu1 }
 0x28d   : > { %v3626_v44 = vadd.f32 %v6130_v63, %v3570_v16 }
 0x28f   : > { %v3682_v32 = vadd.f32 %v6164_v26, %v3626_v44 }
 0x299   : > { %v6184_v45 = vpop.f32.mrb[84].mxu0  ;;  %v6218_v17 = vpop.f32.mrb[84].mxu1 }
 0x29a   : > { %v6185_v37 = vpop.f32.mrb[85].mxu0  ;;  %v6219_v1 = vpop.f32.mrb[85].mxu1 }
 0x29b   : > { %v6186_v5 = vadd.f32 %v6185_v37, %v6184_v45  ;;  %v6220_v58 = vadd.f32 %v6219_v1, %v6218_v17  ;;  %v6187_v39 = vpop.f32.mrb[86].mxu0  ;;  %v6221_v6 = vpop.f32.mrb[86].mxu1 }
 0x29c   : > { %v6188_v24 = vpop.f32.mrb[87].mxu0  ;;  %v6222_v51 = vpop.f32.mrb[87].mxu1 }
 0x29d   : > { %v3722_v27 = vadd.f32 %v6186_v5, %v3666_v28  ;;  %v6189_v13 = vadd.f32 %v6188_v24, %v6187_v39  ;;  %v6223_v18 = vadd.f32 %v6222_v51, %v6221_v6 }
 0x29f   : > { %v3778_v30 = vadd.f32 %v6220_v58, %v3722_v27  ;;  %v3725_v46 = vadd.f32 %v6189_v13, %v3669_v14 }
 0x2a1   : > { %v3781_v3 = vadd.f32 %v6223_v18, %v3725_v46  ;;  %v6190_v31 = vpop.f32.mrb[88].mxu0  ;;  %v6224_v23 = vpop.f32.mrb[88].mxu1 }
 0x2a2   : > { %v6191_v16 = vpop.f32.mrb[89].mxu0  ;;  %v6225_v11 = vpop.f32.mrb[89].mxu1 }
 0x2a3   : > { %v6192_v59 = vadd.f32 %v6191_v16, %v6190_v31  ;;  %v6226_v53 = vadd.f32 %v6225_v11, %v6224_v23  ;;  %v6193_v35 = vpop.f32.mrb[90].mxu0  ;;  %v6227_v40 = vpop.f32.mrb[90].mxu1 }
 0x2a4   : > { %v6194_v34 = vpop.f32.mrb[91].mxu0  ;;  %v6228_v43 = vpop.f32.mrb[91].mxu1 }
 0x2a5   : > { %v3730_v48 = vadd.f32 %v6192_v59, %v3674_v4  ;;  %v6195_v49 = vadd.f32 %v6194_v34, %v6193_v35  ;;  %v6229_v52 = vadd.f32 %v6228_v43, %v6227_v40 }
 0x2a7   : > { %v3786_v60 = vadd.f32 %v6226_v53, %v3730_v48  ;;  %v3733_v38 = vadd.f32 %v6195_v49, %v3677_v57 }
 0x2a9   : > { %v3789_v25 = vadd.f32 %v6229_v52, %v3733_v38  ;;  %v6196_v28 = vpop.f32.mrb[92].mxu0  ;;  %v6230_v36 = vpop.f32.mrb[92].mxu1 }
 0x2aa   : > { %v6197_v14 = vpop.f32.mrb[93].mxu0  ;;  %v6231_v15 = vpop.f32.mrb[93].mxu1 }
 0x2ab   : > { %v6198_v56 = vadd.f32 %v6197_v14, %v6196_v28  ;;  %v6232_v41 = vadd.f32 %v6231_v15, %v6230_v36  ;;  %v6199_v61 = vpop.f32.mrb[94].mxu0  ;;  %v6233_v62 = vpop.f32.mrb[94].mxu1 }
 0x2ac   : > { %v6200_v0 = vpop.f32.mrb[95].mxu0  ;;  %v6234_v29 = vpop.f32.mrb[95].mxu1 }
 0x2ad   : > { %v3738_v55 = vadd.f32 %v6198_v56, %v3682_v32 }
 0x2af   : > { %v7931_v21 = vadd.f32 %v6232_v41, %v3738_v55 }
 0x2ba   : > { %v6252_v42 = vpop.f32.mrb[96].mxu0  ;;  %v6286_v33 = vpop.f32.mrb[96].mxu1 }
 0x2bb   : > { %v6253_v50 = vpop.f32.mrb[97].mxu0  ;;  %v6287_v54 = vpop.f32.mrb[97].mxu1 }
 0x2bc   : > { %v6254_v4 = vadd.f32 %v6253_v50, %v6252_v42  ;;  %v6288_v19 = vadd.f32 %v6287_v54, %v6286_v33  ;;  %v6255_v57 = vpop.f32.mrb[98].mxu0  ;;  %v6289_v7 = vpop.f32.mrb[98].mxu1 }
 0x2bd   : > { %v6256_v9 = vpop.f32.mrb[99].mxu0  ;;  %v6290_v8 = vpop.f32.mrb[99].mxu1 }
 0x2be   : > { %v3834_v12 = vadd.f32 %v6254_v4, %v3778_v30  ;;  %v6257_v63 = vadd.f32 %v6256_v9, %v6255_v57  ;;  %v6291_v26 = vadd.f32 %v6290_v8, %v6289_v7 }
 0x2c0   : > { %v3890_v2 = vadd.f32 %v6288_v19, %v3834_v12  ;;  %v3837_v20 = vadd.f32 %v6257_v63, %v3781_v3 }
 0x2c2   : > { %v3911_v22 = vmax.f32 %v3890_v2, 0.0  ;;  %v3893_v10 = vadd.f32 %v6291_v26, %v3837_v20  ;;  %v6258_v44 = vpop.f32.mrb[100].mxu0  ;;  %v6292_v32 = vpop.f32.mrb[100].mxu1 }
 0x2c3   : > { %v6259_v45 = vpop.f32.mrb[101].mxu0  ;;  %v6293_v17 = vpop.f32.mrb[101].mxu1 }
 0x2c4   : > { %3916 = vst [vmem:[#allocation5] sm:$0xff] %v3911_v22  ;;  %v3912_v37 = vmax.f32 %v3893_v10, 0.0  ;;  %v6260_v1 = vadd.f32 %v6259_v45, %v6258_v44  ;;  %v6294_v5 = vadd.f32 %v6293_v17, %v6292_v32  ;;  %v6261_v58 = vpop.f32.mrb[102].mxu0  ;;  %v6295_v39 = vpop.f32.mrb[102].mxu1 }
 0x2c5   : > { %v6262_v6 = vpop.f32.mrb[103].mxu0  ;;  %v6296_v24 = vpop.f32.mrb[103].mxu1 }
 0x2c6   : > { %3917 = vst [vmem:[#allocation5 + $0x8] sm:$0xff] %v3912_v37  ;;  %v3842_v51 = vadd.f32 %v6260_v1, %v3786_v60  ;;  %v6263_v27 = vadd.f32 %v6262_v6, %v6261_v58  ;;  %v6297_v13 = vadd.f32 %v6296_v24, %v6295_v39 }
 0x2c8   : > { %v3898_v18 = vadd.f32 %v6294_v5, %v3842_v51  ;;  %v3845_v30 = vadd.f32 %v6263_v27, %v3789_v25 }
 0x2ca   : > { %v3913_v46 = vmax.f32 %v3898_v18, 0.0  ;;  %v3901_v3 = vadd.f32 %v6297_v13, %v3845_v30  ;;  %v6264_v31 = vpop.f32.mrb[104].mxu0  ;;  %v6298_v23 = vpop.f32.mrb[104].mxu1 }
 0x2cb   : > { %v3921_v16 = vld [vmem:[#allocation5] sm:$0xf]  ;;  %v6265_v35 = vpop.f32.mrb[105].mxu0  ;;  %v6299_v40 = vpop.f32.mrb[105].mxu1 }
 0x2cc   : > { %v3935_v11 = vld [vmem:[#allocation5 + $0x1] sm:$0xf]  ;;  %3922 = vst [vmem:[#allocation6] sm:$0xf] %v3921_v16  ;;  %3918 = vst [vmem:[#allocation5 + $0x10] sm:$0xff] %v3913_v46  ;;  %v3914_v53 = vmax.f32 %v3901_v3, 0.0  ;;  %v6266_v49 = vadd.f32 %v6265_v35, %v6264_v31  ;;  %v6300_v52 = vadd.f32 %v6299_v40, %v6298_v23 }
 0x2cd   : > { %v3949_v59 = vld [vmem:[#allocation5 + $0x2] sm:$0xf]  ;;  %3936 = vst [vmem:[#allocation6 + $0x8] sm:$0xf] %v3935_v11  ;;  %v3923_v34 = vld [vmem:[#allocation5 + $0x6] sm:$0xf] }
 0x2ce   : > { %3950 = vst [vmem:[#allocation6 + $0x10] sm:$0xf] %v3949_v59  ;;  %v3928_v43 = vld [vmem:[#allocation5 + $0xc] sm:$0xf]  ;;  %v3937_v48 = vld [vmem:[#allocation5 + $0x7] sm:$0xf]  ;;  %v3850_v56 = vadd.f32 %v6266_v49, %v7931_v21 }
 0x2cf   : > { %v3925_v60 = vrot.slane %v3923_v34, 4  ;;  %3929 = vst [vmem:[#allocation6 + $0x48] sm:$0xf] %v3928_v43  ;;  %v3939_v38 = vrot.slane %v3937_v48, 4  ;;  %v3951_v25 = vld [vmem:[#allocation5 + $0x8] sm:$0xf] }
 0x2d0   : > { %v3963_v28 = vld [vmem:[#allocation5 + $0x6] sm:$0xf]  ;;  %3919 = vst [vmem:[#allocation5 + $0x18] sm:$0xff] %v3914_v53  ;;  %v3953_v36 = vrot.slane %v3951_v25, 4  ;;  %v3965_v14 = vld [vmem:[#allocation5 + $0xc] sm:$0xf]  ;;  %v3906_v55 = vadd.f32 %v6300_v52, %v3850_v56 }
 0x2d1   : > { %3964 = vst [vmem:[#allocation6 + $0x18] sm:$0xf] %v3963_v28  ;;  %v3977_v15 = vld [vmem:[#allocation5 + $0x7] sm:$0xf]  ;;  %v6267_v41 = vpop.f32.mrb[106].mxu0  ;;  %v3967_v61 = vrot.slane %v3965_v14, 4 }
 0x2d2   : > { %3927 = vst [vmem:[#allocation6] sm:$0xf0] %v3925_v60  ;;  %3941 = vst [vmem:[#allocation6 + $0x8] sm:$0xf0] %v3939_v38  ;;  %v3991_v62 = vld [vmem:[#allocation5 + $0x8] sm:$0xf] }
 0x2d3   : > { %3978 = vst [vmem:[#allocation6 + $0x20] sm:$0xf] %v3977_v15  ;;  %v4005_v0 = vld [vmem:[#allocation5 + $0xc] sm:$0xf]  ;;  %v6301_v29 = vpop.f32.mrb[106].mxu1  ;;  %v6268_v42 = vpop.f32.mrb[107].mxu0 }
 0x2d4   : > { %3955 = vst [vmem:[#allocation6 + $0x10] sm:$0xf0] %v3953_v36  ;;  %3992 = vst [vmem:[#allocation6 + $0x28] sm:$0xf] %v3991_v62  ;;  %v6302_v33 = vpop.f32.mrb[107].mxu1  ;;  %v3915_v63 = vmax.f32 %v3906_v55, 0.0 }
 0x2d5   : > { %4006 = vst [vmem:[#allocation6 + $0x30] sm:$0xf] %v4005_v0  ;;  %3969 = vst [vmem:[#allocation6 + $0x18] sm:$0xf0] %v3967_v61  ;;  %v3930_v50 = vld [vmem:[#allocation5 + $0x12] sm:$0xf] }
 0x2d6   : > { %v3942_v54 = vld [vmem:[#allocation5 + $0xd] sm:$0xf]  ;;  %v3944_v4 = vld [vmem:[#allocation5 + $0x13] sm:$0xf]  ;;  %v3932_v19 = vrot.slane %v3930_v50, 4  ;;  %3920 = vst [vmem:[#allocation5 + $0x20] sm:$0xff] %v3915_v63 }
 0x2d7   : > { %3943 = vst [vmem:[#allocation6 + $0x50] sm:$0xf] %v3942_v54  ;;  %v3946_v21 = vrot.slane %v3944_v4, 4  ;;  %v3956_v57 = vld [vmem:[#allocation5 + $0xe] sm:$0xf]  ;;  %v6697_v31 = vld [vmem:[%s8207_s3 + $0x100] sm:$0xff]  }
 0x2d8   : > { %v3958_v7 = vld [vmem:[#allocation5 + $0x14] sm:$0xf]  ;;  %3957 = vst [vmem:[#allocation6 + $0x58] sm:$0xf] %v3956_v57  ;;  %v3979_v12 = vld [vmem:[#allocation5 + $0xd] sm:$0xf] }
 0x2d9   : > { %v3960_v9 = vrot.slane %v3958_v7, 4  ;;  %v3970_v8 = vld [vmem:[#allocation5 + $0x12] sm:$0xf]  ;;  %3934 = vst [vmem:[#allocation6 + $0x48] sm:$0xf0] %v3932_v19  ;;  %v3981_v26 = vrot.slane %v3979_v12, 4 }
 0x2da   : > { %3948 = vst [vmem:[#allocation6 + $0x50] sm:$0xf0] %v3946_v21  ;;  %3971 = vst [vmem:[#allocation6 + $0x60] sm:$0xf] %v3970_v8  ;;  %v3984_v2 = vld [vmem:[#allocation5 + $0x13] sm:$0xf] }
 0x2db   : > { %v3993_v20 = vld [vmem:[#allocation5 + $0xe] sm:$0xf]  ;;  %3962 = vst [vmem:[#allocation6 + $0x58] sm:$0xf0] %v3960_v9  ;;  %3985 = vst [vmem:[#allocation6 + $0x68] sm:$0xf] %v3984_v2 }
 0x2dc   : > { %v3995_v22 = vrot.slane %v3993_v20, 4  ;;  %v3998_v10 = vld [vmem:[#allocation5 + $0x14] sm:$0xf]  ;;  %3983 = vst [vmem:[#allocation6 + $0x20] sm:$0xf0] %v3981_v26  ;;  %v4047_v16 = vld [vmem:[#allocation6] sm:$0xff] }
 0x2dd   : > { %v4007_v44 = vld [vmem:[#allocation5 + $0x12] sm:$0xf]  ;;  %3999 = vst [vmem:[#allocation6 + $0x70] sm:$0xf] %v3998_v10  ;;  %v4019_v45 = vld [vmem:[#allocation5 + $0xd] sm:$0xf] }
 0x2de   : > { %v4009_v32 = vrot.slane %v4007_v44, 4  ;;  %v4021_v17 = vld [vmem:[#allocation5 + $0x13] sm:$0xf]  ;;  %3997 = vst [vmem:[#allocation6 + $0x28] sm:$0xf0] %v3995_v22  ;;  %v6700_v52 = vld [vmem:[%s8207_s3 + $0x148] sm:$0xff]  }
 0x2df   : > { %4020 = vst [vmem:[#allocation6 + $0x38] sm:$0xf] %v4019_v45  ;;  %v4023_v37 = vrot.slane %v4021_v17, 4  ;;  %v4033_v1 = vld [vmem:[#allocation5 + $0xe] sm:$0xf]  ;;  %v6701_v60 = vld [vmem:[%s8207_s3 + $0x108] sm:$0xff]  }
 0x2e0   : > { %v4035_v5 = vld [vmem:[#allocation5 + $0x14] sm:$0xf]  ;;  %4011 = vst [vmem:[#allocation6 + $0x30] sm:$0xf0] %v4009_v32  ;;  %4034 = vst [vmem:[#allocation6 + $0x40] sm:$0xf] %v4033_v1 }
 0x2e1   : > { %v4037_v58 = vrot.slane %v4035_v5, 4  ;;  %v3972_v39 = vld [vmem:[#allocation5 + $0x18] sm:$0xf]  ;;  %4025 = vst [vmem:[#allocation6 + $0x38] sm:$0xf0] %v4023_v37  ;;  %v4048_v3 = vld [vmem:[#allocation6 + $0x8] sm:$0xff] }
 0x2e2   : > { %v3986_v6 = vld [vmem:[#allocation5 + $0x19] sm:$0xf]  ;;  %v3974_v24 = vrot.slane %v3972_v39, 4  ;;  %v4056_v11 = vld [vmem:[#allocation6 + $0x48] sm:$0xff]  ;;  %v4014_v59 = vld [vmem:[#allocation5 + $0x1e] sm:$0xf] }
 0x2e3   : > { %v3988_v51 = vrot.slane %v3986_v6, 4  ;;  %v4000_v27 = vld [vmem:[#allocation5 + $0x1a] sm:$0xf]  ;;  %4039 = vst [vmem:[#allocation6 + $0x40] sm:$0xf0] %v4037_v58  ;;  %v4065_v34 = vpack.c.bf16 %v4056_v11, %v4047_v16  ;;  %v4016_v43 = vrot.slane %v4014_v59, 4 }
 0x2e4   : > { %v4012_v13 = vld [vmem:[#allocation5 + $0x18] sm:$0xf]  ;;  %v4002_v18 = vrot.slane %v4000_v27, 4  ;;  %3976 = vst [vmem:[#allocation6 + $0x60] sm:$0xf0] %v3974_v24  ;;  %v4058_v38 = vld [vmem:[#allocation6 + $0x58] sm:$0xff] }
 0x2e5   : > { %4013 = vst [vmem:[#allocation6 + $0x78] sm:$0xf] %v4012_v13  ;;  %v4026_v30 = vld [vmem:[#allocation5 + $0x19] sm:$0xf]  ;;  %3990 = vst [vmem:[#allocation6 + $0x68] sm:$0xf0] %v3988_v51 }
 0x2e6   : > { %v4040_v46 = vld [vmem:[#allocation5 + $0x1a] sm:$0xf]  ;;  %4027 = vst [vmem:[#allocation6 + $0x80] sm:$0xf] %v4026_v30  ;;  %4004 = vst [vmem:[#allocation6 + $0x70] sm:$0xf0] %v4002_v18 }
 0x2e7   : > { %4041 = vst [vmem:[#allocation6 + $0x88] sm:$0xf] %v4040_v46  ;;  %v4057_v23 = vld [vmem:[#allocation6 + $0x50] sm:$0xff]  ;;  %v4042_v35 = vld [vmem:[#allocation5 + $0x20] sm:$0xf]  ;;  %v6704_v25 = vld [vmem:[%s8207_s3 + $0x150] sm:$0xff]  }
 0x2e8   : > { %v4028_v53 = vld [vmem:[#allocation5 + $0x1f] sm:$0xf]  ;;  %v4066_v40 = vpack.c.bf16 %v4057_v23, %v4048_v3  ;;  %v4044_v49 = vrot.slane %v4042_v35, 4  ;;  %4018 = vst [vmem:[#allocation6 + $0x78] sm:$0xf0] %v4016_v43  ;;  %v4052_v56 = vld [vmem:[#allocation6 + $0x28] sm:$0xff] }
 0x2e9   : > { %v4030_v48 = vrot.slane %v4028_v53, 4  ;;  %v4050_v28 = vld [vmem:[#allocation6 + $0x18] sm:$0xff]  ;;  %v6699_v14 = vld [vmem:[%s8207_s3 + $0x180] sm:$0xff]   ;;  %v6705_v55 = vld [vmem:[%s8207_s3 + $0x110] sm:$0xff]  }
 0x2ea   : > { %4687 = vmatprep.mubr.bf16.mxu0 %v4066_v40  ;;  %4046 = vst [vmem:[#allocation6 + $0x88] sm:$0xf0] %v4044_v49  ;;  %v4049_v61 = vld [vmem:[#allocation6 + $0x10] sm:$0xff]  ;;  %v6702_v29 = vld [vmem:[%s8207_s3 + $0x1c8] sm:$0xff]   ;;  %v6708_v42 = vld [vmem:[%s8207_s3 + $0x158] sm:$0xff]  }
 0x2eb   : > { %4032 = vst [vmem:[#allocation6 + $0x80] sm:$0xf0] %v4030_v48  ;;  %4688 = vmatmul.mubr.bf16.vlgmr.msra.gmra.mrb[108].mxu0 %v4065_v34  ;;  %v4059_v36 = vld [vmem:[#allocation6 + $0x60] sm:$0xff]  ;;  %v4067_v0 = vpack.c.bf16 %v4058_v38, %v4049_v61  ;;  %v4054_v33 = vld [vmem:[#allocation6 + $0x38] sm:$0xff]  ;;  %v6709_v21 = vld [vmem:[%s8207_s3 + $0x118] sm:$0xff]  }
 0x2ec   : > { %6349 = vmatpush3.bf16.msra.mxu0 %v6697_v31  ;;  %v4068_v15 = vpack.c.bf16 %v4059_v36, %v4050_v28  ;;  %v6703_v54 = vld [vmem:[%s8207_s3 + $0x188] sm:$0xff]   ;;  %v6706_v19 = vld [vmem:[%s8207_s3 + $0x1d0] sm:$0xff]   ;;  %v6712_v57 = vld [vmem:[%s8207_s3 + $0x160] sm:$0xff]  }
 0x2ed   : > { %6350 = vmatprep.subr.bf16.mxu0 %v6700_v52  ;;  %v4061_v41 = vld [vmem:[#allocation6 + $0x70] sm:$0xff]  ;;  %v6707_v7 = vld [vmem:[%s8207_s3 + $0x190] sm:$0xff]   ;;  %v6710_v9 = vld [vmem:[%s8207_s3 + $0x1d8] sm:$0xff]  }
 0x2ee   : > { %v4070_v62 = vpack.c.bf16 %v4061_v41, %v4052_v56  ;;  %4728 = vmatprep.mubr.bf16.mxu1 %v4068_v15  ;;  %v6713_v8 = vld [vmem:[%s8207_s3 + $0x120] sm:$0xff]   ;;  %v6716_v12 = vld [vmem:[%s8207_s3 + $0x168] sm:$0xff]   ;;  %v6711_v63 = vld [vmem:[%s8207_s3 + $0x198] sm:$0xff]  }
 0x2ef   : > { %4729 = vmatmul.mubr.bf16.vlgmr.msra.gmra.mrb[108].mxu1 %v4067_v0  ;;  %v6714_v26 = vld [vmem:[%s8207_s3 + $0x1e0] sm:$0xff]   ;;  %v6717_v2 = vld [vmem:[%s8207_s3 + $0x128] sm:$0xff]   ;;  %v6720_v20 = vld [vmem:[%s8207_s3 + $0x170] sm:$0xff]  }
 0x2f0   : > { %6351 = vmatpush3.bf16.msra.mxu0 %v6701_v60  ;;  %4769 = vmatprep.mubr.bf16.mxu0 %v4070_v62  ;;  %v6715_v22 = vld [vmem:[%s8207_s3 + $0x1a0] sm:$0xff]   ;;  %v6718_v10 = vld [vmem:[%s8207_s3 + $0x1e8] sm:$0xff]   ;;  %v6721_v44 = vld [vmem:[%s8207_s3 + $0x130] sm:$0xff]  }
 0x2f1   : > { %6352 = vmatprep.subr.bf16.mxu0 %v6704_v25  ;;  %6371 = vmatpush3.bf16.msra.mxu1 %v6699_v14  ;;  %v6724_v32 = vld [vmem:[%s8207_s3 + $0x178] sm:$0xff]   ;;  %v6719_v45 = vld [vmem:[%s8207_s3 + $0x1a8] sm:$0xff]   ;;  %v6722_v17 = vld [vmem:[%s8207_s3 + $0x1f0] sm:$0xff]  }
 0x2f2   : > { %v4063_v50 = vld [vmem:[#allocation6 + $0x80] sm:$0xff]  ;;  %6372 = vmatprep.subr.bf16.mxu1 %v6702_v29  ;;  %v6725_v37 = vld [vmem:[%s8207_s3 + $0x138] sm:$0xff]   ;;  %v6728_v6 = vld [vmem:[%s8207_s3 + $0x200] sm:$0xff]  }
 0x2f3   : > { %v4072_v4 = vpack.c.bf16 %v4063_v50, %v4054_v33  ;;  %v4060_v1 = vld [vmem:[#allocation6 + $0x68] sm:$0xff]  ;;  %v6723_v5 = vld [vmem:[%s8207_s3 + $0x1b0] sm:$0xff]   ;;  %v6729_v27 = vld [vmem:[%s8207_s3 + $0x208] sm:$0xff]  }
 0x2f4   : > { %6353 = vmatpush3.bf16.msra.mxu0 %v6705_v55  ;;  %v6726_v58 = vld [vmem:[%s8207_s3 + $0x1f8] sm:$0xff]   ;;  %v4051_v39 = vld [vmem:[#allocation6 + $0x20] sm:$0xff]  ;;  %v4062_v13 = vld [vmem:[#allocation6 + $0x78] sm:$0xff] }
 0x2f5   : > { %4810 = vmatprep.mubr.bf16.mxu1 %v4072_v4  ;;  %6354 = vmatprep.subr.bf16.mxu0 %v6708_v42  ;;  %v4069_v24 = vpack.c.bf16 %v4060_v1, %v4051_v39  ;;  %v6727_v51 = vld [vmem:[%s8207_s3 + $0x1b8] sm:$0xff]   ;;  %v4053_v18 = vld [vmem:[#allocation6 + $0x30] sm:$0xff]  ;;  %v6730_v46 = vld [vmem:[%s8207_s3 + $0x210] sm:$0xff]  }
 0x2f6   : > { %6373 = vmatpush3.bf16.msra.mxu1 %v6703_v54  ;;  %v4071_v30 = vpack.c.bf16 %v4062_v13, %v4053_v18  ;;  %v6731_v3 = vld [vmem:[%s8207_s3 + $0x218] sm:$0xff]   ;;  %v6732_v31 = vld [vmem:[%s8207_s3 + $0x220] sm:$0xff]   ;;  %v6733_v23 = vld [vmem:[%s8207_s3 + $0x228] sm:$0xff]  }
 0x2f7   : > { %6374 = vmatprep.subr.bf16.mxu1 %v6706_v19  ;;  %v6734_v16 = vld [vmem:[%s8207_s3 + $0x230] sm:$0xff]   ;;  %v6735_v11 = vld [vmem:[%s8207_s3 + $0x238] sm:$0xff]   ;;  %v6736_v40 = vld [vmem:[%s8208_s4 + $0x40] sm:$0xff]  }
 0x2f8   : > { %6355 = vmatpush3.bf16.msra.mxu0 %v6709_v21  ;;  %v4064_v59 = vld [vmem:[#allocation6 + $0x88] sm:$0xff]  ;;  %v4055_v53 = vld [vmem:[#allocation6 + $0x40] sm:$0xff]  ;;  %v6737_v34 = vld [vmem:[%s8208_s4] sm:$0xff]  }
 0x2f9   : > { %6356 = vmatprep.subr.bf16.mxu0 %v6712_v57  ;;  %v4073_v35 = vpack.c.bf16 %v4064_v59, %v4055_v53  ;;  %v6738_v43 = vld [vmem:[%s8208_s4 + $0xc0] sm:$0xff]   ;;  %v6740_v49 = vld [vmem:[%s8208_s4 + $0x48] sm:$0xff]   ;;  %v6744_v25 = vld [vmem:[%s8208_s4 + $0x50] sm:$0xff]  }
 0x2fa   : > { %6375 = vmatpush3.bf16.msra.mxu1 %v6707_v7  ;;  %v6739_v48 = vld [vmem:[%s8208_s4 + $0x80] sm:$0xff]   ;;  %v6742_v52 = vld [vmem:[%s8208_s4 + $0xc8] sm:$0xff]   ;;  %v6745_v28 = vld [vmem:[%s8208_s4 + $0x10] sm:$0xff]  }
 0x2fb   : > { %6376 = vmatprep.subr.bf16.mxu1 %v6710_v9  ;;  %v6741_v60 = vld [vmem:[%s8208_s4 + $0x8] sm:$0xff]   ;;  %v6746_v36 = vld [vmem:[%s8208_s4 + $0xd0] sm:$0xff]   ;;  %v6748_v15 = vld [vmem:[%s8208_s4 + $0x58] sm:$0xff]  }
 0x2fc   : > { %6357 = vmatpush3.bf16.msra.mxu0 %v6713_v8  ;;  %v6743_v38 = vld [vmem:[%s8208_s4 + $0x88] sm:$0xff]   ;;  %v6747_v14 = vld [vmem:[%s8208_s4 + $0x90] sm:$0xff]   ;;  %v6749_v56 = vld [vmem:[%s8208_s4 + $0x18] sm:$0xff]  }
 0x2fd   : > { %6358 = vmatprep.subr.bf16.mxu0 %v6716_v12  ;;  %v6750_v41 = vld [vmem:[%s8208_s4 + $0xd8] sm:$0xff]   ;;  %v6752_v62 = vld [vmem:[%s8208_s4 + $0x60] sm:$0xff]   ;;  %v6756_v55 = vld [vmem:[%s8208_s4 + $0x68] sm:$0xff]  }
 0x2fe   : > { %6377 = vmatpush3.bf16.msra.mxu1 %v6711_v63  ;;  %v6751_v61 = vld [vmem:[%s8208_s4 + $0x98] sm:$0xff]   ;;  %v6754_v0 = vld [vmem:[%s8208_s4 + $0xe0] sm:$0xff]   ;;  %v6758_v33 = vld [vmem:[%s8208_s4 + $0xe8] sm:$0xff]  }
 0x2ff   : > { %6378 = vmatprep.subr.bf16.mxu1 %v6714_v26  ;;  %v6753_v29 = vld [vmem:[%s8208_s4 + $0x20] sm:$0xff]   ;;  %v6757_v50 = vld [vmem:[%s8208_s4 + $0x28] sm:$0xff]   ;;  %v6760_v54 = vld [vmem:[%s8208_s4 + $0x70] sm:$0xff]  }
 0x300   : > { %6359 = vmatpush3.bf16.msra.mxu0 %v6717_v2  ;;  %v6755_v42 = vld [vmem:[%s8208_s4 + $0xa0] sm:$0xff]   ;;  %v6759_v4 = vld [vmem:[%s8208_s4 + $0xa8] sm:$0xff]   ;;  %v6762_v19 = vld [vmem:[%s8208_s4 + $0xf0] sm:$0xff]  }
 0x301   : > { %6360 = vmatprep.subr.bf16.mxu0 %v6720_v20  ;;  %v6761_v21 = vld [vmem:[%s8208_s4 + $0x30] sm:$0xff]   ;;  %v6764_v57 = vld [vmem:[%s8208_s4 + $0x78] sm:$0xff]  }
 0x302   : > { %6379 = vmatpush3.bf16.msra.mxu1 %v6715_v22  ;;  %v6763_v7 = vld [vmem:[%s8208_s4 + $0xb0] sm:$0xff]   ;;  %v6766_v9 = vld [vmem:[%s8208_s4 + $0xf8] sm:$0xff]  }
 0x303   : > { %6380 = vmatprep.subr.bf16.mxu1 %v6718_v10  ;;  %v6765_v8 = vld [vmem:[%s8208_s4 + $0x38] sm:$0xff]   ;;  %v5702_v10 = vld [vmem:[%s8210_s6 + $0x2] ss:$0 sm:$0xff] }
 0x304   : > { %6361 = vmatpush3.bf16.msra.mxu0 %v6721_v44  ;;  %v6767_v12 = vld [vmem:[%s8208_s4 + $0xb8] sm:$0xff]  }
 0x305   : > { %6362 = vmatprep.subr.bf16.mxu0 %v6724_v32 }
 0x306   : > { %6381 = vmatpush3.bf16.msra.mxu1 %v6719_v45 }
 0x307   : > { %6382 = vmatprep.subr.bf16.mxu1 %v6722_v17 }
 0x308   : > { %6363 = vmatpush3.bf16.msra.mxu0 %v6725_v37 }
 0x309   : > { %6454 = vmatprep.subr.bf16.mxu0 %v6785_v47 }
 0x30a   : > { %6383 = vmatpush3.bf16.msra.mxu1 %v6723_v5 }
 0x30b   : > { %4770 = vmatmul.mubr.bf16.vlgmr.msra.gmra.mrb[112].mxu0 %v4069_v24  ;;  %6384 = vmatprep.subr.bf16.mxu1 %v6726_v58 }
 0x30c   : > { %6455 = vmatpush3.bf16.msra.mxu0 %v6728_v6  ;;  %6470 = vmatprep.mubr.msk.bf16.mxu0 %vm6786_vm7, %v6785_v47 }
 0x30d   : > { %6456 = vmatprep.subr.bf16.mxu0 %v6785_v47 }
 0x30e   : > { %6385 = vmatpush3.bf16.msra.mxu1 %v6727_v51 }
 0x30f   : > { %6401 = vmatprep.subr.bf16.mxu1 %v6736_v40 }
 0x310   : > { %6457 = vmatpush3.bf16.msra.mxu0 %v6729_v27 }
 0x311   : > { %6458 = vmatprep.subr.bf16.mxu0 %v6785_v47  ;;  %4811 = vmatmul.mubr.bf16.vlgmr.msra.gmra.mrb[112].mxu1 %v4071_v30 }
 0x312   : > { %6402 = vmatpush3.bf16.msra.mxu1 %v6737_v34 }
 0x313   : > { %6403 = vmatprep.subr.bf16.mxu1 %v6740_v49 }
 0x314   : > { %6459 = vmatpush3.bf16.msra.mxu0 %v6730_v46 }
 0x315   : > { %6460 = vmatprep.subr.bf16.mxu0 %v6785_v47 }
 0x316   : > { %6404 = vmatpush3.bf16.msra.mxu1 %v6741_v60 }
 0x317   : > { %6405 = vmatprep.subr.bf16.mxu1 %v6744_v25 }
 0x318   : > { %6461 = vmatpush3.bf16.msra.mxu0 %v6731_v3 }
 0x319   : > { %6462 = vmatprep.subr.bf16.mxu0 %v6785_v47 }
 0x31a   : > { %6406 = vmatpush3.bf16.msra.mxu1 %v6745_v28  ;;  %v4890_v28 = vlaneseq }
 0x31b   : > { %6407 = vmatprep.subr.bf16.mxu1 %v6748_v15 }
 0x31c   : > { %6463 = vmatpush3.bf16.msra.mxu0 %v6732_v31 }
 0x31d   : > { %6464 = vmatprep.subr.bf16.mxu0 %v6785_v47 }
 0x31e   : > { %6408 = vmatpush3.bf16.msra.mxu1 %v6749_v56 }
 0x31f   : > { %6409 = vmatprep.subr.bf16.mxu1 %v6752_v62 }
 0x320   : > { %6465 = vmatpush3.bf16.msra.mxu0 %v6733_v23 }
 0x321   : > { %6466 = vmatprep.subr.bf16.mxu0 %v6785_v47 }
 0x322   : > { %6410 = vmatpush3.bf16.msra.mxu1 %v6753_v29 }
 0x323   : > { %6411 = vmatprep.subr.bf16.mxu1 %v6756_v55 }
 0x324   : > { %6467 = vmatpush3.bf16.msra.mxu0 %v6734_v16 }
 0x325   : > { %6468 = vmatprep.subr.bf16.mxu0 %v6785_v47 }
 0x326   : > { %6412 = vmatpush3.bf16.msra.mxu1 %v6757_v50 }
 0x327   : > { %6413 = vmatprep.subr.bf16.mxu1 %v6760_v54 }
 0x328   : > { %6469 = vmatpush3.bf16.msra.mxu0 %v6735_v11 }
 0x329   : > { %6423 = vmatprep.subr.bf16.mxu0 %v6738_v43 }
 0x32a   : > { %6414 = vmatpush3.bf16.msra.mxu1 %v6761_v21 }
 0x32b   : > { %6471 = vmatmul.mubr.bf16.vlgmr.msra.gmra.mrb[116].mxu0 %v4073_v35  ;;  %6415 = vmatprep.subr.bf16.mxu1 %v6764_v57 }
 0x32c   : > { %6424 = vmatpush3.bf16.msra.mxu0 %v6739_v48 }
 0x32d   : > { %6425 = vmatprep.subr.bf16.mxu0 %v6742_v52 }
 0x32e   : > { %6416 = vmatpush3.bf16.msra.mxu1 %v6765_v8 }
 0x32f   : > { %6474 = vmatprep.subr.bf16.mxu1 %v6785_v47 }
 0x330   : > { %6426 = vmatpush3.bf16.msra.mxu0 %v6743_v38 }
 0x331   : > { %6427 = vmatprep.subr.bf16.mxu0 %v6746_v36 }
 0x334   : > { %6428 = vmatpush3.bf16.msra.mxu0 %v6747_v14 }
 0x335   : > { %6429 = vmatprep.subr.bf16.mxu0 %v6750_v41 }
 0x338   : > { %6430 = vmatpush3.bf16.msra.mxu0 %v6751_v61  ;;  %v4891_v61 = vshrl.u32 %v4890_v28, 7 }
 0x339   : > { %6431 = vmatprep.subr.bf16.mxu0 %v6754_v0 }
 0x33a   : > { %v4892_v54 = vsub.s32 0, %v4891_v61 }
 0x33c   : > { %6432 = vmatpush3.bf16.msra.mxu0 %v6755_v42 }
 0x33d   : > { %6433 = vmatprep.subr.bf16.mxu0 %v6758_v33 }
 0x340   : > { %6434 = vmatpush3.bf16.msra.mxu0 %v6759_v4 }
 0x341   : > { %6435 = vmatprep.subr.bf16.mxu0 %v6762_v19 }
 0x344   : > { %6436 = vmatpush3.bf16.msra.mxu0 %v6763_v7 }
 0x345   : > { %6437 = vmatprep.subr.bf16.mxu0 %v6766_v9 }
 0x348   : > { %6438 = vmatpush3.bf16.msra.mxu0 %v6767_v12 }
 0x3be   : > { %v6320_v63 = vpop.f32.mrb[108].mxu0 }
 0x3bf   : > { %v6321_v26 = vpop.f32.mrb[109].mxu0 }
 0x3c0   : > { %v6322_v2 = vadd.f32 %v6321_v26, %v6320_v63  ;;  %v6323_v20 = vpop.f32.mrb[110].mxu0 }
 0x3c1   : > { %v6324_v22 = vpop.f32.mrb[111].mxu0 }
 0x3c2   : > { %v6325_v44 = vadd.f32 %v6324_v22, %v6323_v20  ;;  %v4690_v32 = vadd.f32 %v6322_v2, %v5702_v10  ;;  %v6342_v45 = vpop.f32.mrb[108].mxu1  ;;  %v6768_v2 = vld [vmem:[%s8209_s5] sm:$0xff]  }
 0x3c3   : > { %v6343_v17 = vpop.f32.mrb[109].mxu1 }
 0x3c4   : > { %v4693_v37 = vadd.f32 %v6325_v44, %v5702_v10  ;;  %v6344_v1 = vadd.f32 %v6343_v17, %v6342_v45  ;;  %v6345_v5 = vpop.f32.mrb[110].mxu1  ;;  %v6769_v44 = vld [vmem:[%s8209_s5 + $0x8] sm:$0xff]   ;;  %v6771_v45 = vld [vmem:[%s8209_s5 + $0x18] sm:$0xff]   ;;  %v6772_v17 = vld [vmem:[%s8209_s5 + $0x20] sm:$0xff]  }
 0x3c5   : > { %v6346_v58 = vpop.f32.mrb[111].mxu1 }
 0x3c6   : > { %v4731_v39 = vadd.f32 %v6344_v1, %v4690_v32  ;;  %v6347_v6 = vadd.f32 %v6346_v58, %v6345_v5  ;;  %v6770_v32 = vld [vmem:[%s8209_s5 + $0x10] sm:$0xff]   ;;  %v6775_v5 = vld [vmem:[%s8209_s5 + $0x38] sm:$0xff]  }
 0x3c7   : > { %v6774_v1 = vld [vmem:[%s8209_s5 + $0x30] sm:$0xff]  }
 0x3c8   : > { %v4734_v24 = vadd.f32 %v6347_v6, %v4693_v37  ;;  %v6773_v37 = vld [vmem:[%s8209_s5 + $0x28] sm:$0xff]  }
 0x3de   : > { %v6364_v51 = vpop.f32.mrb[112].mxu0 }
 0x3df   : > { %v6365_v27 = vpop.f32.mrb[113].mxu0 }
 0x3e0   : > { %v6366_v13 = vadd.f32 %v6365_v27, %v6364_v51  ;;  %v6367_v18 = vpop.f32.mrb[114].mxu0 }
 0x3e1   : > { %v6368_v30 = vpop.f32.mrb[115].mxu0 }
 0x3e2   : > { %v4772_v46 = vadd.f32 %v6366_v13, %v4731_v39  ;;  %v6369_v3 = vadd.f32 %v6368_v30, %v6367_v18  ;;  %v5775_v39 = vld [vmem:[%s8210_s6 + $0x3] ss:$0 sm:$0xff] }
 0x3e4   : > { %v4775_v31 = vadd.f32 %v6369_v3, %v4734_v24  ;;  %v6386_v23 = vpop.f32.mrb[112].mxu1 }
 0x3e5   : > { %v6387_v16 = vpop.f32.mrb[113].mxu1 }
 0x3e6   : > { %v6388_v11 = vadd.f32 %v6387_v16, %v6386_v23  ;;  %v6389_v59 = vpop.f32.mrb[114].mxu1 }
 0x3e7   : > { %v6390_v53 = vpop.f32.mrb[115].mxu1 }
 0x3e8   : > { %v6391_v35 = vadd.f32 %v6390_v53, %v6389_v59  ;;  %v4813_v40 = vadd.f32 %v6388_v11, %v4772_v46  ;;  %v5808_v11 = vld [vmem:[%s8210_s6 + $0x4] ss:$0 sm:$0xff] }
 0x3ea   : > { %v4816_v34 = vadd.f32 %v6391_v35, %v4775_v31 }
 0x3fe   : > { %v4853_v43 = vpop.f32.mrb[116].mxu0 }
 0x3ff   : > { %v4854_v48 = vadd.f32 %v4853_v43, %v4813_v40  ;;  %v6472_v49 = vpop.f32.mrb[117].mxu0 }
 0x400   : > { %v4856_v52 = vpop.f32.mrb[118].mxu0 }
 0x401   : > { %v4860_v60 = vmax.f32 %v4854_v48, 0.0  ;;  %v4857_v38 = vadd.f32 %v4856_v52, %v4816_v34  ;;  %v6473_v25 = vpop.f32.mrb[119].mxu0 }
 0x403   : > { %v4863_v36 = vrot.slane %v4860_v60, 1  ;;  %v4861_v14 = vmax.f32 %v4857_v38, 0.0  ;;  %v4866_v56 = vrot.slane %v4860_v60, 4  ;;  %v4869_v62 = vrot.slane %v4860_v60, 5 }
 0x405   : > { %v4865_v15 = vadd.f32 %v4863_v36, %v4860_v60  ;;  %v4874_v41 = vrot.slane %v4861_v14, 1  ;;  %v4877_v29 = vrot.slane %v4861_v14, 4  ;;  %v4880_v42 = vrot.slane %v4861_v14, 5 }
 0x407   : > { %v4876_v0 = vadd.f32 %v4874_v41, %v4861_v14  ;;  %v4868_v55 = vadd.f32 %v4866_v56, %v4865_v15 }
 0x409   : > { %v4871_v33 = vadd.f32 %v4869_v62, %v4868_v55  ;;  %v4879_v50 = vadd.f32 %v4877_v29, %v4876_v0 }
 0x40b   : > { %v4872_v4 = vmul.f32 0.25, %v4871_v33  ;;  %v4882_v19 = vadd.f32 %v4880_v42, %v4879_v50 }
 0x40d   : > { %v4885_v21 = vrot.slane %v4872_v4, 2  ;;  %v4883_v57 = vmul.f32 0.25, %v4882_v19  ;;  %v4893_v7 = vrot.slane %v4872_v4, %v4892_v54 }
 0x40f   : > { %v4897_v9 = vrot.slane %v4885_v21, %v4892_v54  ;;  %v4888_v8 = vrot.slane %v4883_v57, 2  ;;  %v4901_v12 = vrot.slane %v4883_v57, %v4892_v54  ;;  %v4906_v20 = vpack.c.bf16 %v4893_v7, %v4893_v7 }
 0x411   : > { %v4907_v63 = vpack.c.bf16 %v4897_v9, %v4897_v9  ;;  %v4905_v26 = vrot.slane %v4888_v8, %v4892_v54  ;;  %v4908_v10 = vpack.c.bf16 %v4901_v12, %v4901_v12 }
 0x413   : > { %5203 = vmatprep.mubr.bf16.mxu1 %v4907_v63  ;;  %v4909_v22 = vpack.c.bf16 %v4905_v26, %v4905_v26 }
 0x414   : > { %5204 = vmatmul.mubr.bf16.vlgmr.msra.gmra.mrb[116].mxu1 %v4906_v20 }
 0x415   : > { %5243 = vmatprep.mubr.bf16.mxu0 %v4909_v22  ;;  %6475 = vmatpush3.bf16.msra.mxu1 %v6768_v2 }
 0x416   : > { %5244 = vmatmul.mubr.bf16.vlgmr.msra.gmra.mrb[120].mxu0 %v4908_v10  ;;  %6476 = vmatprep.subr.bf16.mxu1 %v6785_v47 }
 0x417   : > { %6490 = vmatprep.mubr.msk.bf16.mxu1 %vm6786_vm7, %v6785_v47 }
 0x419   : > { %6477 = vmatpush3.bf16.msra.mxu1 %v6769_v44 }
 0x41a   : > { %6478 = vmatprep.subr.bf16.mxu1 %v6785_v47 }
 0x41d   : > { %6479 = vmatpush3.bf16.msra.mxu1 %v6770_v32 }
 0x41e   : > { %6480 = vmatprep.subr.bf16.mxu1 %v6785_v47 }
 0x421   : > { %6481 = vmatpush3.bf16.msra.mxu1 %v6771_v45 }
 0x422   : > { %6482 = vmatprep.subr.bf16.mxu1 %v6785_v47 }
 0x425   : > { %6483 = vmatpush3.bf16.msra.mxu1 %v6772_v17 }
 0x426   : > { %6484 = vmatprep.subr.bf16.mxu1 %v6785_v47 }
 0x429   : > { %6485 = vmatpush3.bf16.msra.mxu1 %v6773_v37 }
 0x42a   : > { %6486 = vmatprep.subr.bf16.mxu1 %v6785_v47 }
 0x42d   : > { %6487 = vmatpush3.bf16.msra.mxu1 %v6774_v1 }
 0x42e   : > { %6488 = vmatprep.subr.bf16.mxu1 %v6785_v47 }
 0x431   : > { %6489 = vmatpush3.bf16.msra.mxu1 %v6775_v5 }
 0x4e7   : > { %v6417_v58 = vpop.f32.mrb[116].mxu1 }
 0x4e8   : > { %v6418_v6 = vpop.f32.mrb[117].mxu1 }
 0x4e9   : > { %v6419_v24 = vadd.f32 %v6418_v6, %v6417_v58  ;;  %v6420_v51 = vpop.f32.mrb[118].mxu1  ;;  %v6439_v27 = vpop.f32.mrb[120].mxu0 }
 0x4ea   : > { %v6421_v13 = vpop.f32.mrb[119].mxu1  ;;  %v6440_v18 = vpop.f32.mrb[121].mxu0 }
 0x4eb   : > { %v5206_v30 = vadd.f32 %v6419_v24, %v5775_v39  ;;  %v6441_v46 = vadd.f32 %v6440_v18, %v6439_v27  ;;  %v6442_v3 = vpop.f32.mrb[122].mxu0 }
 0x4ec   : > { %v6443_v31 = vpop.f32.mrb[123].mxu0 }
 0x4ed   : > { %v5246_v23 = vadd.f32 %v6441_v46, %v5206_v30 }
 0x4ef   : > { %v5251_v16 = vmax.f32 %v5246_v23, 0.0 }
 0x4f1   : > { %v5252_v47 = vpack.c.bf16 %v5251_v16, %v5251_v16 }
 0x4f3   : > { %6491 = vmatmul.mubr.bf16.vlgmr.msra.gmra.mrb[120].mxu1 %v5252_v47 }
 0x5c6   : > { %v5356_v59 = vpop.f32.mrb[120].mxu1 }
 0x5c7   : > { %v5357_v53 = vadd.f32 %v5808_v11, %v5356_v59  ;;  %v6492_v35 = vpop.f32.mrb[121].mxu1 }
 0x5c8   : > { %v5359_v40 = vpop.f32.mrb[122].mxu1 }
 0x5c9   : > { %5362 = vst [vmem:[%s276_s20] sm:$0xff] %v5357_v53  ;;  %v6493_v34 = vpop.f32.mrb[123].mxu1 }
 0x5ca PF: > { %s17_s24 = sadd.s32 1, %s6783_s24  }
 0x5cb   : > { %p14_p4 = scmp.ge.s32.totalorder %s17_s24, 4  }
 0x5cd   :  { %16 = sbr.rel (!%p14_p4) target bundleno = 1 (0x1), region = 148 }

</bundles_post_ra>
